<compile_context>
chip_gen: v7x
topology: tpu7x:2x2x1
jax: 0.10.0
libtpu: 0.0.40
codegen_flags: <defaults>
</compile_context>

<pallas_src>
import functools
import math

import numpy as np
import jax
import jax.numpy as jnp
from jax.experimental import pallas as pl
from jax.experimental.pallas import tpu as pltpu

_K = 5          # every conv / conv-transpose in the module is 5x5, stride 1, pad 0
_R = _K - 1     # per-layer receptive-field growth (4)


# ----------------------------------------------------------------------------
# Fused forward kernel
# ----------------------------------------------------------------------------
def _tap_layer(act, wb_ref, cin, cout, l_out, offsets):
    """One 5x5 (de)conv layer + bias + ReLU on the flat constant-pitch canvas.

    act:      (cin, l_in) value, l_in = l_out + D.
    wb_ref:   (cout, 25*cin + 1) ref; columns [t*cin:(t+1)*cin] are tap t's
              (cout, cin) matrix, the last column is the bias.
    offsets:  25 static lane offsets (one per tap), all in [0, D].
    Returns   relu(sum_t M_t @ act[:, off_t : off_t + l_out] + bias),  (cout, l_out).
    """
    acc = None
    for t in range(_K * _K):
        off = offsets[t]
        sl = act[:, off:off + l_out]                        # (cin, l_out) lane slice
        if cin == 1:
            term = wb_ref[:, t:t + 1] * sl                  # VPU outer product
        else:
            term = jnp.dot(wb_ref[:, t * cin:(t + 1) * cin], sl,
                           preferred_element_type=jnp.float32)
        acc = term if acc is None else acc + term
    bias = wb_ref[:, _K * _K * cin: _K * _K * cin + 1]      # (cout, 1)
    return jnp.maximum(acc + bias, 0.0)


def _autoencoder_kernel(x_ref, w1_ref, w2_ref, w3_ref, w4_ref, m_ref, o_ref,
                        *, pitch, l_blk):
    D = _R * pitch + _R                       # max tap offset / per-layer shrink
    enc_off = [p * pitch + q for p in range(_K) for q in range(_K)]
    dec_off = [D - (r * pitch + s) for r in range(_K) for s in range(_K)]

    l1 = l_blk - D
    l2 = l1 - D
    l3 = l2 - D
    l4 = l3 - D

    x = x_ref[0]                                            # (1, l_blk), zero margins

    # ------------------------------ encoder ------------------------------
    a1 = _tap_layer(x, w1_ref, 1, 10, l1, enc_off)          # (10, l1)
    a2 = _tap_layer(a1, w2_ref, 10, 20, l2, enc_off)        # (20, l2)

    # ------------------------------ decoder ------------------------------
    # ConvTranspose == correlation with negative offsets; the base-offset chain
    # (2D -> 2D -> D -> 0) keeps every tap offset >= 0, so NO padding/shift is
    # ever materialised.  One mask multiply zeroes garbage lanes + margins.
    a2 = a2 * m_ref[0:1, :l2]
    a3 = _tap_layer(a2, w3_ref, 20, 10, l3, dec_off)        # (10, l3)
    a3 = a3 * m_ref[1:2, :l3]
    a4 = _tap_layer(a3, w4_ref, 10, 1, l4, dec_off)         # (1, l4)

    o_ref[0] = a4                                           # single lane-dense store


# ----------------------------------------------------------------------------
# Mask construction (trace-time numpy; zero runtime cost beyond one multiply)
# ----------------------------------------------------------------------------
def _decoder_input_masks(H, W, pitch, lc, D, l2):
    """Row 0: keep-mask for a2 (data base 2*D); row 1: for a3 (data base D)."""
    h2, w2 = H - 2 * _R, W - 2 * _R
    h3, w3 = H - _R, W - _R
    loc = np.arange(l2) % lc                 # per-image canvas coordinate
    u2 = loc - 2 * D
    m2 = (u2 >= 0) & (u2 < h2 * pitch) & ((u2 % pitch) < w2)
    u3 = loc - D
    m3 = (u3 >= 0) & (u3 < h3 * pitch) & ((u3 % pitch) < w3)
    return np.stack([m2, m3]).astype(np.float32)            # (2, l2)


# ----------------------------------------------------------------------------
# Forward wrapper (single pallas_call, <=2 grid blocks, images folded per block)
# ----------------------------------------------------------------------------
def autoencoder_forward(params, x, *, max_blocks=2):
    """x: (N, 1, H, W) float32 -> (N, 1, H, W) float32."""
    N, C, H, W = x.shape
    assert C == 1 and H > 2 * _R and W > 2 * _R

    pitch = W                                 # constant pitch for every layer
    D = _R * pitch + _R
    lc_min = 4 * D + (H - 1) * pitch + W      # per-image canvas length (flat lanes)
    lc = -(-lc_min // pitch) * pitch
    hc = lc // pitch

    # Explicit layout invariants (review): every activation row fits the pitch,
    # so flat-index tap arithmetic never aliases across rows / images.
    assert pitch >= W
    assert lc >= 4 * D + (H - 1) * pitch + W

    num_blocks = max(1, min(N, max_blocks))   # >=2 blocks when N>=2 (v7x megacore)
    ipb = -(-N // num_blocks)                 # images folded per block (lane concat)
    n_pad = num_blocks * ipb
    l_blk = ipb * lc
    l2 = l_blk - 2 * D
    l4 = l_blk - 4 * D

    # ---- input canvas: image data at flat offset 2*D, zeros everywhere else ----
    xf = x.reshape(N, H * W).astype(jnp.float32)
    if n_pad > N:
        xf = jnp.concatenate([xf, jnp.zeros((n_pad - N, H * W), jnp.float32)], 0)
    xc = jnp.pad(xf, ((0, 0), (2 * D, lc - 2 * D - H * W)))          # (n_pad, lc)
    xc = xc.reshape(num_blocks, 1, l_blk)

    masks = jnp.asarray(_decoder_input_masks(H, W, pitch, lc, D, l2))

    w1, w2, w3, w4 = params["w1"], params["w2"], params["w3"], params["w4"]

    out = pl.pallas_call(
        functools.partial(_autoencoder_kernel, pitch=pitch, l_blk=l_blk),
        out_shape=jax.ShapeDtypeStruct((num_blocks, 1, l4), jnp.float32),
        grid=(num_blocks,),
        in_specs=[
            pl.BlockSpec((1, 1, l_blk), lambda b: (b, 0, 0)),   # input canvas
            pl.BlockSpec(w1.shape, lambda b: (0, 0)),           # resident weights
            pl.BlockSpec(w2.shape, lambda b: (0, 0)),
            pl.BlockSpec(w3.shape, lambda b: (0, 0)),
            pl.BlockSpec(w4.shape, lambda b: (0, 0)),
            pl.BlockSpec(masks.shape, lambda b: (0, 0)),        # decoder masks
        ],
        out_specs=pl.BlockSpec((1, 1, l4), lambda b: (b, 0, 0)),
        compiler_params=pltpu.CompilerParams(
            dimension_semantics=("parallel",)),
    )(xc, w1, w2, w3, w4, masks)

    # ---- strip the canvas back to (N, 1, H, W) with cheap XLA reshape/slice ----
    out = jnp.pad(out.reshape(num_blocks, l4), ((0, 0), (0, l_blk - l4)))
    out = out.reshape(n_pad, hc, pitch)[:N, :H, :W]
    return out.reshape(N, 1, H, W)


# ----------------------------------------------------------------------------
# Parameters: PyTorch-layout init + one-time kernel-ready repack
# ----------------------------------------------------------------------------
def prepare_params(raw):
    """One-time repack to 2-D (Cout, 25*Cin + 1) kernel-ready weight+bias slabs."""
    def pack_conv(w, b):                       # Conv2d weight (Cout, Cin, k, k)
        cout, cin, k, _ = w.shape
        wt = jnp.transpose(w, (0, 2, 3, 1)).reshape(cout, k * k * cin)
        return jnp.concatenate([wt, b.reshape(cout, 1)], axis=1)

    def pack_deconv(w, b):                     # ConvTranspose2d weight (Cin, Cout, k, k)
        cin, cout, k, _ = w.shape
        wt = jnp.transpose(w, (1, 2, 3, 0)).reshape(cout, k * k * cin)
        return jnp.concatenate([wt, b.reshape(cout, 1)], axis=1)

    return {
        "w1": pack_conv(raw["enc1_w"], raw["enc1_b"]),
        "w2": pack_conv(raw["enc2_w"], raw["enc2_b"]),
        "w3": pack_deconv(raw["dec1_w"], raw["dec1_b"]),
        "w4": pack_deconv(raw["dec2_w"], raw["dec2_b"]),
    }


def init_params(key):
    """Deterministic PyTorch-default-style uniform init, PyTorch weight layouts."""
    ks = jax.random.split(key, 8)

    def uni(k, shape, fan_in):
        bound = 1.0 / math.sqrt(fan_in)
        return jax.random.uniform(k, shape, jnp.float32, -bound, bound)

    # TODO(synk): self.proj = nn.Linear(1, 11) is never used in forward(); omitted.
    return {
        "enc1_w": uni(ks[0], (10, 1, 5, 5), 1 * 25),
        "enc1_b": uni(ks[1], (10,), 1 * 25),
        "enc2_w": uni(ks[2], (20, 10, 5, 5), 10 * 25),
        "enc2_b": uni(ks[3], (20,), 10 * 25),
        "dec1_w": uni(ks[4], (20, 10, 5, 5), 20 * 25),     # ConvTranspose2d(20, 10, 5)
        "dec1_b": uni(ks[5], (10,), 20 * 25),
        "dec2_w": uni(ks[6], (10, 1, 5, 5), 10 * 25),      # ConvTranspose2d(10, 1, 5)
        "dec2_b": uni(ks[7], (1,), 10 * 25),
    }


# ----------------------------------------------------------------------------
# Pure-JAX reference (numerical validation of the fused kernel)
# ----------------------------------------------------------------------------
def _reference_forward(raw, x):
    def conv(x, w, b):
        y = jax.lax.conv_general_dilated(
            x, w, window_strides=(1, 1), padding="VALID",
            dimension_numbers=("NCHW", "OIHW", "NCHW"))
        return jax.nn.relu(y + b.reshape(1, -1, 1, 1))

    def deconv(x, w_t, b):
        k = w_t.shape[-1]
        xp = jnp.pad(x, ((0, 0), (0, 0), (k - 1, k - 1), (k - 1, k - 1)))
        w_eq = jnp.flip(w_t, (2, 3)).transpose(1, 0, 2, 3)
        return conv(xp, w_eq, b)

    f = conv(x, raw["enc1_w"], raw["enc1_b"])
    f = conv(f, raw["enc2_w"], raw["enc2_b"])
    o = deconv(f, raw["dec1_w"], raw["dec1_b"])
    o = deconv(o, raw["dec2_w"], raw["dec2_b"])
    return o


if __name__ == "__main__":
    H = W = 16
    key = jax.random.PRNGKey(0)
    kp, kx = jax.random.split(key)
    raw = init_params(kp)
    params = prepare_params(raw)                            # one-time repack
    x = jax.random.normal(kx, (2, 1, H, W), jnp.float32)    # NCHW, batch = 2

    fwd = jax.jit(autoencoder_forward)
    y = fwd(params, x)
    jax.block_until_ready(y)
    assert y.shape == (2, 1, H, W) and y.dtype == jnp.float32

    y_ref = _reference_forward(raw, x)
    max_err = float(jnp.max(jnp.abs(y - y_ref)))
    assert max_err < 1e-4, f"mismatch vs XLA reference: max abs err = {max_err}"
    print("KERNEL_OK")
</pallas_src>

<mosaic_0001>
module attributes {stable_mosaic.version = 11 : i64} {
  func.func @_autoencoder_kernel(%arg0: i32, %arg1: memref<1x1x528xf32, #tpu.memory_space<vmem>>, %arg2: memref<10x26xf32, #tpu.memory_space<vmem>>, %arg3: memref<20x251xf32, #tpu.memory_space<vmem>>, %arg4: memref<10x501xf32, #tpu.memory_space<vmem>>, %arg5: memref<1x251xf32, #tpu.memory_space<vmem>>, %arg6: memref<2x392xf32, #tpu.memory_space<vmem>>, %arg7: memref<1x1x256xf32, #tpu.memory_space<vmem>>) attributes {dimension_semantics = [#tpu.dimension_semantics<parallel>], iteration_bounds = array<i64: 2>, scalar_prefetch = 0 : i64, scratch_operands = 0 : i64, tpu.core_type = #tpu.core_type<tc>, window_params = [{transform_indices = @transform_0, window_bounds = array<i64: 1, 1, 528>}, {pipeline_mode = #tpu.pipeline_mode<synchronous>, transform_indices = @transform_1, window_bounds = array<i64: 10, 26>}, {pipeline_mode = #tpu.pipeline_mode<synchronous>, transform_indices = @transform_2, window_bounds = array<i64: 20, 251>}, {pipeline_mode = #tpu.pipeline_mode<synchronous>, transform_indices = @transform_3, window_bounds = array<i64: 10, 501>}, {pipeline_mode = #tpu.pipeline_mode<synchronous>, transform_indices = @transform_4, window_bounds = array<i64: 1, 251>}, {pipeline_mode = #tpu.pipeline_mode<synchronous>, transform_indices = @transform_5, window_bounds = array<i64: 2, 392>}, {transform_indices = @transform_6, window_bounds = array<i64: 1, 1, 256>}]} {
    %c0 = arith.constant 0 : index
    %c0_0 = arith.constant 0 : index
    %c0_1 = arith.constant 0 : index
    %0 = vector.load %arg1[%c0, %c0_0, %c0_1] : memref<1x1x528xf32, #tpu.memory_space<vmem>>, vector<1x1x528xf32>
    %1 = vector.shape_cast %0 : vector<1x1x528xf32> to vector<1x528xf32>
    %2 = vector.extract_strided_slice %1 {offsets = [0, 0], sizes = [1, 460], strides = [1, 1]} : vector<1x528xf32> to vector<1x460xf32>
    %c0_2 = arith.constant 0 : index
    %c0_3 = arith.constant 0 : index
    %3 = vector.load %arg2[%c0_2, %c0_3] : memref<10x26xf32, #tpu.memory_space<vmem>>, vector<10x1xf32>
    %4 = vector.broadcast %3 : vector<10x1xf32> to vector<10x460xf32>
    %5 = vector.broadcast %2 : vector<1x460xf32> to vector<10x460xf32>
    %6 = arith.mulf %4, %5 : vector<10x460xf32>
    %7 = vector.extract_strided_slice %1 {offsets = [0, 1], sizes = [1, 460], strides = [1, 1]} : vector<1x528xf32> to vector<1x460xf32>
    %c0_4 = arith.constant 0 : index
    %c1 = arith.constant 1 : index
    %8 = vector.load %arg2[%c0_4, %c1] : memref<10x26xf32, #tpu.memory_space<vmem>>, vector<10x1xf32>
    %9 = vector.broadcast %8 : vector<10x1xf32> to vector<10x460xf32>
    %10 = vector.broadcast %7 : vector<1x460xf32> to vector<10x460xf32>
    %11 = arith.mulf %9, %10 : vector<10x460xf32>
    %12 = arith.addf %6, %11 : vector<10x460xf32>
    %13 = vector.extract_strided_slice %1 {offsets = [0, 2], sizes = [1, 460], strides = [1, 1]} : vector<1x528xf32> to vector<1x460xf32>
    %c0_5 = arith.constant 0 : index
    %c2 = arith.constant 2 : index
    %14 = vector.load %arg2[%c0_5, %c2] : memref<10x26xf32, #tpu.memory_space<vmem>>, vector<10x1xf32>
    %15 = vector.broadcast %14 : vector<10x1xf32> to vector<10x460xf32>
    %16 = vector.broadcast %13 : vector<1x460xf32> to vector<10x460xf32>
    %17 = arith.mulf %15, %16 : vector<10x460xf32>
    %18 = arith.addf %12, %17 : vector<10x460xf32>
    %19 = vector.extract_strided_slice %1 {offsets = [0, 3], sizes = [1, 460], strides = [1, 1]} : vector<1x528xf32> to vector<1x460xf32>
    %c0_6 = arith.constant 0 : index
    %c3 = arith.constant 3 : index
    %20 = vector.load %arg2[%c0_6, %c3] : memref<10x26xf32, #tpu.memory_space<vmem>>, vector<10x1xf32>
    %21 = vector.broadcast %20 : vector<10x1xf32> to vector<10x460xf32>
    %22 = vector.broadcast %19 : vector<1x460xf32> to vector<10x460xf32>
    %23 = arith.mulf %21, %22 : vector<10x460xf32>
    %24 = arith.addf %18, %23 : vector<10x460xf32>
    %25 = vector.extract_strided_slice %1 {offsets = [0, 4], sizes = [1, 460], strides = [1, 1]} : vector<1x528xf32> to vector<1x460xf32>
    %c0_7 = arith.constant 0 : index
    %c4 = arith.constant 4 : index
    %26 = vector.load %arg2[%c0_7, %c4] : memref<10x26xf32, #tpu.memory_space<vmem>>, vector<10x1xf32>
    %27 = vector.broadcast %26 : vector<10x1xf32> to vector<10x460xf32>
    %28 = vector.broadcast %25 : vector<1x460xf32> to vector<10x460xf32>
    %29 = arith.mulf %27, %28 : vector<10x460xf32>
    %30 = arith.addf %24, %29 : vector<10x460xf32>
    %31 = vector.extract_strided_slice %1 {offsets = [0, 16], sizes = [1, 460], strides = [1, 1]} : vector<1x528xf32> to vector<1x460xf32>
    %c0_8 = arith.constant 0 : index
    %c5 = arith.constant 5 : index
    %32 = vector.load %arg2[%c0_8, %c5] : memref<10x26xf32, #tpu.memory_space<vmem>>, vector<10x1xf32>
    %33 = vector.broadcast %32 : vector<10x1xf32> to vector<10x460xf32>
    %34 = vector.broadcast %31 : vector<1x460xf32> to vector<10x460xf32>
    %35 = arith.mulf %33, %34 : vector<10x460xf32>
    %36 = arith.addf %30, %35 : vector<10x460xf32>
    %37 = vector.extract_strided_slice %1 {offsets = [0, 17], sizes = [1, 460], strides = [1, 1]} : vector<1x528xf32> to vector<1x460xf32>
    %c0_9 = arith.constant 0 : index
    %c6 = arith.constant 6 : index
    %38 = vector.load %arg2[%c0_9, %c6] : memref<10x26xf32, #tpu.memory_space<vmem>>, vector<10x1xf32>
    %39 = vector.broadcast %38 : vector<10x1xf32> to vector<10x460xf32>
    %40 = vector.broadcast %37 : vector<1x460xf32> to vector<10x460xf32>
    %41 = arith.mulf %39, %40 : vector<10x460xf32>
    %42 = arith.addf %36, %41 : vector<10x460xf32>
    %43 = vector.extract_strided_slice %1 {offsets = [0, 18], sizes = [1, 460], strides = [1, 1]} : vector<1x528xf32> to vector<1x460xf32>
    %c0_10 = arith.constant 0 : index
    %c7 = arith.constant 7 : index
    %44 = vector.load %arg2[%c0_10, %c7] : memref<10x26xf32, #tpu.memory_space<vmem>>, vector<10x1xf32>
    %45 = vector.broadcast %44 : vector<10x1xf32> to vector<10x460xf32>
    %46 = vector.broadcast %43 : vector<1x460xf32> to vector<10x460xf32>
    %47 = arith.mulf %45, %46 : vector<10x460xf32>
    %48 = arith.addf %42, %47 : vector<10x460xf32>
    %49 = vector.extract_strided_slice %1 {offsets = [0, 19], sizes = [1, 460], strides = [1, 1]} : vector<1x528xf32> to vector<1x460xf32>
    %c0_11 = arith.constant 0 : index
    %c8 = arith.constant 8 : index
    %50 = vector.load %arg2[%c0_11, %c8] : memref<10x26xf32, #tpu.memory_space<vmem>>, vector<10x1xf32>
    %51 = vector.broadcast %50 : vector<10x1xf32> to vector<10x460xf32>
    %52 = vector.broadcast %49 : vector<1x460xf32> to vector<10x460xf32>
    %53 = arith.mulf %51, %52 : vector<10x460xf32>
    %54 = arith.addf %48, %53 : vector<10x460xf32>
    %55 = vector.extract_strided_slice %1 {offsets = [0, 20], sizes = [1, 460], strides = [1, 1]} : vector<1x528xf32> to vector<1x460xf32>
    %c0_12 = arith.constant 0 : index
    %c9 = arith.constant 9 : index
    %56 = vector.load %arg2[%c0_12, %c9] : memref<10x26xf32, #tpu.memory_space<vmem>>, vector<10x1xf32>
    %57 = vector.broadcast %56 : vector<10x1xf32> to vector<10x460xf32>
    %58 = vector.broadcast %55 : vector<1x460xf32> to vector<10x460xf32>
    %59 = arith.mulf %57, %58 : vector<10x460xf32>
    %60 = arith.addf %54, %59 : vector<10x460xf32>
    %61 = vector.extract_strided_slice %1 {offsets = [0, 32], sizes = [1, 460], strides = [1, 1]} : vector<1x528xf32> to vector<1x460xf32>
    %c0_13 = arith.constant 0 : index
    %c10 = arith.constant 10 : index
    %62 = vector.load %arg2[%c0_13, %c10] : memref<10x26xf32, #tpu.memory_space<vmem>>, vector<10x1xf32>
    %63 = vector.broadcast %62 : vector<10x1xf32> to vector<10x460xf32>
    %64 = vector.broadcast %61 : vector<1x460xf32> to vector<10x460xf32>
    %65 = arith.mulf %63, %64 : vector<10x460xf32>
    %66 = arith.addf %60, %65 : vector<10x460xf32>
    %67 = vector.extract_strided_slice %1 {offsets = [0, 33], sizes = [1, 460], strides = [1, 1]} : vector<1x528xf32> to vector<1x460xf32>
    %c0_14 = arith.constant 0 : index
    %c11 = arith.constant 11 : index
    %68 = vector.load %arg2[%c0_14, %c11] : memref<10x26xf32, #tpu.memory_space<vmem>>, vector<10x1xf32>
    %69 = vector.broadcast %68 : vector<10x1xf32> to vector<10x460xf32>
    %70 = vector.broadcast %67 : vector<1x460xf32> to vector<10x460xf32>
    %71 = arith.mulf %69, %70 : vector<10x460xf32>
    %72 = arith.addf %66, %71 : vector<10x460xf32>
    %73 = vector.extract_strided_slice %1 {offsets = [0, 34], sizes = [1, 460], strides = [1, 1]} : vector<1x528xf32> to vector<1x460xf32>
    %c0_15 = arith.constant 0 : index
    %c12 = arith.constant 12 : index
    %74 = vector.load %arg2[%c0_15, %c12] : memref<10x26xf32, #tpu.memory_space<vmem>>, vector<10x1xf32>
    %75 = vector.broadcast %74 : vector<10x1xf32> to vector<10x460xf32>
    %76 = vector.broadcast %73 : vector<1x460xf32> to vector<10x460xf32>
    %77 = arith.mulf %75, %76 : vector<10x460xf32>
    %78 = arith.addf %72, %77 : vector<10x460xf32>
    %79 = vector.extract_strided_slice %1 {offsets = [0, 35], sizes = [1, 460], strides = [1, 1]} : vector<1x528xf32> to vector<1x460xf32>
    %c0_16 = arith.constant 0 : index
    %c13 = arith.constant 13 : index
    %80 = vector.load %arg2[%c0_16, %c13] : memref<10x26xf32, #tpu.memory_space<vmem>>, vector<10x1xf32>
    %81 = vector.broadcast %80 : vector<10x1xf32> to vector<10x460xf32>
    %82 = vector.broadcast %79 : vector<1x460xf32> to vector<10x460xf32>
    %83 = arith.mulf %81, %82 : vector<10x460xf32>
    %84 = arith.addf %78, %83 : vector<10x460xf32>
    %85 = vector.extract_strided_slice %1 {offsets = [0, 36], sizes = [1, 460], strides = [1, 1]} : vector<1x528xf32> to vector<1x460xf32>
    %c0_17 = arith.constant 0 : index
    %c14 = arith.constant 14 : index
    %86 = vector.load %arg2[%c0_17, %c14] : memref<10x26xf32, #tpu.memory_space<vmem>>, vector<10x1xf32>
    %87 = vector.broadcast %86 : vector<10x1xf32> to vector<10x460xf32>
    %88 = vector.broadcast %85 : vector<1x460xf32> to vector<10x460xf32>
    %89 = arith.mulf %87, %88 : vector<10x460xf32>
    %90 = arith.addf %84, %89 : vector<10x460xf32>
    %91 = vector.extract_strided_slice %1 {offsets = [0, 48], sizes = [1, 460], strides = [1, 1]} : vector<1x528xf32> to vector<1x460xf32>
    %c0_18 = arith.constant 0 : index
    %c15 = arith.constant 15 : index
    %92 = vector.load %arg2[%c0_18, %c15] : memref<10x26xf32, #tpu.memory_space<vmem>>, vector<10x1xf32>
    %93 = vector.broadcast %92 : vector<10x1xf32> to vector<10x460xf32>
    %94 = vector.broadcast %91 : vector<1x460xf32> to vector<10x460xf32>
    %95 = arith.mulf %93, %94 : vector<10x460xf32>
    %96 = arith.addf %90, %95 : vector<10x460xf32>
    %97 = vector.extract_strided_slice %1 {offsets = [0, 49], sizes = [1, 460], strides = [1, 1]} : vector<1x528xf32> to vector<1x460xf32>
    %c0_19 = arith.constant 0 : index
    %c16 = arith.constant 16 : index
    %98 = vector.load %arg2[%c0_19, %c16] : memref<10x26xf32, #tpu.memory_space<vmem>>, vector<10x1xf32>
    %99 = vector.broadcast %98 : vector<10x1xf32> to vector<10x460xf32>
    %100 = vector.broadcast %97 : vector<1x460xf32> to vector<10x460xf32>
    %101 = arith.mulf %99, %100 : vector<10x460xf32>
    %102 = arith.addf %96, %101 : vector<10x460xf32>
    %103 = vector.extract_strided_slice %1 {offsets = [0, 50], sizes = [1, 460], strides = [1, 1]} : vector<1x528xf32> to vector<1x460xf32>
    %c0_20 = arith.constant 0 : index
    %c17 = arith.constant 17 : index
    %104 = vector.load %arg2[%c0_20, %c17] : memref<10x26xf32, #tpu.memory_space<vmem>>, vector<10x1xf32>
    %105 = vector.broadcast %104 : vector<10x1xf32> to vector<10x460xf32>
    %106 = vector.broadcast %103 : vector<1x460xf32> to vector<10x460xf32>
    %107 = arith.mulf %105, %106 : vector<10x460xf32>
    %108 = arith.addf %102, %107 : vector<10x460xf32>
    %109 = vector.extract_strided_slice %1 {offsets = [0, 51], sizes = [1, 460], strides = [1, 1]} : vector<1x528xf32> to vector<1x460xf32>
    %c0_21 = arith.constant 0 : index
    %c18 = arith.constant 18 : index
    %110 = vector.load %arg2[%c0_21, %c18] : memref<10x26xf32, #tpu.memory_space<vmem>>, vector<10x1xf32>
    %111 = vector.broadcast %110 : vector<10x1xf32> to vector<10x460xf32>
    %112 = vector.broadcast %109 : vector<1x460xf32> to vector<10x460xf32>
    %113 = arith.mulf %111, %112 : vector<10x460xf32>
    %114 = arith.addf %108, %113 : vector<10x460xf32>
    %115 = vector.extract_strided_slice %1 {offsets = [0, 52], sizes = [1, 460], strides = [1, 1]} : vector<1x528xf32> to vector<1x460xf32>
    %c0_22 = arith.constant 0 : index
    %c19 = arith.constant 19 : index
    %116 = vector.load %arg2[%c0_22, %c19] : memref<10x26xf32, #tpu.memory_space<vmem>>, vector<10x1xf32>
    %117 = vector.broadcast %116 : vector<10x1xf32> to vector<10x460xf32>
    %118 = vector.broadcast %115 : vector<1x460xf32> to vector<10x460xf32>
    %119 = arith.mulf %117, %118 : vector<10x460xf32>
    %120 = arith.addf %114, %119 : vector<10x460xf32>
    %121 = vector.extract_strided_slice %1 {offsets = [0, 64], sizes = [1, 460], strides = [1, 1]} : vector<1x528xf32> to vector<1x460xf32>
    %c0_23 = arith.constant 0 : index
    %c20 = arith.constant 20 : index
    %122 = vector.load %arg2[%c0_23, %c20] : memref<10x26xf32, #tpu.memory_space<vmem>>, vector<10x1xf32>
    %123 = vector.broadcast %122 : vector<10x1xf32> to vector<10x460xf32>
    %124 = vector.broadcast %121 : vector<1x460xf32> to vector<10x460xf32>
    %125 = arith.mulf %123, %124 : vector<10x460xf32>
    %126 = arith.addf %120, %125 : vector<10x460xf32>
    %127 = vector.extract_strided_slice %1 {offsets = [0, 65], sizes = [1, 460], strides = [1, 1]} : vector<1x528xf32> to vector<1x460xf32>
    %c0_24 = arith.constant 0 : index
    %c21 = arith.constant 21 : index
    %128 = vector.load %arg2[%c0_24, %c21] : memref<10x26xf32, #tpu.memory_space<vmem>>, vector<10x1xf32>
    %129 = vector.broadcast %128 : vector<10x1xf32> to vector<10x460xf32>
    %130 = vector.broadcast %127 : vector<1x460xf32> to vector<10x460xf32>
    %131 = arith.mulf %129, %130 : vector<10x460xf32>
    %132 = arith.addf %126, %131 : vector<10x460xf32>
    %133 = vector.extract_strided_slice %1 {offsets = [0, 66], sizes = [1, 460], strides = [1, 1]} : vector<1x528xf32> to vector<1x460xf32>
    %c0_25 = arith.constant 0 : index
    %c22 = arith.constant 22 : index
    %134 = vector.load %arg2[%c0_25, %c22] : memref<10x26xf32, #tpu.memory_space<vmem>>, vector<10x1xf32>
    %135 = vector.broadcast %134 : vector<10x1xf32> to vector<10x460xf32>
    %136 = vector.broadcast %133 : vector<1x460xf32> to vector<10x460xf32>
    %137 = arith.mulf %135, %136 : vector<10x460xf32>
    %138 = arith.addf %132, %137 : vector<10x460xf32>
    %139 = vector.extract_strided_slice %1 {offsets = [0, 67], sizes = [1, 460], strides = [1, 1]} : vector<1x528xf32> to vector<1x460xf32>
    %c0_26 = arith.constant 0 : index
    %c23 = arith.constant 23 : index
    %140 = vector.load %arg2[%c0_26, %c23] : memref<10x26xf32, #tpu.memory_space<vmem>>, vector<10x1xf32>
    %141 = vector.broadcast %140 : vector<10x1xf32> to vector<10x460xf32>
    %142 = vector.broadcast %139 : vector<1x460xf32> to vector<10x460xf32>
    %143 = arith.mulf %141, %142 : vector<10x460xf32>
    %144 = arith.addf %138, %143 : vector<10x460xf32>
    %145 = vector.extract_strided_slice %1 {offsets = [0, 68], sizes = [1, 460], strides = [1, 1]} : vector<1x528xf32> to vector<1x460xf32>
    %c0_27 = arith.constant 0 : index
    %c24 = arith.constant 24 : index
    %146 = vector.load %arg2[%c0_27, %c24] : memref<10x26xf32, #tpu.memory_space<vmem>>, vector<10x1xf32>
    %147 = vector.broadcast %146 : vector<10x1xf32> to vector<10x460xf32>
    %148 = vector.broadcast %145 : vector<1x460xf32> to vector<10x460xf32>
    %149 = arith.mulf %147, %148 : vector<10x460xf32>
    %150 = arith.addf %144, %149 : vector<10x460xf32>
    %c0_28 = arith.constant 0 : index
    %c25 = arith.constant 25 : index
    %151 = vector.load %arg2[%c0_28, %c25] : memref<10x26xf32, #tpu.memory_space<vmem>>, vector<10x1xf32>
    %152 = vector.broadcast %151 : vector<10x1xf32> to vector<10x460xf32>
    %153 = arith.addf %150, %152 : vector<10x460xf32>
    %cst = arith.constant 0.000000e+00 : f32
    %154 = vector.broadcast %cst : f32 to vector<10x460xf32>
    %155 = arith.maximumf %153, %154 : vector<10x460xf32>
    %156 = vector.extract_strided_slice %155 {offsets = [0, 0], sizes = [10, 392], strides = [1, 1]} : vector<10x460xf32> to vector<10x392xf32>
    %c0_29 = arith.constant 0 : index
    %c0_30 = arith.constant 0 : index
    %157 = vector.load %arg3[%c0_29, %c0_30] : memref<20x251xf32, #tpu.memory_space<vmem>>, vector<20x10xf32>
    %cst_31 = arith.constant dense<0.000000e+00> : vector<20x392xf32>
    %158 = tpu.matmul %157, %156, %cst_31 {dimension_numbers = #tpu.dot_dimension_numbers<[1], [0], [0], [1], [0, 0, 1, 1], [], []>} : vector<20x10xf32>, vector<10x392xf32>, vector<20x392xf32> -> vector<20x392xf32>
    %159 = vector.extract_strided_slice %155 {offsets = [0, 1], sizes = [10, 392], strides = [1, 1]} : vector<10x460xf32> to vector<10x392xf32>
    %c0_32 = arith.constant 0 : index
    %c10_33 = arith.constant 10 : index
    %160 = vector.load %arg3[%c0_32, %c10_33] : memref<20x251xf32, #tpu.memory_space<vmem>>, vector<20x10xf32>
    %cst_34 = arith.constant dense<0.000000e+00> : vector<20x392xf32>
    %161 = tpu.matmul %160, %159, %cst_34 {dimension_numbers = #tpu.dot_dimension_numbers<[1], [0], [0], [1], [0, 0, 1, 1], [], []>} : vector<20x10xf32>, vector<10x392xf32>, vector<20x392xf32> -> vector<20x392xf32>
    %162 = arith.addf %158, %161 : vector<20x392xf32>
    %163 = vector.extract_strided_slice %155 {offsets = [0, 2], sizes = [10, 392], strides = [1, 1]} : vector<10x460xf32> to vector<10x392xf32>
    %c0_35 = arith.constant 0 : index
    %c20_36 = arith.constant 20 : index
    %164 = vector.load %arg3[%c0_35, %c20_36] : memref<20x251xf32, #tpu.memory_space<vmem>>, vector<20x10xf32>
    %cst_37 = arith.constant dense<0.000000e+00> : vector<20x392xf32>
    %165 = tpu.matmul %164, %163, %cst_37 {dimension_numbers = #tpu.dot_dimension_numbers<[1], [0], [0], [1], [0, 0, 1, 1], [], []>} : vector<20x10xf32>, vector<10x392xf32>, vector<20x392xf32> -> vector<20x392xf32>
    %166 = arith.addf %162, %165 : vector<20x392xf32>
    %167 = vector.extract_strided_slice %155 {offsets = [0, 3], sizes = [10, 392], strides = [1, 1]} : vector<10x460xf32> to vector<10x392xf32>
    %c0_38 = arith.constant 0 : index
    %c30 = arith.constant 30 : index
    %168 = vector.load %arg3[%c0_38, %c30] : memref<20x251xf32, #tpu.memory_space<vmem>>, vector<20x10xf32>
    %cst_39 = arith.constant dense<0.000000e+00> : vector<20x392xf32>
    %169 = tpu.matmul %168, %167, %cst_39 {dimension_numbers = #tpu.dot_dimension_numbers<[1], [0], [0], [1], [0, 0, 1, 1], [], []>} : vector<20x10xf32>, vector<10x392xf32>, vector<20x392xf32> -> vector<20x392xf32>
    %170 = arith.addf %166, %169 : vector<20x392xf32>
    %171 = vector.extract_strided_slice %155 {offsets = [0, 4], sizes = [10, 392], strides = [1, 1]} : vector<10x460xf32> to vector<10x392xf32>
    %c0_40 = arith.constant 0 : index
    %c40 = arith.constant 40 : index
    %172 = vector.load %arg3[%c0_40, %c40] : memref<20x251xf32, #tpu.memory_space<vmem>>, vector<20x10xf32>
    %cst_41 = arith.constant dense<0.000000e+00> : vector<20x392xf32>
    %173 = tpu.matmul %172, %171, %cst_41 {dimension_numbers = #tpu.dot_dimension_numbers<[1], [0], [0], [1], [0, 0, 1, 1], [], []>} : vector<20x10xf32>, vector<10x392xf32>, vector<20x392xf32> -> vector<20x392xf32>
    %174 = arith.addf %170, %173 : vector<20x392xf32>
    %175 = vector.extract_strided_slice %155 {offsets = [0, 16], sizes = [10, 392], strides = [1, 1]} : vector<10x460xf32> to vector<10x392xf32>
    %c0_42 = arith.constant 0 : index
    %c50 = arith.constant 50 : index
    %176 = vector.load %arg3[%c0_42, %c50] : memref<20x251xf32, #tpu.memory_space<vmem>>, vector<20x10xf32>
    %cst_43 = arith.constant dense<0.000000e+00> : vector<20x392xf32>
    %177 = tpu.matmul %176, %175, %cst_43 {dimension_numbers = #tpu.dot_dimension_numbers<[1], [0], [0], [1], [0, 0, 1, 1], [], []>} : vector<20x10xf32>, vector<10x392xf32>, vector<20x392xf32> -> vector<20x392xf32>
    %178 = arith.addf %174, %177 : vector<20x392xf32>
    %179 = vector.extract_strided_slice %155 {offsets = [0, 17], sizes = [10, 392], strides = [1, 1]} : vector<10x460xf32> to vector<10x392xf32>
    %c0_44 = arith.constant 0 : index
    %c60 = arith.constant 60 : index
    %180 = vector.load %arg3[%c0_44, %c60] : memref<20x251xf32, #tpu.memory_space<vmem>>, vector<20x10xf32>
    %cst_45 = arith.constant dense<0.000000e+00> : vector<20x392xf32>
    %181 = tpu.matmul %180, %179, %cst_45 {dimension_numbers = #tpu.dot_dimension_numbers<[1], [0], [0], [1], [0, 0, 1, 1], [], []>} : vector<20x10xf32>, vector<10x392xf32>, vector<20x392xf32> -> vector<20x392xf32>
    %182 = arith.addf %178, %181 : vector<20x392xf32>
    %183 = vector.extract_strided_slice %155 {offsets = [0, 18], sizes = [10, 392], strides = [1, 1]} : vector<10x460xf32> to vector<10x392xf32>
    %c0_46 = arith.constant 0 : index
    %c70 = arith.constant 70 : index
    %184 = vector.load %arg3[%c0_46, %c70] : memref<20x251xf32, #tpu.memory_space<vmem>>, vector<20x10xf32>
    %cst_47 = arith.constant dense<0.000000e+00> : vector<20x392xf32>
    %185 = tpu.matmul %184, %183, %cst_47 {dimension_numbers = #tpu.dot_dimension_numbers<[1], [0], [0], [1], [0, 0, 1, 1], [], []>} : vector<20x10xf32>, vector<10x392xf32>, vector<20x392xf32> -> vector<20x392xf32>
    %186 = arith.addf %182, %185 : vector<20x392xf32>
    %187 = vector.extract_strided_slice %155 {offsets = [0, 19], sizes = [10, 392], strides = [1, 1]} : vector<10x460xf32> to vector<10x392xf32>
    %c0_48 = arith.constant 0 : index
    %c80 = arith.constant 80 : index
    %188 = vector.load %arg3[%c0_48, %c80] : memref<20x251xf32, #tpu.memory_space<vmem>>, vector<20x10xf32>
    %cst_49 = arith.constant dense<0.000000e+00> : vector<20x392xf32>
    %189 = tpu.matmul %188, %187, %cst_49 {dimension_numbers = #tpu.dot_dimension_numbers<[1], [0], [0], [1], [0, 0, 1, 1], [], []>} : vector<20x10xf32>, vector<10x392xf32>, vector<20x392xf32> -> vector<20x392xf32>
    %190 = arith.addf %186, %189 : vector<20x392xf32>
    %191 = vector.extract_strided_slice %155 {offsets = [0, 20], sizes = [10, 392], strides = [1, 1]} : vector<10x460xf32> to vector<10x392xf32>
    %c0_50 = arith.constant 0 : index
    %c90 = arith.constant 90 : index
    %192 = vector.load %arg3[%c0_50, %c90] : memref<20x251xf32, #tpu.memory_space<vmem>>, vector<20x10xf32>
    %cst_51 = arith.constant dense<0.000000e+00> : vector<20x392xf32>
    %193 = tpu.matmul %192, %191, %cst_51 {dimension_numbers = #tpu.dot_dimension_numbers<[1], [0], [0], [1], [0, 0, 1, 1], [], []>} : vector<20x10xf32>, vector<10x392xf32>, vector<20x392xf32> -> vector<20x392xf32>
    %194 = arith.addf %190, %193 : vector<20x392xf32>
    %195 = vector.extract_strided_slice %155 {offsets = [0, 32], sizes = [10, 392], strides = [1, 1]} : vector<10x460xf32> to vector<10x392xf32>
    %c0_52 = arith.constant 0 : index
    %c100 = arith.constant 100 : index
    %196 = vector.load %arg3[%c0_52, %c100] : memref<20x251xf32, #tpu.memory_space<vmem>>, vector<20x10xf32>
    %cst_53 = arith.constant dense<0.000000e+00> : vector<20x392xf32>
    %197 = tpu.matmul %196, %195, %cst_53 {dimension_numbers = #tpu.dot_dimension_numbers<[1], [0], [0], [1], [0, 0, 1, 1], [], []>} : vector<20x10xf32>, vector<10x392xf32>, vector<20x392xf32> -> vector<20x392xf32>
    %198 = arith.addf %194, %197 : vector<20x392xf32>
    %199 = vector.extract_strided_slice %155 {offsets = [0, 33], sizes = [10, 392], strides = [1, 1]} : vector<10x460xf32> to vector<10x392xf32>
    %c0_54 = arith.constant 0 : index
    %c110 = arith.constant 110 : index
    %200 = vector.load %arg3[%c0_54, %c110] : memref<20x251xf32, #tpu.memory_space<vmem>>, vector<20x10xf32>
    %cst_55 = arith.constant dense<0.000000e+00> : vector<20x392xf32>
    %201 = tpu.matmul %200, %199, %cst_55 {dimension_numbers = #tpu.dot_dimension_numbers<[1], [0], [0], [1], [0, 0, 1, 1], [], []>} : vector<20x10xf32>, vector<10x392xf32>, vector<20x392xf32> -> vector<20x392xf32>
    %202 = arith.addf %198, %201 : vector<20x392xf32>
    %203 = vector.extract_strided_slice %155 {offsets = [0, 34], sizes = [10, 392], strides = [1, 1]} : vector<10x460xf32> to vector<10x392xf32>
    %c0_56 = arith.constant 0 : index
    %c120 = arith.constant 120 : index
    %204 = vector.load %arg3[%c0_56, %c120] : memref<20x251xf32, #tpu.memory_space<vmem>>, vector<20x10xf32>
    %cst_57 = arith.constant dense<0.000000e+00> : vector<20x392xf32>
    %205 = tpu.matmul %204, %203, %cst_57 {dimension_numbers = #tpu.dot_dimension_numbers<[1], [0], [0], [1], [0, 0, 1, 1], [], []>} : vector<20x10xf32>, vector<10x392xf32>, vector<20x392xf32> -> vector<20x392xf32>
    %206 = arith.addf %202, %205 : vector<20x392xf32>
    %207 = vector.extract_strided_slice %155 {offsets = [0, 35], sizes = [10, 392], strides = [1, 1]} : vector<10x460xf32> to vector<10x392xf32>
    %c0_58 = arith.constant 0 : index
    %c130 = arith.constant 130 : index
    %208 = vector.load %arg3[%c0_58, %c130] : memref<20x251xf32, #tpu.memory_space<vmem>>, vector<20x10xf32>
    %cst_59 = arith.constant dense<0.000000e+00> : vector<20x392xf32>
    %209 = tpu.matmul %208, %207, %cst_59 {dimension_numbers = #tpu.dot_dimension_numbers<[1], [0], [0], [1], [0, 0, 1, 1], [], []>} : vector<20x10xf32>, vector<10x392xf32>, vector<20x392xf32> -> vector<20x392xf32>
    %210 = arith.addf %206, %209 : vector<20x392xf32>
    %211 = vector.extract_strided_slice %155 {offsets = [0, 36], sizes = [10, 392], strides = [1, 1]} : vector<10x460xf32> to vector<10x392xf32>
    %c0_60 = arith.constant 0 : index
    %c140 = arith.constant 140 : index
    %212 = vector.load %arg3[%c0_60, %c140] : memref<20x251xf32, #tpu.memory_space<vmem>>, vector<20x10xf32>
    %cst_61 = arith.constant dense<0.000000e+00> : vector<20x392xf32>
    %213 = tpu.matmul %212, %211, %cst_61 {dimension_numbers = #tpu.dot_dimension_numbers<[1], [0], [0], [1], [0, 0, 1, 1], [], []>} : vector<20x10xf32>, vector<10x392xf32>, vector<20x392xf32> -> vector<20x392xf32>
    %214 = arith.addf %210, %213 : vector<20x392xf32>
    %215 = vector.extract_strided_slice %155 {offsets = [0, 48], sizes = [10, 392], strides = [1, 1]} : vector<10x460xf32> to vector<10x392xf32>
    %c0_62 = arith.constant 0 : index
    %c150 = arith.constant 150 : index
    %216 = vector.load %arg3[%c0_62, %c150] : memref<20x251xf32, #tpu.memory_space<vmem>>, vector<20x10xf32>
    %cst_63 = arith.constant dense<0.000000e+00> : vector<20x392xf32>
    %217 = tpu.matmul %216, %215, %cst_63 {dimension_numbers = #tpu.dot_dimension_numbers<[1], [0], [0], [1], [0, 0, 1, 1], [], []>} : vector<20x10xf32>, vector<10x392xf32>, vector<20x392xf32> -> vector<20x392xf32>
    %218 = arith.addf %214, %217 : vector<20x392xf32>
    %219 = vector.extract_strided_slice %155 {offsets = [0, 49], sizes = [10, 392], strides = [1, 1]} : vector<10x460xf32> to vector<10x392xf32>
    %c0_64 = arith.constant 0 : index
    %c160 = arith.constant 160 : index
    %220 = vector.load %arg3[%c0_64, %c160] : memref<20x251xf32, #tpu.memory_space<vmem>>, vector<20x10xf32>
    %cst_65 = arith.constant dense<0.000000e+00> : vector<20x392xf32>
    %221 = tpu.matmul %220, %219, %cst_65 {dimension_numbers = #tpu.dot_dimension_numbers<[1], [0], [0], [1], [0, 0, 1, 1], [], []>} : vector<20x10xf32>, vector<10x392xf32>, vector<20x392xf32> -> vector<20x392xf32>
    %222 = arith.addf %218, %221 : vector<20x392xf32>
    %223 = vector.extract_strided_slice %155 {offsets = [0, 50], sizes = [10, 392], strides = [1, 1]} : vector<10x460xf32> to vector<10x392xf32>
    %c0_66 = arith.constant 0 : index
    %c170 = arith.constant 170 : index
    %224 = vector.load %arg3[%c0_66, %c170] : memref<20x251xf32, #tpu.memory_space<vmem>>, vector<20x10xf32>
    %cst_67 = arith.constant dense<0.000000e+00> : vector<20x392xf32>
    %225 = tpu.matmul %224, %223, %cst_67 {dimension_numbers = #tpu.dot_dimension_numbers<[1], [0], [0], [1], [0, 0, 1, 1], [], []>} : vector<20x10xf32>, vector<10x392xf32>, vector<20x392xf32> -> vector<20x392xf32>
    %226 = arith.addf %222, %225 : vector<20x392xf32>
    %227 = vector.extract_strided_slice %155 {offsets = [0, 51], sizes = [10, 392], strides = [1, 1]} : vector<10x460xf32> to vector<10x392xf32>
    %c0_68 = arith.constant 0 : index
    %c180 = arith.constant 180 : index
    %228 = vector.load %arg3[%c0_68, %c180] : memref<20x251xf32, #tpu.memory_space<vmem>>, vector<20x10xf32>
    %cst_69 = arith.constant dense<0.000000e+00> : vector<20x392xf32>
    %229 = tpu.matmul %228, %227, %cst_69 {dimension_numbers = #tpu.dot_dimension_numbers<[1], [0], [0], [1], [0, 0, 1, 1], [], []>} : vector<20x10xf32>, vector<10x392xf32>, vector<20x392xf32> -> vector<20x392xf32>
    %230 = arith.addf %226, %229 : vector<20x392xf32>
    %231 = vector.extract_strided_slice %155 {offsets = [0, 52], sizes = [10, 392], strides = [1, 1]} : vector<10x460xf32> to vector<10x392xf32>
    %c0_70 = arith.constant 0 : index
    %c190 = arith.constant 190 : index
    %232 = vector.load %arg3[%c0_70, %c190] : memref<20x251xf32, #tpu.memory_space<vmem>>, vector<20x10xf32>
    %cst_71 = arith.constant dense<0.000000e+00> : vector<20x392xf32>
    %233 = tpu.matmul %232, %231, %cst_71 {dimension_numbers = #tpu.dot_dimension_numbers<[1], [0], [0], [1], [0, 0, 1, 1], [], []>} : vector<20x10xf32>, vector<10x392xf32>, vector<20x392xf32> -> vector<20x392xf32>
    %234 = arith.addf %230, %233 : vector<20x392xf32>
    %235 = vector.extract_strided_slice %155 {offsets = [0, 64], sizes = [10, 392], strides = [1, 1]} : vector<10x460xf32> to vector<10x392xf32>
    %c0_72 = arith.constant 0 : index
    %c200 = arith.constant 200 : index
    %236 = vector.load %arg3[%c0_72, %c200] : memref<20x251xf32, #tpu.memory_space<vmem>>, vector<20x10xf32>
    %cst_73 = arith.constant dense<0.000000e+00> : vector<20x392xf32>
    %237 = tpu.matmul %236, %235, %cst_73 {dimension_numbers = #tpu.dot_dimension_numbers<[1], [0], [0], [1], [0, 0, 1, 1], [], []>} : vector<20x10xf32>, vector<10x392xf32>, vector<20x392xf32> -> vector<20x392xf32>
    %238 = arith.addf %234, %237 : vector<20x392xf32>
    %239 = vector.extract_strided_slice %155 {offsets = [0, 65], sizes = [10, 392], strides = [1, 1]} : vector<10x460xf32> to vector<10x392xf32>
    %c0_74 = arith.constant 0 : index
    %c210 = arith.constant 210 : index
    %240 = vector.load %arg3[%c0_74, %c210] : memref<20x251xf32, #tpu.memory_space<vmem>>, vector<20x10xf32>
    %cst_75 = arith.constant dense<0.000000e+00> : vector<20x392xf32>
    %241 = tpu.matmul %240, %239, %cst_75 {dimension_numbers = #tpu.dot_dimension_numbers<[1], [0], [0], [1], [0, 0, 1, 1], [], []>} : vector<20x10xf32>, vector<10x392xf32>, vector<20x392xf32> -> vector<20x392xf32>
    %242 = arith.addf %238, %241 : vector<20x392xf32>
    %243 = vector.extract_strided_slice %155 {offsets = [0, 66], sizes = [10, 392], strides = [1, 1]} : vector<10x460xf32> to vector<10x392xf32>
    %c0_76 = arith.constant 0 : index
    %c220 = arith.constant 220 : index
    %244 = vector.load %arg3[%c0_76, %c220] : memref<20x251xf32, #tpu.memory_space<vmem>>, vector<20x10xf32>
    %cst_77 = arith.constant dense<0.000000e+00> : vector<20x392xf32>
    %245 = tpu.matmul %244, %243, %cst_77 {dimension_numbers = #tpu.dot_dimension_numbers<[1], [0], [0], [1], [0, 0, 1, 1], [], []>} : vector<20x10xf32>, vector<10x392xf32>, vector<20x392xf32> -> vector<20x392xf32>
    %246 = arith.addf %242, %245 : vector<20x392xf32>
    %247 = vector.extract_strided_slice %155 {offsets = [0, 67], sizes = [10, 392], strides = [1, 1]} : vector<10x460xf32> to vector<10x392xf32>
    %c0_78 = arith.constant 0 : index
    %c230 = arith.constant 230 : index
    %248 = vector.load %arg3[%c0_78, %c230] : memref<20x251xf32, #tpu.memory_space<vmem>>, vector<20x10xf32>
    %cst_79 = arith.constant dense<0.000000e+00> : vector<20x392xf32>
    %249 = tpu.matmul %248, %247, %cst_79 {dimension_numbers = #tpu.dot_dimension_numbers<[1], [0], [0], [1], [0, 0, 1, 1], [], []>} : vector<20x10xf32>, vector<10x392xf32>, vector<20x392xf32> -> vector<20x392xf32>
    %250 = arith.addf %246, %249 : vector<20x392xf32>
    %251 = vector.extract_strided_slice %155 {offsets = [0, 68], sizes = [10, 392], strides = [1, 1]} : vector<10x460xf32> to vector<10x392xf32>
    %c0_80 = arith.constant 0 : index
    %c240 = arith.constant 240 : index
    %252 = vector.load %arg3[%c0_80, %c240] : memref<20x251xf32, #tpu.memory_space<vmem>>, vector<20x10xf32>
    %cst_81 = arith.constant dense<0.000000e+00> : vector<20x392xf32>
    %253 = tpu.matmul %252, %251, %cst_81 {dimension_numbers = #tpu.dot_dimension_numbers<[1], [0], [0], [1], [0, 0, 1, 1], [], []>} : vector<20x10xf32>, vector<10x392xf32>, vector<20x392xf32> -> vector<20x392xf32>
    %254 = arith.addf %250, %253 : vector<20x392xf32>
    %c0_82 = arith.constant 0 : index
    %c250 = arith.constant 250 : index
    %255 = vector.load %arg3[%c0_82, %c250] : memref<20x251xf32, #tpu.memory_space<vmem>>, vector<20x1xf32>
    %256 = vector.broadcast %255 : vector<20x1xf32> to vector<20x392xf32>
    %257 = arith.addf %254, %256 : vector<20x392xf32>
    %cst_83 = arith.constant 0.000000e+00 : f32
    %258 = vector.broadcast %cst_83 : f32 to vector<20x392xf32>
    %259 = arith.maximumf %257, %258 : vector<20x392xf32>
    %c0_84 = arith.constant 0 : index
    %c0_85 = arith.constant 0 : index
    %260 = vector.load %arg6[%c0_84, %c0_85] : memref<2x392xf32, #tpu.memory_space<vmem>>, vector<1x392xf32>
    %261 = vector.broadcast %260 : vector<1x392xf32> to vector<20x392xf32>
    %262 = arith.mulf %259, %261 : vector<20x392xf32>
    %263 = vector.extract_strided_slice %262 {offsets = [0, 68], sizes = [20, 324], strides = [1, 1]} : vector<20x392xf32> to vector<20x324xf32>
    %c0_86 = arith.constant 0 : index
    %c0_87 = arith.constant 0 : index
    %264 = vector.load %arg4[%c0_86, %c0_87] : memref<10x501xf32, #tpu.memory_space<vmem>>, vector<10x20xf32>
    %cst_88 = arith.constant dense<0.000000e+00> : vector<10x324xf32>
    %265 = tpu.matmul %264, %263, %cst_88 {dimension_numbers = #tpu.dot_dimension_numbers<[1], [0], [0], [1], [0, 0, 1, 1], [], []>} : vector<10x20xf32>, vector<20x324xf32>, vector<10x324xf32> -> vector<10x324xf32>
    %266 = vector.extract_strided_slice %262 {offsets = [0, 67], sizes = [20, 324], strides = [1, 1]} : vector<20x392xf32> to vector<20x324xf32>
    %c0_89 = arith.constant 0 : index
    %c20_90 = arith.constant 20 : index
    %267 = vector.load %arg4[%c0_89, %c20_90] : memref<10x501xf32, #tpu.memory_space<vmem>>, vector<10x20xf32>
    %cst_91 = arith.constant dense<0.000000e+00> : vector<10x324xf32>
    %268 = tpu.matmul %267, %266, %cst_91 {dimension_numbers = #tpu.dot_dimension_numbers<[1], [0], [0], [1], [0, 0, 1, 1], [], []>} : vector<10x20xf32>, vector<20x324xf32>, vector<10x324xf32> -> vector<10x324xf32>
    %269 = arith.addf %265, %268 : vector<10x324xf32>
    %270 = vector.extract_strided_slice %262 {offsets = [0, 66], sizes = [20, 324], strides = [1, 1]} : vector<20x392xf32> to vector<20x324xf32>
    %c0_92 = arith.constant 0 : index
    %c40_93 = arith.constant 40 : index
    %271 = vector.load %arg4[%c0_92, %c40_93] : memref<10x501xf32, #tpu.memory_space<vmem>>, vector<10x20xf32>
    %cst_94 = arith.constant dense<0.000000e+00> : vector<10x324xf32>
    %272 = tpu.matmul %271, %270, %cst_94 {dimension_numbers = #tpu.dot_dimension_numbers<[1], [0], [0], [1], [0, 0, 1, 1], [], []>} : vector<10x20xf32>, vector<20x324xf32>, vector<10x324xf32> -> vector<10x324xf32>
    %273 = arith.addf %269, %272 : vector<10x324xf32>
    %274 = vector.extract_strided_slice %262 {offsets = [0, 65], sizes = [20, 324], strides = [1, 1]} : vector<20x392xf32> to vector<20x324xf32>
    %c0_95 = arith.constant 0 : index
    %c60_96 = arith.constant 60 : index
    %275 = vector.load %arg4[%c0_95, %c60_96] : memref<10x501xf32, #tpu.memory_space<vmem>>, vector<10x20xf32>
    %cst_97 = arith.constant dense<0.000000e+00> : vector<10x324xf32>
    %276 = tpu.matmul %275, %274, %cst_97 {dimension_numbers = #tpu.dot_dimension_numbers<[1], [0], [0], [1], [0, 0, 1, 1], [], []>} : vector<10x20xf32>, vector<20x324xf32>, vector<10x324xf32> -> vector<10x324xf32>
    %277 = arith.addf %273, %276 : vector<10x324xf32>
    %278 = vector.extract_strided_slice %262 {offsets = [0, 64], sizes = [20, 324], strides = [1, 1]} : vector<20x392xf32> to vector<20x324xf32>
    %c0_98 = arith.constant 0 : index
    %c80_99 = arith.constant 80 : index
    %279 = vector.load %arg4[%c0_98, %c80_99] : memref<10x501xf32, #tpu.memory_space<vmem>>, vector<10x20xf32>
    %cst_100 = arith.constant dense<0.000000e+00> : vector<10x324xf32>
    %280 = tpu.matmul %279, %278, %cst_100 {dimension_numbers = #tpu.dot_dimension_numbers<[1], [0], [0], [1], [0, 0, 1, 1], [], []>} : vector<10x20xf32>, vector<20x324xf32>, vector<10x324xf32> -> vector<10x324xf32>
    %281 = arith.addf %277, %280 : vector<10x324xf32>
    %282 = vector.extract_strided_slice %262 {offsets = [0, 52], sizes = [20, 324], strides = [1, 1]} : vector<20x392xf32> to vector<20x324xf32>
    %c0_101 = arith.constant 0 : index
    %c100_102 = arith.constant 100 : index
    %283 = vector.load %arg4[%c0_101, %c100_102] : memref<10x501xf32, #tpu.memory_space<vmem>>, vector<10x20xf32>
    %cst_103 = arith.constant dense<0.000000e+00> : vector<10x324xf32>
    %284 = tpu.matmul %283, %282, %cst_103 {dimension_numbers = #tpu.dot_dimension_numbers<[1], [0], [0], [1], [0, 0, 1, 1], [], []>} : vector<10x20xf32>, vector<20x324xf32>, vector<10x324xf32> -> vector<10x324xf32>
    %285 = arith.addf %281, %284 : vector<10x324xf32>
    %286 = vector.extract_strided_slice %262 {offsets = [0, 51], sizes = [20, 324], strides = [1, 1]} : vector<20x392xf32> to vector<20x324xf32>
    %c0_104 = arith.constant 0 : index
    %c120_105 = arith.constant 120 : index
    %287 = vector.load %arg4[%c0_104, %c120_105] : memref<10x501xf32, #tpu.memory_space<vmem>>, vector<10x20xf32>
    %cst_106 = arith.constant dense<0.000000e+00> : vector<10x324xf32>
    %288 = tpu.matmul %287, %286, %cst_106 {dimension_numbers = #tpu.dot_dimension_numbers<[1], [0], [0], [1], [0, 0, 1, 1], [], []>} : vector<10x20xf32>, vector<20x324xf32>, vector<10x324xf32> -> vector<10x324xf32>
    %289 = arith.addf %285, %288 : vector<10x324xf32>
    %290 = vector.extract_strided_slice %262 {offsets = [0, 50], sizes = [20, 324], strides = [1, 1]} : vector<20x392xf32> to vector<20x324xf32>
    %c0_107 = arith.constant 0 : index
    %c140_108 = arith.constant 140 : index
    %291 = vector.load %arg4[%c0_107, %c140_108] : memref<10x501xf32, #tpu.memory_space<vmem>>, vector<10x20xf32>
    %cst_109 = arith.constant dense<0.000000e+00> : vector<10x324xf32>
    %292 = tpu.matmul %291, %290, %cst_109 {dimension_numbers = #tpu.dot_dimension_numbers<[1], [0], [0], [1], [0, 0, 1, 1], [], []>} : vector<10x20xf32>, vector<20x324xf32>, vector<10x324xf32> -> vector<10x324xf32>
    %293 = arith.addf %289, %292 : vector<10x324xf32>
    %294 = vector.extract_strided_slice %262 {offsets = [0, 49], sizes = [20, 324], strides = [1, 1]} : vector<20x392xf32> to vector<20x324xf32>
    %c0_110 = arith.constant 0 : index
    %c160_111 = arith.constant 160 : index
    %295 = vector.load %arg4[%c0_110, %c160_111] : memref<10x501xf32, #tpu.memory_space<vmem>>, vector<10x20xf32>
    %cst_112 = arith.constant dense<0.000000e+00> : vector<10x324xf32>
    %296 = tpu.matmul %295, %294, %cst_112 {dimension_numbers = #tpu.dot_dimension_numbers<[1], [0], [0], [1], [0, 0, 1, 1], [], []>} : vector<10x20xf32>, vector<20x324xf32>, vector<10x324xf32> -> vector<10x324xf32>
    %297 = arith.addf %293, %296 : vector<10x324xf32>
    %298 = vector.extract_strided_slice %262 {offsets = [0, 48], sizes = [20, 324], strides = [1, 1]} : vector<20x392xf32> to vector<20x324xf32>
    %c0_113 = arith.constant 0 : index
    %c180_114 = arith.constant 180 : index
    %299 = vector.load %arg4[%c0_113, %c180_114] : memref<10x501xf32, #tpu.memory_space<vmem>>, vector<10x20xf32>
    %cst_115 = arith.constant dense<0.000000e+00> : vector<10x324xf32>
    %300 = tpu.matmul %299, %298, %cst_115 {dimension_numbers = #tpu.dot_dimension_numbers<[1], [0], [0], [1], [0, 0, 1, 1], [], []>} : vector<10x20xf32>, vector<20x324xf32>, vector<10x324xf32> -> vector<10x324xf32>
    %301 = arith.addf %297, %300 : vector<10x324xf32>
    %302 = vector.extract_strided_slice %262 {offsets = [0, 36], sizes = [20, 324], strides = [1, 1]} : vector<20x392xf32> to vector<20x324xf32>
    %c0_116 = arith.constant 0 : index
    %c200_117 = arith.constant 200 : index
    %303 = vector.load %arg4[%c0_116, %c200_117] : memref<10x501xf32, #tpu.memory_space<vmem>>, vector<10x20xf32>
    %cst_118 = arith.constant dense<0.000000e+00> : vector<10x324xf32>
    %304 = tpu.matmul %303, %302, %cst_118 {dimension_numbers = #tpu.dot_dimension_numbers<[1], [0], [0], [1], [0, 0, 1, 1], [], []>} : vector<10x20xf32>, vector<20x324xf32>, vector<10x324xf32> -> vector<10x324xf32>
    %305 = arith.addf %301, %304 : vector<10x324xf32>
    %306 = vector.extract_strided_slice %262 {offsets = [0, 35], sizes = [20, 324], strides = [1, 1]} : vector<20x392xf32> to vector<20x324xf32>
    %c0_119 = arith.constant 0 : index
    %c220_120 = arith.constant 220 : index
    %307 = vector.load %arg4[%c0_119, %c220_120] : memref<10x501xf32, #tpu.memory_space<vmem>>, vector<10x20xf32>
    %cst_121 = arith.constant dense<0.000000e+00> : vector<10x324xf32>
    %308 = tpu.matmul %307, %306, %cst_121 {dimension_numbers = #tpu.dot_dimension_numbers<[1], [0], [0], [1], [0, 0, 1, 1], [], []>} : vector<10x20xf32>, vector<20x324xf32>, vector<10x324xf32> -> vector<10x324xf32>
    %309 = arith.addf %305, %308 : vector<10x324xf32>
    %310 = vector.extract_strided_slice %262 {offsets = [0, 34], sizes = [20, 324], strides = [1, 1]} : vector<20x392xf32> to vector<20x324xf32>
    %c0_122 = arith.constant 0 : index
    %c240_123 = arith.constant 240 : index
    %311 = vector.load %arg4[%c0_122, %c240_123] : memref<10x501xf32, #tpu.memory_space<vmem>>, vector<10x20xf32>
    %cst_124 = arith.constant dense<0.000000e+00> : vector<10x324xf32>
    %312 = tpu.matmul %311, %310, %cst_124 {dimension_numbers = #tpu.dot_dimension_numbers<[1], [0], [0], [1], [0, 0, 1, 1], [], []>} : vector<10x20xf32>, vector<20x324xf32>, vector<10x324xf32> -> vector<10x324xf32>
    %313 = arith.addf %309, %312 : vector<10x324xf32>
    %314 = vector.extract_strided_slice %262 {offsets = [0, 33], sizes = [20, 324], strides = [1, 1]} : vector<20x392xf32> to vector<20x324xf32>
    %c0_125 = arith.constant 0 : index
    %c260 = arith.constant 260 : index
    %315 = vector.load %arg4[%c0_125, %c260] : memref<10x501xf32, #tpu.memory_space<vmem>>, vector<10x20xf32>
    %cst_126 = arith.constant dense<0.000000e+00> : vector<10x324xf32>
    %316 = tpu.matmul %315, %314, %cst_126 {dimension_numbers = #tpu.dot_dimension_numbers<[1], [0], [0], [1], [0, 0, 1, 1], [], []>} : vector<10x20xf32>, vector<20x324xf32>, vector<10x324xf32> -> vector<10x324xf32>
    %317 = arith.addf %313, %316 : vector<10x324xf32>
    %318 = vector.extract_strided_slice %262 {offsets = [0, 32], sizes = [20, 324], strides = [1, 1]} : vector<20x392xf32> to vector<20x324xf32>
    %c0_127 = arith.constant 0 : index
    %c280 = arith.constant 280 : index
    %319 = vector.load %arg4[%c0_127, %c280] : memref<10x501xf32, #tpu.memory_space<vmem>>, vector<10x20xf32>
    %cst_128 = arith.constant dense<0.000000e+00> : vector<10x324xf32>
    %320 = tpu.matmul %319, %318, %cst_128 {dimension_numbers = #tpu.dot_dimension_numbers<[1], [0], [0], [1], [0, 0, 1, 1], [], []>} : vector<10x20xf32>, vector<20x324xf32>, vector<10x324xf32> -> vector<10x324xf32>
    %321 = arith.addf %317, %320 : vector<10x324xf32>
    %322 = vector.extract_strided_slice %262 {offsets = [0, 20], sizes = [20, 324], strides = [1, 1]} : vector<20x392xf32> to vector<20x324xf32>
    %c0_129 = arith.constant 0 : index
    %c300 = arith.constant 300 : index
    %323 = vector.load %arg4[%c0_129, %c300] : memref<10x501xf32, #tpu.memory_space<vmem>>, vector<10x20xf32>
    %cst_130 = arith.constant dense<0.000000e+00> : vector<10x324xf32>
    %324 = tpu.matmul %323, %322, %cst_130 {dimension_numbers = #tpu.dot_dimension_numbers<[1], [0], [0], [1], [0, 0, 1, 1], [], []>} : vector<10x20xf32>, vector<20x324xf32>, vector<10x324xf32> -> vector<10x324xf32>
    %325 = arith.addf %321, %324 : vector<10x324xf32>
    %326 = vector.extract_strided_slice %262 {offsets = [0, 19], sizes = [20, 324], strides = [1, 1]} : vector<20x392xf32> to vector<20x324xf32>
    %c0_131 = arith.constant 0 : index
    %c320 = arith.constant 320 : index
    %327 = vector.load %arg4[%c0_131, %c320] : memref<10x501xf32, #tpu.memory_space<vmem>>, vector<10x20xf32>
    %cst_132 = arith.constant dense<0.000000e+00> : vector<10x324xf32>
    %328 = tpu.matmul %327, %326, %cst_132 {dimension_numbers = #tpu.dot_dimension_numbers<[1], [0], [0], [1], [0, 0, 1, 1], [], []>} : vector<10x20xf32>, vector<20x324xf32>, vector<10x324xf32> -> vector<10x324xf32>
    %329 = arith.addf %325, %328 : vector<10x324xf32>
    %330 = vector.extract_strided_slice %262 {offsets = [0, 18], sizes = [20, 324], strides = [1, 1]} : vector<20x392xf32> to vector<20x324xf32>
    %c0_133 = arith.constant 0 : index
    %c340 = arith.constant 340 : index
    %331 = vector.load %arg4[%c0_133, %c340] : memref<10x501xf32, #tpu.memory_space<vmem>>, vector<10x20xf32>
    %cst_134 = arith.constant dense<0.000000e+00> : vector<10x324xf32>
    %332 = tpu.matmul %331, %330, %cst_134 {dimension_numbers = #tpu.dot_dimension_numbers<[1], [0], [0], [1], [0, 0, 1, 1], [], []>} : vector<10x20xf32>, vector<20x324xf32>, vector<10x324xf32> -> vector<10x324xf32>
    %333 = arith.addf %329, %332 : vector<10x324xf32>
    %334 = vector.extract_strided_slice %262 {offsets = [0, 17], sizes = [20, 324], strides = [1, 1]} : vector<20x392xf32> to vector<20x324xf32>
    %c0_135 = arith.constant 0 : index
    %c360 = arith.constant 360 : index
    %335 = vector.load %arg4[%c0_135, %c360] : memref<10x501xf32, #tpu.memory_space<vmem>>, vector<10x20xf32>
    %cst_136 = arith.constant dense<0.000000e+00> : vector<10x324xf32>
    %336 = tpu.matmul %335, %334, %cst_136 {dimension_numbers = #tpu.dot_dimension_numbers<[1], [0], [0], [1], [0, 0, 1, 1], [], []>} : vector<10x20xf32>, vector<20x324xf32>, vector<10x324xf32> -> vector<10x324xf32>
    %337 = arith.addf %333, %336 : vector<10x324xf32>
    %338 = vector.extract_strided_slice %262 {offsets = [0, 16], sizes = [20, 324], strides = [1, 1]} : vector<20x392xf32> to vector<20x324xf32>
    %c0_137 = arith.constant 0 : index
    %c380 = arith.constant 380 : index
    %339 = vector.load %arg4[%c0_137, %c380] : memref<10x501xf32, #tpu.memory_space<vmem>>, vector<10x20xf32>
    %cst_138 = arith.constant dense<0.000000e+00> : vector<10x324xf32>
    %340 = tpu.matmul %339, %338, %cst_138 {dimension_numbers = #tpu.dot_dimension_numbers<[1], [0], [0], [1], [0, 0, 1, 1], [], []>} : vector<10x20xf32>, vector<20x324xf32>, vector<10x324xf32> -> vector<10x324xf32>
    %341 = arith.addf %337, %340 : vector<10x324xf32>
    %342 = vector.extract_strided_slice %262 {offsets = [0, 4], sizes = [20, 324], strides = [1, 1]} : vector<20x392xf32> to vector<20x324xf32>
    %c0_139 = arith.constant 0 : index
    %c400 = arith.constant 400 : index
    %343 = vector.load %arg4[%c0_139, %c400] : memref<10x501xf32, #tpu.memory_space<vmem>>, vector<10x20xf32>
    %cst_140 = arith.constant dense<0.000000e+00> : vector<10x324xf32>
    %344 = tpu.matmul %343, %342, %cst_140 {dimension_numbers = #tpu.dot_dimension_numbers<[1], [0], [0], [1], [0, 0, 1, 1], [], []>} : vector<10x20xf32>, vector<20x324xf32>, vector<10x324xf32> -> vector<10x324xf32>
    %345 = arith.addf %341, %344 : vector<10x324xf32>
    %346 = vector.extract_strided_slice %262 {offsets = [0, 3], sizes = [20, 324], strides = [1, 1]} : vector<20x392xf32> to vector<20x324xf32>
    %c0_141 = arith.constant 0 : index
    %c420 = arith.constant 420 : index
    %347 = vector.load %arg4[%c0_141, %c420] : memref<10x501xf32, #tpu.memory_space<vmem>>, vector<10x20xf32>
    %cst_142 = arith.constant dense<0.000000e+00> : vector<10x324xf32>
    %348 = tpu.matmul %347, %346, %cst_142 {dimension_numbers = #tpu.dot_dimension_numbers<[1], [0], [0], [1], [0, 0, 1, 1], [], []>} : vector<10x20xf32>, vector<20x324xf32>, vector<10x324xf32> -> vector<10x324xf32>
    %349 = arith.addf %345, %348 : vector<10x324xf32>
    %350 = vector.extract_strided_slice %262 {offsets = [0, 2], sizes = [20, 324], strides = [1, 1]} : vector<20x392xf32> to vector<20x324xf32>
    %c0_143 = arith.constant 0 : index
    %c440 = arith.constant 440 : index
    %351 = vector.load %arg4[%c0_143, %c440] : memref<10x501xf32, #tpu.memory_space<vmem>>, vector<10x20xf32>
    %cst_144 = arith.constant dense<0.000000e+00> : vector<10x324xf32>
    %352 = tpu.matmul %351, %350, %cst_144 {dimension_numbers = #tpu.dot_dimension_numbers<[1], [0], [0], [1], [0, 0, 1, 1], [], []>} : vector<10x20xf32>, vector<20x324xf32>, vector<10x324xf32> -> vector<10x324xf32>
    %353 = arith.addf %349, %352 : vector<10x324xf32>
    %354 = vector.extract_strided_slice %262 {offsets = [0, 1], sizes = [20, 324], strides = [1, 1]} : vector<20x392xf32> to vector<20x324xf32>
    %c0_145 = arith.constant 0 : index
    %c460 = arith.constant 460 : index
    %355 = vector.load %arg4[%c0_145, %c460] : memref<10x501xf32, #tpu.memory_space<vmem>>, vector<10x20xf32>
    %cst_146 = arith.constant dense<0.000000e+00> : vector<10x324xf32>
    %356 = tpu.matmul %355, %354, %cst_146 {dimension_numbers = #tpu.dot_dimension_numbers<[1], [0], [0], [1], [0, 0, 1, 1], [], []>} : vector<10x20xf32>, vector<20x324xf32>, vector<10x324xf32> -> vector<10x324xf32>
    %357 = arith.addf %353, %356 : vector<10x324xf32>
    %358 = vector.extract_strided_slice %262 {offsets = [0, 0], sizes = [20, 324], strides = [1, 1]} : vector<20x392xf32> to vector<20x324xf32>
    %c0_147 = arith.constant 0 : index
    %c480 = arith.constant 480 : index
    %359 = vector.load %arg4[%c0_147, %c480] : memref<10x501xf32, #tpu.memory_space<vmem>>, vector<10x20xf32>
    %cst_148 = arith.constant dense<0.000000e+00> : vector<10x324xf32>
    %360 = tpu.matmul %359, %358, %cst_148 {dimension_numbers = #tpu.dot_dimension_numbers<[1], [0], [0], [1], [0, 0, 1, 1], [], []>} : vector<10x20xf32>, vector<20x324xf32>, vector<10x324xf32> -> vector<10x324xf32>
    %361 = arith.addf %357, %360 : vector<10x324xf32>
    %c0_149 = arith.constant 0 : index
    %c500 = arith.constant 500 : index
    %362 = vector.load %arg4[%c0_149, %c500] : memref<10x501xf32, #tpu.memory_space<vmem>>, vector<10x1xf32>
    %363 = vector.broadcast %362 : vector<10x1xf32> to vector<10x324xf32>
    %364 = arith.addf %361, %363 : vector<10x324xf32>
    %cst_150 = arith.constant 0.000000e+00 : f32
    %365 = vector.broadcast %cst_150 : f32 to vector<10x324xf32>
    %366 = arith.maximumf %364, %365 : vector<10x324xf32>
    %c1_151 = arith.constant 1 : index
    %c0_152 = arith.constant 0 : index
    %367 = vector.load %arg6[%c1_151, %c0_152] : memref<2x392xf32, #tpu.memory_space<vmem>>, vector<1x324xf32>
    %368 = vector.broadcast %367 : vector<1x324xf32> to vector<10x324xf32>
    %369 = arith.mulf %366, %368 : vector<10x324xf32>
    %370 = vector.extract_strided_slice %369 {offsets = [0, 68], sizes = [10, 256], strides = [1, 1]} : vector<10x324xf32> to vector<10x256xf32>
    %c0_153 = arith.constant 0 : index
    %c0_154 = arith.constant 0 : index
    %371 = vector.load %arg5[%c0_153, %c0_154] : memref<1x251xf32, #tpu.memory_space<vmem>>, vector<1x10xf32>
    %cst_155 = arith.constant dense<0.000000e+00> : vector<1x256xf32>
    %372 = tpu.matmul %371, %370, %cst_155 {dimension_numbers = #tpu.dot_dimension_numbers<[1], [0], [0], [1], [0, 0, 1, 1], [], []>} : vector<1x10xf32>, vector<10x256xf32>, vector<1x256xf32> -> vector<1x256xf32>
    %373 = vector.extract_strided_slice %369 {offsets = [0, 67], sizes = [10, 256], strides = [1, 1]} : vector<10x324xf32> to vector<10x256xf32>
    %c0_156 = arith.constant 0 : index
    %c10_157 = arith.constant 10 : index
    %374 = vector.load %arg5[%c0_156, %c10_157] : memref<1x251xf32, #tpu.memory_space<vmem>>, vector<1x10xf32>
    %cst_158 = arith.constant dense<0.000000e+00> : vector<1x256xf32>
    %375 = tpu.matmul %374, %373, %cst_158 {dimension_numbers = #tpu.dot_dimension_numbers<[1], [0], [0], [1], [0, 0, 1, 1], [], []>} : vector<1x10xf32>, vector<10x256xf32>, vector<1x256xf32> -> vector<1x256xf32>
    %376 = arith.addf %372, %375 : vector<1x256xf32>
    %377 = vector.extract_strided_slice %369 {offsets = [0, 66], sizes = [10, 256], strides = [1, 1]} : vector<10x324xf32> to vector<10x256xf32>
    %c0_159 = arith.constant 0 : index
    %c20_160 = arith.constant 20 : index
    %378 = vector.load %arg5[%c0_159, %c20_160] : memref<1x251xf32, #tpu.memory_space<vmem>>, vector<1x10xf32>
    %cst_161 = arith.constant dense<0.000000e+00> : vector<1x256xf32>
    %379 = tpu.matmul %378, %377, %cst_161 {dimension_numbers = #tpu.dot_dimension_numbers<[1], [0], [0], [1], [0, 0, 1, 1], [], []>} : vector<1x10xf32>, vector<10x256xf32>, vector<1x256xf32> -> vector<1x256xf32>
    %380 = arith.addf %376, %379 : vector<1x256xf32>
    %381 = vector.extract_strided_slice %369 {offsets = [0, 65], sizes = [10, 256], strides = [1, 1]} : vector<10x324xf32> to vector<10x256xf32>
    %c0_162 = arith.constant 0 : index
    %c30_163 = arith.constant 30 : index
    %382 = vector.load %arg5[%c0_162, %c30_163] : memref<1x251xf32, #tpu.memory_space<vmem>>, vector<1x10xf32>
    %cst_164 = arith.constant dense<0.000000e+00> : vector<1x256xf32>
    %383 = tpu.matmul %382, %381, %cst_164 {dimension_numbers = #tpu.dot_dimension_numbers<[1], [0], [0], [1], [0, 0, 1, 1], [], []>} : vector<1x10xf32>, vector<10x256xf32>, vector<1x256xf32> -> vector<1x256xf32>
    %384 = arith.addf %380, %383 : vector<1x256xf32>
    %385 = vector.extract_strided_slice %369 {offsets = [0, 64], sizes = [10, 256], strides = [1, 1]} : vector<10x324xf32> to vector<10x256xf32>
    %c0_165 = arith.constant 0 : index
    %c40_166 = arith.constant 40 : index
    %386 = vector.load %arg5[%c0_165, %c40_166] : memref<1x251xf32, #tpu.memory_space<vmem>>, vector<1x10xf32>
    %cst_167 = arith.constant dense<0.000000e+00> : vector<1x256xf32>
    %387 = tpu.matmul %386, %385, %cst_167 {dimension_numbers = #tpu.dot_dimension_numbers<[1], [0], [0], [1], [0, 0, 1, 1], [], []>} : vector<1x10xf32>, vector<10x256xf32>, vector<1x256xf32> -> vector<1x256xf32>
    %388 = arith.addf %384, %387 : vector<1x256xf32>
    %389 = vector.extract_strided_slice %369 {offsets = [0, 52], sizes = [10, 256], strides = [1, 1]} : vector<10x324xf32> to vector<10x256xf32>
    %c0_168 = arith.constant 0 : index
    %c50_169 = arith.constant 50 : index
    %390 = vector.load %arg5[%c0_168, %c50_169] : memref<1x251xf32, #tpu.memory_space<vmem>>, vector<1x10xf32>
    %cst_170 = arith.constant dense<0.000000e+00> : vector<1x256xf32>
    %391 = tpu.matmul %390, %389, %cst_170 {dimension_numbers = #tpu.dot_dimension_numbers<[1], [0], [0], [1], [0, 0, 1, 1], [], []>} : vector<1x10xf32>, vector<10x256xf32>, vector<1x256xf32> -> vector<1x256xf32>
    %392 = arith.addf %388, %391 : vector<1x256xf32>
    %393 = vector.extract_strided_slice %369 {offsets = [0, 51], sizes = [10, 256], strides = [1, 1]} : vector<10x324xf32> to vector<10x256xf32>
    %c0_171 = arith.constant 0 : index
    %c60_172 = arith.constant 60 : index
    %394 = vector.load %arg5[%c0_171, %c60_172] : memref<1x251xf32, #tpu.memory_space<vmem>>, vector<1x10xf32>
    %cst_173 = arith.constant dense<0.000000e+00> : vector<1x256xf32>
    %395 = tpu.matmul %394, %393, %cst_173 {dimension_numbers = #tpu.dot_dimension_numbers<[1], [0], [0], [1], [0, 0, 1, 1], [], []>} : vector<1x10xf32>, vector<10x256xf32>, vector<1x256xf32> -> vector<1x256xf32>
    %396 = arith.addf %392, %395 : vector<1x256xf32>
    %397 = vector.extract_strided_slice %369 {offsets = [0, 50], sizes = [10, 256], strides = [1, 1]} : vector<10x324xf32> to vector<10x256xf32>
    %c0_174 = arith.constant 0 : index
    %c70_175 = arith.constant 70 : index
    %398 = vector.load %arg5[%c0_174, %c70_175] : memref<1x251xf32, #tpu.memory_space<vmem>>, vector<1x10xf32>
    %cst_176 = arith.constant dense<0.000000e+00> : vector<1x256xf32>
    %399 = tpu.matmul %398, %397, %cst_176 {dimension_numbers = #tpu.dot_dimension_numbers<[1], [0], [0], [1], [0, 0, 1, 1], [], []>} : vector<1x10xf32>, vector<10x256xf32>, vector<1x256xf32> -> vector<1x256xf32>
    %400 = arith.addf %396, %399 : vector<1x256xf32>
    %401 = vector.extract_strided_slice %369 {offsets = [0, 49], sizes = [10, 256], strides = [1, 1]} : vector<10x324xf32> to vector<10x256xf32>
    %c0_177 = arith.constant 0 : index
    %c80_178 = arith.constant 80 : index
    %402 = vector.load %arg5[%c0_177, %c80_178] : memref<1x251xf32, #tpu.memory_space<vmem>>, vector<1x10xf32>
    %cst_179 = arith.constant dense<0.000000e+00> : vector<1x256xf32>
    %403 = tpu.matmul %402, %401, %cst_179 {dimension_numbers = #tpu.dot_dimension_numbers<[1], [0], [0], [1], [0, 0, 1, 1], [], []>} : vector<1x10xf32>, vector<10x256xf32>, vector<1x256xf32> -> vector<1x256xf32>
    %404 = arith.addf %400, %403 : vector<1x256xf32>
    %405 = vector.extract_strided_slice %369 {offsets = [0, 48], sizes = [10, 256], strides = [1, 1]} : vector<10x324xf32> to vector<10x256xf32>
    %c0_180 = arith.constant 0 : index
    %c90_181 = arith.constant 90 : index
    %406 = vector.load %arg5[%c0_180, %c90_181] : memref<1x251xf32, #tpu.memory_space<vmem>>, vector<1x10xf32>
    %cst_182 = arith.constant dense<0.000000e+00> : vector<1x256xf32>
    %407 = tpu.matmul %406, %405, %cst_182 {dimension_numbers = #tpu.dot_dimension_numbers<[1], [0], [0], [1], [0, 0, 1, 1], [], []>} : vector<1x10xf32>, vector<10x256xf32>, vector<1x256xf32> -> vector<1x256xf32>
    %408 = arith.addf %404, %407 : vector<1x256xf32>
    %409 = vector.extract_strided_slice %369 {offsets = [0, 36], sizes = [10, 256], strides = [1, 1]} : vector<10x324xf32> to vector<10x256xf32>
    %c0_183 = arith.constant 0 : index
    %c100_184 = arith.constant 100 : index
    %410 = vector.load %arg5[%c0_183, %c100_184] : memref<1x251xf32, #tpu.memory_space<vmem>>, vector<1x10xf32>
    %cst_185 = arith.constant dense<0.000000e+00> : vector<1x256xf32>
    %411 = tpu.matmul %410, %409, %cst_185 {dimension_numbers = #tpu.dot_dimension_numbers<[1], [0], [0], [1], [0, 0, 1, 1], [], []>} : vector<1x10xf32>, vector<10x256xf32>, vector<1x256xf32> -> vector<1x256xf32>
    %412 = arith.addf %408, %411 : vector<1x256xf32>
    %413 = vector.extract_strided_slice %369 {offsets = [0, 35], sizes = [10, 256], strides = [1, 1]} : vector<10x324xf32> to vector<10x256xf32>
    %c0_186 = arith.constant 0 : index
    %c110_187 = arith.constant 110 : index
    %414 = vector.load %arg5[%c0_186, %c110_187] : memref<1x251xf32, #tpu.memory_space<vmem>>, vector<1x10xf32>
    %cst_188 = arith.constant dense<0.000000e+00> : vector<1x256xf32>
    %415 = tpu.matmul %414, %413, %cst_188 {dimension_numbers = #tpu.dot_dimension_numbers<[1], [0], [0], [1], [0, 0, 1, 1], [], []>} : vector<1x10xf32>, vector<10x256xf32>, vector<1x256xf32> -> vector<1x256xf32>
    %416 = arith.addf %412, %415 : vector<1x256xf32>
    %417 = vector.extract_strided_slice %369 {offsets = [0, 34], sizes = [10, 256], strides = [1, 1]} : vector<10x324xf32> to vector<10x256xf32>
    %c0_189 = arith.constant 0 : index
    %c120_190 = arith.constant 120 : index
    %418 = vector.load %arg5[%c0_189, %c120_190] : memref<1x251xf32, #tpu.memory_space<vmem>>, vector<1x10xf32>
    %cst_191 = arith.constant dense<0.000000e+00> : vector<1x256xf32>
    %419 = tpu.matmul %418, %417, %cst_191 {dimension_numbers = #tpu.dot_dimension_numbers<[1], [0], [0], [1], [0, 0, 1, 1], [], []>} : vector<1x10xf32>, vector<10x256xf32>, vector<1x256xf32> -> vector<1x256xf32>
    %420 = arith.addf %416, %419 : vector<1x256xf32>
    %421 = vector.extract_strided_slice %369 {offsets = [0, 33], sizes = [10, 256], strides = [1, 1]} : vector<10x324xf32> to vector<10x256xf32>
    %c0_192 = arith.constant 0 : index
    %c130_193 = arith.constant 130 : index
    %422 = vector.load %arg5[%c0_192, %c130_193] : memref<1x251xf32, #tpu.memory_space<vmem>>, vector<1x10xf32>
    %cst_194 = arith.constant dense<0.000000e+00> : vector<1x256xf32>
    %423 = tpu.matmul %422, %421, %cst_194 {dimension_numbers = #tpu.dot_dimension_numbers<[1], [0], [0], [1], [0, 0, 1, 1], [], []>} : vector<1x10xf32>, vector<10x256xf32>, vector<1x256xf32> -> vector<1x256xf32>
    %424 = arith.addf %420, %423 : vector<1x256xf32>
    %425 = vector.extract_strided_slice %369 {offsets = [0, 32], sizes = [10, 256], strides = [1, 1]} : vector<10x324xf32> to vector<10x256xf32>
    %c0_195 = arith.constant 0 : index
    %c140_196 = arith.constant 140 : index
    %426 = vector.load %arg5[%c0_195, %c140_196] : memref<1x251xf32, #tpu.memory_space<vmem>>, vector<1x10xf32>
    %cst_197 = arith.constant dense<0.000000e+00> : vector<1x256xf32>
    %427 = tpu.matmul %426, %425, %cst_197 {dimension_numbers = #tpu.dot_dimension_numbers<[1], [0], [0], [1], [0, 0, 1, 1], [], []>} : vector<1x10xf32>, vector<10x256xf32>, vector<1x256xf32> -> vector<1x256xf32>
    %428 = arith.addf %424, %427 : vector<1x256xf32>
    %429 = vector.extract_strided_slice %369 {offsets = [0, 20], sizes = [10, 256], strides = [1, 1]} : vector<10x324xf32> to vector<10x256xf32>
    %c0_198 = arith.constant 0 : index
    %c150_199 = arith.constant 150 : index
    %430 = vector.load %arg5[%c0_198, %c150_199] : memref<1x251xf32, #tpu.memory_space<vmem>>, vector<1x10xf32>
    %cst_200 = arith.constant dense<0.000000e+00> : vector<1x256xf32>
    %431 = tpu.matmul %430, %429, %cst_200 {dimension_numbers = #tpu.dot_dimension_numbers<[1], [0], [0], [1], [0, 0, 1, 1], [], []>} : vector<1x10xf32>, vector<10x256xf32>, vector<1x256xf32> -> vector<1x256xf32>
    %432 = arith.addf %428, %431 : vector<1x256xf32>
    %433 = vector.extract_strided_slice %369 {offsets = [0, 19], sizes = [10, 256], strides = [1, 1]} : vector<10x324xf32> to vector<10x256xf32>
    %c0_201 = arith.constant 0 : index
    %c160_202 = arith.constant 160 : index
    %434 = vector.load %arg5[%c0_201, %c160_202] : memref<1x251xf32, #tpu.memory_space<vmem>>, vector<1x10xf32>
    %cst_203 = arith.constant dense<0.000000e+00> : vector<1x256xf32>
    %435 = tpu.matmul %434, %433, %cst_203 {dimension_numbers = #tpu.dot_dimension_numbers<[1], [0], [0], [1], [0, 0, 1, 1], [], []>} : vector<1x10xf32>, vector<10x256xf32>, vector<1x256xf32> -> vector<1x256xf32>
    %436 = arith.addf %432, %435 : vector<1x256xf32>
    %437 = vector.extract_strided_slice %369 {offsets = [0, 18], sizes = [10, 256], strides = [1, 1]} : vector<10x324xf32> to vector<10x256xf32>
    %c0_204 = arith.constant 0 : index
    %c170_205 = arith.constant 170 : index
    %438 = vector.load %arg5[%c0_204, %c170_205] : memref<1x251xf32, #tpu.memory_space<vmem>>, vector<1x10xf32>
    %cst_206 = arith.constant dense<0.000000e+00> : vector<1x256xf32>
    %439 = tpu.matmul %438, %437, %cst_206 {dimension_numbers = #tpu.dot_dimension_numbers<[1], [0], [0], [1], [0, 0, 1, 1], [], []>} : vector<1x10xf32>, vector<10x256xf32>, vector<1x256xf32> -> vector<1x256xf32>
    %440 = arith.addf %436, %439 : vector<1x256xf32>
    %441 = vector.extract_strided_slice %369 {offsets = [0, 17], sizes = [10, 256], strides = [1, 1]} : vector<10x324xf32> to vector<10x256xf32>
    %c0_207 = arith.constant 0 : index
    %c180_208 = arith.constant 180 : index
    %442 = vector.load %arg5[%c0_207, %c180_208] : memref<1x251xf32, #tpu.memory_space<vmem>>, vector<1x10xf32>
    %cst_209 = arith.constant dense<0.000000e+00> : vector<1x256xf32>
    %443 = tpu.matmul %442, %441, %cst_209 {dimension_numbers = #tpu.dot_dimension_numbers<[1], [0], [0], [1], [0, 0, 1, 1], [], []>} : vector<1x10xf32>, vector<10x256xf32>, vector<1x256xf32> -> vector<1x256xf32>
    %444 = arith.addf %440, %443 : vector<1x256xf32>
    %445 = vector.extract_strided_slice %369 {offsets = [0, 16], sizes = [10, 256], strides = [1, 1]} : vector<10x324xf32> to vector<10x256xf32>
    %c0_210 = arith.constant 0 : index
    %c190_211 = arith.constant 190 : index
    %446 = vector.load %arg5[%c0_210, %c190_211] : memref<1x251xf32, #tpu.memory_space<vmem>>, vector<1x10xf32>
    %cst_212 = arith.constant dense<0.000000e+00> : vector<1x256xf32>
    %447 = tpu.matmul %446, %445, %cst_212 {dimension_numbers = #tpu.dot_dimension_numbers<[1], [0], [0], [1], [0, 0, 1, 1], [], []>} : vector<1x10xf32>, vector<10x256xf32>, vector<1x256xf32> -> vector<1x256xf32>
    %448 = arith.addf %444, %447 : vector<1x256xf32>
    %449 = vector.extract_strided_slice %369 {offsets = [0, 4], sizes = [10, 256], strides = [1, 1]} : vector<10x324xf32> to vector<10x256xf32>
    %c0_213 = arith.constant 0 : index
    %c200_214 = arith.constant 200 : index
    %450 = vector.load %arg5[%c0_213, %c200_214] : memref<1x251xf32, #tpu.memory_space<vmem>>, vector<1x10xf32>
    %cst_215 = arith.constant dense<0.000000e+00> : vector<1x256xf32>
    %451 = tpu.matmul %450, %449, %cst_215 {dimension_numbers = #tpu.dot_dimension_numbers<[1], [0], [0], [1], [0, 0, 1, 1], [], []>} : vector<1x10xf32>, vector<10x256xf32>, vector<1x256xf32> -> vector<1x256xf32>
    %452 = arith.addf %448, %451 : vector<1x256xf32>
    %453 = vector.extract_strided_slice %369 {offsets = [0, 3], sizes = [10, 256], strides = [1, 1]} : vector<10x324xf32> to vector<10x256xf32>
    %c0_216 = arith.constant 0 : index
    %c210_217 = arith.constant 210 : index
    %454 = vector.load %arg5[%c0_216, %c210_217] : memref<1x251xf32, #tpu.memory_space<vmem>>, vector<1x10xf32>
    %cst_218 = arith.constant dense<0.000000e+00> : vector<1x256xf32>
    %455 = tpu.matmul %454, %453, %cst_218 {dimension_numbers = #tpu.dot_dimension_numbers<[1], [0], [0], [1], [0, 0, 1, 1], [], []>} : vector<1x10xf32>, vector<10x256xf32>, vector<1x256xf32> -> vector<1x256xf32>
    %456 = arith.addf %452, %455 : vector<1x256xf32>
    %457 = vector.extract_strided_slice %369 {offsets = [0, 2], sizes = [10, 256], strides = [1, 1]} : vector<10x324xf32> to vector<10x256xf32>
    %c0_219 = arith.constant 0 : index
    %c220_220 = arith.constant 220 : index
    %458 = vector.load %arg5[%c0_219, %c220_220] : memref<1x251xf32, #tpu.memory_space<vmem>>, vector<1x10xf32>
    %cst_221 = arith.constant dense<0.000000e+00> : vector<1x256xf32>
    %459 = tpu.matmul %458, %457, %cst_221 {dimension_numbers = #tpu.dot_dimension_numbers<[1], [0], [0], [1], [0, 0, 1, 1], [], []>} : vector<1x10xf32>, vector<10x256xf32>, vector<1x256xf32> -> vector<1x256xf32>
    %460 = arith.addf %456, %459 : vector<1x256xf32>
    %461 = vector.extract_strided_slice %369 {offsets = [0, 1], sizes = [10, 256], strides = [1, 1]} : vector<10x324xf32> to vector<10x256xf32>
    %c0_222 = arith.constant 0 : index
    %c230_223 = arith.constant 230 : index
    %462 = vector.load %arg5[%c0_222, %c230_223] : memref<1x251xf32, #tpu.memory_space<vmem>>, vector<1x10xf32>
    %cst_224 = arith.constant dense<0.000000e+00> : vector<1x256xf32>
    %463 = tpu.matmul %462, %461, %cst_224 {dimension_numbers = #tpu.dot_dimension_numbers<[1], [0], [0], [1], [0, 0, 1, 1], [], []>} : vector<1x10xf32>, vector<10x256xf32>, vector<1x256xf32> -> vector<1x256xf32>
    %464 = arith.addf %460, %463 : vector<1x256xf32>
    %465 = vector.extract_strided_slice %369 {offsets = [0, 0], sizes = [10, 256], strides = [1, 1]} : vector<10x324xf32> to vector<10x256xf32>
    %c0_225 = arith.constant 0 : index
    %c240_226 = arith.constant 240 : index
    %466 = vector.load %arg5[%c0_225, %c240_226] : memref<1x251xf32, #tpu.memory_space<vmem>>, vector<1x10xf32>
    %cst_227 = arith.constant dense<0.000000e+00> : vector<1x256xf32>
    %467 = tpu.matmul %466, %465, %cst_227 {dimension_numbers = #tpu.dot_dimension_numbers<[1], [0], [0], [1], [0, 0, 1, 1], [], []>} : vector<1x10xf32>, vector<10x256xf32>, vector<1x256xf32> -> vector<1x256xf32>
    %468 = arith.addf %464, %467 : vector<1x256xf32>
    %c0_228 = arith.constant 0 : index
    %c250_229 = arith.constant 250 : index
    %469 = vector.load %arg5[%c0_228, %c250_229] : memref<1x251xf32, #tpu.memory_space<vmem>>, vector<1x1xf32>
    %470 = vector.broadcast %469 : vector<1x1xf32> to vector<1x256xf32>
    %471 = arith.addf %468, %470 : vector<1x256xf32>
    %cst_230 = arith.constant 0.000000e+00 : f32
    %472 = vector.broadcast %cst_230 : f32 to vector<1x256xf32>
    %473 = arith.maximumf %471, %472 : vector<1x256xf32>
    %c0_231 = arith.constant 0 : index
    %c0_232 = arith.constant 0 : index
    %c0_233 = arith.constant 0 : index
    %474 = vector.load %arg7[%c0_231, %c0_232, %c0_233] : memref<1x1x256xf32, #tpu.memory_space<vmem>>, vector<1x1x256xf32>
    %475 = vector.shape_cast %474 : vector<1x1x256xf32> to vector<1x256xf32>
    %476 = vector.shape_cast %473 : vector<1x256xf32> to vector<1x1x256xf32>
    tpu.vector_store %arg7[%c0_231, %c0_232, %c0_233], %476 {strides = array<i32>} : memref<1x1x256xf32, #tpu.memory_space<vmem>>, vector<1x1x256xf32>,
    return
  }
  func.func @transform_0(%arg0: i32) -> (i32, i32, i32) {
    %c0_i32 = arith.constant 0 : i32
    %c0_i32_0 = arith.constant 0 : i32
    %c0_i32_1 = arith.constant 0 : i32
    return %arg0, %c0_i32, %c0_i32_0 : i32, i32, i32
  }
  func.func @transform_1(%arg0: i32) -> (i32, i32) {
    %c0_i32 = arith.constant 0 : i32
    %c0_i32_0 = arith.constant 0 : i32
    %c0_i32_1 = arith.constant 0 : i32
    return %c0_i32, %c0_i32_0 : i32, i32
  }
  func.func @transform_2(%arg0: i32) -> (i32, i32) {
    %c0_i32 = arith.constant 0 : i32
    %c0_i32_0 = arith.constant 0 : i32
    %c0_i32_1 = arith.constant 0 : i32
    return %c0_i32, %c0_i32_0 : i32, i32
  }
  func.func @transform_3(%arg0: i32) -> (i32, i32) {
    %c0_i32 = arith.constant 0 : i32
    %c0_i32_0 = arith.constant 0 : i32
    %c0_i32_1 = arith.constant 0 : i32
    return %c0_i32, %c0_i32_0 : i32, i32
  }
  func.func @transform_4(%arg0: i32) -> (i32, i32) {
    %c0_i32 = arith.constant 0 : i32
    %c0_i32_0 = arith.constant 0 : i32
    %c0_i32_1 = arith.constant 0 : i32
    return %c0_i32, %c0_i32_0 : i32, i32
  }
  func.func @transform_5(%arg0: i32) -> (i32, i32) {
    %c0_i32 = arith.constant 0 : i32
    %c0_i32_0 = arith.constant 0 : i32
    %c0_i32_1 = arith.constant 0 : i32
    return %c0_i32, %c0_i32_0 : i32, i32
  }
  func.func @transform_6(%arg0: i32) -> (i32, i32, i32) {
    %c0_i32 = arith.constant 0 : i32
    %c0_i32_0 = arith.constant 0 : i32
    %c0_i32_1 = arith.constant 0 : i32
    return %arg0, %c0_i32, %c0_i32_0 : i32, i32, i32
  }
}

</mosaic_0001>

<bundles_post_ra>
// kernel: autoencoder_forward.1
= control target key start
LH: loop header
LB: loop body
LE: loop exit
PB: predicated region body
PF: predicated region fallthrough
CT: control target
= control target key end

     0   :  { %s23235_s0 = inlined_call_operand.vmem [shape: f32[2,1,528], index: 0, kind: input, shape index: {}]   ;;  %s23236_s1 = inlined_call_operand.hbm [shape: f32[10,26], index: 1, kind: input, shape index: {}]   ;;  %s23237_s2 = inlined_call_operand.hbm [shape: f32[20,251], index: 2, kind: input, shape index: {}]   ;;  %s23238_s3 = inlined_call_operand.vmem [shape: f32[10,501], index: 3, kind: input, shape index: {}]   ;;  %s23239_s4 = inlined_call_operand.vmem [shape: f32[1,251], index: 4, kind: input, shape index: {}]   ;;  %s23240_s5 = inlined_call_operand.vmem [shape: f32[2,392], index: 5, kind: input, shape index: {}]   ;;  %s23241_s6 = inlined_call_operand.vmem [shape: f32[2,1,256], index: 6, kind: output, shape index: {}]  }
   0x1   :  { %23433 = sst [smem:[#allocation123_spill]] %s23235_s0 }
   0x2   :  { %23434 = sst [smem:[#allocation124_spill]] %s23236_s1 }
   0x3   :  { %23435 = sst [smem:[#allocation125_spill]] %s23237_s2 }
   0x4   :  { %11 = vsyncpa [#allocation3], 0 }
   0x5   :  { %12 = vsyncpa [#allocation5], 0  ;;  %s18896_s21 = smov 0  }
   0x6 LB: > { %s18773_s22 = smov [#allocation2]   ;;  %s18902_s24 = sadd.s32 4294967295, %s18771_s21   ;;  %s18771_s21 = sphi %s18896_s21, %s18_s21  }
   0x7   : > { %s192_s23 = sshll.u32 %s18773_s22, 4  ;;  %p15311_p0 = scmp.ge.s32.totalorder %s18771_s21, 1  ;;  %s193_s23 = int_to_ptr.vmem [resolvable:$true] %s192_s23 }
   0x8   : > { %p180_p1 = scmp.lt.s32.totalorder %s18771_s21, 3  ;;  %p23242_p3 = scmp.eq.s32.totalorder %s18902_s24, 0 }
   0x9   : > { %s18774_s26 = smov [#allocation4]   ;;  %s23438_s1 = sld [smem:[#allocation124_spill]] }
   0xa   : > { %p18906_p2 = pnand %p15311_p0, %p180_p1  ;;  %s205_s27 = sshll.u32 %s18774_s26, 4  ;;  %s18919_s27 = int_to_ptr.vmem [resolvable:$true] %s205_s27 }
   0xc   : > { %s23436_s25 = scalar_select %p18906_p2, 1, 0 }
   0xd   : > { %p17311_p4 = pneg %p18906_p2 }
   0xf   : > { %p18915_p5 = pnand %p23242_p3, %p17311_p4  ;;  %s18701_s7 = scalar_lea.hbm %s23438_s1, 256 }
  0x10   : > { %p18702_p6 = scmp.ne.s32.totalorder %s23438_s1, %s18701_s7  ;;  %p18708_p10 = scmp.lt.u32.totalorder %s18701_s7, %s23438_s1 }
  0x11   : > { %p18703_p7 = pneg %p18915_p5 }
  0x13   : > { %p18704_p8 = pnand %p18703_p7, %p18702_p6 }
  0x15   : > { %p18705_p9 = pneg %p18704_p8 }
  0x17   : > { %p18710_p11 = pnand %p18708_p10, %p18705_p9 }
  0x19   : > { %18713 = shalt.err (!%p18710_p11)
}
  0x1a   : > { %s18714_s12 = scalar_lea.vmem %s193_s23, 256  ;;  %p18722_p1 = scmp.lt.s32.totalorder %s193_s23, %s193_s23 }
  0x1b   : > { %p18715_p12 = scmp.ne.s32.totalorder %s193_s23, %s18714_s12  ;;  %p18723_p4 = scmp.lt.s32.totalorder %s18714_s12, %s18714_s12 }
  0x1d   : > { %p18717_p13 = pnand %p18715_p12, %p18703_p7  ;;  %p18724_p3 = por %p18723_p4, %p18722_p1 }
  0x1f   : > { %p18718_p0 = pneg %p18717_p13 }
  0x21   : > { %p18725_p2 = pnand %p18724_p3, %p18718_p0 }
  0x23   : > { %18728 = shalt.err (!%p18725_p2)
}
  0x24   : > { %s18775_s13 = smov 128   ;;  %s18776_s14 = smov 8  }
  0x25   : > { %17314 = dma.hbm_to_vmem [thread:$0]  (!%p18915_p5), %s23438_s1, 256, %s193_s23, [#allocation3], %s18775_s13, %s18775_s13, %s18776_s14  }
  0x26   : > { %s23439_s2 = sld [smem:[#allocation125_spill]] }
  0x2c   : > { %s18729_s19 = scalar_lea.hbm %s23439_s2, 768 }
  0x2d   : > { %p18730_p6 = scmp.ne.s32.totalorder %s23439_s2, %s18729_s19  ;;  %p18736_p8 = scmp.lt.u32.totalorder %s18729_s19, %s23439_s2 }
  0x2f   : > { %p18732_p2 = pnand %p18730_p6, %p18703_p7 }
  0x31   : > { %p18733_p3 = pneg %p18732_p2 }
  0x33   : > { %p18738_p9 = pnand %p18736_p8, %p18733_p3 }
  0x35   : > { %18741 = shalt.err (!%p18738_p9)
}
  0x36   : > { %s18742_s23 = scalar_lea.vmem %s18919_s27, 768  ;;  %p18750_p13 = scmp.lt.s32.totalorder %s18919_s27, %s18919_s27 }
  0x37   : > { %p18743_p10 = scmp.ne.s32.totalorder %s18919_s27, %s18742_s23  ;;  %p18751_p0 = scmp.lt.s32.totalorder %s18742_s23, %s18742_s23 }
  0x39   : > { %p18745_p11 = pnand %p18743_p10, %p18703_p7  ;;  %p18752_p1 = por %p18751_p0, %p18750_p13 }
  0x3b   : > { %p18746_p12 = pneg %p18745_p11 }
  0x3d   : > { %p18753_p4 = pnand %p18752_p1, %p18746_p12 }
  0x3f   : > { %18756 = shalt.err (!%p18753_p4)
}
  0x40   : > { %s18777_s30 = smov 256   ;;  %s18778_s7 = smov 16  }
  0x41   : > { %17317 = dma.hbm_to_vmem [thread:$0]  (!%p18915_p5), %s23439_s2, 768, %s18919_s27, [#allocation5], %s18777_s30, %s18777_s30, %s18778_s7  }
  0x42   : > { %p23440_p6 = scmp.ne.s32.totalorder %s23436_s25, 0 }
  0x44   : > { %237 = sbr.rel (%p23440_p6) target bundleno = 4002 (0xfa2), region = 44 }
  0x4b   : > { %p23441_p7 = scmp.eq.s32.totalorder %s18902_s24, 0 }
  0x4d   : > { %18762 = dma.done.wait (%p23441_p7), [#allocation3], 256   ;;  %p23442_p2 = pmov %p23441_p7 }
  0x4f   : > { %18764 = vsyncadd (%p23442_p2), [#allocation3], 4294967040  ;;  %p23443_p3 = pmov %p23442_p2 }
  0x50   : > { %p23444_p8 = pmov %p23442_p2 }
  0x51   : > { %18766 = dma.done.wait (%p23443_p3), [#allocation5], 768  }
  0x52   : > { %18768 = vsyncadd (%p23444_p8), [#allocation5], 4294966528  ;;  %v18779_v0 = vmov 1   ;;  %v18780_v1 = vmov 0   ;;  %v18978_v2 = vld [vmem:[#allocation2] sm:$0xff]  ;;  %v18781_v4 = vmov 2   ;;  %v23244_v10 = vlaneseq }
  0x53   : > { %17419 = vset.pattern.permute.xlu1 %v18779_v0  ;;  %17418 = vset.pattern.permute.xlu0 %v18780_v1  ;;  %v18982_v3 = vld [vmem:[#allocation2 + $0x8] sm:$0x3]  ;;  %v18782_v5 = vmov 3   ;;  %v18783_v6 = vmov 4   ;;  %v18784_v7 = vmov 5   ;;  %v18785_v8 = vmov 6  }
  0x54   : > { %320 = vperm.xlu1 %17419, %v18978_v2   ;;  %282 = vperm.xlu0 %17418, %v18978_v2   ;;  %v18786_v9 = vmov 7   ;;  %p269_p5 = scmp.lt.s32.totalorder %s18902_s24, 1  ;;  %v19003_v11 = vshrl.u32 %v23244_v10, 7  ;;  %s23446_s0 = sld [smem:[#allocation123_spill]]  ;;  %vm23377_vm0 = vcmask 1039360   ;;  %vm23378_vm1 = vcmask 1031168  }
  0x55   : > { %s23353_s11 = smov 127   ;;  %s23370_s12 = smov 126   ;;  %vm23379_vm2 = vcmask 1022976   ;;  %vm23386_vm3 = vcmask 1014784   ;;  %vm23387_vm4 = vcmask 916480   ;;  %vm23388_vm5 = vcmask 908288  }
  0x56   : > { %s24006_s24 = smov (!%p269_p5, %s18902_s24), 1  ;;  %23445 = vst [vmem:[#allocation8_spill] sm:$0xff] %v19003_v11  ;;  %v19011_v12 = vsub.s32 1, %v19003_v11  ;;  %v19014_v13 = vsub.s32 0, %v19003_v11  ;;  %v23245_v17 = vsub.s32 3, %v19003_v11  ;;  %v19025_v18 = vsub.s32 2, %v19003_v11 }
  0x57   : > { %s17302_s25 = smul.u32 5, %s24006_s24  ;;  %s23356_s13 = smov 125   ;;  %vm23411_vm6 = vcmask 900096   ;;  %vm800_vm7 = vcmask 891904   ;;  %vm863_vm8 = vcmask 883712   ;;  %vm23348_vm9 = vcmask 785408  }
  0x58   : > { %324 = vperm.xlu1 %17419, %v18982_v3   ;;  %287 = vperm.xlu0 %17418, %v18982_v3   ;;  %23447 = vst [vmem:[#allocation9_spill] sm:$0xff] %v19011_v12  ;;  %23448 = vst [vmem:[#allocation10_spill] sm:$0xff] %v19014_v13  ;;  %s23375_s14 = smov 124   ;;  %s23359_s15 = smov 112   ;;  %vm23347_vm10 = vcmask 777216   ;;  %vm23346_vm11 = vcmask 769024  }
  0x59   : > { %23449 = vst [vmem:[#allocation11_spill] sm:$0xff] %v19025_v18  ;;  %s23364_s16 = smov 111   ;;  %s23368_s17 = smov 110   ;;  %vm23345_vm12 = vcmask 760832   ;;  %vm23344_vm13 = vcmask 752640   ;;  %vm23343_vm14 = vcmask 654336  }
  0x5a   : > { %s19008_s10 = scalar_lea.vmem %s23446_s0, %s17302_s25  ;;  %s23372_s18 = smov 109   ;;  %vm23349_vm15 = vcmask 646144  }
  0x5b   : > { %v277_v14 = vld [vmem:[%s19008_s10] sm:$0x1f]  ;;  %s23425_s19 = smov 108   ;;  %s23401_s20 = smov 96  }
  0x5c   : > { %17420 = vset.pattern.permute.xlu0 %v18781_v4  ;;  %17421 = vset.pattern.permute.xlu1 %v18781_v4  ;;  %v19018_v15 = vrot.slane %v277_v14, %v19011_v12  ;;  %v19021_v16 = vrot.slane %v277_v14, %v19014_v13  ;;  %v19031_v22 = vrot.slane %v277_v14, %v23245_v17  ;;  %s23380_s22 = smov 95   ;;  %s23383_s26 = smov 94  }
  0x5d   : > { %383 = vperm.xlu0 %17420, %v18978_v2   ;;  %387 = vperm.xlu1 %17421, %v18982_v3   ;;  %v19034_v23 = vrot.slane %v277_v14, %v19025_v18  ;;  %s23397_s29 = smov 93   ;;  %s23399_s23 = smov 92  }
  0x5e   : > { %s23403_s30 = smov 80   ;;  %s23322_s7 = smov 79  }
  0x5f   : > { %s23418_s8 = smov 78   ;;  %s23313_s9 = smov 77  }
  0x60   : > { %s23309_s25 = smov 76   ;;  %s23421_s27 = smov 64  }
  0x61   : > { %17422 = vset.pattern.permute.xlu1 %v18782_v5  ;;  %17423 = vset.pattern.permute.xlu0 %v18782_v5  ;;  %s23423_s28 = smov 63   ;;  %s18858_s0 = smov 32  }
  0x62   : > { %446 = vperm.xlu1 %17422, %v18978_v2   ;;  %450 = vperm.xlu0 %17423, %v18982_v3   ;;  %s23887_s1 = smov 62   ;;  %s23891_s2 = smov 64  }
  0x66   : > { %17424 = vset.pattern.permute.xlu0 %v18783_v6  ;;  %17425 = vset.pattern.permute.xlu1 %v18783_v6 }
  0x67   : > { %509 = vperm.xlu0 %17424, %v18978_v2   ;;  %513 = vperm.xlu1 %17425, %v18982_v3  }
  0x6b   : > { %17426 = vset.pattern.permute.xlu1 %v18784_v7  ;;  %17427 = vset.pattern.permute.xlu0 %v18784_v7 }
  0x6c   : > { %572 = vperm.xlu1 %17426, %v18978_v2   ;;  %576 = vperm.xlu0 %17427, %v18982_v3  }
  0x70   : > { %17428 = vset.pattern.permute.xlu0 %v18785_v8  ;;  %17429 = vset.pattern.permute.xlu1 %v18785_v8 }
  0x71   : > { %635 = vperm.xlu0 %17428, %v18978_v2   ;;  %639 = vperm.xlu1 %17429, %v18982_v3  }
  0x75   : > { %17430 = vset.pattern.permute.xlu1 %v18786_v9  ;;  %17431 = vset.pattern.permute.xlu0 %v18786_v9 }
  0x76   : > { %698 = vperm.xlu1 %17430, %v18978_v2  }
  0xd3   : > { %v321_v19 = vpop.permute.xlu1 %320  ;;  %v19036_v24 = vpop.permute.xlu0 %282 }
  0xd4   : > { %v328_v20 = vmul.f32 %v321_v19, %v19018_v15  ;;  %v327_v21 = vmul.f32 %v321_v19, %v19021_v16  ;;  %v330_v25 = vmul.f32 %v321_v19, %v19031_v22  ;;  %v329_v26 = vmul.f32 %v321_v19, %v19034_v23 }
  0xd6   : > { %345 = vrot.lane.b32.xlu1 %v328_v20, %s23353_s11  ;;  %343 = vrot.lane.b32.xlu0 %v327_v21, %s23353_s11 }
  0xd7   : > { %v325_v27 = vpop.permute.xlu1 %324  ;;  %v19044_v28 = vpop.permute.xlu0 %287 }
  0xd8   : > { %v332_v29 = vmul.f32 %v325_v27, %v19018_v15  ;;  %v331_v30 = vmul.f32 %v325_v27, %v19021_v16  ;;  %v334_v32 = vmul.f32 %v325_v27, %v19031_v22  ;;  %v333_v33 = vmul.f32 %v325_v27, %v19034_v23 }
  0xda   : > { %349 = vrot.lane.b32.xlu1 %v330_v25, %s23353_s11  ;;  %347 = vrot.lane.b32.xlu0 %v329_v26, %s23353_s11 }
  0xdc   : > { %v384_v31 = vpop.permute.xlu0 %383  ;;  %v388_v36 = vpop.permute.xlu1 %387 }
  0xdd   : > { %v390_v34 = vmul.f32 %v384_v31, %v19021_v16  ;;  %v391_v35 = vmul.f32 %v384_v31, %v19018_v15  ;;  %v392_v37 = vmul.f32 %v384_v31, %v19034_v23  ;;  %v393_v38 = vmul.f32 %v384_v31, %v19031_v22 }
  0xde   : > { %353 = vrot.lane.b32.xlu1 %v332_v29, %s23353_s11  ;;  %351 = vrot.lane.b32.xlu0 %v331_v30, %s23353_s11  ;;  %v394_v39 = vmul.f32 %v388_v36, %v19021_v16  ;;  %v395_v40 = vmul.f32 %v388_v36, %v19018_v15  ;;  %v396_v42 = vmul.f32 %v388_v36, %v19034_v23 }
  0xdf   : > { %v397_v43 = vmul.f32 %v388_v36, %v19031_v22 }
  0xe1   : > { %v447_v41 = vpop.permute.xlu1 %446  ;;  %v451_v46 = vpop.permute.xlu0 %450 }
  0xe2   : > { %357 = vrot.lane.b32.xlu1 %v334_v32, %s23353_s11  ;;  %355 = vrot.lane.b32.xlu0 %v333_v33, %s23353_s11  ;;  %v453_v44 = vmul.f32 %v447_v41, %v19021_v16  ;;  %v455_v45 = vmul.f32 %v447_v41, %v19034_v23  ;;  %v457_v47 = vmul.f32 %v451_v46, %v19021_v16 }
  0xe3   : > { %v454_v48 = vmul.f32 %v447_v41, %v19018_v15  ;;  %v456_v50 = vmul.f32 %v447_v41, %v19031_v22  ;;  %v459_v51 = vmul.f32 %v451_v46, %v19034_v23  ;;  %v458_v53 = vmul.f32 %v451_v46, %v19018_v15 }
  0xe4   : > { %v460_v55 = vmul.f32 %v451_v46, %v19031_v22 }
  0xe6   : > { %406 = vrot.lane.b32.xlu1 %v390_v34, %s23370_s12  ;;  %408 = vrot.lane.b32.xlu0 %v391_v35, %s23370_s12  ;;  %v510_v49 = vpop.permute.xlu0 %509  ;;  %v514_v54 = vpop.permute.xlu1 %513  ;;  %v18794_v34 = vmov 8  }
  0xe7   : > { %v517_v52 = vmul.f32 %v510_v49, %v19018_v15  ;;  %v519_v56 = vmul.f32 %v510_v49, %v19031_v22  ;;  %v521_v57 = vmul.f32 %v514_v54, %v19018_v15  ;;  %v516_v58 = vmul.f32 %v510_v49, %v19021_v16  ;;  %17433 = vset.pattern.permute.xlu1 %v18794_v34 }
  0xe8   : > { %v518_v60 = vmul.f32 %v510_v49, %v19034_v23  ;;  %v523_v61 = vmul.f32 %v514_v54, %v19031_v22  ;;  %v520_v0 = vmul.f32 %v514_v54, %v19021_v16  ;;  %v522_v4 = vmul.f32 %v514_v54, %v19034_v23 }
  0xea   : > { %410 = vrot.lane.b32.xlu1 %v392_v37, %s23370_s12  ;;  %412 = vrot.lane.b32.xlu0 %v393_v38, %s23370_s12 }
  0xeb   : > { %v573_v59 = vpop.permute.xlu1 %572  ;;  %v577_v63 = vpop.permute.xlu0 %576 }
  0xec   : > { %v581_v62 = vmul.f32 %v573_v59, %v19034_v23  ;;  %v583_v1 = vmul.f32 %v577_v63, %v19021_v16  ;;  %v579_v6 = vmul.f32 %v573_v59, %v19021_v16  ;;  %v585_v7 = vmul.f32 %v577_v63, %v19034_v23 }
  0xed   : > { %v580_v9 = vmul.f32 %v573_v59, %v19018_v15  ;;  %v582_v19 = vmul.f32 %v573_v59, %v19031_v22  ;;  %v584_v25 = vmul.f32 %v577_v63, %v19018_v15  ;;  %v586_v26 = vmul.f32 %v577_v63, %v19031_v22 }
  0xee   : > { %414 = vrot.lane.b32.xlu1 %v394_v39, %s23370_s12  ;;  %416 = vrot.lane.b32.xlu0 %v395_v40, %s23370_s12 }
  0xf0   : > { %v636_v5 = vpop.permute.xlu0 %635  ;;  %v640_v14 = vpop.permute.xlu1 %639 }
  0xf1   : > { %v643_v8 = vmul.f32 %v636_v5, %v19018_v15  ;;  %v645_v20 = vmul.f32 %v636_v5, %v19031_v22  ;;  %v647_v21 = vmul.f32 %v640_v14, %v19018_v15  ;;  %v649_v27 = vmul.f32 %v640_v14, %v19031_v22 }
  0xf2   : > { %418 = vrot.lane.b32.xlu1 %v396_v42, %s23370_s12  ;;  %420 = vrot.lane.b32.xlu0 %v397_v43, %s23370_s12  ;;  %v642_v29 = vmul.f32 %v636_v5, %v19021_v16  ;;  %v644_v32 = vmul.f32 %v636_v5, %v19034_v23  ;;  %v646_v33 = vmul.f32 %v640_v14, %v19021_v16 }
  0xf3   : > { %v648_v35 = vmul.f32 %v640_v14, %v19034_v23 }
  0xf5   : > { %v699_v30 = vpop.permute.xlu1 %698 }
  0xf6   : > { %469 = vrot.lane.b32.xlu1 %v453_v44, %s23356_s13  ;;  %473 = vrot.lane.b32.xlu0 %v455_v45, %s23356_s13  ;;  %v707_v31 = vmul.f32 %v699_v30, %v19034_v23  ;;  %v705_v36 = vmul.f32 %v699_v30, %v19021_v16  ;;  %v706_v37 = vmul.f32 %v699_v30, %v19018_v15 }
  0xf7   : > { %v708_v38 = vmul.f32 %v699_v30, %v19031_v22 }
  0xfa   : > { %471 = vrot.lane.b32.xlu1 %v454_v48, %s23356_s13  ;;  %477 = vrot.lane.b32.xlu0 %v457_v47, %s23356_s13 }
  0xfe   : > { %475 = vrot.lane.b32.xlu1 %v456_v50, %s23356_s13  ;;  %481 = vrot.lane.b32.xlu0 %v459_v51, %s23356_s13 }
 0x102   : > { %479 = vrot.lane.b32.xlu1 %v458_v53, %s23356_s13  ;;  %534 = vrot.lane.b32.xlu0 %v517_v52, %s23375_s14 }
 0x106   : > { %483 = vrot.lane.b32.xlu1 %v460_v55, %s23356_s13  ;;  %538 = vrot.lane.b32.xlu0 %v519_v56, %s23375_s14 }
 0x10a   : > { %532 = vrot.lane.b32.xlu1 %v516_v58, %s23375_s14  ;;  %542 = vrot.lane.b32.xlu0 %v521_v57, %s23375_s14 }
 0x10e   : > { %536 = vrot.lane.b32.xlu1 %v518_v60, %s23375_s14  ;;  %546 = vrot.lane.b32.xlu0 %v523_v61, %s23375_s14 }
 0x112   : > { %540 = vrot.lane.b32.xlu1 %v520_v0, %s23375_s14  ;;  %599 = vrot.lane.b32.xlu0 %v581_v62, %s23359_s15 }
 0x116   : > { %544 = vrot.lane.b32.xlu1 %v522_v4, %s23375_s14  ;;  %603 = vrot.lane.b32.xlu0 %v583_v1, %s23359_s15 }
 0x11a   : > { %595 = vrot.lane.b32.xlu1 %v579_v6, %s23359_s15  ;;  %607 = vrot.lane.b32.xlu0 %v585_v7, %s23359_s15 }
 0x11e   : > { %597 = vrot.lane.b32.xlu1 %v580_v9, %s23359_s15  ;;  %660 = vrot.lane.b32.xlu0 %v643_v8, %s23364_s16 }
 0x122   : > { %601 = vrot.lane.b32.xlu1 %v582_v19, %s23359_s15  ;;  %664 = vrot.lane.b32.xlu0 %v645_v20, %s23364_s16 }
 0x126   : > { %605 = vrot.lane.b32.xlu1 %v584_v25, %s23359_s15  ;;  %668 = vrot.lane.b32.xlu0 %v647_v21, %s23364_s16 }
 0x12a   : > { %609 = vrot.lane.b32.xlu1 %v586_v26, %s23359_s15  ;;  %672 = vrot.lane.b32.xlu0 %v649_v27, %s23364_s16  ;;  %v18795_v27 = vmov 9  }
 0x12e   : > { %658 = vrot.lane.b32.xlu1 %v642_v29, %s23364_s16  ;;  %702 = vperm.xlu0 %17431, %v18982_v3  }
 0x132   : > { %662 = vrot.lane.b32.xlu1 %v644_v32, %s23364_s16  ;;  %725 = vrot.lane.b32.xlu0 %v707_v31, %s23368_s17 }
 0x133   : > { %17432 = vset.pattern.permute.xlu0 %v18794_v34 }
 0x136   : > { %666 = vrot.lane.b32.xlu1 %v646_v33, %s23364_s16 }
 0x13a   : > { %670 = vrot.lane.b32.xlu1 %v648_v35, %s23364_s16 }
 0x13e   : > { %721 = vrot.lane.b32.xlu1 %v705_v36, %s23368_s17 }
 0x142   : > { %723 = vrot.lane.b32.xlu1 %v706_v37, %s23368_s17 }
 0x146   : > { %727 = vrot.lane.b32.xlu1 %v708_v38, %s23368_s17 }
 0x148   : > { %v19143_v39 = vpop.permute.xlu0 %343  ;;  %v19173_v54 = vpop.permute.xlu1 %345 }
 0x14c   : > { %v19145_v40 = vpop.permute.xlu0 %347  ;;  %v19177_v56 = vpop.permute.xlu1 %349 }
 0x150   : > { %v19147_v41 = vpop.permute.xlu0 %351  ;;  %v19181_v58 = vpop.permute.xlu1 %353 }
 0x154   : > { %v19149_v42 = vpop.permute.xlu0 %355  ;;  %v19185_v60 = vpop.permute.xlu1 %357 }
 0x158   : > { %v19151_v43 = vpop.permute.xlu0 %408  ;;  %v19189_v62 = vpop.permute.xlu1 %406 }
 0x15c   : > { %v19153_v44 = vpop.permute.xlu0 %412  ;;  %v19193_v0 = vpop.permute.xlu1 %410 }
 0x160   : > { %v19155_v45 = vpop.permute.xlu0 %416  ;;  %v19197_v4 = vpop.permute.xlu1 %414 }
 0x164   : > { %v19157_v46 = vpop.permute.xlu0 %420  ;;  %v19203_v9 = vpop.permute.xlu1 %418 }
 0x168   : > { %v19159_v47 = vpop.permute.xlu0 %473  ;;  %v19211_v20 = vpop.permute.xlu1 %469 }
 0x16c   : > { %v19161_v48 = vpop.permute.xlu0 %477  ;;  %v19215_v21 = vpop.permute.xlu1 %471 }
 0x170   : > { %v19163_v49 = vpop.permute.xlu0 %481  ;;  %v19217_v25 = vpop.permute.xlu1 %475 }
 0x174   : > { %v19165_v50 = vpop.permute.xlu0 %534  ;;  %v19219_v26 = vpop.permute.xlu1 %479 }
 0x178   : > { %v19167_v51 = vpop.permute.xlu0 %538  ;;  %v19221_v29 = vpop.permute.xlu1 %483 }
 0x17c   : > { %v19169_v52 = vpop.permute.xlu0 %542  ;;  %v19223_v30 = vpop.permute.xlu1 %532 }
 0x180   : > { %v19171_v53 = vpop.permute.xlu0 %546  ;;  %v19225_v31 = vpop.permute.xlu1 %536 }
 0x184   : > { %v19175_v55 = vpop.permute.xlu0 %599  ;;  %v19227_v32 = vpop.permute.xlu1 %540 }
 0x188   : > { %v19179_v57 = vpop.permute.xlu0 %603  ;;  %v19229_v33 = vpop.permute.xlu1 %544 }
 0x18c   : > { %v19183_v59 = vpop.permute.xlu0 %607  ;;  %v19231_v34 = vpop.permute.xlu1 %595 }
 0x18d   : > { %23450 = vst [vmem:[#allocation12_spill] sm:$0xff] %v19183_v59 }
 0x190   : > { %v19187_v61 = vpop.permute.xlu0 %660  ;;  %v19233_v35 = vpop.permute.xlu1 %597 }
 0x191   : > { %23451 = vst [vmem:[#allocation13_spill] sm:$0xff] %v19187_v61 }
 0x194   : > { %v19191_v63 = vpop.permute.xlu0 %664  ;;  %v19235_v36 = vpop.permute.xlu1 %601 }
 0x195   : > { %23452 = vst [vmem:[#allocation14_spill] sm:$0xff] %v19191_v63 }
 0x198   : > { %v19195_v1 = vpop.permute.xlu0 %668  ;;  %v19237_v37 = vpop.permute.xlu1 %605 }
 0x199   : > { %23453 = vst [vmem:[#allocation15_spill] sm:$0xff] %v19195_v1 }
 0x19c   : > { %v19199_v5 = vpop.permute.xlu0 %672  ;;  %v19239_v38 = vpop.permute.xlu1 %609 }
 0x19d   : > { %23454 = vst [vmem:[#allocation16_spill] sm:$0xff] %v19199_v5  ;;  %23455 = vst [vmem:[#allocation17_spill] sm:$0xff] %v19239_v38 }
 0x1ad   : > { %v703_v6 = vpop.permute.xlu0 %702 }
 0x1ae   : > { %v710_v7 = vmul.f32 %v703_v6, %v19018_v15  ;;  %v709_v8 = vmul.f32 %v703_v6, %v19021_v16  ;;  %v712_v14 = vmul.f32 %v703_v6, %v19031_v22  ;;  %v711_v19 = vmul.f32 %v703_v6, %v19034_v23  ;;  %v19241_v6 = vpop.permute.xlu1 %658 }
 0x1af   : > { %23456 = vst [vmem:[#allocation18_spill] sm:$0xff] %v19241_v6 }
 0x1b0   : > { %731 = vrot.lane.b32.xlu1 %v710_v7, %s23368_s17  ;;  %729 = vrot.lane.b32.xlu0 %v709_v8, %s23368_s17 }
 0x1b1   : > { %v19253_v10 = vpop.permute.xlu0 %725 }
 0x1b2   : > { %v19243_v7 = vpop.permute.xlu1 %662  ;;  %23462 = vst [vmem:[#allocation24_spill] sm:$0xff] %v19253_v10 }
 0x1b3   : > { %23457 = vst [vmem:[#allocation19_spill] sm:$0xff] %v19243_v7 }
 0x1b4   : > { %735 = vrot.lane.b32.xlu1 %v712_v14, %s23368_s17  ;;  %733 = vrot.lane.b32.xlu0 %v711_v19, %s23368_s17 }
 0x1b6   : > { %v19245_v8 = vpop.permute.xlu1 %666 }
 0x1b7   : > { %23458 = vst [vmem:[#allocation20_spill] sm:$0xff] %v19245_v8 }
 0x1b8   : > { %761 = vperm.xlu0 %17432, %v18978_v2   ;;  %765 = vperm.xlu1 %17433, %v18982_v3  }
 0x1ba   : > { %v19247_v14 = vpop.permute.xlu1 %670 }
 0x1bb   : > { %23459 = vst [vmem:[#allocation21_spill] sm:$0xff] %v19247_v14 }
 0x1bc   : > { %17434 = vset.pattern.permute.xlu1 %v18795_v27  ;;  %17435 = vset.pattern.permute.xlu0 %v18795_v27 }
 0x1be   : > { %v19249_v19 = vpop.permute.xlu1 %721 }
 0x1bf   : > { %23460 = vst [vmem:[#allocation22_spill] sm:$0xff] %v19249_v19 }
 0x1c2   : > { %v19251_v27 = vpop.permute.xlu1 %723 }
 0x1c3   : > { %23461 = vst [vmem:[#allocation23_spill] sm:$0xff] %v19251_v27 }
 0x1c6   : > { %v19255_v17 = vpop.permute.xlu1 %727 }
 0x1c7   : > { %23463 = vst [vmem:[#allocation25_spill] sm:$0xff] %v19255_v17 }
 0x222   : > { %v19257_v13 = vpop.permute.xlu0 %729  ;;  %v19259_v18 = vpop.permute.xlu1 %731 }
 0x223   : > { %23464 = vst [vmem:[#allocation26_spill] sm:$0xff] %v19257_v13  ;;  %23465 = vst [vmem:[#allocation27_spill] sm:$0xff] %v19259_v18 }
 0x226   : > { %v19261_v12 = vpop.permute.xlu0 %733  ;;  %v19263_v5 = vpop.permute.xlu1 %735 }
 0x227   : > { %23466 = vst [vmem:[#allocation28_spill] sm:$0xff] %v19261_v12  ;;  %23467 = vst [vmem:[#allocation29_spill] sm:$0xff] %v19263_v5 }
 0x237   : > { %v762_v1 = vpop.permute.xlu0 %761  ;;  %v766_v10 = vpop.permute.xlu1 %765 }
 0x238   : > { %v769_v8 = vmul.f32 %v762_v1, %v19018_v15  ;;  %v768_v14 = vmul.f32 %v762_v1, %v19021_v16  ;;  %v771_v17 = vmul.f32 %v762_v1, %v19031_v22  ;;  %v770_v13 = vmul.f32 %v762_v1, %v19034_v23 }
 0x239   : > { %v773_v5 = vmul.f32 %v766_v10, %v19018_v15  ;;  %v772_v12 = vmul.f32 %v766_v10, %v19021_v16 }
 0x23a   : > { %786 = vrot.lane.b32.xlu0 %v769_v8, %s23372_s18  ;;  %784 = vrot.lane.b32.xlu1 %v768_v14, %s23372_s18  ;;  %v775_v8 = vmul.f32 %v766_v10, %v19031_v22  ;;  %v774_v14 = vmul.f32 %v766_v10, %v19034_v23 }
 0x23e   : > { %790 = vrot.lane.b32.xlu0 %v771_v17, %s23372_s18  ;;  %788 = vrot.lane.b32.xlu1 %v770_v13, %s23372_s18  ;;  %v18797_v13 = vmov 10  }
 0x242   : > { %794 = vrot.lane.b32.xlu0 %v773_v5, %s23372_s18  ;;  %792 = vrot.lane.b32.xlu1 %v772_v12, %s23372_s18 }
 0x246   : > { %798 = vrot.lane.b32.xlu0 %v775_v8, %s23372_s18  ;;  %796 = vrot.lane.b32.xlu1 %v774_v14, %s23372_s18 }
 0x24a   : > { %824 = vperm.xlu1 %17434, %v18978_v2   ;;  %828 = vperm.xlu0 %17435, %v18982_v3  }
 0x24e   : > { %17436 = vset.pattern.permute.xlu0 %v18797_v13  ;;  %17437 = vset.pattern.permute.xlu1 %v18797_v13 }
 0x2ac   : > { %v19283_v17 = vpop.permute.xlu0 %786  ;;  %v19285_v1 = vpop.permute.xlu1 %784 }
 0x2ad   : > { %23468 = vst [vmem:[#allocation30_spill] sm:$0xff] %v19283_v17  ;;  %23469 = vst [vmem:[#allocation31_spill] sm:$0xff] %v19285_v1 }
 0x2b0   : > { %v19287_v12 = vpop.permute.xlu0 %790  ;;  %v19289_v5 = vpop.permute.xlu1 %788 }
 0x2b1   : > { %23470 = vst [vmem:[#allocation32_spill] sm:$0xff] %v19287_v12  ;;  %23471 = vst [vmem:[#allocation33_spill] sm:$0xff] %v19289_v5 }
 0x2b4   : > { %v19291_v10 = vpop.permute.xlu0 %794  ;;  %v19293_v8 = vpop.permute.xlu1 %792 }
 0x2b5   : > { %23472 = vst [vmem:[#allocation34_spill] sm:$0xff] %v19291_v10  ;;  %23473 = vst [vmem:[#allocation35_spill] sm:$0xff] %v19293_v8 }
 0x2b8   : > { %v19295_v14 = vpop.permute.xlu0 %798  ;;  %v19297_v18 = vpop.permute.xlu1 %796 }
 0x2b9   : > { %23474 = vst [vmem:[#allocation36_spill] sm:$0xff] %v19295_v14  ;;  %23475 = vst [vmem:[#allocation37_spill] sm:$0xff] %v19297_v18 }
 0x2c9   : > { %v825_v19 = vpop.permute.xlu1 %824  ;;  %v829_v27 = vpop.permute.xlu0 %828 }
 0x2ca   : > { %v833_v13 = vmul.f32 %v825_v19, %v19034_v23  ;;  %v831_v17 = vmul.f32 %v825_v19, %v19021_v16  ;;  %v835_v12 = vmul.f32 %v829_v27, %v19021_v16  ;;  %v832_v10 = vmul.f32 %v825_v19, %v19018_v15 }
 0x2cb   : > { %v837_v14 = vmul.f32 %v829_v27, %v19034_v23  ;;  %v834_v18 = vmul.f32 %v825_v19, %v19031_v22 }
 0x2cc   : > { %851 = vrot.lane.b32.xlu0 %v833_v13, %s23425_s19  ;;  %847 = vrot.lane.b32.xlu1 %v831_v17, %s23425_s19  ;;  %v836_v13 = vmul.f32 %v829_v27, %v19018_v15  ;;  %v838_v17 = vmul.f32 %v829_v27, %v19031_v22 }
 0x2d0   : > { %855 = vrot.lane.b32.xlu0 %v835_v12, %s23425_s19  ;;  %849 = vrot.lane.b32.xlu1 %v832_v10, %s23425_s19  ;;  %v18799_v12 = vmov 11  }
 0x2d4   : > { %859 = vrot.lane.b32.xlu0 %v837_v14, %s23425_s19  ;;  %853 = vrot.lane.b32.xlu1 %v834_v18, %s23425_s19 }
 0x2d8   : > { %887 = vperm.xlu0 %17436, %v18978_v2   ;;  %857 = vrot.lane.b32.xlu1 %v836_v13, %s23425_s19 }
 0x2dc   : > { %861 = vrot.lane.b32.xlu1 %v838_v17, %s23425_s19  ;;  %17439 = vset.pattern.permute.xlu0 %v18799_v12 }
 0x2e0   : > { %891 = vperm.xlu1 %17437, %v18982_v3  }
 0x2e4   : > { %17438 = vset.pattern.permute.xlu1 %v18799_v12 }
 0x33e   : > { %v19317_v19 = vpop.permute.xlu1 %847  ;;  %v19319_v10 = vpop.permute.xlu0 %851 }
 0x33f   : > { %23476 = vst [vmem:[#allocation38_spill] sm:$0xff] %v19317_v19  ;;  %23477 = vst [vmem:[#allocation39_spill] sm:$0xff] %v19319_v10 }
 0x342   : > { %v19321_v18 = vpop.permute.xlu1 %849  ;;  %v19323_v14 = vpop.permute.xlu0 %855 }
 0x343   : > { %23478 = vst [vmem:[#allocation40_spill] sm:$0xff] %v19321_v18  ;;  %23479 = vst [vmem:[#allocation41_spill] sm:$0xff] %v19323_v14 }
 0x346   : > { %v19325_v8 = vpop.permute.xlu1 %853  ;;  %v19327_v13 = vpop.permute.xlu0 %859 }
 0x347   : > { %23480 = vst [vmem:[#allocation42_spill] sm:$0xff] %v19325_v8  ;;  %23481 = vst [vmem:[#allocation43_spill] sm:$0xff] %v19327_v13 }
 0x34a   : > { %v19329_v27 = vpop.permute.xlu1 %857 }
 0x34b   : > { %23482 = vst [vmem:[#allocation44_spill] sm:$0xff] %v19329_v27 }
 0x34e   : > { %v19335_v12 = vpop.permute.xlu1 %861 }
 0x34f   : > { %23483 = vst [vmem:[#allocation45_spill] sm:$0xff] %v19335_v12 }
 0x357   : > { %v888_v17 = vpop.permute.xlu0 %887 }
 0x358   : > { %v895_v5 = vmul.f32 %v888_v17, %v19018_v15  ;;  %v894_v1 = vmul.f32 %v888_v17, %v19021_v16  ;;  %v897_v14 = vmul.f32 %v888_v17, %v19031_v22  ;;  %v896_v8 = vmul.f32 %v888_v17, %v19034_v23 }
 0x35a   : > { %912 = vrot.lane.b32.xlu0 %v895_v5, %s23401_s20  ;;  %910 = vrot.lane.b32.xlu1 %v894_v1, %s23401_s20 }
 0x35e   : > { %916 = vrot.lane.b32.xlu0 %v897_v14, %s23401_s20  ;;  %914 = vrot.lane.b32.xlu1 %v896_v8, %s23401_s20  ;;  %v18801_v8 = vmov 12  }
 0x35f   : > { %v892_v13 = vpop.permute.xlu1 %891 }
 0x360   : > { %v899_v27 = vmul.f32 %v892_v13, %v19018_v15  ;;  %v898_v10 = vmul.f32 %v892_v13, %v19021_v16  ;;  %v901_v1 = vmul.f32 %v892_v13, %v19031_v22  ;;  %v900_v5 = vmul.f32 %v892_v13, %v19034_v23 }
 0x362   : > { %920 = vrot.lane.b32.xlu0 %v899_v27, %s23401_s20  ;;  %918 = vrot.lane.b32.xlu1 %v898_v10, %s23401_s20 }
 0x366   : > { %924 = vrot.lane.b32.xlu0 %v901_v1, %s23401_s20  ;;  %922 = vrot.lane.b32.xlu1 %v900_v5, %s23401_s20 }
 0x36a   : > { %950 = vperm.xlu1 %17438, %v18978_v2   ;;  %954 = vperm.xlu0 %17439, %v18982_v3  }
 0x36e   : > { %17440 = vset.pattern.permute.xlu0 %v18801_v8  ;;  %17441 = vset.pattern.permute.xlu1 %v18801_v8 }
 0x3cc   : > { %v19351_v14 = vpop.permute.xlu0 %912  ;;  %v19353_v27 = vpop.permute.xlu1 %910 }
 0x3cd   : > { %23484 = vst [vmem:[#allocation46_spill] sm:$0xff] %v19351_v14  ;;  %23485 = vst [vmem:[#allocation47_spill] sm:$0xff] %v19353_v27 }
 0x3d0   : > { %v19355_v10 = vpop.permute.xlu0 %916  ;;  %v19357_v17 = vpop.permute.xlu1 %914 }
 0x3d1   : > { %23486 = vst [vmem:[#allocation48_spill] sm:$0xff] %v19355_v10  ;;  %23487 = vst [vmem:[#allocation49_spill] sm:$0xff] %v19357_v17 }
 0x3d4   : > { %v19359_v13 = vpop.permute.xlu0 %920  ;;  %v19361_v1 = vpop.permute.xlu1 %918 }
 0x3d5   : > { %23488 = vst [vmem:[#allocation50_spill] sm:$0xff] %v19359_v13  ;;  %23489 = vst [vmem:[#allocation51_spill] sm:$0xff] %v19361_v1 }
 0x3d8   : > { %v19363_v5 = vpop.permute.xlu0 %924  ;;  %v19365_v12 = vpop.permute.xlu1 %922 }
 0x3d9   : > { %23490 = vst [vmem:[#allocation52_spill] sm:$0xff] %v19363_v5  ;;  %23491 = vst [vmem:[#allocation53_spill] sm:$0xff] %v19365_v12 }
 0x3e9   : > { %v951_v19 = vpop.permute.xlu1 %950  ;;  %v955_v18 = vpop.permute.xlu0 %954 }
 0x3ea   : > { %v959_v8 = vmul.f32 %v951_v19, %v19034_v23  ;;  %v957_v14 = vmul.f32 %v951_v19, %v19021_v16  ;;  %v961_v10 = vmul.f32 %v955_v18, %v19021_v16  ;;  %v958_v13 = vmul.f32 %v951_v19, %v19018_v15 }
 0x3eb   : > { %v963_v5 = vmul.f32 %v955_v18, %v19034_v23  ;;  %v960_v12 = vmul.f32 %v951_v19, %v19031_v22 }
 0x3ec   : > { %977 = vrot.lane.b32.xlu0 %v959_v8, %s23380_s22  ;;  %973 = vrot.lane.b32.xlu1 %v957_v14, %s23380_s22  ;;  %v962_v8 = vmul.f32 %v955_v18, %v19018_v15  ;;  %v964_v14 = vmul.f32 %v955_v18, %v19031_v22 }
 0x3f0   : > { %981 = vrot.lane.b32.xlu0 %v961_v10, %s23380_s22  ;;  %975 = vrot.lane.b32.xlu1 %v958_v13, %s23380_s22  ;;  %v18803_v10 = vmov 13  }
 0x3f4   : > { %985 = vrot.lane.b32.xlu0 %v963_v5, %s23380_s22  ;;  %979 = vrot.lane.b32.xlu1 %v960_v12, %s23380_s22 }
 0x3f8   : > { %1013 = vperm.xlu0 %17440, %v18978_v2   ;;  %983 = vrot.lane.b32.xlu1 %v962_v8, %s23380_s22 }
 0x3fc   : > { %987 = vrot.lane.b32.xlu1 %v964_v14, %s23380_s22  ;;  %17443 = vset.pattern.permute.xlu0 %v18803_v10 }
 0x400   : > { %1017 = vperm.xlu1 %17441, %v18982_v3  }
 0x404   : > { %17442 = vset.pattern.permute.xlu1 %v18803_v10 }
 0x45e   : > { %v19385_v19 = vpop.permute.xlu1 %973  ;;  %v19387_v13 = vpop.permute.xlu0 %977 }
 0x45f   : > { %23492 = vst [vmem:[#allocation54_spill] sm:$0xff] %v19385_v19  ;;  %23493 = vst [vmem:[#allocation55_spill] sm:$0xff] %v19387_v13 }
 0x462   : > { %v19389_v12 = vpop.permute.xlu1 %975  ;;  %v19391_v5 = vpop.permute.xlu0 %981 }
 0x463   : > { %23494 = vst [vmem:[#allocation56_spill] sm:$0xff] %v19389_v12  ;;  %23495 = vst [vmem:[#allocation57_spill] sm:$0xff] %v19391_v5 }
 0x466   : > { %v19393_v1 = vpop.permute.xlu1 %979  ;;  %v19395_v8 = vpop.permute.xlu0 %985 }
 0x467   : > { %23496 = vst [vmem:[#allocation58_spill] sm:$0xff] %v19393_v1  ;;  %23497 = vst [vmem:[#allocation59_spill] sm:$0xff] %v19395_v8 }
 0x46a   : > { %v19397_v18 = vpop.permute.xlu1 %983 }
 0x46b   : > { %23498 = vst [vmem:[#allocation60_spill] sm:$0xff] %v19397_v18 }
 0x46e   : > { %v19403_v10 = vpop.permute.xlu1 %987 }
 0x46f   : > { %23499 = vst [vmem:[#allocation61_spill] sm:$0xff] %v19403_v10 }
 0x477   : > { %v1014_v14 = vpop.permute.xlu0 %1013 }
 0x478   : > { %v1021_v17 = vmul.f32 %v1014_v14, %v19018_v15  ;;  %v1020_v27 = vmul.f32 %v1014_v14, %v19021_v16  ;;  %v1023_v5 = vmul.f32 %v1014_v14, %v19031_v22  ;;  %v1022_v1 = vmul.f32 %v1014_v14, %v19034_v23 }
 0x47a   : > { %1038 = vrot.lane.b32.xlu0 %v1021_v17, %s23383_s26  ;;  %1036 = vrot.lane.b32.xlu1 %v1020_v27, %s23383_s26 }
 0x47e   : > { %1042 = vrot.lane.b32.xlu0 %v1023_v5, %s23383_s26  ;;  %1040 = vrot.lane.b32.xlu1 %v1022_v1, %s23383_s26  ;;  %v18805_v1 = vmov 14  }
 0x47f   : > { %v1018_v8 = vpop.permute.xlu1 %1017 }
 0x480   : > { %v1025_v18 = vmul.f32 %v1018_v8, %v19018_v15  ;;  %v1024_v13 = vmul.f32 %v1018_v8, %v19021_v16  ;;  %v1027_v27 = vmul.f32 %v1018_v8, %v19031_v22  ;;  %v1026_v17 = vmul.f32 %v1018_v8, %v19034_v23 }
 0x482   : > { %1046 = vrot.lane.b32.xlu0 %v1025_v18, %s23383_s26  ;;  %1044 = vrot.lane.b32.xlu1 %v1024_v13, %s23383_s26 }
 0x486   : > { %1050 = vrot.lane.b32.xlu0 %v1027_v27, %s23383_s26  ;;  %1048 = vrot.lane.b32.xlu1 %v1026_v17, %s23383_s26 }
 0x48a   : > { %1076 = vperm.xlu1 %17442, %v18978_v2   ;;  %1080 = vperm.xlu0 %17443, %v18982_v3  }
 0x48e   : > { %17444 = vset.pattern.permute.xlu0 %v18805_v1  ;;  %17445 = vset.pattern.permute.xlu1 %v18805_v1 }
 0x4ec   : > { %v19419_v5 = vpop.permute.xlu0 %1038  ;;  %v19421_v18 = vpop.permute.xlu1 %1036 }
 0x4ed   : > { %23500 = vst [vmem:[#allocation62_spill] sm:$0xff] %v19419_v5  ;;  %23501 = vst [vmem:[#allocation63_spill] sm:$0xff] %v19421_v18 }
 0x4f0   : > { %v19423_v13 = vpop.permute.xlu0 %1042  ;;  %v19425_v14 = vpop.permute.xlu1 %1040 }
 0x4f1   : > { %23502 = vst [vmem:[#allocation64_spill] sm:$0xff] %v19423_v13  ;;  %23503 = vst [vmem:[#allocation65_spill] sm:$0xff] %v19425_v14 }
 0x4f4   : > { %v19427_v8 = vpop.permute.xlu0 %1046  ;;  %v19429_v27 = vpop.permute.xlu1 %1044 }
 0x4f5   : > { %23504 = vst [vmem:[#allocation66_spill] sm:$0xff] %v19427_v8  ;;  %23505 = vst [vmem:[#allocation67_spill] sm:$0xff] %v19429_v27 }
 0x4f8   : > { %v19431_v17 = vpop.permute.xlu0 %1050  ;;  %v19433_v10 = vpop.permute.xlu1 %1048 }
 0x4f9   : > { %23506 = vst [vmem:[#allocation68_spill] sm:$0xff] %v19431_v17  ;;  %23507 = vst [vmem:[#allocation69_spill] sm:$0xff] %v19433_v10 }
 0x509   : > { %v1077_v19 = vpop.permute.xlu1 %1076  ;;  %v1081_v12 = vpop.permute.xlu0 %1080 }
 0x50a   : > { %v1085_v1 = vmul.f32 %v1077_v19, %v19034_v23  ;;  %v1083_v5 = vmul.f32 %v1077_v19, %v19021_v16  ;;  %v1087_v13 = vmul.f32 %v1081_v12, %v19021_v16  ;;  %v1084_v8 = vmul.f32 %v1077_v19, %v19018_v15 }
 0x50b   : > { %v1089_v17 = vmul.f32 %v1081_v12, %v19034_v23  ;;  %v1086_v10 = vmul.f32 %v1077_v19, %v19031_v22 }
 0x50c   : > { %1103 = vrot.lane.b32.xlu0 %v1085_v1, %s23397_s29  ;;  %1099 = vrot.lane.b32.xlu1 %v1083_v5, %s23397_s29  ;;  %v1088_v1 = vmul.f32 %v1081_v12, %v19018_v15  ;;  %v1090_v5 = vmul.f32 %v1081_v12, %v19031_v22 }
 0x510   : > { %1107 = vrot.lane.b32.xlu0 %v1087_v13, %s23397_s29  ;;  %1101 = vrot.lane.b32.xlu1 %v1084_v8, %s23397_s29  ;;  %v18807_v13 = vmov 15  }
 0x514   : > { %1111 = vrot.lane.b32.xlu0 %v1089_v17, %s23397_s29  ;;  %1105 = vrot.lane.b32.xlu1 %v1086_v10, %s23397_s29 }
 0x518   : > { %1139 = vperm.xlu0 %17444, %v18978_v2   ;;  %1109 = vrot.lane.b32.xlu1 %v1088_v1, %s23397_s29 }
 0x51c   : > { %1113 = vrot.lane.b32.xlu1 %v1090_v5, %s23397_s29  ;;  %17447 = vset.pattern.permute.xlu0 %v18807_v13 }
 0x520   : > { %1143 = vperm.xlu1 %17445, %v18982_v3  }
 0x524   : > { %17446 = vset.pattern.permute.xlu1 %v18807_v13 }
 0x57e   : > { %v19453_v19 = vpop.permute.xlu1 %1099  ;;  %v19455_v8 = vpop.permute.xlu0 %1103 }
 0x57f   : > { %23508 = vst [vmem:[#allocation70_spill] sm:$0xff] %v19453_v19  ;;  %23509 = vst [vmem:[#allocation71_spill] sm:$0xff] %v19455_v8 }
 0x582   : > { %v19457_v10 = vpop.permute.xlu1 %1101  ;;  %v19459_v17 = vpop.permute.xlu0 %1107 }
 0x583   : > { %23510 = vst [vmem:[#allocation72_spill] sm:$0xff] %v19457_v10  ;;  %23511 = vst [vmem:[#allocation73_spill] sm:$0xff] %v19459_v17 }
 0x586   : > { %v19461_v27 = vpop.permute.xlu1 %1105  ;;  %v19463_v1 = vpop.permute.xlu0 %1111 }
 0x587   : > { %23512 = vst [vmem:[#allocation74_spill] sm:$0xff] %v19461_v27  ;;  %23513 = vst [vmem:[#allocation75_spill] sm:$0xff] %v19463_v1 }
 0x58a   : > { %v19465_v12 = vpop.permute.xlu1 %1109 }
 0x58b   : > { %23514 = vst [vmem:[#allocation76_spill] sm:$0xff] %v19465_v12 }
 0x58e   : > { %v19471_v13 = vpop.permute.xlu1 %1113 }
 0x58f   : > { %23515 = vst [vmem:[#allocation77_spill] sm:$0xff] %v19471_v13 }
 0x597   : > { %v1140_v5 = vpop.permute.xlu0 %1139 }
 0x598   : > { %v1147_v14 = vmul.f32 %v1140_v5, %v19018_v15  ;;  %v1146_v18 = vmul.f32 %v1140_v5, %v19021_v16  ;;  %v1149_v17 = vmul.f32 %v1140_v5, %v19031_v22  ;;  %v1148_v27 = vmul.f32 %v1140_v5, %v19034_v23 }
 0x59a   : > { %1164 = vrot.lane.b32.xlu0 %v1147_v14, %s23399_s23  ;;  %1162 = vrot.lane.b32.xlu1 %v1146_v18, %s23399_s23 }
 0x59e   : > { %1168 = vrot.lane.b32.xlu0 %v1149_v17, %s23399_s23  ;;  %1166 = vrot.lane.b32.xlu1 %v1148_v27, %s23399_s23  ;;  %v18809_v27 = vmov 16  }
 0x59f   : > { %v1144_v1 = vpop.permute.xlu1 %1143 }
 0x5a0   : > { %v1151_v12 = vmul.f32 %v1144_v1, %v19018_v15  ;;  %v1150_v8 = vmul.f32 %v1144_v1, %v19021_v16  ;;  %v1153_v18 = vmul.f32 %v1144_v1, %v19031_v22  ;;  %v1152_v14 = vmul.f32 %v1144_v1, %v19034_v23 }
 0x5a2   : > { %1172 = vrot.lane.b32.xlu0 %v1151_v12, %s23399_s23  ;;  %1170 = vrot.lane.b32.xlu1 %v1150_v8, %s23399_s23 }
 0x5a6   : > { %1176 = vrot.lane.b32.xlu0 %v1153_v18, %s23399_s23  ;;  %1174 = vrot.lane.b32.xlu1 %v1152_v14, %s23399_s23 }
 0x5aa   : > { %1202 = vperm.xlu1 %17446, %v18978_v2   ;;  %1206 = vperm.xlu0 %17447, %v18982_v3  }
 0x5ae   : > { %17448 = vset.pattern.permute.xlu0 %v18809_v27  ;;  %17449 = vset.pattern.permute.xlu1 %v18809_v27 }
 0x60c   : > { %v19487_v17 = vpop.permute.xlu0 %1164  ;;  %v19489_v12 = vpop.permute.xlu1 %1162 }
 0x60d   : > { %23516 = vst [vmem:[#allocation78_spill] sm:$0xff] %v19487_v17  ;;  %23517 = vst [vmem:[#allocation79_spill] sm:$0xff] %v19489_v12 }
 0x610   : > { %v19491_v8 = vpop.permute.xlu0 %1168  ;;  %v19493_v5 = vpop.permute.xlu1 %1166 }
 0x611   : > { %23518 = vst [vmem:[#allocation80_spill] sm:$0xff] %v19491_v8  ;;  %23519 = vst [vmem:[#allocation81_spill] sm:$0xff] %v19493_v5 }
 0x614   : > { %v19495_v1 = vpop.permute.xlu0 %1172  ;;  %v19497_v18 = vpop.permute.xlu1 %1170 }
 0x615   : > { %23520 = vst [vmem:[#allocation82_spill] sm:$0xff] %v19495_v1  ;;  %23521 = vst [vmem:[#allocation83_spill] sm:$0xff] %v19497_v18 }
 0x618   : > { %v19499_v14 = vpop.permute.xlu0 %1176  ;;  %v19501_v13 = vpop.permute.xlu1 %1174 }
 0x619   : > { %23522 = vst [vmem:[#allocation84_spill] sm:$0xff] %v19499_v14  ;;  %23523 = vst [vmem:[#allocation85_spill] sm:$0xff] %v19501_v13 }
 0x629   : > { %v1203_v19 = vpop.permute.xlu1 %1202  ;;  %v1207_v10 = vpop.permute.xlu0 %1206 }
 0x62a   : > { %v1211_v27 = vmul.f32 %v1203_v19, %v19034_v23  ;;  %v1209_v17 = vmul.f32 %v1203_v19, %v19021_v16  ;;  %v1213_v8 = vmul.f32 %v1207_v10, %v19021_v16  ;;  %v1210_v1 = vmul.f32 %v1203_v19, %v19018_v15 }
 0x62b   : > { %v1215_v14 = vmul.f32 %v1207_v10, %v19034_v23  ;;  %v1212_v13 = vmul.f32 %v1203_v19, %v19031_v22  ;;  %v18812_v19 = vmov 19  }
 0x62c   : > { %1229 = vrot.lane.b32.xlu0 %v1211_v27, %s23403_s30  ;;  %1225 = vrot.lane.b32.xlu1 %v1209_v17, %s23403_s30  ;;  %v1214_v27 = vmul.f32 %v1207_v10, %v19018_v15  ;;  %v1216_v17 = vmul.f32 %v1207_v10, %v19031_v22  ;;  %v18814_v10 = vmov 18  }
 0x630   : > { %1233 = vrot.lane.b32.xlu0 %v1213_v8, %s23403_s30  ;;  %1227 = vrot.lane.b32.xlu1 %v1210_v1, %s23403_s30  ;;  %v18811_v8 = vmov 17   ;;  %v18815_v1 = vmov 22  }
 0x634   : > { %1237 = vrot.lane.b32.xlu0 %v1215_v14, %s23403_s30  ;;  %1231 = vrot.lane.b32.xlu1 %v1212_v13, %s23403_s30  ;;  %v18813_v13 = vmov 20   ;;  %v18816_v14 = vmov 23  }
 0x638   : > { %1265 = vperm.xlu0 %17448, %v18978_v2   ;;  %1235 = vrot.lane.b32.xlu1 %v1214_v27, %s23403_s30  ;;  %v19528_v27 = vld [vmem:[#allocation2 + $0x8] sm:$0x3] }
 0x63c   : > { %1239 = vrot.lane.b32.xlu1 %v1216_v17, %s23403_s30  ;;  %17451 = vset.pattern.permute.xlu0 %v18811_v8  ;;  %v19532_v17 = vld [vmem:[#allocation2] sm:$0xff] }
 0x63d   : > { %1332 = vperm.xlu0 %17451, %v18982_v3  }
 0x640   : > { %1269 = vperm.xlu1 %17449, %v18982_v3  }
 0x641   : > { %17453 = vset.pattern.permute.xlu0 %v18812_v19 }
 0x642   : > { %1454 = vperm.xlu0 %17453, %v18978_v2  }
 0x644   : > { %17450 = vset.pattern.permute.xlu1 %v18811_v8  ;;  %v18817_v8 = vmov 21  }
 0x645   : > { %1328 = vperm.xlu1 %17450, %v18978_v2  }
 0x646   : > { %17456 = vset.pattern.permute.xlu0 %v18813_v13 }
 0x647   : > { %1521 = vperm.xlu0 %17456, %v18982_v3  }
 0x649   : > { %17452 = vset.pattern.permute.xlu1 %v18814_v10 }
 0x64a   : > { %1391 = vperm.xlu1 %17452, %v18978_v2  }
 0x64b   : > { %17458 = vset.pattern.permute.xlu0 %v18815_v1 }
 0x64c   : > { %1668 = vperm.xlu0 %17458, %v18978_v2   ;;  %v18818_v2 = vmov 24  }
 0x64e   : > { %1395 = vperm.xlu1 %17452, %v18982_v3  }
 0x650   : > { %17461 = vset.pattern.permute.xlu0 %v18816_v14 }
 0x651   : > { %1745 = vperm.xlu0 %17461, %v19528_v27  }
 0x652   : > { %17454 = vset.pattern.permute.xlu1 %v18812_v19  ;;  %v18819_v19 = vmov 25  }
 0x653   : > { %1458 = vperm.xlu1 %17454, %v19528_v27  }
 0x655   : > { %17463 = vset.pattern.permute.xlu0 %v18819_v19 }
 0x657   : > { %17455 = vset.pattern.permute.xlu1 %v18813_v13 }
 0x658   : > { %1517 = vperm.xlu1 %17455, %v19532_v17  }
 0x65c   : > { %17457 = vset.pattern.permute.xlu1 %v18817_v8 }
 0x65d   : > { %1595 = vperm.xlu1 %17457, %v19532_v17  }
 0x661   : > { %1599 = vperm.xlu1 %17457, %v19528_v27  }
 0x665   : > { %17459 = vset.pattern.permute.xlu1 %v18815_v1 }
 0x666   : > { %1672 = vperm.xlu1 %17459, %v19528_v27  }
 0x66a   : > { %17460 = vset.pattern.permute.xlu1 %v18816_v14 }
 0x66b   : > { %1741 = vperm.xlu1 %17460, %v19532_v17  }
 0x66f   : > { %17462 = vset.pattern.permute.xlu1 %v18818_v2 }
 0x670   : > { %1814 = vperm.xlu1 %17462, %v19532_v17  }
 0x674   : > { %1818 = vperm.xlu1 %17462, %v19528_v27  }
 0x678   : > { %17464 = vset.pattern.permute.xlu1 %v18819_v19 }
 0x69e   : > { %v19541_v3 = vpop.permute.xlu1 %1225  ;;  %v19543_v13 = vpop.permute.xlu0 %1229 }
 0x69f   : > { %23524 = vst [vmem:[#allocation86_spill] sm:$0xff] %v19541_v3  ;;  %23525 = vst [vmem:[#allocation87_spill] sm:$0xff] %v19543_v13 }
 0x6a2   : > { %v19545_v10 = vpop.permute.xlu1 %1227  ;;  %v19547_v1 = vpop.permute.xlu0 %1233 }
 0x6a3   : > { %23526 = vst [vmem:[#allocation88_spill] sm:$0xff] %v19545_v10  ;;  %23527 = vst [vmem:[#allocation89_spill] sm:$0xff] %v19547_v1 }
 0x6a6   : > { %v19549_v14 = vpop.permute.xlu1 %1231  ;;  %v19551_v8 = vpop.permute.xlu0 %1237 }
 0x6a7   : > { %23528 = vst [vmem:[#allocation90_spill] sm:$0xff] %v19549_v14  ;;  %23529 = vst [vmem:[#allocation91_spill] sm:$0xff] %v19551_v8 }
 0x6aa   : > { %v19553_v2 = vpop.permute.xlu1 %1235 }
 0x6ab   : > { %23530 = vst [vmem:[#allocation92_spill] sm:$0xff] %v19553_v2 }
 0x6ae   : > { %v19560_v13 = vpop.permute.xlu1 %1239 }
 0x6af   : > { %23531 = vst [vmem:[#allocation93_spill] sm:$0xff] %v19560_v13 }
 0x6b7   : > { %v1266_v18 = vpop.permute.xlu0 %1265 }
 0x6b8   : > { %v1273_v5 = vmul.f32 %v1266_v18, %v19018_v15  ;;  %v1274_v3 = vmul.f32 %v1266_v18, %v19034_v23  ;;  %v1275_v19 = vmul.f32 %v1266_v18, %v19031_v22  ;;  %v1272_v14 = vmul.f32 %v1266_v18, %v19021_v16 }
 0x6ba   : > { %1290 = vrot.lane.b32.xlu0 %v1273_v5, %s23322_s7  ;;  %1292 = vrot.lane.b32.xlu1 %v1274_v3, %s23322_s7 }
 0x6be   : > { %1294 = vrot.lane.b32.xlu0 %v1275_v19, %s23322_s7 }
 0x6bf   : > { %v1270_v1 = vpop.permute.xlu1 %1269 }
 0x6c0   : > { %v1278_v8 = vmul.f32 %v1270_v1, %v19034_v23  ;;  %v1277_v2 = vmul.f32 %v1270_v1, %v19018_v15  ;;  %v1279_v5 = vmul.f32 %v1270_v1, %v19031_v22  ;;  %v1276_v13 = vmul.f32 %v1270_v1, %v19021_v16 }
 0x6c2   : > { %1300 = vrot.lane.b32.xlu0 %v1278_v8, %s23322_s7  ;;  %1298 = vrot.lane.b32.xlu1 %v1277_v2, %s23322_s7  ;;  %v1333_v2 = vpop.permute.xlu0 %1332 }
 0x6c3   : > { %v1342_v1 = vmul.f32 %v1333_v2, %v19031_v22 }
 0x6c4   : > { %v1329_v3 = vpop.permute.xlu1 %1328 }
 0x6c5   : > { %v1336_v19 = vmul.f32 %v1329_v3, %v19018_v15  ;;  %v1337_v8 = vmul.f32 %v1329_v3, %v19034_v23  ;;  %v1338_v18 = vmul.f32 %v1329_v3, %v19031_v22 }
 0x6c6   : > { %1288 = vrot.lane.b32.xlu0 %v1272_v14, %s23322_s7  ;;  %1302 = vrot.lane.b32.xlu1 %v1279_v5, %s23322_s7  ;;  %v1340_v14 = vmul.f32 %v1333_v2, %v19018_v15  ;;  %v1341_v5 = vmul.f32 %v1333_v2, %v19034_v23 }
 0x6ca   : > { %1296 = vrot.lane.b32.xlu1 %v1276_v13, %s23322_s7  ;;  %1353 = vrot.lane.b32.xlu0 %v1336_v19, %s23418_s8  ;;  %v1392_v13 = vpop.permute.xlu1 %1391  ;;  %v1335_v19 = vmul.f32 %v1329_v3, %v19021_v16  ;;  %s23429_s7 = smov 60  }
 0x6ce   : > { %1355 = vrot.lane.b32.xlu1 %v1337_v8, %s23418_s8  ;;  %1357 = vrot.lane.b32.xlu0 %v1338_v18, %s23418_s8  ;;  %v1399_v8 = vmul.f32 %v1392_v13, %v19018_v15  ;;  %v1339_v18 = vmul.f32 %v1333_v2, %v19021_v16  ;;  %v1396_v10 = vpop.permute.xlu1 %1395  ;;  %v1455_v2 = vpop.permute.xlu0 %1454 }
 0x6cf   : > { %v1404_v3 = vmul.f32 %v1396_v10, %v19034_v23 }
 0x6d2   : > { %1361 = vrot.lane.b32.xlu1 %v1340_v14, %s23418_s8  ;;  %1363 = vrot.lane.b32.xlu0 %v1341_v5, %s23418_s8  ;;  %v1400_v14 = vmul.f32 %v1392_v13, %v19034_v23  ;;  %v1401_v5 = vmul.f32 %v1392_v13, %v19031_v22 }
 0x6d6   : > { %1365 = vrot.lane.b32.xlu1 %v1342_v1, %s23418_s8  ;;  %1351 = vrot.lane.b32.xlu0 %v1335_v19, %s23418_s8  ;;  %v1403_v1 = vmul.f32 %v1396_v10, %v19018_v15  ;;  %v1398_v19 = vmul.f32 %v1392_v13, %v19021_v16  ;;  %v1459_v13 = vpop.permute.xlu1 %1458 }
 0x6da   : > { %1359 = vrot.lane.b32.xlu1 %v1339_v18, %s23418_s8  ;;  %1416 = vrot.lane.b32.xlu0 %v1399_v8, %s23313_s9  ;;  %v1405_v8 = vmul.f32 %v1396_v10, %v19031_v22  ;;  %v1462_v18 = vmul.f32 %v1455_v2, %v19018_v15 }
 0x6de   : > { %1418 = vrot.lane.b32.xlu1 %v1400_v14, %s23313_s9  ;;  %1420 = vrot.lane.b32.xlu0 %v1401_v5, %s23313_s9  ;;  %v1402_v14 = vmul.f32 %v1396_v10, %v19021_v16  ;;  %v1464_v5 = vmul.f32 %v1455_v2, %v19031_v22  ;;  %v19615_v10 = vpop.permute.xlu1 %1517 }
 0x6e2   : > { %1426 = vrot.lane.b32.xlu0 %v1404_v3, %s23313_s9  ;;  %1424 = vrot.lane.b32.xlu1 %v1403_v1, %s23313_s9  ;;  %v1463_v3 = vmul.f32 %v1455_v2, %v19034_v23  ;;  %v1467_v1 = vmul.f32 %v1459_v13, %v19034_v23 }
 0x6e6   : > { %1414 = vrot.lane.b32.xlu0 %v1398_v19, %s23313_s9  ;;  %1428 = vrot.lane.b32.xlu1 %v1405_v8, %s23313_s9  ;;  %v1466_v19 = vmul.f32 %v1459_v13, %v19018_v15  ;;  %v1461_v8 = vmul.f32 %v1455_v2, %v19021_v16  ;;  %v1532_v2 = vmul.f32 %v19615_v10, %v19031_v22 }
 0x6ea   : > { %1479 = vrot.lane.b32.xlu0 %v1462_v18, %s23309_s25  ;;  %1422 = vrot.lane.b32.xlu1 %v1402_v14, %s23313_s9  ;;  %v1468_v18 = vmul.f32 %v1459_v13, %v19031_v22  ;;  %v1530_v14 = vmul.f32 %v19615_v10, %v19018_v15  ;;  %s23431_s9 = smov 61  }
 0x6ee   : > { %1483 = vrot.lane.b32.xlu0 %v1464_v5, %s23309_s25  ;;  %1481 = vrot.lane.b32.xlu1 %v1463_v3, %s23309_s25  ;;  %v1465_v5 = vmul.f32 %v1459_v13, %v19021_v16  ;;  %v1531_v3 = vmul.f32 %v19615_v10, %v19034_v23 }
 0x6f2   : > { %1489 = vrot.lane.b32.xlu0 %v1467_v1, %s23309_s25  ;;  %1487 = vrot.lane.b32.xlu1 %v1466_v19, %s23309_s25  ;;  %v19630_v1 = vpop.permute.xlu0 %1521 }
 0x6f3   : > { %v1535_v13 = vmul.f32 %v19630_v1, %v19018_v15  ;;  %v1536_v19 = vmul.f32 %v19630_v1, %v19034_v23 }
 0x6f6   : > { %1477 = vrot.lane.b32.xlu0 %v1461_v8, %s23309_s25  ;;  %1491 = vrot.lane.b32.xlu1 %v1468_v18, %s23309_s25  ;;  %v19640_v8 = vpop.permute.xlu1 %1595  ;;  %v1537_v18 = vmul.f32 %v19630_v1, %v19031_v22 }
 0x6fa   : > { %1485 = vrot.lane.b32.xlu1 %v1465_v5, %s23309_s25  ;;  %1551 = vrot.lane.b32.xlu0 %v1530_v14, %s23421_s27  ;;  %v1529_v14 = vmul.f32 %v19615_v10, %v19021_v16  ;;  %v1603_v5 = vmul.f32 %v19640_v8, %v19018_v15  ;;  %s23427_s25 = smov 62  }
 0x6fe   : > { %1553 = vrot.lane.b32.xlu1 %v1531_v3, %s23421_s27  ;;  %1555 = vrot.lane.b32.xlu0 %v1532_v2, %s23421_s27  ;;  %v1534_v3 = vmul.f32 %v19630_v1, %v19021_v16  ;;  %v1604_v2 = vmul.f32 %v19640_v8, %v19034_v23 }
 0x702   : > { %1561 = vrot.lane.b32.xlu1 %v1535_v13, %s23421_s27  ;;  %1563 = vrot.lane.b32.xlu0 %v1536_v19, %s23421_s27  ;;  %v1605_v13 = vmul.f32 %v19640_v8, %v19031_v22  ;;  %v19658_v19 = vpop.permute.xlu1 %1599 }
 0x706   : > { %1565 = vrot.lane.b32.xlu1 %v1537_v18, %s23421_s27  ;;  %1549 = vrot.lane.b32.xlu0 %v1529_v14, %s23421_s27  ;;  %v1609_v18 = vmul.f32 %v19658_v19, %v19034_v23  ;;  %v1608_v14 = vmul.f32 %v19658_v19, %v19018_v15  ;;  %v19680_v12 = vpop.permute.xlu1 %1672 }
 0x707   : > { %v1682_v7 = vmul.f32 %v19680_v12, %v19034_v23  ;;  %v1683_v63 = vmul.f32 %v19680_v12, %v19031_v22 }
 0x70a   : > { %1559 = vrot.lane.b32.xlu1 %v1534_v3, %s23421_s27  ;;  %1624 = vrot.lane.b32.xlu0 %v1603_v5, %s23423_s28  ;;  %v19668_v5 = vpop.permute.xlu0 %1668  ;;  %v1602_v3 = vmul.f32 %v19640_v8, %v19021_v16 }
 0x70e   : > { %1626 = vrot.lane.b32.xlu1 %v1604_v2, %s23423_s28  ;;  %1628 = vrot.lane.b32.xlu0 %v1605_v13, %s23423_s28  ;;  %v1610_v2 = vmul.f32 %v19658_v19, %v19031_v22  ;;  %v1676_v13 = vmul.f32 %v19668_v5, %v19018_v15 }
 0x712   : > { %1636 = vrot.lane.b32.xlu0 %v1609_v18, %s23423_s28  ;;  %1634 = vrot.lane.b32.xlu1 %v1608_v14, %s23423_s28  ;;  %v1607_v18 = vmul.f32 %v19658_v19, %v19021_v16  ;;  %v1678_v14 = vmul.f32 %v19668_v5, %v19031_v22 }
 0x716   : > { %1622 = vrot.lane.b32.xlu0 %v1602_v3, %s23423_s28  ;;  %1638 = vrot.lane.b32.xlu1 %v1610_v2, %s23423_s28  ;;  %v1677_v3 = vmul.f32 %v19668_v5, %v19034_v23  ;;  %v19690_v2 = vpop.permute.xlu1 %1741 }
 0x717   : > { %v1751_v38 = vmul.f32 %v19690_v2, %v19031_v22 }
 0x71a   : > { %1697 = vrot.lane.b32.xlu0 %v1676_v13, %s23427_s25  ;;  %1632 = vrot.lane.b32.xlu1 %v1607_v18, %s23423_s28  ;;  %v1681_v13 = vmul.f32 %v19680_v12, %v19018_v15  ;;  %v19698_v18 = vpop.permute.xlu1 %1814 }
 0x71e   : > { %1701 = vrot.lane.b32.xlu0 %v1678_v14, %s23427_s25  ;;  %1699 = vrot.lane.b32.xlu1 %v1677_v3, %s23427_s25  ;;  %v19704_v14 = vpop.permute.xlu0 %1745  ;;  %v1680_v3 = vmul.f32 %v19680_v12, %v19021_v16  ;;  %v19708_v6 = vpop.permute.xlu1 %1818 }
 0x722   : > { %1709 = vrot.lane.b32.xlu0 %v1682_v7, %s23427_s25  ;;  %1707 = vrot.lane.b32.xlu1 %v1681_v13, %s23427_s25  ;;  %v1750_v7 = vmul.f32 %v19690_v2, %v19034_v23 }
 0x726   : > { %1887 = vperm.xlu0 %17463, %v19532_v17   ;;  %1711 = vrot.lane.b32.xlu1 %v1683_v63, %s23427_s25  ;;  %v1675_v17 = vmul.f32 %v19668_v5, %v19021_v16  ;;  %v1754_v63 = vmul.f32 %v19704_v14, %v19018_v15 }
 0x72a   : > { %1891 = vperm.xlu1 %17464, %v19528_v27   ;;  %1705 = vrot.lane.b32.xlu0 %v1680_v3, %s23427_s25  ;;  %v1749_v27 = vmul.f32 %v19690_v2, %v19018_v15 }
 0x72c   : > { %v19714_v13 = vpop.permute.xlu0 %1290  ;;  %v19724_v3 = vpop.permute.xlu1 %1292 }
 0x72d   : > { %23532 = vst [vmem:[#allocation94_spill] sm:$0xff] %v19714_v13  ;;  %23533 = vst [vmem:[#allocation95_spill] sm:$0xff] %v19724_v3 }
 0x72e   : > { %1695 = vrot.lane.b32.xlu1 %v1675_v17, %s23427_s25  ;;  %1772 = vrot.lane.b32.xlu0 %v1750_v7, %s23431_s9  ;;  %v1756_v17 = vmul.f32 %v19704_v14, %v19031_v22 }
 0x730   : > { %v19726_v61 = vpop.permute.xlu0 %1294 }
 0x731   : > { %23534 = vst [vmem:[#allocation96_spill] sm:$0xff] %v19726_v61  ;;  %v1753_v61 = vmul.f32 %v19704_v14, %v19021_v16 }
 0x732   : > { %1780 = vrot.lane.b32.xlu0 %v1754_v63, %s23431_s9  ;;  %1770 = vrot.lane.b32.xlu1 %v1749_v27, %s23431_s9  ;;  %v1755_v63 = vmul.f32 %v19704_v14, %v19034_v23 }
 0x734   : > { %v19732_v13 = vpop.permute.xlu0 %1300  ;;  %v19734_v7 = vpop.permute.xlu1 %1298 }
 0x735   : > { %23535 = vst [vmem:[#allocation97_spill] sm:$0xff] %v19732_v13  ;;  %23536 = vst [vmem:[#allocation98_spill] sm:$0xff] %v19734_v7 }
 0x736   : > { %1784 = vrot.lane.b32.xlu0 %v1756_v17, %s23431_s9  ;;  %1774 = vrot.lane.b32.xlu1 %v1751_v38, %s23431_s9  ;;  %v1748_v38 = vmul.f32 %v19690_v2, %v19021_v16  ;;  %v1823_v17 = vmul.f32 %v19698_v18, %v19034_v23 }
 0x738   : > { %v19744_v27 = vpop.permute.xlu0 %1288  ;;  %v19746_v3 = vpop.permute.xlu1 %1302 }
 0x739   : > { %23537 = vst [vmem:[#allocation99_spill] sm:$0xff] %v19744_v27  ;;  %23538 = vst [vmem:[#allocation100_spill] sm:$0xff] %v19746_v3 }
 0x73a   : > { %1778 = vrot.lane.b32.xlu0 %v1753_v61, %s23431_s9  ;;  %1782 = vrot.lane.b32.xlu1 %v1755_v63, %s23431_s9  ;;  %v1822_v63 = vmul.f32 %v19698_v18, %v19018_v15 }
 0x73c   : > { %v19750_v7 = vpop.permute.xlu0 %1353  ;;  %v19752_v13 = vpop.permute.xlu1 %1296 }
 0x73d   : > { %23539 = vst [vmem:[#allocation101_spill] sm:$0xff] %v19750_v7  ;;  %23540 = vst [vmem:[#allocation102_spill] sm:$0xff] %v19752_v13  ;;  %v1827_v7 = vmul.f32 %v19708_v6, %v19018_v15 }
 0x73e   : > { %1768 = vrot.lane.b32.xlu1 %v1748_v38, %s23431_s9  ;;  %1845 = vrot.lane.b32.xlu0 %v1823_v17, %s23429_s7  ;;  %v1824_v17 = vmul.f32 %v19698_v18, %v19031_v22 }
 0x740   : > { %v19760_v3 = vpop.permute.xlu0 %1357  ;;  %v19762_v61 = vpop.permute.xlu1 %1355 }
 0x741   : > { %23541 = vst [vmem:[#allocation103_spill] sm:$0xff] %v19760_v3  ;;  %23542 = vst [vmem:[#allocation104_spill] sm:$0xff] %v19762_v61  ;;  %v1829_v3 = vmul.f32 %v19708_v6, %v19031_v22  ;;  %v1526_v61 = vsub.s32 4, %v19003_v11  ;;  %v1821_v11 = vmul.f32 %v19698_v18, %v19021_v16 }
 0x742   : > { %1843 = vrot.lane.b32.xlu1 %v1822_v63, %s23429_s7  ;;  %1853 = vrot.lane.b32.xlu0 %v1827_v7, %s23429_s7  ;;  %v1828_v7 = vmul.f32 %v19708_v6, %v19034_v23 }
 0x744   : > { %v19770_v13 = vpop.permute.xlu0 %1363  ;;  %v19772_v38 = vpop.permute.xlu1 %1361 }
 0x745   : > { %23543 = vst [vmem:[#allocation105_spill] sm:$0xff] %v19770_v13  ;;  %23544 = vst [vmem:[#allocation106_spill] sm:$0xff] %v19772_v38  ;;  %v1826_v38 = vmul.f32 %v19708_v6, %v19021_v16  ;;  %v18697_v13 = vld [vmem:[%s19008_s10] sm:$0x1f]  ;;  %s23352_s10 = smov 118  }
 0x746   : > { %1847 = vrot.lane.b32.xlu1 %v1824_v17, %s23429_s7  ;;  %1857 = vrot.lane.b32.xlu0 %v1829_v3, %s23429_s7  ;;  %v1527_v17 = vrot.slane %v18697_v13, %v1526_v61 }
 0x748   : > { %v19781_v27 = vpop.permute.xlu0 %1351  ;;  %v19783_v63 = vpop.permute.xlu1 %1365  ;;  %v1611_v13 = vmul.f32 %v19658_v19, %v1527_v17  ;;  %v1679_v19 = vmul.f32 %v19668_v5, %v1527_v17 }
 0x749   : > { %23545 = vst [vmem:[#allocation107_spill] sm:$0xff] %v19781_v27  ;;  %23546 = vst [vmem:[#allocation108_spill] sm:$0xff] %v19783_v63  ;;  %v1538_v63 = vmul.f32 %v1527_v17, %v19630_v1  ;;  %v1684_v1 = vmul.f32 %v19680_v12, %v1527_v17  ;;  %v1752_v12 = vmul.f32 %v19690_v2, %v1527_v17 }
 0x74a   : > { %1855 = vrot.lane.b32.xlu1 %v1828_v7, %s23429_s7  ;;  %1851 = vrot.lane.b32.xlu0 %v1826_v38, %s23429_s7  ;;  %v1533_v38 = vmul.f32 %v1527_v17, %v19615_v10 }
 0x74c   : > { %v19792_v59 = vpop.permute.xlu0 %1416  ;;  %v19794_v3 = vpop.permute.xlu1 %1359 }
 0x74d   : > { %23547 = vst [vmem:[#allocation109_spill] sm:$0xff] %v19794_v3 }
 0x74e   : > { %1841 = vrot.lane.b32.xlu1 %v1821_v11, %s23429_s7  ;;  %1567 = vrot.lane.b32.xlu0 %v1538_v63, %s23421_s27  ;;  %v1606_v11 = vmul.f32 %v19640_v8, %v1527_v17 }
 0x750   : > { %v19801_v27 = vpop.permute.xlu0 %1420  ;;  %v19803_v7 = vpop.permute.xlu1 %1418 }
 0x752   : > { %1557 = vrot.lane.b32.xlu1 %v1533_v38, %s23421_s27  ;;  %1640 = vrot.lane.b32.xlu0 %v1611_v13, %s23423_s28  ;;  %v1757_v38 = vmul.f32 %v19704_v14, %v1527_v17  ;;  %v1825_v14 = vmul.f32 %v19698_v18, %v1527_v17 }
 0x754   : > { %v19809_v61 = vpop.permute.xlu0 %1426  ;;  %v19811_v3 = vpop.permute.xlu1 %1424 }
 0x756   : > { %1630 = vrot.lane.b32.xlu1 %v1606_v11, %s23423_s28  ;;  %1713 = vrot.lane.b32.xlu0 %v1684_v1, %s23427_s25  ;;  %v1830_v11 = vmul.f32 %v19708_v6, %v1527_v17 }
 0x758   : > { %v19817_v63 = vpop.permute.xlu0 %1414  ;;  %v19819_v10 = vpop.permute.xlu1 %1428 }
 0x75a   : > { %1703 = vrot.lane.b32.xlu1 %v1679_v19, %s23427_s25  ;;  %1786 = vrot.lane.b32.xlu0 %v1757_v38, %s23431_s9 }
 0x75c   : > { %v19825_v13 = vpop.permute.xlu0 %1479  ;;  %v19827_v8 = vpop.permute.xlu1 %1422 }
 0x75d   : > { %23548 = vst [vmem:[#allocation110_spill] sm:$0xff] %v19827_v8 }
 0x75e   : > { %1776 = vrot.lane.b32.xlu1 %v1752_v12, %s23431_s9  ;;  %1859 = vrot.lane.b32.xlu0 %v1830_v11, %s23429_s7 }
 0x760   : > { %v19833_v1 = vpop.permute.xlu0 %1483  ;;  %v19835_v5 = vpop.permute.xlu1 %1481 }
 0x761   : > { %23549 = vst [vmem:[#allocation111_spill] sm:$0xff] %v19833_v1 }
 0x762   : > { %1849 = vrot.lane.b32.xlu1 %v1825_v14, %s23429_s7  ;;  %v311_v14 = vmul.f32 %v19021_v16, %v19036_v24 }
 0x764   : > { %v19839_v19 = vpop.permute.xlu0 %1489  ;;  %v19841_v38 = vpop.permute.xlu1 %1487 }
 0x765   : > { %23550 = vst [vmem:[#allocation112_spill] sm:$0xff] %v19839_v19  ;;  %23551 = vst [vmem:[#allocation113_spill] sm:$0xff] %v19841_v38  ;;  %v318_v38 = vmul.f32 %v19031_v22, %v19044_v28  ;;  %v316_v19 = vmul.f32 %v19018_v15, %v19044_v28 }
 0x768   : > { %v19843_v8 = vpop.permute.xlu0 %1477  ;;  %v19845_v2 = vpop.permute.xlu1 %1491 }
 0x769   : > { %23552 = vst [vmem:[#allocation114_spill] sm:$0xff] %v19843_v8  ;;  %23553 = vst [vmem:[#allocation115_spill] sm:$0xff] %v19845_v2  ;;  %v314_v8 = vmul.f32 %v19031_v22, %v19036_v24  ;;  %v312_v2 = vmul.f32 %v19018_v15, %v19036_v24  ;;  %v364_v15 = vsel %vm23377_vm0, %v19181_v58, %v19149_v42 }
 0x76c   : > { %v19847_v6 = vpop.permute.xlu0 %1551  ;;  %v19849_v12 = vpop.permute.xlu1 %1485 }
 0x76d   : > { %23554 = vst [vmem:[#allocation116_spill] sm:$0xff] %v19847_v6  ;;  %23555 = vst [vmem:[#allocation117_spill] sm:$0xff] %v19849_v12  ;;  %v313_v12 = vmul.f32 %v19034_v23, %v19036_v24  ;;  %v362_v24 = vsel %vm23377_vm0, %v19145_v40, %v19177_v56 }
 0x770   : > { %v19851_v11 = vpop.permute.xlu0 %1555  ;;  %v19853_v1 = vpop.permute.xlu1 %1553 }
 0x771   : > { %23556 = vst [vmem:[#allocation118_spill] sm:$0xff] %v19851_v11  ;;  %v360_v11 = vsel %vm23377_vm0, %v19143_v39, %v19173_v54  ;;  %v317_v39 = vmul.f32 %v19034_v23, %v19044_v28  ;;  %v365_v23 = vsel %vm23377_vm0, %v19149_v42, %v19185_v60  ;;  %v381_v42 = vadd.f32 %v19185_v60, %v318_v38 }
 0x772   : > { %v374_v22 = vadd.f32 %v360_v11, %v311_v14  ;;  %v425_v11 = vsel %vm23378_vm1, %v19193_v0, %v19153_v44  ;;  %v428_v60 = vsel %vm23378_vm1, %v19203_v9, %v19157_v46 }
 0x774   : > { %v19855_v18 = vpop.permute.xlu0 %1563  ;;  %v19857_v17 = vpop.permute.xlu1 %1561 }
 0x775   : > { %23557 = vst [vmem:[#allocation119_spill] sm:$0xff] %v19855_v18  ;;  %23558 = vst [vmem:[#allocation120_spill] sm:$0xff] %v19857_v17  ;;  %v315_v18 = vmul.f32 %v19021_v16, %v19044_v28  ;;  %v361_v17 = vsel %vm23377_vm0, %v19173_v54, %v19145_v40  ;;  %v363_v16 = vsel %vm23377_vm0, %v19147_v41, %v19181_v58 }
 0x776   : > { %v423_v28 = vsel %vm23378_vm1, %v19189_v62, %v19151_v43  ;;  %v377_v40 = vadd.f32 %v19177_v56, %v314_v8  ;;  %v375_v41 = vadd.f32 %v361_v17, %v312_v2  ;;  %v376_v58 = vadd.f32 %v362_v24, %v313_v12 }
 0x777   : > { %v378_v14 = vadd.f32 %v363_v16, %v315_v18  ;;  %v426_v62 = vsel %vm23378_vm1, %v19197_v4, %v19155_v45  ;;  %v380_v56 = vadd.f32 %v365_v23, %v317_v39  ;;  %v437_v8 = vadd.f32 %v423_v28, %v374_v22 }
 0x778   : > { %v19887_v54 = vpop.permute.xlu0 %1549  ;;  %v19889_v6 = vpop.permute.xlu1 %1565  ;;  %v440_v12 = vadd.f32 %v19153_v44, %v377_v40  ;;  %v488_v44 = vsel %vm23379_vm2, %v19159_v47, %v19217_v25  ;;  %v444_v18 = vadd.f32 %v19157_v46, %v381_v42  ;;  %v490_v39 = vsel %vm23379_vm2, %v19219_v26, %v19163_v49 }
 0x779   : > { %23559 = vst [vmem:[#allocation121_spill] sm:$0xff] %v19887_v54  ;;  %23560 = vst [vmem:[#allocation122_spill] sm:$0xff] %v19889_v6  ;;  %v424_v6 = vsel %vm23378_vm1, %v19151_v43, %v19193_v0  ;;  %v379_v54 = vadd.f32 %v364_v15, %v316_v19  ;;  %v427_v43 = vsel %vm23378_vm1, %v19155_v45, %v19203_v9 }
 0x77a   : > { %v438_v17 = vadd.f32 %v424_v6, %v375_v41  ;;  %v439_v0 = vadd.f32 %v425_v11, %v376_v58  ;;  %v441_v4 = vadd.f32 %v426_v62, %v378_v14  ;;  %v486_v19 = vsel %vm23379_vm2, %v19211_v20, %v19215_v21 }
 0x77b   : > { %v487_v45 = vsel %vm23379_vm2, %v19215_v21, %v19159_v47  ;;  %v442_v6 = vadd.f32 %v427_v43, %v379_v54  ;;  %v489_v9 = vsel %vm23379_vm2, %v19161_v48, %v19219_v26  ;;  %v443_v20 = vadd.f32 %v428_v60, %v380_v56  ;;  %v23564_v60 = vld [vmem:[#allocation18_spill] sm:$0xff] }
 0x77c   : > { %v19914_v2 = vpop.permute.xlu1 %1559  ;;  %v19920_v38 = vpop.permute.xlu0 %1624  ;;  %v503_v24 = vadd.f32 %v19217_v25, %v440_v12  ;;  %v491_v21 = vsel %vm23379_vm2, %v19163_v49, %v19221_v29  ;;  %v549_v47 = vsel %vm23386_vm3, %v19223_v30, %v19165_v50  ;;  %v500_v46 = vadd.f32 %v486_v19, %v437_v8  ;;  %v23562_v8 = vld [vmem:[#allocation17_spill] sm:$0xff] }
 0x77d   : > { %v501_v16 = vadd.f32 %v487_v45, %v438_v17  ;;  %v502_v54 = vadd.f32 %v488_v44, %v439_v0  ;;  %v550_v48 = vsel %vm23386_vm3, %v19165_v50, %v19225_v31  ;;  %v504_v22 = vadd.f32 %v489_v9, %v441_v4  ;;  %v23563_v12 = vld [vmem:[#allocation13_spill] sm:$0xff]  ;;  %v23565_v4 = vld [vmem:[#allocation14_spill] sm:$0xff]  ;;  %v23566_v44 = vld [vmem:[#allocation19_spill] sm:$0xff] }
 0x77e   : > { %v505_v25 = vadd.f32 %v490_v39, %v442_v6  ;;  %v507_v15 = vadd.f32 %v19221_v29, %v444_v18  ;;  %v566_v49 = vadd.f32 %v19167_v51, %v503_v24  ;;  %v506_v23 = vadd.f32 %v491_v21, %v443_v20  ;;  %v23567_v20 = vld [vmem:[#allocation15_spill] sm:$0xff]  ;;  %v23568_v24 = vld [vmem:[#allocation20_spill] sm:$0xff] }
 0x77f   : > { %v563_v28 = vadd.f32 %v549_v47, %v500_v46  ;;  %v551_v30 = vsel %vm23386_vm3, %v19225_v31, %v19167_v51  ;;  %v552_v40 = vsel %vm23386_vm3, %v19227_v32, %v19169_v52  ;;  %v564_v50 = vadd.f32 %v550_v48, %v501_v16  ;;  %v23569_v47 = vld [vmem:[#allocation21_spill] sm:$0xff]  ;;  %v23570_v16 = vld [vmem:[#allocation16_spill] sm:$0xff] }
 0x780   : > { %v19948_v26 = vpop.permute.xlu1 %1626  ;;  %v19958_v41 = vpop.permute.xlu0 %1628  ;;  %v570_v11 = vadd.f32 %v19171_v53, %v507_v15  ;;  %v553_v29 = vsel %vm23386_vm3, %v19169_v52, %v19229_v33  ;;  %v554_v58 = vsel %vm23386_vm3, %v19229_v33, %v19171_v53  ;;  %v612_v51 = vsel %vm23387_vm4, %v19231_v34, %v19233_v35  ;;  %v23561_v33 = vld [vmem:[#allocation12_spill] sm:$0xff]  ;;  %v23572_v15 = vld [vmem:[#allocation22_spill] sm:$0xff] }
 0x781   : > { %v613_v31 = vsel %vm23387_vm4, %v19233_v35, %v19175_v55  ;;  %v614_v32 = vsel %vm23387_vm4, %v19175_v55, %v19235_v36  ;;  %v629_v14 = vadd.f32 %v19235_v36, %v566_v49  ;;  %v565_v42 = vadd.f32 %v551_v30, %v502_v54 }
 0x782   : > { %v567_v52 = vadd.f32 %v552_v40, %v504_v22  ;;  %v615_v53 = vsel %vm23387_vm4, %v19179_v57, %v19237_v37  ;;  %v616_v34 = vsel %vm23387_vm4, %v19237_v37, %v23561_v33  ;;  %v568_v62 = vadd.f32 %v553_v29, %v505_v25  ;;  %v23571_v25 = vld [vmem:[#allocation23_spill] sm:$0xff]  ;;  %v23574_v40 = vld [vmem:[#allocation25_spill] sm:$0xff] }
 0x783   : > { %v569_v56 = vadd.f32 %v554_v58, %v506_v23  ;;  %v617_v35 = vsel %vm23387_vm4, %v23561_v33, %v23562_v8  ;;  %v633_v55 = vadd.f32 %v23562_v8, %v570_v11  ;;  %v626_v36 = vadd.f32 %v612_v51, %v563_v28  ;;  %v23573_v28 = vld [vmem:[#allocation24_spill] sm:$0xff]  ;;  %v23575_v51 = vld [vmem:[#allocation27_spill] sm:$0xff] }
 0x784   : > { %v19987_v43 = vpop.permute.xlu1 %1634  ;;  %v627_v17 = vadd.f32 %v613_v31, %v564_v50  ;;  %v628_v0 = vadd.f32 %v614_v32, %v565_v42  ;;  %v675_v57 = vsel %vm23388_vm5, %v23564_v60, %v23563_v12  ;;  %v692_v19 = vadd.f32 %v23565_v4, %v629_v14  ;;  %v19996_v18 = vpop.permute.xlu0 %1636  ;;  %v23576_v31 = vld [vmem:[#allocation26_spill] sm:$0xff] }
 0x785   : > { %v630_v37 = vadd.f32 %v615_v53, %v567_v52  ;;  %v631_v45 = vadd.f32 %v616_v34, %v568_v62  ;;  %v676_v6 = vsel %vm23388_vm5, %v23563_v12, %v23566_v44  ;;  %v632_v9 = vadd.f32 %v617_v35, %v569_v56  ;;  %v23577_v53 = vld [vmem:[#allocation28_spill] sm:$0xff]  ;;  %v23578_v34 = vld [vmem:[#allocation29_spill] sm:$0xff] }
 0x786   : > { %v677_v39 = vsel %vm23388_vm5, %v23566_v44, %v23565_v4  ;;  %v678_v21 = vsel %vm23388_vm5, %v23568_v24, %v23567_v20  ;;  %v679_v46 = vsel %vm23388_vm5, %v23567_v20, %v23569_v47  ;;  %v696_v54 = vadd.f32 %v23570_v16, %v633_v55  ;;  %v23579_v55 = vld [vmem:[#allocation30_spill] sm:$0xff]  ;;  %v23582_v44 = vld [vmem:[#allocation32_spill] sm:$0xff] }
 0x787   : > { %v689_v48 = vadd.f32 %v675_v57, %v626_v36  ;;  %v680_v22 = vsel %vm23388_vm5, %v23569_v47, %v23570_v16  ;;  %v738_v49 = vsel %vm23411_vm6, %v23572_v15, %v23571_v25  ;;  %v690_v23 = vadd.f32 %v676_v6, %v627_v17  ;;  %v23580_v36 = vld [vmem:[#allocation31_spill] sm:$0xff]  ;;  %v23581_v57 = vld [vmem:[#allocation33_spill] sm:$0xff]  ;;  %v23583_v6 = vld [vmem:[#allocation34_spill] sm:$0xff] }
 0x788   : > { %v739_v30 = vsel %vm23411_vm6, %v23571_v25, %v23573_v28  ;;  %v740_v50 = vsel %vm23411_vm6, %v23573_v28, %v23574_v40  ;;  %v691_v11 = vadd.f32 %v677_v39, %v628_v0  ;;  %v693_v29 = vadd.f32 %v678_v21, %v630_v37  ;;  %v20023_v14 = vpop.permute.xlu1 %1638  ;;  %v20035_v0 = vpop.permute.xlu0 %1622  ;;  %v23585_v21 = vld [vmem:[#allocation37_spill] sm:$0xff]  ;;  %v23589_v15 = vld [vmem:[#allocation39_spill] sm:$0xff] }
 0x789   : > { %v694_v58 = vadd.f32 %v679_v46, %v631_v45  ;;  %v741_v32 = vsel %vm23411_vm6, %v23576_v31, %v23575_v51  ;;  %v695_v42 = vadd.f32 %v680_v22, %v632_v9  ;;  %v752_v52 = vadd.f32 %v738_v49, %v689_v48  ;;  %v23584_v9 = vld [vmem:[#allocation35_spill] sm:$0xff]  ;;  %v23586_v46 = vld [vmem:[#allocation36_spill] sm:$0xff]  ;;  %v23588_v22 = vld [vmem:[#allocation38_spill] sm:$0xff] }
 0x78a   : > { %v742_v33 = vsel %vm23411_vm6, %v23575_v51, %v23577_v53  ;;  %v743_v62 = vsel %vm23411_vm6, %v23577_v53, %v23578_v34  ;;  %v753_v56 = vadd.f32 %v739_v30, %v690_v23  ;;  %v754_v8 = vadd.f32 %v740_v50, %v691_v11  ;;  %v23587_v48 = vld [vmem:[#allocation40_spill] sm:$0xff]  ;;  %v23590_v50 = vld [vmem:[#allocation42_spill] sm:$0xff]  ;;  %v23592_v31 = vld [vmem:[#allocation41_spill] sm:$0xff] }
 0x78b   : > { %v755_v35 = vadd.f32 %v23574_v40, %v692_v19  ;;  %v801_v17 = vsel %vm800_vm7, %v23580_v36, %v23579_v55  ;;  %v756_v12 = vadd.f32 %v741_v32, %v693_v29  ;;  %v759_v60 = vadd.f32 %v23578_v34, %v696_v54  ;;  %v23591_v51 = vld [vmem:[#allocation44_spill] sm:$0xff] }
 0x78c   : > { %v802_v4 = vsel %vm800_vm7, %v23579_v55, %v23581_v57  ;;  %v757_v37 = vadd.f32 %v742_v33, %v694_v58  ;;  %v758_v45 = vadd.f32 %v743_v62, %v695_v42  ;;  %v803_v19 = vsel %vm800_vm7, %v23581_v57, %v23582_v44  ;;  %v20060_v23 = vpop.permute.xlu1 %1632  ;;  %v23593_v42 = vld [vmem:[#allocation43_spill] sm:$0xff]  ;;  %v20072_v53 = vpop.permute.xlu0 %1697  ;;  %v23594_v62 = vld [vmem:[#allocation45_spill] sm:$0xff] }
 0x78d   : > { %v804_v39 = vsel %vm800_vm7, %v23584_v9, %v23583_v6  ;;  %v815_v20 = vadd.f32 %v801_v17, %v752_v52  ;;  %v818_v24 = vadd.f32 %v23582_v44, %v755_v35  ;;  %v805_v47 = vsel %vm800_vm7, %v23583_v6, %v23585_v21  ;;  %v23596_v35 = vld [vmem:[#allocation47_spill] sm:$0xff] }
 0x78e   : > { %v806_v16 = vsel %vm800_vm7, %v23585_v21, %v23586_v46  ;;  %v816_v54 = vadd.f32 %v802_v4, %v753_v56  ;;  %v864_v25 = vsel %vm863_vm8, %v23588_v22, %v23587_v48  ;;  %v865_v49 = vsel %vm863_vm8, %v23587_v48, %v23589_v15  ;;  %v23603_v22 = vld [vmem:[#allocation56_spill] sm:$0xff] }
 0x78f   : > { %v817_v28 = vadd.f32 %v803_v19, %v754_v8  ;;  %v819_v30 = vadd.f32 %v804_v39, %v756_v12  ;;  %v822_v40 = vadd.f32 %v23586_v46, %v759_v60  ;;  %v866_v11 = vsel %vm863_vm8, %v23589_v15, %v23590_v50  ;;  %v23595_v8 = vld [vmem:[#allocation46_spill] sm:$0xff]  ;;  %v23597_v12 = vld [vmem:[#allocation49_spill] sm:$0xff] }
 0x790   : > { %v820_v29 = vadd.f32 %v805_v47, %v757_v37  ;;  %v821_v58 = vadd.f32 %v806_v16, %v758_v45  ;;  %v867_v32 = vsel %vm863_vm8, %v23592_v31, %v23591_v51  ;;  %v868_v52 = vsel %vm863_vm8, %v23591_v51, %v23593_v42  ;;  %v23598_v45 = vld [vmem:[#allocation48_spill] sm:$0xff]  ;;  %v23599_v39 = vld [vmem:[#allocation50_spill] sm:$0xff]  ;;  %v20092_v21 = vpop.permute.xlu1 %1699  ;;  %v23601_v46 = vld [vmem:[#allocation53_spill] sm:$0xff] }
 0x791   : > { %v878_v33 = vadd.f32 %v864_v25, %v815_v20  ;;  %v879_v34 = vadd.f32 %v865_v49, %v816_v54  ;;  %v869_v56 = vsel %vm863_vm8, %v23593_v42, %v23594_v62  ;;  %v927_v55 = vsel %vm23348_vm9, %v23596_v35, %v23595_v8  ;;  %v23600_v20 = vld [vmem:[#allocation51_spill] sm:$0xff]  ;;  %v23602_v54 = vld [vmem:[#allocation52_spill] sm:$0xff]  ;;  %v23604_v25 = vld [vmem:[#allocation54_spill] sm:$0xff] }
 0x792   : > { %v880_v36 = vadd.f32 %v866_v11, %v817_v28  ;;  %v881_v17 = vadd.f32 %v23590_v50, %v818_v24  ;;  %v928_v60 = vsel %vm23348_vm9, %v23595_v8, %v23597_v12  ;;  %v882_v57 = vadd.f32 %v867_v32, %v819_v30  ;;  %v23605_v28 = vld [vmem:[#allocation55_spill] sm:$0xff]  ;;  %v20109_v11 = vpop.permute.xlu0 %1701  ;;  %v23607_v51 = vld [vmem:[#allocation60_spill] sm:$0xff]  ;;  %v23608_v31 = vld [vmem:[#allocation57_spill] sm:$0xff] }
 0x793   : > { %v883_v4 = vadd.f32 %v868_v52, %v820_v29  ;;  %v885_v37 = vadd.f32 %v23594_v62, %v822_v40  ;;  %v929_v44 = vsel %vm23348_vm9, %v23597_v12, %v23598_v45  ;;  %v884_v19 = vadd.f32 %v869_v56, %v821_v58  ;;  %v23606_v40 = vld [vmem:[#allocation58_spill] sm:$0xff]  ;;  %v23609_v42 = vld [vmem:[#allocation59_spill] sm:$0xff]  ;;  %v23610_v56 = vld [vmem:[#allocation61_spill] sm:$0xff] }
 0x794   : > { %v941_v6 = vadd.f32 %v927_v55, %v878_v33  ;;  %v944_v9 = vadd.f32 %v23598_v45, %v881_v17  ;;  %v930_v24 = vsel %vm23348_vm9, %v23600_v20, %v23599_v39  ;;  %v942_v47 = vadd.f32 %v928_v60, %v879_v34  ;;  %v23611_v17 = vld [vmem:[#allocation62_spill] sm:$0xff]  ;;  %v23612_v12 = vld [vmem:[#allocation63_spill] sm:$0xff]  ;;  %v23613_v45 = vld [vmem:[#allocation65_spill] sm:$0xff] }
 0x795   : > { %v931_v16 = vsel %vm23348_vm9, %v23599_v39, %v23601_v46  ;;  %v932_v48 = vsel %vm23348_vm9, %v23601_v46, %v23602_v54  ;;  %v990_v15 = vsel %vm23347_vm10, %v23604_v25, %v23603_v22  ;;  %v943_v49 = vadd.f32 %v929_v44, %v880_v36  ;;  %v20128_v44 = vpop.permute.xlu1 %1707  ;;  %v23614_v39 = vld [vmem:[#allocation64_spill] sm:$0xff]  ;;  %v23615_v20 = vld [vmem:[#allocation66_spill] sm:$0xff] }
 0x796   : > { %v991_v30 = vsel %vm23347_vm10, %v23603_v22, %v23605_v28  ;;  %v992_v50 = vsel %vm23347_vm10, %v23605_v28, %v23606_v40  ;;  %v945_v29 = vadd.f32 %v930_v24, %v882_v57  ;;  %v948_v58 = vadd.f32 %v23602_v54, %v885_v37  ;;  %v23616_v24 = vld [vmem:[#allocation67_spill] sm:$0xff]  ;;  %v23617_v54 = vld [vmem:[#allocation69_spill] sm:$0xff]  ;;  %v23618_v22 = vld [vmem:[#allocation68_spill] sm:$0xff] }
 0x797   : > { %v993_v32 = vsel %vm23347_vm10, %v23608_v31, %v23607_v51  ;;  %v994_v52 = vsel %vm23347_vm10, %v23607_v51, %v23609_v42  ;;  %v946_v33 = vadd.f32 %v931_v16, %v883_v4  ;;  %v947_v34 = vadd.f32 %v932_v48, %v884_v19  ;;  %v23619_v28 = vld [vmem:[#allocation72_spill] sm:$0xff] }
 0x798   : > { %v1004_v62 = vadd.f32 %v990_v15, %v941_v6  ;;  %v995_v8 = vsel %vm23347_vm10, %v23609_v42, %v23610_v56  ;;  %v1005_v35 = vadd.f32 %v991_v30, %v942_v47  ;;  %v1006_v55 = vadd.f32 %v992_v50, %v943_v49  ;;  %v20144_v15 = vpop.permute.xlu0 %1709  ;;  %v23620_v30 = vld [vmem:[#allocation70_spill] sm:$0xff]  ;;  %v23621_v50 = vld [vmem:[#allocation71_spill] sm:$0xff] }
 0x799   : > { %v1007_v36 = vadd.f32 %v23606_v40, %v944_v9  ;;  %v1053_v60 = vsel %vm23346_vm11, %v23612_v12, %v23611_v17  ;;  %v1008_v57 = vadd.f32 %v993_v32, %v945_v29  ;;  %v1009_v37 = vadd.f32 %v994_v52, %v946_v33  ;;  %v23622_v32 = vld [vmem:[#allocation74_spill] sm:$0xff] }
 0x79a   : > { %v1054_v4 = vsel %vm23346_vm11, %v23611_v17, %v23613_v45  ;;  %v1010_v19 = vadd.f32 %v995_v8, %v947_v34  ;;  %v1011_v6 = vadd.f32 %v23610_v56, %v948_v58  ;;  %v1055_v9 = vsel %vm23346_vm11, %v23613_v45, %v23614_v39  ;;  %v23623_v34 = vld [vmem:[#allocation76_spill] sm:$0xff]  ;;  %v23625_v8 = vld [vmem:[#allocation75_spill] sm:$0xff] }
 0x79b   : > { %v1056_v47 = vsel %vm23346_vm11, %v23616_v24, %v23615_v20  ;;  %v1067_v46 = vadd.f32 %v1053_v60, %v1004_v62  ;;  %v1070_v16 = vadd.f32 %v23614_v39, %v1007_v36  ;;  %v1057_v48 = vsel %vm23346_vm11, %v23615_v20, %v23617_v54  ;;  %v23624_v62 = vld [vmem:[#allocation73_spill] sm:$0xff]  ;;  %v23627_v60 = vld [vmem:[#allocation78_spill] sm:$0xff] }
 0x79c   : > { %v1058_v25 = vsel %vm23346_vm11, %v23617_v54, %v23618_v22  ;;  %v1068_v49 = vadd.f32 %v1054_v4, %v1005_v35  ;;  %v1116_v40 = vsel %vm23345_vm12, %v23620_v30, %v23619_v28  ;;  %v1117_v29 = vsel %vm23345_vm12, %v23619_v28, %v23621_v50  ;;  %v23629_v39 = vld [vmem:[#allocation81_spill] sm:$0xff]  ;;  %v23632_v28 = vld [vmem:[#allocation83_spill] sm:$0xff] }
 0x79d   : > { %v1069_v58 = vadd.f32 %v1055_v9, %v1006_v55  ;;  %v1071_v51 = vadd.f32 %v1056_v47, %v1008_v57  ;;  %v1074_v31 = vadd.f32 %v23618_v22, %v1011_v6  ;;  %v1118_v42 = vsel %vm23345_vm12, %v23621_v50, %v23622_v32  ;;  %v23626_v55 = vld [vmem:[#allocation77_spill] sm:$0xff]  ;;  %v23628_v57 = vld [vmem:[#allocation79_spill] sm:$0xff] }
 0x79e   : > { %v1072_v52 = vadd.f32 %v1057_v48, %v1009_v37  ;;  %v1073_v33 = vadd.f32 %v1058_v25, %v1010_v19  ;;  %v1119_v56 = vsel %vm23345_vm12, %v23624_v62, %v23623_v34  ;;  %v1120_v35 = vsel %vm23345_vm12, %v23623_v34, %v23625_v8  ;;  %v20168_v37 = vpop.permute.xlu1 %1711  ;;  %v23638_v34 = vld [vmem:[#allocation87_spill] sm:$0xff] }
 0x79f   : > { %v1130_v36 = vadd.f32 %v1116_v40, %v1067_v46  ;;  %v1131_v17 = vadd.f32 %v1117_v29, %v1068_v49  ;;  %v1121_v12 = vsel %vm23345_vm12, %v23625_v8, %v23626_v55  ;;  %v1179_v45 = vsel %vm23344_vm13, %v23628_v57, %v23627_v60  ;;  %v23630_v46 = vld [vmem:[#allocation80_spill] sm:$0xff]  ;;  %v23631_v49 = vld [vmem:[#allocation82_spill] sm:$0xff]  ;;  %v23633_v40 = vld [vmem:[#allocation85_spill] sm:$0xff] }
 0x7a0   : > { %v1132_v19 = vadd.f32 %v1118_v42, %v1069_v58  ;;  %v1133_v6 = vadd.f32 %v23622_v32, %v1070_v16  ;;  %v1180_v9 = vsel %vm23344_vm13, %v23627_v60, %v23629_v39  ;;  %v1134_v20 = vadd.f32 %v1119_v56, %v1071_v51  ;;  %v23634_v29 = vld [vmem:[#allocation84_spill] sm:$0xff]  ;;  %v23639_v56 = vld [vmem:[#allocation90_spill] sm:$0xff]  ;;  %v23643_v57 = vld [vmem:[#allocation93_spill] sm:$0xff] }
 0x7a1   : > { %v1135_v24 = vadd.f32 %v1120_v35, %v1072_v52  ;;  %v1137_v47 = vadd.f32 %v23626_v55, %v1074_v31  ;;  %v1181_v54 = vsel %vm23344_vm13, %v23629_v39, %v23630_v46  ;;  %v1136_v48 = vadd.f32 %v1121_v12, %v1073_v33  ;;  %v23635_v51 = vld [vmem:[#allocation88_spill] sm:$0xff]  ;;  %v23636_v31 = vld [vmem:[#allocation86_spill] sm:$0xff]  ;;  %v23642_v12 = vld [vmem:[#allocation91_spill] sm:$0xff] }
 0x7a2   : > { %v1193_v22 = vadd.f32 %v1179_v45, %v1130_v36  ;;  %v1196_v25 = vadd.f32 %v23630_v46, %v1133_v6  ;;  %v1182_v16 = vsel %vm23344_vm13, %v23632_v28, %v23631_v49  ;;  %v1194_v30 = vadd.f32 %v1180_v9, %v1131_v17  ;;  %v23640_v35 = vld [vmem:[#allocation92_spill] sm:$0xff]  ;;  %v23641_v36 = vld [vmem:[#allocation89_spill] sm:$0xff] }
 0x7a3   : > { %v1183_v50 = vsel %vm23344_vm13, %v23631_v49, %v23633_v40  ;;  %v1184_v58 = vsel %vm23344_vm13, %v23633_v40, %v23634_v29  ;;  %v1242_v32 = vsel %vm23343_vm14, %v23636_v31, %v23635_v51  ;;  %v1195_v33 = vadd.f32 %v1181_v54, %v1132_v19 }
 0x7a4   : > { %v1243_v62 = vsel %vm23343_vm14, %v23635_v51, %v23638_v34  ;;  %v1244_v8 = vsel %vm23343_vm14, %v23638_v34, %v23639_v56  ;;  %v1245_v17 = vsel %vm23343_vm14, %v23641_v36, %v23640_v35  ;;  %v1197_v55 = vadd.f32 %v1182_v16, %v1134_v20  ;;  %v23644_v34 = vld [vmem:[#allocation95_spill] sm:$0xff] }
 0x7a5   : > { %v20170_v4 = vpop.permute.xlu0 %1887  ;;  %v1246_v60 = vsel %vm23343_vm14, %v23640_v35, %v23642_v12  ;;  %v1247_v45 = vsel %vm23343_vm14, %v23642_v12, %v23643_v57  ;;  %v1200_v19 = vadd.f32 %v23634_v29, %v1137_v47  ;;  %v1198_v6 = vadd.f32 %v1183_v50, %v1135_v24  ;;  %v23645_v35 = vld [vmem:[#allocation94_spill] sm:$0xff]  ;;  %v23646_v47 = vld [vmem:[#allocation96_spill] sm:$0xff]  ;;  %v23649_v50 = vld [vmem:[#allocation99_spill] sm:$0xff] }
 0x7a6   : > { %v1199_v39 = vadd.f32 %v1184_v58, %v1136_v48  ;;  %v1256_v9 = vadd.f32 %v1242_v32, %v1193_v22  ;;  %v1257_v46 = vadd.f32 %v1243_v62, %v1194_v30  ;;  %v1258_v54 = vadd.f32 %v1244_v8, %v1195_v33  ;;  %v23647_v22 = vld [vmem:[#allocation97_spill] sm:$0xff]  ;;  %v23650_v58 = vld [vmem:[#allocation100_spill] sm:$0xff]  ;;  %v23651_v62 = vld [vmem:[#allocation102_spill] sm:$0xff] }
 0x7a7   : > { %v1259_v49 = vadd.f32 %v23639_v56, %v1196_v25  ;;  %v1260_v28 = vadd.f32 %v1245_v17, %v1197_v55  ;;  %v1261_v40 = vadd.f32 %v1246_v60, %v1198_v6  ;;  %v20219_v31 = vadd.f32 %v23643_v57, %v1200_v19  ;;  %v23648_v25 = vld [vmem:[#allocation98_spill] sm:$0xff]  ;;  %v23652_v55 = vld [vmem:[#allocation104_spill] sm:$0xff]  ;;  %v23653_v12 = vld [vmem:[#allocation101_spill] sm:$0xff] }
 0x7a8   : > { %v1262_v51 = vadd.f32 %v1247_v45, %v1199_v39  ;;  %v1306_v24 = vsel %vm23349_vm15, %v23645_v35, %v23644_v34  ;;  %vm23351_vm14 = vcmask 637952   ;;  %vm1430_vm13 = vcmask 629760   ;;  %v23654_v57 = vld [vmem:[#allocation103_spill] sm:$0xff]  ;;  %v23655_v19 = vld [vmem:[#allocation105_spill] sm:$0xff]  ;;  %v23656_v6 = vld [vmem:[#allocation106_spill] sm:$0xff] }
 0x7a9   : > { %v20193_v42 = vpop.permute.xlu0 %1705  ;;  %v20195_v52 = vpop.permute.xlu1 %1891  ;;  %vm1493_vm12 = vcmask 621568   ;;  %vm1569_vm11 = vcmask 523264   ;;  %v1307_v48 = vsel %vm23349_vm15, %v23644_v34, %v23646_v47  ;;  %v1309_v30 = vsel %vm23349_vm15, %v23648_v25, %v23647_v22 }
 0x7aa   : > { %23637 = vst [vmem:[#allocation12_spill] sm:$0xff] %v20195_v52  ;;  %v1305_v29 = vsel %vm23349_vm15, %v23649_v50, %v23645_v35  ;;  %v1310_v32 = vsel %vm23349_vm15, %v23647_v22, %v23650_v58  ;;  %v1320_v33 = vadd.f32 %v1306_v24, %v1257_v46  ;;  %v1308_v56 = vsel %vm23349_vm15, %v23651_v62, %v23648_v25  ;;  %v23658_v25 = vld [vmem:[#allocation108_spill] sm:$0xff] }
 0x7ab   : > { %vm1642_vm10 = vcmask 515072   ;;  %vm23362_vm9 = vcmask 506880   ;;  %v20244_v17 = vadd.f32 %v23646_v47, %v1259_v49  ;;  %v1369_v60 = vsel %vm23351_vm14, %v23653_v12, %v23652_v55  ;;  %v23657_v49 = vld [vmem:[#allocation107_spill] sm:$0xff] }
 0x7ac   : > { %v1370_v45 = vsel %vm23351_vm14, %v23652_v55, %v23654_v57  ;;  %v1372_v39 = vsel %vm23351_vm14, %v23656_v6, %v23655_v19  ;;  %v1321_v46 = vadd.f32 %v1307_v48, %v1258_v54  ;;  %v1324_v34 = vadd.f32 %v1309_v30, %v1261_v40 }
 0x7ad   : > { %v20214_v20 = vpop.permute.xlu0 %1772  ;;  %v20216_v16 = vpop.permute.xlu1 %1695  ;;  %v1319_v35 = vadd.f32 %v1305_v29, %v1256_v9  ;;  %v1325_v24 = vadd.f32 %v1310_v32, %v1262_v51  ;;  %vm23361_vm15 = vcmask 498688   ;;  %v1323_v22 = vadd.f32 %v1308_v56, %v1260_v28  ;;  %v23659_v9 = vld [vmem:[#allocation109_spill] sm:$0xff] }
 0x7ae   : > { %v1368_v47 = vsel %vm23351_vm14, %v23657_v49, %v23653_v12  ;;  %v1373_v50 = vsel %vm23351_vm14, %v23655_v19, %v23658_v25  ;;  %v1432_v62 = vsel %vm1430_vm13, %v19792_v59, %v19803_v7  ;;  %v1383_v55 = vadd.f32 %v1369_v60, %v1320_v33 }
 0x7af   : > { %v1384_v52 = vadd.f32 %v1370_v45, %v1321_v46  ;;  %v1387_v54 = vadd.f32 %v1372_v39, %v1324_v34  ;;  %v1371_v40 = vsel %vm23351_vm14, %v23659_v9, %v23656_v6  ;;  %v1433_v48 = vsel %vm1430_vm13, %v19803_v7, %v19801_v27  ;;  %v23660_v45 = vld [vmem:[#allocation110_spill] sm:$0xff]  ;;  %v23661_v6 = vld [vmem:[#allocation111_spill] sm:$0xff] }
 0x7b0   : > { %v1435_v30 = vsel %vm1430_vm13, %v19811_v3, %v19809_v61  ;;  %v1431_v29 = vsel %vm1430_vm13, %v19817_v63, %v19792_v59  ;;  %v1495_v32 = vsel %vm1493_vm12, %v19825_v13, %v19835_v5  ;;  %v1382_v33 = vadd.f32 %v1368_v47, %v1319_v35  ;;  %v23662_v63 = vld [vmem:[#allocation116_spill] sm:$0xff] }
 0x7b1   : > { %v20239_v8 = vpop.permute.xlu0 %1780  ;;  %v20241_v36 = vpop.permute.xlu1 %1770  ;;  %v1388_v56 = vadd.f32 %v1373_v50, %v1325_v24  ;;  %v1446_v12 = vadd.f32 %v1432_v62, %v1383_v55  ;;  %v1436_v60 = vsel %vm1430_vm13, %v19809_v61, %v19819_v10  ;;  %vm23358_vm14 = vcmask 490496   ;;  %v23664_v50 = vld [vmem:[#allocation113_spill] sm:$0xff] }
 0x7b2   : > { %v1386_v7 = vadd.f32 %v1371_v40, %v1323_v22  ;;  %v1434_v19 = vsel %vm1430_vm13, %v23660_v45, %v19811_v3  ;;  %v1496_v59 = vsel %vm1493_vm12, %v19835_v5, %v23661_v6  ;;  %v1571_v39 = vsel %vm1569_vm11, %v23662_v63, %v19853_v1  ;;  %v23663_v22 = vld [vmem:[#allocation112_spill] sm:$0xff]  ;;  %v23665_v3 = vld [vmem:[#allocation114_spill] sm:$0xff] }
 0x7b3   : > { %v1447_v46 = vadd.f32 %v1433_v48, %v1384_v52  ;;  %v1450_v34 = vadd.f32 %v1435_v30, %v1387_v54  ;;  %v1445_v35 = vadd.f32 %v1431_v29, %v1382_v33  ;;  %v1509_v24 = vadd.f32 %v1495_v32, %v1446_v12  ;;  %v23666_v54 = vld [vmem:[#allocation115_spill] sm:$0xff]  ;;  %v23667_v30 = vld [vmem:[#allocation117_spill] sm:$0xff]  ;;  %v23668_v32 = vld [vmem:[#allocation118_spill] sm:$0xff] }
 0x7b4   : > { %v1451_v47 = vadd.f32 %v1436_v60, %v1388_v56  ;;  %v1498_v62 = vsel %vm1493_vm12, %v23664_v50, %v23663_v22  ;;  %v1494_v55 = vsel %vm1493_vm12, %v23665_v3, %v19825_v13  ;;  %v1644_v5 = vsel %vm1642_vm10, %v19920_v38, %v19948_v26  ;;  %v23669_v13 = vld [vmem:[#allocation119_spill] sm:$0xff]  ;;  %v23670_v56 = vld [vmem:[#allocation120_spill] sm:$0xff] }
 0x7b5   : > { %v20267_v28 = vpop.permute.xlu0 %1784  ;;  %v20269_v51 = vpop.permute.xlu1 %1774  ;;  %v1449_v9 = vadd.f32 %v1434_v19, %v1386_v7  ;;  %v1510_v52 = vadd.f32 %v1496_v59, %v1447_v46  ;;  %v1499_v40 = vsel %vm1493_vm12, %v23663_v22, %v23666_v54  ;;  %v1587_v48 = vadd.f32 %v1571_v39, %v1509_v24  ;;  %v23671_v19 = vld [vmem:[#allocation121_spill] sm:$0xff] }
 0x7b6   : > { %v1497_v29 = vsel %vm1493_vm12, %v23667_v30, %v23664_v50  ;;  %v1572_v33 = vsel %vm1569_vm11, %v19853_v1, %v23668_v32  ;;  %v1575_v12 = vsel %vm1569_vm11, %v23670_v56, %v23669_v13  ;;  %v1717_v60 = vsel %vm23362_vm9, %v20072_v53, %v20092_v21 }
 0x7b7   : > { %v1513_v7 = vadd.f32 %v1498_v62, %v1450_v34  ;;  %v1508_v45 = vadd.f32 %v1494_v55, %v1445_v35  ;;  %v1570_v59 = vsel %vm1569_vm11, %v23671_v19, %v23662_v63  ;;  %v1660_v39 = vadd.f32 %v1644_v5, %v1587_v48  ;;  %v23672_v5 = vld [vmem:[#allocation122_spill] sm:$0xff] }
 0x7b8   : > { %v1514_v22 = vadd.f32 %v1499_v40, %v1451_v47  ;;  %v1574_v1 = vsel %vm1569_vm11, %v19914_v2, %v23670_v56  ;;  %v1645_v50 = vsel %vm1642_vm10, %v19948_v26, %v19958_v41  ;;  %v1790_v34 = vsel %vm23361_vm15, %v20241_v36, %v20214_v20 }
 0x7b9   : > { %v1779_v49 = vpop.permute.xlu0 %1778  ;;  %v1783_v61 = vpop.permute.xlu1 %1782  ;;  %v1512_v35 = vadd.f32 %v1497_v29, %v1449_v9  ;;  %v1588_v62 = vadd.f32 %v1572_v33, %v1510_v52  ;;  %v1591_v3 = vadd.f32 %v1575_v12, %v1513_v7  ;;  %v1733_v63 = vadd.f32 %v1717_v60, %v1660_v39 }
 0x7ba   : > { %v1586_v55 = vadd.f32 %v1570_v59, %v1508_v45  ;;  %v1576_v47 = vsel %vm1569_vm11, %v23669_v13, %v23672_v5  ;;  %v1647_v2 = vsel %vm1642_vm10, %v20060_v23, %v19987_v43  ;;  %v1718_v26 = vsel %vm23362_vm9, %v20092_v21, %v20109_v11 }
 0x7bb   : > { %v1590_v40 = vadd.f32 %v1574_v1, %v1512_v35  ;;  %v1661_v48 = vadd.f32 %v1645_v50, %v1588_v62  ;;  %v1648_v9 = vsel %vm1642_vm10, %v19987_v43, %v19996_v18  ;;  %v1806_v52 = vadd.f32 %v1790_v34, %v1733_v63 }
 0x7bc   : > { %v1649_v33 = vsel %vm1642_vm10, %v19996_v18, %v20023_v14  ;;  %v1720_v23 = vsel %vm23362_vm9, %v20193_v42, %v20128_v44  ;;  %v1791_v21 = vsel %vm23361_vm15, %v20214_v20, %v20269_v51  ;;  %v1592_v56 = vadd.f32 %v1576_v47, %v1514_v22 }
 0x7bd   : > { %v1846_v46 = vpop.permute.xlu0 %1845  ;;  %v1769_v24 = vpop.permute.xlu1 %1768  ;;  %v1663_v12 = vadd.f32 %v1647_v2, %v1590_v40  ;;  %v1734_v43 = vadd.f32 %v1718_v26, %v1661_v48  ;;  %v1664_v7 = vadd.f32 %v1648_v9, %v1591_v3  ;;  %v1643_v45 = vsel %vm1642_vm10, %v20035_v0, %v19920_v38 }
 0x7be   : > { %v1721_v18 = vsel %vm23362_vm9, %v20128_v44, %v20144_v15  ;;  %v1722_v42 = vsel %vm23362_vm9, %v20144_v15, %v20168_v37  ;;  %v1665_v20 = vadd.f32 %v1649_v33, %v1592_v56  ;;  %v1793_v39 = vsel %vm23361_vm15, %v1779_v49, %v20239_v8 }
 0x7bf   : > { %v1736_v19 = vadd.f32 %v1720_v23, %v1663_v12  ;;  %v1807_v59 = vadd.f32 %v1791_v21, %v1734_v43  ;;  %v1794_v38 = vsel %vm23361_vm15, %v20239_v8, %v1783_v61  ;;  %v1795_v0 = vsel %vm23361_vm15, %v1783_v61, %v20267_v28 }
 0x7c0   : > { %v1326_v50 = vadd.f32 %v23650_v58, %v20219_v31  ;;  %v1737_v34 = vadd.f32 %v1721_v18, %v1664_v7  ;;  %v1738_v49 = vadd.f32 %v1722_v42, %v1665_v20  ;;  %v1385_v62 = vadd.f32 %v23654_v57, %v20244_v17 }
 0x7c1   : > { %v1854_v30 = vpop.permute.xlu0 %1853  ;;  %v1844_v29 = vpop.permute.xlu1 %1843  ;;  %v1659_v3 = vadd.f32 %v1643_v45, %v1586_v55  ;;  %v1716_v8 = vsel %vm23362_vm9, %v20216_v16, %v20072_v53  ;;  %v1809_v61 = vadd.f32 %v1793_v39, %v1736_v19 }
 0x7c2   : > { %v1863_v13 = vsel %vm23358_vm14, %v1844_v29, %v1846_v46  ;;  %v1810_v63 = vadd.f32 %v1794_v38, %v1737_v34  ;;  %v1811_v47 = vadd.f32 %v1795_v0, %v1738_v49  ;;  %v1389_v9 = vadd.f32 %v23658_v25, %v1326_v50 }
 0x7c3   : > { %v1879_v60 = vadd.f32 %v1863_v13, %v1806_v52  ;;  %v1732_v52 = vadd.f32 %v1716_v8, %v1659_v3 }
 0x7c5   : > { %v20364_v22 = vpop.permute.xlu0 %1857  ;;  %v20366_v1 = vpop.permute.xlu1 %1847  ;;  %v1895_v44 = vadd.f32 %v20170_v4, %v1879_v60 }
 0x7c6   : > { %v1864_v15 = vsel %vm23358_vm14, %v1846_v46, %v20366_v1  ;;  %v1789_v46 = vsel %vm23361_vm15, %v1769_v24, %v20241_v36  ;;  %v1448_v36 = vadd.f32 %v19801_v27, %v1385_v62  ;;  %v23673_v24 = vld [vmem:[#allocation12_spill] sm:$0xff] }
 0x7c7   : > { %v1880_v35 = vadd.f32 %v1864_v15, %v1807_v59  ;;  %v1903_v26 = vmax.f32 %v1895_v44, 0.0  ;;  %v1805_v12 = vadd.f32 %v1789_v46, %v1732_v52 }
 0x7c8   : > { %v1511_v25 = vadd.f32 %v23661_v6, %v1448_v36 }
 0x7c9   : > { %v1896_v2 = vadd.f32 %v20170_v4, %v1880_v35  ;;  %v1852_v31 = vpop.permute.xlu0 %1851  ;;  %v1856_v58 = vpop.permute.xlu1 %1855 }
 0x7ca   : > { %v1866_v40 = vsel %vm23358_vm14, %v1852_v31, %v1854_v30  ;;  %v1867_v17 = vsel %vm23358_vm14, %v1854_v30, %v1856_v58  ;;  %v1868_v57 = vsel %vm23358_vm14, %v1856_v58, %v20364_v22  ;;  %v1452_v30 = vadd.f32 %v19819_v10, %v1389_v9 }
 0x7cb   : > { %v1904_v55 = vmax.f32 %v1896_v2, 0.0  ;;  %v1882_v53 = vadd.f32 %v1866_v40, %v1809_v61  ;;  %v1883_v16 = vadd.f32 %v1867_v17, %v1810_v63  ;;  %v1884_v48 = vadd.f32 %v1868_v57, %v1811_v47  ;;  %v20426_v61 = vld [vmem:[#allocation4 + $0x10] sm:$0xff] }
 0x7cc   : > { %v1515_v18 = vadd.f32 %v23666_v54, %v1452_v30  ;;  %v20412_v54 = vld [vmem:[#allocation4] sm:$0xff]  ;;  %v23407_v47 = vmov 0.0  }
 0x7cd   : > { %v1899_v33 = vadd.f32 %v23673_v24, %v1883_v16  ;;  %v1900_v23 = vadd.f32 %v23673_v24, %v1884_v48  ;;  %v1568_v21 = vpop.permute.xlu0 %1567  ;;  %v1842_v13 = vpop.permute.xlu1 %1841  ;;  %v20393_v56 = vpack.i.bf16 %v1904_v55, %v1903_v26  ;;  %v1898_v43 = vadd.f32 %v23673_v24, %v1882_v53  ;;  %2036 = vmatprep.mubr.f32.mxu0 %v23407_v47 }
 0x7ce   : > { %v1862_v60 = vsel %vm23358_vm14, %v1842_v13, %v1844_v29  ;;  %v1577_v27 = vsel %vm1569_vm11, %v23672_v5, %v1568_v21  ;;  %2511 = vmatprep.mubr.f32.mxu1 %v23407_v47 }
 0x7cf   : > { %v1907_v7 = vmax.f32 %v1899_v33, 0.0  ;;  %v1908_v45 = vmax.f32 %v1900_v23, 0.0  ;;  %17466 = vrot.lane.b32.xlu1 %v20393_v56, %s23353_s11  ;;  %v1878_v42 = vadd.f32 %v1862_v60, %v1805_v12  ;;  %v1906_v59 = vmax.f32 %v1898_v43, 0.0 }
 0x7d0   : > { %v1593_v39 = vadd.f32 %v1577_v27, %v1515_v18  ;;  %v23674_v60 = vmov 0 }
 0x7d1   : > { %v1641_v20 = vpop.permute.xlu0 %1640  ;;  %v1558_v10 = vpop.permute.xlu1 %1557  ;;  %v17470_v19 = vpack.i.bf16 %v1908_v45, %v1907_v7  ;;  %v1894_v29 = vadd.f32 %v20170_v4, %v1878_v42  ;;  %v20410_v5 = vpack.c.bf16 %v1907_v7, %v1903_v26  ;;  %v20414_v44 = vpack.c.bf16 %v1908_v45, %v1904_v55  ;;  %v20438_v26 = vld [vmem:[#allocation4 + $0x20] sm:$0xf] }
 0x7d2   : > { %v1650_v6 = vsel %vm1642_vm10, %v20023_v14, %v1641_v20  ;;  %v1573_v38 = vsel %vm1569_vm11, %v23668_v32, %v1558_v10 }
 0x7d3   : > { %17471 = vrot.lane.b32.xlu0 %v17470_v19, %s23353_s11  ;;  %v1902_v0 = vmax.f32 %v1894_v29, 0.0  ;;  %v1666_v14 = vadd.f32 %v1650_v6, %v1593_v39  ;;  %v1589_v35 = vadd.f32 %v1573_v38, %v1511_v25 }
 0x7d5   : > { %v1714_v15 = vpop.permute.xlu0 %1713  ;;  %v1631_v50 = vpop.permute.xlu1 %1630  ;;  %v20418_v49 = vpack.i.bf16 %v1906_v59, %v1902_v0 }
 0x7d6   : > { %v1723_v34 = vsel %vm23362_vm9, %v20168_v37, %v1714_v15  ;;  %v1646_v32 = vsel %vm1642_vm10, %v19958_v41, %v1631_v50  ;;  %v20431_v41 = vpack.c.bf16 %v1906_v59, %v1902_v0 }
 0x7d7   : > { %1916 = vrot.lane.b32.xlu0 %v20412_v54, %s23352_s10  ;;  %17476 = vrot.lane.b32.xlu1 %v20418_v49, %s23353_s11  ;;  %v1739_v62 = vadd.f32 %v1723_v34, %v1666_v14  ;;  %v1662_v37 = vadd.f32 %v1646_v32, %v1589_v35 }
 0x7d9   : > { %v1787_v3 = vpop.permute.xlu0 %1786  ;;  %v1704_v8 = vpop.permute.xlu1 %1703 }
 0x7da   : > { %v1796_v63 = vsel %vm23361_vm15, %v20267_v28, %v1787_v3  ;;  %v1719_v2 = vsel %vm23362_vm9, %v20109_v11, %v1704_v8 }
 0x7db   : > { %v1812_v46 = vadd.f32 %v1796_v63, %v1739_v62  ;;  %1918 = vrot.lane.b32.xlu1 %v20426_v61, %s23352_s10  ;;  %v1735_v17 = vadd.f32 %v1719_v2, %v1662_v37 }
 0x7dd   : > { %v1860_v31 = vpop.permute.xlu0 %1859  ;;  %v1777_v58 = vpop.permute.xlu1 %1776 }
 0x7de   : > { %v1869_v28 = vsel %vm23358_vm14, %v20364_v22, %v1860_v31  ;;  %v1792_v40 = vsel %vm23361_vm15, %v20269_v51, %v1777_v58  ;;  %vm18836_vm15 = vmmov 1  }
 0x7df   : > { %v1885_v57 = vadd.f32 %v1869_v28, %v1812_v46  ;;  %1920 = vrot.lane.b32.xlu1 %v20438_v26, %s23352_s10  ;;  %v1808_v55 = vadd.f32 %v1792_v40, %v1735_v17  ;;  %s23355_s10 = smov 98  }
 0x7e1   : > { %v1901_v11 = vadd.f32 %v23673_v24, %v1885_v57  ;;  %v1850_v53 = vpop.permute.xlu1 %1849 }
 0x7e2   : > { %v1865_v16 = vsel %vm23358_vm14, %v20366_v1, %v1850_v53  ;;  %vm1963_vm14 = vcmask 1041408  }
 0x7e3   : > { %v20449_v48 = vmax.f32 %v1901_v11, 0.0  ;;  %v1881_v9 = vadd.f32 %v1865_v16, %v1808_v55  ;;  %vm20561_vm9 = vmpackc.low %vm1963_vm14, %vm18836_vm15  ;;  %vm23405_vm14 = vcmask 80896   ;;  %vm23679_vm15 = vcmask 785408  }
 0x7e4   : > { %v23675_v60 = vsel %vm20561_vm9, 4294967295, %v23674_v60 }
 0x7e5   : > { %v1897_v22 = vadd.f32 %v20170_v4, %v1881_v9  ;;  %v20453_v52 = vpack.i.bf16 %v20449_v48, %v1908_v45  ;;  %23676 = vst [vmem:[#allocation17_spill] sm:$0xff] %v23675_v60 }
 0x7e7   : > { %v20455_v51 = vmax.f32 %v1897_v22, 0.0 }
 0x7e9   : > { %v17480_v36 = vpack.i.bf16 %v20449_v48, %v20455_v51  ;;  %v20460_v24 = vpack.i.bf16 %v1907_v7, %v20455_v51  ;;  %v16190_v1 = vpack.c.bf16 %v20449_v48, %v20455_v51 }
 0x7eb   : > { %17481 = vrot.lane.b32.xlu0 %v17480_v36, %s23353_s11  ;;  %17491 = vrot.lane.b32.xlu1 %v20460_v24, %s23370_s12  ;;  %s23420_s11 = smov 88  }
 0x7ef   : > { %17486 = vrot.lane.b32.xlu0 %v20393_v56, %s23370_s12  ;;  %17501 = vrot.lane.b32.xlu1 %v20418_v49, %s23370_s12 }
 0x7f3   : > { %17496 = vrot.lane.b32.xlu0 %v20453_v52, %s23370_s12  ;;  %2320 = vrot.lane.b32.xlu1 %v20426_v61, %s23425_s19 }
 0x7f7   : > { %2318 = vrot.lane.b32.xlu0 %v20412_v54, %s23425_s19  ;;  %17511 = vrot.lane.b32.xlu1 %v20460_v24, %s23356_s13 }
 0x7fb   : > { %17506 = vrot.lane.b32.xlu0 %v20393_v56, %s23356_s13  ;;  %17521 = vrot.lane.b32.xlu1 %v20418_v49, %s23356_s13 }
 0x7ff   : > { %17516 = vrot.lane.b32.xlu0 %v20453_v52, %s23356_s13  ;;  %2542 = vrot.lane.b32.xlu1 %v20412_v54, %s23355_s10  ;;  %s23363_s13 = smov 58  }
 0x803   : > { %2322 = vrot.lane.b32.xlu0 %v20438_v26, %s23425_s19  ;;  %17526 = vrot.lane.b32.xlu1 %v20393_v56, %s23375_s14 }
 0x807   : > { %2544 = vrot.lane.b32.xlu0 %v20426_v61, %s23355_s10  ;;  %17536 = vrot.lane.b32.xlu1 %v20453_v52, %s23375_s14 }
 0x80b   : > { %17531 = vrot.lane.b32.xlu0 %v20460_v24, %s23375_s14  ;;  %2546 = vrot.lane.b32.xlu1 %v20438_v26, %s23355_s10  ;;  %s23417_s10 = smov 68  }
 0x80f   : > { %17541 = vrot.lane.b32.xlu0 %v20418_v49, %s23375_s14  ;;  %2768 = vrot.lane.b32.xlu1 %v20426_v61, %s23420_s11  ;;  %s23678_s14 = smov 77  }
 0x813   : > { %2766 = vrot.lane.b32.xlu0 %v20412_v54, %s23420_s11  ;;  %17551 = vrot.lane.b32.xlu1 %v20460_v24, %s23359_s15 }
 0x817   : > { %17546 = vrot.lane.b32.xlu0 %v20393_v56, %s23359_s15  ;;  %17561 = vrot.lane.b32.xlu1 %v20418_v49, %s23359_s15 }
 0x81b   : > { %17556 = vrot.lane.b32.xlu0 %v20453_v52, %s23359_s15  ;;  %2990 = vrot.lane.b32.xlu1 %v20412_v54, %s23418_s8  ;;  %s23416_s15 = smov 48  }
 0x81f   : > { %2770 = vrot.lane.b32.xlu0 %v20438_v26, %s23420_s11  ;;  %17566 = vrot.lane.b32.xlu1 %v20393_v56, %s23364_s16 }
 0x823   : > { %2992 = vrot.lane.b32.xlu0 %v20426_v61, %s23418_s8  ;;  %17576 = vrot.lane.b32.xlu1 %v20453_v52, %s23364_s16 }
 0x827   : > { %17571 = vrot.lane.b32.xlu0 %v20460_v24, %s23364_s16  ;;  %2994 = vrot.lane.b32.xlu1 %v20438_v26, %s23418_s8 }
 0x82b   : > { %17581 = vrot.lane.b32.xlu0 %v20418_v49, %s23364_s16  ;;  %3216 = vrot.lane.b32.xlu1 %v20426_v61, %s23417_s10  ;;  %s23415_s16 = smov 28  }
 0x82f   : > { %3214 = vrot.lane.b32.xlu0 %v20412_v54, %s23417_s10  ;;  %17591 = vrot.lane.b32.xlu1 %v20460_v24, %s23368_s17 }
 0x833   : > { %17586 = vrot.lane.b32.xlu0 %v20393_v56, %s23368_s17  ;;  %17601 = vrot.lane.b32.xlu1 %v20418_v49, %s23368_s17 }
 0x837   : > { %17596 = vrot.lane.b32.xlu0 %v20453_v52, %s23368_s17  ;;  %3438 = vrot.lane.b32.xlu1 %v20412_v54, %s23363_s13  ;;  %s23412_s17 = smov 116  }
 0x83b   : > { %3218 = vrot.lane.b32.xlu0 %v20438_v26, %s23417_s10  ;;  %17606 = vrot.lane.b32.xlu1 %v20393_v56, %s23372_s18 }
 0x83f   : > { %3440 = vrot.lane.b32.xlu0 %v20426_v61, %s23363_s13  ;;  %17616 = vrot.lane.b32.xlu1 %v20453_v52, %s23372_s18 }
 0x841   : > { %v17467_v4 = vpop.permute.xlu1 %17466 }
 0x842   : > { %v17469_v33 = vunpack.i.h.bf16 %v17467_v4  ;;  %v17468_v23 = vunpack.i.l.bf16 %v17467_v4 }
 0x843   : > { %17611 = vrot.lane.b32.xlu0 %v20460_v24, %s23372_s18  ;;  %3442 = vrot.lane.b32.xlu1 %v20438_v26, %s23363_s13  ;;  %s23366_s13 = smov 38  }
 0x844   : > { %v1947_v12 = vsel %vm23377_vm0, %v17468_v23, %v17469_v33 }
 0x845   : > { %v17472_v21 = vpop.permute.xlu0 %17471 }
 0x846   : > { %v17474_v13 = vunpack.i.h.bf16 %v17472_v21  ;;  %v17473_v30 = vunpack.i.l.bf16 %v17472_v21 }
 0x847   : > { %17621 = vrot.lane.b32.xlu0 %v20418_v49, %s23372_s18  ;;  %3664 = vrot.lane.b32.xlu1 %v20426_v61, %s23416_s15  ;;  %s23677_s18 = smov 79  }
 0x848   : > { %v1950_v43 = vsel %vm23377_vm0, %v17473_v30, %v17474_v13 }
 0x849   : > { %v16172_v25 = vpack.c.bf16 %v1950_v43, %v1947_v12  ;;  %v17477_v7 = vpop.permute.xlu1 %17476  ;;  %v1917_v10 = vpop.permute.xlu0 %1916 }
 0x84a   : > { %v17479_v45 = vunpack.i.h.bf16 %v17477_v7  ;;  %v17478_v27 = vunpack.i.l.bf16 %v17477_v7 }
 0x84b   : > { %16174 = vmatprep.subr.msk.bf16.mxu0 %vm20561_vm9, %v16172_v25  ;;  %3662 = vrot.lane.b32.xlu0 %v20412_v54, %s23416_s15 }
 0x84c   : > { %17631 = vrot.lane.b32.xlu1 %v20460_v24, %s23425_s19  ;;  %v1946_v18 = vsel %vm23377_vm0, %v17478_v27, %v17468_v23  ;;  %v1949_v42 = vsel %vm23377_vm0, %v17479_v45, %v17473_v30 }
 0x84d   : > { %v16175_v20 = vpack.c.bf16 %v1949_v42, %v1946_v18  ;;  %v1919_v19 = vpop.permute.xlu1 %1918 }
 0x84f   : > { %17626 = vrot.lane.b32.xlu0 %v20393_v56, %s23425_s19  ;;  %16177 = vmatpush1.bf16.msk.msra.mxu0 %vm20561_vm9, %v16175_v20 }
 0x850   : > { %17641 = vrot.lane.b32.xlu1 %v20418_v49, %s23425_s19 }
 0x851   : > { %v1921_v59 = vpop.permute.xlu1 %1920 }
 0x852   : > { %15321 = vmatmul.mubr.msk.f32.vlgmr.msra.gmra.mrb[0].mxu0 %vm23405_vm14, %v1917_v10 }
 0x853   : > { %17636 = vrot.lane.b32.xlu0 %v20453_v52, %s23425_s19  ;;  %2042 = vmatprep.mubr.f32.mxu0 %v23407_v47 }
 0x854   : > { %3886 = vrot.lane.b32.xlu1 %v20412_v54, %s23366_s13 }
 0x856   : > { %15322 = vmatmul.mubr.msk.f32.gmra.mrb[2].mxu0 %vm23405_vm14, %v1919_v19 }
 0x857   : > { %3666 = vrot.lane.b32.xlu0 %v20438_v26, %s23416_s15  ;;  %2048 = vmatprep.mubr.f32.mxu0 %v23407_v47 }
 0x858   : > { %17646 = vrot.lane.b32.xlu1 %v20393_v56, %s23401_s20 }
 0x85a   : > { %15323 = vmatmul.mubr.msk.f32.gmra.mrb[4].mxu0 %vm23405_vm14, %v1921_v59 }
 0x85b   : > { %3888 = vrot.lane.b32.xlu0 %v20426_v61, %s23366_s13  ;;  %2119 = vmatprep.mubr.f32.mxu0 %v23407_v47 }
 0x85c   : > { %17656 = vrot.lane.b32.xlu1 %v20453_v52, %s23401_s20 }
 0x85d   : > { %v17482_v39 = vpop.permute.xlu0 %17481  ;;  %v20597_v29 = vpop.permute.xlu1 %17491 }
 0x85e   : > { %v17484_v6 = vunpack.i.h.bf16 %v17482_v39  ;;  %v17483_v38 = vunpack.i.l.bf16 %v17482_v39  ;;  %v17493_v63 = vunpack.i.l.bf16 %v20597_v29  ;;  %v17494_v28 = vunpack.i.h.bf16 %v20597_v29  ;;  %v20737_v39 = vld [vmem:[#allocation4 + $0x8] sm:$0xff] }
 0x85f   : > { %17651 = vrot.lane.b32.xlu0 %v20460_v24, %s23401_s20 }
 0x860   : > { %v1951_v0 = vsel %vm23377_vm0, %v17474_v13, %v17484_v6  ;;  %v1948_v15 = vsel %vm23377_vm0, %v17469_v33, %v17483_v38  ;;  %v16178_v50 = vpack.c.bf16 %v17484_v6, %v17483_v38  ;;  %3890 = vrot.lane.b32.xlu1 %v20438_v26, %s23366_s13  ;;  %s23367_s13 = smov 18   ;;  %vm23680_vm0 = vmmov %vm23679_vm15 }
 0x861   : > { %v16181_v34 = vpack.c.bf16 %v1951_v0, %v1948_v15  ;;  %v20605_v14 = vpop.permute.xlu0 %17486  ;;  %v20607_v35 = vpop.permute.xlu1 %17501 }
 0x862   : > { %16180 = vmatprep.subr.msk.bf16.mxu0 %vm20561_vm9, %v16178_v50  ;;  %v17489_v32 = vunpack.i.h.bf16 %v20605_v14  ;;  %v17488_v40 = vunpack.i.l.bf16 %v20605_v14  ;;  %v17503_v30 = vunpack.i.l.bf16 %v20607_v35 }
 0x863   : > { %17661 = vrot.lane.b32.xlu0 %v20418_v49, %s23401_s20  ;;  %16183 = vmatpush1.bf16.msk.msra.mxu0 %vm20561_vm9, %v16181_v34 }
 0x864   : > { %4112 = vrot.lane.b32.xlu1 %v20426_v61, %s23415_s16  ;;  %16186 = vmatprep.subr.msk.bf16.mxu0 %vm20561_vm9, %v20410_v5  ;;  %v2342_v46 = vsel %vm23378_vm1, %v17489_v32, %v17493_v63  ;;  %v2341_v53 = vsel %vm23378_vm1, %v17488_v40, %v17489_v32  ;;  %v2340_v25 = vsel %vm23378_vm1, %v17503_v30, %v17488_v40 }
 0x865   : > { %v17497_v62 = vpop.permute.xlu0 %17496  ;;  %v20621_v3 = vpop.permute.xlu1 %2320 }
 0x866   : > { %v17498_v8 = vunpack.i.l.bf16 %v17497_v62  ;;  %15326 = vmatmul.mubr.msk.f32.vlgmr.msra.gmra.mrb[6].mxu0 %vm23405_vm14, %v1917_v10  ;;  %v17499_v37 = vunpack.i.h.bf16 %v17497_v62  ;;  %v20761_v62 = vld [vmem:[#allocation4 + $0x18] sm:$0xff] }
 0x867   : > { %4110 = vrot.lane.b32.xlu0 %v20412_v54, %s23415_s16  ;;  %16189 = vmatpush1.bf16.msk.msra.mxu0 %vm20561_vm9, %v20431_v41 }
 0x868   : > { %17671 = vrot.lane.b32.xlu1 %v20460_v24, %s23380_s22  ;;  %16192 = vmatprep.subr.msk.bf16.mxu0 %vm20561_vm9, %v16190_v1  ;;  %v16202_v5 = vpack.c.bf16 %v17499_v37, %v17493_v63  ;;  %v2345_v2 = vsel %vm23378_vm1, %v17498_v8, %v17499_v37  ;;  %v2344_v11 = vsel %vm23378_vm1, %v17494_v28, %v17498_v8 }
 0x869   : > { %v20639_v31 = vpop.permute.xlu0 %2318  ;;  %v20641_v58 = vpop.permute.xlu1 %17511  ;;  %2125 = vmatprep.mubr.f32.mxu0 %v23407_v47  ;;  %v16205_v41 = vpack.c.bf16 %v2345_v2, %v2342_v46  ;;  %v16196_v36 = vpack.c.bf16 %v2344_v11, %v2341_v53 }
 0x86a   : > { %15327 = vmatmul.mubr.msk.f32.gmra.mrb[8].mxu0 %vm23405_vm14, %v1919_v19  ;;  %16204 = vmatprep.subr.msk.bf16.mxu1 %vm20561_vm9, %v16202_v5  ;;  %v17513_v9 = vunpack.i.l.bf16 %v20641_v58  ;;  %v17514_v45 = vunpack.i.h.bf16 %v20641_v58 }
 0x86b   : > { %17666 = vrot.lane.b32.xlu0 %v20393_v56, %s23380_s22  ;;  %16207 = vmatpush1.bf16.msk.msra.mxu1 %vm20561_vm9, %v16205_v41 }
 0x86c   : > { %17681 = vrot.lane.b32.xlu1 %v20418_v49, %s23380_s22  ;;  %2131 = vmatprep.mubr.f32.mxu0 %v23407_v47 }
 0x86d   : > { %v20656_v17 = vpop.permute.xlu0 %17506  ;;  %v20658_v57 = vpop.permute.xlu1 %17521 }
 0x86e   : > { %15328 = vmatmul.mubr.msk.f32.gmra.mrb[10].mxu0 %vm23405_vm14, %v1921_v59  ;;  %15346 = vmatmul.mubr.msk.f32.vlgmr.msra.gmra.mrb[0].mxu1 %vm23405_vm14, %v20639_v31  ;;  %v17509_v55 = vunpack.i.h.bf16 %v20656_v17  ;;  %v17508_v27 = vunpack.i.l.bf16 %v20656_v17  ;;  %v17524_v8 = vunpack.i.h.bf16 %v20658_v57  ;;  %v17523_v37 = vunpack.i.l.bf16 %v20658_v57 }
 0x86f   : > { %17676 = vrot.lane.b32.xlu0 %v20453_v52, %s23380_s22  ;;  %2216 = vmatprep.mubr.f32.mxu0 %v23407_v47  ;;  %s23683_s22 = smov 76  }
 0x870   : > { %4334 = vrot.lane.b32.xlu1 %v20412_v54, %s23367_s13  ;;  %2517 = vmatprep.mubr.f32.mxu1 %v23407_v47  ;;  %v2566_v1 = vsel %vm23379_vm2, %v17509_v55, %v17513_v9  ;;  %v2565_v29 = vsel %vm23379_vm2, %v17508_v27, %v17509_v55  ;;  %v2564_v2 = vsel %vm23379_vm2, %v17523_v37, %v17508_v27 }
 0x871   : > { %v17517_v16 = vpop.permute.xlu0 %17516  ;;  %v20671_v48 = vpop.permute.xlu1 %2542  ;;  %v2567_v58 = vsel %vm23379_vm2, %v17524_v8, %v17514_v45 }
 0x872   : > { %v17519_v22 = vunpack.i.h.bf16 %v17517_v16  ;;  %v17518_v51 = vunpack.i.l.bf16 %v17517_v16  ;;  %15331 = vmatmul.mubr.msk.f32.vlgmr.msra.gmra.mrb[0].mxu0 %vm23405_vm14, %v20412_v54  ;;  %15347 = vmatmul.mubr.msk.f32.gmra.mrb[2].mxu1 %vm23405_vm14, %v20621_v3  ;;  %v16211_v41 = vpack.c.bf16 %v2567_v58, %v2564_v2 }
 0x873   : > { %16195 = vmatpush1.bf16.msk.msra.mxu0 %vm20561_vm9, %v20414_v44  ;;  %4114 = vrot.lane.b32.xlu0 %v20438_v26, %s23415_s16  ;;  %v17504_v44 = vunpack.i.h.bf16 %v20607_v35 }
 0x874   : > { %v2569_v4 = vsel %vm23379_vm2, %v17518_v51, %v17519_v22  ;;  %v16214_v33 = vpack.c.bf16 %v17519_v22, %v17513_v9  ;;  %17686 = vrot.lane.b32.xlu1 %v20393_v56, %s23383_s26  ;;  %16198 = vmatprep.subr.msk.bf16.mxu0 %vm20561_vm9, %v16196_v36  ;;  %v2568_v18 = vsel %vm23379_vm2, %v17514_v45, %v17518_v51  ;;  %vm23682_vm2 = vmmov %vm23680_vm0 }
 0x875   : > { %v16217_v23 = vpack.c.bf16 %v2569_v4, %v2566_v1  ;;  %v20690_v21 = vpop.permute.xlu0 %2322  ;;  %v20692_v13 = vpop.permute.xlu1 %17526  ;;  %2222 = vmatprep.mubr.f32.mxu0 %v23407_v47  ;;  %2523 = vmatprep.mubr.f32.mxu1 %v23407_v47  ;;  %v2343_v7 = vsel %vm23378_vm1, %v17504_v44, %v17494_v28  ;;  %v16208_v0 = vpack.c.bf16 %v2568_v18, %v2565_v29  ;;  %vm23681_vm1 = vmmov %vm23680_vm0 }
 0x876   : > { %15332 = vmatmul.mubr.msk.f32.gmra.mrb[2].mxu0 %vm23405_vm14, %v20426_v61  ;;  %15348 = vmatmul.mubr.msk.f32.gmra.mrb[4].mxu1 %vm23405_vm14, %v20690_v21  ;;  %v16199_v10 = vpack.c.bf16 %v2343_v7, %v2340_v25  ;;  %v17529_v6 = vunpack.i.h.bf16 %v20692_v13  ;;  %v20844_v25 = vld [vmem:[#allocation4 + $0x28] sm:$0xf] }
 0x877   : > { %16216 = vmatprep.subr.msk.bf16.mxu1 %vm20561_vm9, %v16214_v33  ;;  %4336 = vrot.lane.b32.xlu0 %v20426_v61, %s23367_s13 }
 0x878   : > { %17696 = vrot.lane.b32.xlu1 %v20453_v52, %s23383_s26  ;;  %16219 = vmatpush1.bf16.msk.msra.mxu1 %vm20561_vm9, %v16217_v23 }
 0x879   : > { %v20710_v12 = vpop.permute.xlu0 %2544  ;;  %v20712_v43 = vpop.permute.xlu1 %17536  ;;  %2228 = vmatprep.mubr.f32.mxu0 %v23407_v47  ;;  %2735 = vmatprep.mubr.f32.mxu1 %v23407_v47 }
 0x87a   : > { %15333 = vmatmul.mubr.msk.f32.gmra.mrb[4].mxu0 %vm23405_vm14, %v20438_v26  ;;  %v17539_v42 = vunpack.i.h.bf16 %v20712_v43  ;;  %v17538_v20 = vunpack.i.l.bf16 %v20712_v43 }
 0x87b   : > { %15356 = vmatmul.mubr.msk.f32.vlgmr.msra.gmra.mrb[0].mxu1 %vm23405_vm14, %v20671_v48  ;;  %17691 = vrot.lane.b32.xlu0 %v20460_v24, %s23383_s26 }
 0x87c   : > { %4338 = vrot.lane.b32.xlu1 %v20438_v26, %s23367_s13  ;;  %2299 = vmatprep.mubr.f32.mxu0 %v23407_v47  ;;  %v2793_v15 = vsel %vm23386_vm3, %v17538_v20, %v17539_v42  ;;  %s23413_s13 = smov 8  }
 0x87d   : > { %v20732_v19 = vpop.permute.xlu0 %17531  ;;  %v20734_v59 = vpop.permute.xlu1 %2546  ;;  %2741 = vmatprep.mubr.f32.mxu1 %v23407_v47 }
 0x87e   : > { %v17533_v38 = vunpack.i.l.bf16 %v20732_v19  ;;  %15336 = vmatmul.mubr.msk.f32.vlgmr.msra.gmra.mrb[6].mxu0 %vm23405_vm14, %v20412_v54  ;;  %v17534_v63 = vunpack.i.h.bf16 %v20732_v19 }
 0x87f   : > { %16201 = vmatpush1.bf16.msk.msra.mxu0 %vm20561_vm9, %v16199_v10  ;;  %15357 = vmatmul.mubr.msk.f32.gmra.mrb[2].mxu1 %vm23405_vm14, %v20710_v12 }
 0x880   : > { %v2790_v50 = vsel %vm23386_vm3, %v17529_v6, %v17533_v38  ;;  %v16226_v34 = vpack.c.bf16 %v17539_v42, %v17533_v38  ;;  %17701 = vrot.lane.b32.xlu0 %v20418_v49, %s23383_s26  ;;  %4572 = vrot.lane.b32.xlu1 %v20737_v39, %s23413_s13  ;;  %v2792_v28 = vsel %vm23386_vm3, %v17534_v63, %v17538_v20  ;;  %s23389_s26 = smov 56  }
 0x881   : > { %v16229_v14 = vpack.c.bf16 %v2793_v15, %v2790_v50  ;;  %16210 = vmatprep.subr.msk.bf16.mxu0 %vm20561_vm9, %v16208_v0  ;;  %v20756_v35 = vpop.permute.xlu0 %17541  ;;  %v20758_v32 = vpop.permute.xlu1 %2768  ;;  %2305 = vmatprep.mubr.f32.mxu0 %v23407_v47 }
 0x882   : > { %2747 = vmatprep.mubr.f32.mxu1 %v23407_v47  ;;  %15337 = vmatmul.mubr.msk.f32.gmra.mrb[8].mxu0 %vm23405_vm14, %v20426_v61  ;;  %v17544_v55 = vunpack.i.h.bf16 %v20756_v35  ;;  %v17543_v16 = vunpack.i.l.bf16 %v20756_v35 }
 0x883   : > { %15358 = vmatmul.mubr.msk.f32.gmra.mrb[4].mxu1 %vm23405_vm14, %v20734_v59  ;;  %16228 = vmatprep.subr.msk.bf16.mxu1 %vm20561_vm9, %v16226_v34 }
 0x884   : > { %4570 = vrot.lane.b32.xlu0 %v20412_v54, %s23413_s13  ;;  %4576 = vrot.lane.b32.xlu1 %v20761_v62, %s23413_s13  ;;  %v17528_v54 = vunpack.i.l.bf16 %v20692_v13  ;;  %v2791_v30 = vsel %vm23386_vm3, %v17544_v55, %v17534_v63 }
 0x885   : > { %16231 = vmatpush1.bf16.msk.msra.mxu1 %vm20561_vm9, %v16229_v14  ;;  %v20779_v5 = vpop.permute.xlu0 %2766  ;;  %v20781_v46 = vpop.permute.xlu1 %17551  ;;  %2311 = vmatprep.mubr.f32.mxu0 %v23407_v47 }
 0x886   : > { %2959 = vmatprep.mubr.f32.mxu1 %v23407_v47  ;;  %15338 = vmatmul.mubr.msk.f32.gmra.mrb[10].mxu0 %vm23405_vm14, %v20438_v26  ;;  %v4562_v26 = vld [vmem:[#allocation4 + $0x20] sm:$0xf]  ;;  %v2789_v57 = vsel %vm23386_vm3, %v17528_v54, %v17529_v6  ;;  %v17553_v9 = vunpack.i.l.bf16 %v20781_v46  ;;  %v17554_v33 = vunpack.i.h.bf16 %v20781_v46  ;;  %v2788_v43 = vsel %vm23386_vm3, %v17543_v16, %v17528_v54 }
 0x887   : > { %2428 = vmatprep.mubr.f32.mxu0 %v23407_v47  ;;  %v16220_v11 = vpack.c.bf16 %v2792_v28, %v2789_v57  ;;  %v16223_v45 = vpack.c.bf16 %v2791_v30, %v2788_v43 }
 0x888   : > { %15366 = vmatmul.mubr.msk.f32.vlgmr.msra.gmra.mrb[0].mxu1 %vm23405_vm14, %v20779_v5  ;;  %4574 = vrot.lane.b32.xlu0 %v20426_v61, %s23413_s13 }
 0x889   : > { %17711 = vrot.lane.b32.xlu1 %v20460_v24, %s23397_s29  ;;  %v20798_v40 = vpop.permute.xlu0 %17546  ;;  %v20800_v17 = vpop.permute.xlu1 %17561  ;;  %2965 = vmatprep.mubr.f32.mxu1 %v23407_v47 }
 0x88a   : > { %15341 = vmatmul.mubr.msk.f32.vlgmr.msra.gmra.mrb[0].mxu0 %vm23405_vm14, %v20639_v31  ;;  %v17549_v61 = vunpack.i.h.bf16 %v20798_v40  ;;  %v17548_v23 = vunpack.i.l.bf16 %v20798_v40  ;;  %v17564_v29 = vunpack.i.h.bf16 %v20800_v17  ;;  %v17563_v6 = vunpack.i.l.bf16 %v20800_v17 }
 0x88b   : > { %16213 = vmatpush1.bf16.msk.msra.mxu0 %vm20561_vm9, %v16211_v41  ;;  %2434 = vmatprep.mubr.f32.mxu0 %v23407_v47 }
 0x88c   : > { %15367 = vmatmul.mubr.msk.f32.gmra.mrb[2].mxu1 %vm23405_vm14, %v20758_v32  ;;  %17706 = vrot.lane.b32.xlu0 %v20393_v56, %s23397_s29  ;;  %v3014_v36 = vsel %vm23387_vm4, %v17549_v61, %v17553_v9  ;;  %v3012_v63 = vsel %vm23387_vm4, %v17563_v6, %v17548_v23  ;;  %v3015_v46 = vsel %vm23387_vm4, %v17564_v29, %v17554_v33 }
 0x88d   : > { %4578 = vrot.lane.b32.xlu1 %v4562_v26, %s23413_s13  ;;  %v17557_v31 = vpop.permute.xlu0 %17556  ;;  %v20816_v53 = vpop.permute.xlu1 %2990  ;;  %16222 = vmatprep.subr.msk.bf16.mxu0 %vm20561_vm9, %v16220_v11  ;;  %v16235_v58 = vpack.c.bf16 %v3015_v46, %v3012_v63 }
 0x88e   : > { %v17559_v22 = vunpack.i.h.bf16 %v17557_v31  ;;  %v17558_v51 = vunpack.i.l.bf16 %v17557_v31  ;;  %15342 = vmatmul.mubr.msk.f32.gmra.mrb[2].mxu0 %vm23405_vm14, %v20621_v3  ;;  %2971 = vmatprep.mubr.f32.mxu1 %v23407_v47 }
 0x88f   : > { %2440 = vmatprep.mubr.f32.mxu0 %v23407_v47 }
 0x890   : > { %v3017_v1 = vsel %vm23387_vm4, %v17558_v51, %v17559_v22  ;;  %v16238_v4 = vpack.c.bf16 %v17559_v22, %v17553_v9  ;;  %17716 = vrot.lane.b32.xlu0 %v20453_v52, %s23397_s29  ;;  %v3016_v7 = vsel %vm23387_vm4, %v17554_v33, %v17558_v51 }
 0x891   : > { %v16241_v13 = vpack.c.bf16 %v3017_v1, %v3014_v36  ;;  %17721 = vrot.lane.b32.xlu1 %v20418_v49, %s23397_s29  ;;  %v20834_v3 = vpop.permute.xlu0 %2770  ;;  %v20836_v44 = vpop.permute.xlu1 %17566  ;;  %s23774_s29 = smov 93  }
 0x892   : > { %15343 = vmatmul.mubr.msk.f32.gmra.mrb[4].mxu0 %vm23405_vm14, %v20690_v21  ;;  %15368 = vmatmul.mubr.msk.f32.gmra.mrb[4].mxu1 %vm23405_vm14, %v20834_v3  ;;  %v3013_v21 = vsel %vm23387_vm4, %v17548_v23, %v17549_v61  ;;  %v17569_v38 = vunpack.i.h.bf16 %v20836_v44  ;;  %v17568_v35 = vunpack.i.l.bf16 %v20836_v44 }
 0x893   : > { %16240 = vmatprep.subr.msk.bf16.mxu1 %vm20561_vm9, %v16238_v4  ;;  %2652 = vmatprep.mubr.f32.mxu0 %v23407_v47  ;;  %v16232_v42 = vpack.c.bf16 %v3016_v7, %v3013_v21 }
 0x894   : > { %16243 = vmatpush1.bf16.msk.msra.mxu1 %vm20561_vm9, %v16241_v13  ;;  %3183 = vmatprep.mubr.f32.mxu1 %v23407_v47  ;;  %v3237_v54 = vsel %vm23388_vm5, %v17568_v35, %v17569_v38 }
 0x895   : > { %4580 = vrot.lane.b32.xlu0 %v20844_v25, %s23413_s13  ;;  %4806 = vrot.lane.b32.xlu1 %v20761_v62, %s23370_s12  ;;  %v20858_v27 = vpop.permute.xlu0 %2992  ;;  %v17577_v18 = vpop.permute.xlu1 %17576 }
 0x896   : > { %15351 = vmatmul.mubr.msk.f32.vlgmr.msra.gmra.mrb[0].mxu0 %vm23405_vm14, %v20671_v48  ;;  %v17579_v20 = vunpack.i.h.bf16 %v17577_v18  ;;  %v17578_v10 = vunpack.i.l.bf16 %v17577_v18 }
 0x897   : > { %16225 = vmatpush1.bf16.msk.msra.mxu0 %vm20561_vm9, %v16223_v45  ;;  %15376 = vmatmul.mubr.msk.f32.vlgmr.msra.gmra.mrb[0].mxu1 %vm23405_vm14, %v20816_v53 }
 0x898   : > { %16234 = vmatprep.subr.msk.bf16.mxu0 %vm20561_vm9, %v16232_v42  ;;  %2658 = vmatprep.mubr.f32.mxu0 %v23407_v47  ;;  %v3241_v50 = vsel %vm23388_vm5, %v17578_v10, %v17579_v20 }
 0x899   : > { %4804 = vrot.lane.b32.xlu0 %v20737_v39, %s23370_s12  ;;  %17731 = vrot.lane.b32.xlu1 %v20460_v24, %s23399_s23  ;;  %v17572_v48 = vpop.permute.xlu0 %17571  ;;  %v20873_v19 = vpop.permute.xlu1 %2994 }
 0x89a   : > { %v17573_v0 = vunpack.i.l.bf16 %v17572_v48  ;;  %3189 = vmatprep.mubr.f32.mxu1 %v23407_v47  ;;  %15352 = vmatmul.mubr.msk.f32.gmra.mrb[2].mxu0 %vm23405_vm14, %v20710_v12  ;;  %v17574_v15 = vunpack.i.h.bf16 %v17572_v48 }
 0x89b   : > { %15377 = vmatmul.mubr.msk.f32.gmra.mrb[2].mxu1 %vm23405_vm14, %v20858_v27  ;;  %2664 = vmatprep.mubr.f32.mxu0 %v23407_v47 }
 0x89c   : > { %v3238_v34 = vsel %vm23388_vm5, %v17569_v38, %v17573_v0  ;;  %v16250_v14 = vpack.c.bf16 %v17579_v20, %v17573_v0  ;;  %3195 = vmatprep.mubr.f32.mxu1 %v23407_v47  ;;  %v3240_v2 = vsel %vm23388_vm5, %v17574_v15, %v17578_v10 }
 0x89d   : > { %v16253_v8 = vpack.c.bf16 %v3241_v50, %v3238_v34  ;;  %17726 = vrot.lane.b32.xlu0 %v20393_v56, %s23399_s23  ;;  %17741 = vrot.lane.b32.xlu1 %v20418_v49, %s23399_s23  ;;  %v17582_v12 = vpop.permute.xlu0 %17581  ;;  %v20892_v37 = vpop.permute.xlu1 %3216  ;;  %v16244_v28 = vpack.c.bf16 %v3240_v2, %v3237_v54 }
 0x89e   : > { %15353 = vmatmul.mubr.msk.f32.gmra.mrb[4].mxu0 %vm23405_vm14, %v20734_v59  ;;  %16252 = vmatprep.subr.msk.bf16.mxu1 %vm20561_vm9, %v16250_v14  ;;  %v17584_v40 = vunpack.i.h.bf16 %v17582_v12  ;;  %v17583_v17 = vunpack.i.l.bf16 %v17582_v12 }
 0x89f   : > { %15378 = vmatmul.mubr.msk.f32.gmra.mrb[4].mxu1 %vm23405_vm14, %v20873_v19  ;;  %2876 = vmatprep.mubr.f32.mxu0 %v23407_v47 }
 0x8a0   : > { %16255 = vmatpush1.bf16.msk.msra.mxu1 %vm20561_vm9, %v16253_v8  ;;  %3407 = vmatprep.mubr.f32.mxu1 %v23407_v47  ;;  %v3236_v11 = vsel %vm23388_vm5, %v17583_v17, %v17568_v35  ;;  %v3239_v55 = vsel %vm23388_vm5, %v17584_v40, %v17574_v15 }
 0x8a1   : > { %17736 = vrot.lane.b32.xlu0 %v20453_v52, %s23399_s23  ;;  %5028 = vrot.lane.b32.xlu1 %v20737_v39, %s23412_s17  ;;  %v20912_v59 = vpop.permute.xlu0 %3214  ;;  %v20914_v41 = vpop.permute.xlu1 %17591  ;;  %v16247_v13 = vpack.c.bf16 %v3239_v55, %v3236_v11  ;;  %s23778_s23 = smov 56  }
 0x8a2   : > { %15361 = vmatmul.mubr.msk.f32.vlgmr.msra.gmra.mrb[0].mxu0 %vm23405_vm14, %v20779_v5  ;;  %v17594_v16 = vunpack.i.h.bf16 %v20914_v41  ;;  %v17593_v9 = vunpack.i.l.bf16 %v20914_v41 }
 0x8a3   : > { %16237 = vmatpush1.bf16.msk.msra.mxu0 %vm20561_vm9, %v16235_v58  ;;  %15386 = vmatmul.mubr.msk.f32.vlgmr.msra.gmra.mrb[0].mxu1 %vm23405_vm14, %v20912_v59 }
 0x8a4   : > { %16246 = vmatprep.subr.msk.bf16.mxu0 %vm20561_vm9, %v16244_v28  ;;  %2882 = vmatprep.mubr.f32.mxu0 %v23407_v47 }
 0x8a5   : > { %4808 = vrot.lane.b32.xlu0 %v20844_v25, %s23370_s12  ;;  %17746 = vrot.lane.b32.xlu1 %v20393_v56, %s23403_s30  ;;  %v20929_v5 = vpop.permute.xlu0 %17586  ;;  %v20931_v26 = vpop.permute.xlu1 %17601  ;;  %s23374_s12 = smov 106  }
 0x8a6   : > { %3413 = vmatprep.mubr.f32.mxu1 %v23407_v47  ;;  %15362 = vmatmul.mubr.msk.f32.gmra.mrb[2].mxu0 %vm23405_vm14, %v20758_v32  ;;  %v17589_v57 = vunpack.i.h.bf16 %v20929_v5  ;;  %v17588_v61 = vunpack.i.l.bf16 %v20929_v5  ;;  %v17604_v45 = vunpack.i.h.bf16 %v20931_v26  ;;  %v17603_v21 = vunpack.i.l.bf16 %v20931_v26 }
 0x8a7   : > { %15387 = vmatmul.mubr.msk.f32.gmra.mrb[2].mxu1 %vm23405_vm14, %v20892_v37  ;;  %2888 = vmatprep.mubr.f32.mxu0 %v23407_v47 }
 0x8a8   : > { %3419 = vmatprep.mubr.f32.mxu1 %v23407_v47  ;;  %v3461_v36 = vsel %vm23411_vm6, %v17588_v61, %v17589_v57  ;;  %v3462_v1 = vsel %vm23411_vm6, %v17589_v57, %v17593_v9  ;;  %v3460_v38 = vsel %vm23411_vm6, %v17603_v21, %v17588_v61  ;;  %v3463_v0 = vsel %vm23411_vm6, %v17604_v45, %v17594_v16 }
 0x8a9   : > { %5030 = vrot.lane.b32.xlu0 %v20761_v62, %s23412_s17  ;;  %17756 = vrot.lane.b32.xlu1 %v20453_v52, %s23403_s30  ;;  %v17597_v32 = vpop.permute.xlu0 %17596  ;;  %v20948_v31 = vpop.permute.xlu1 %3438  ;;  %v16259_v63 = vpack.c.bf16 %v3463_v0, %v3460_v38 }
 0x8aa   : > { %v17599_v22 = vunpack.i.h.bf16 %v17597_v32  ;;  %v17598_v51 = vunpack.i.l.bf16 %v17597_v32  ;;  %15363 = vmatmul.mubr.msk.f32.gmra.mrb[4].mxu0 %vm23405_vm14, %v20834_v3 }
 0x8ab   : > { %3100 = vmatprep.mubr.f32.mxu0 %v23407_v47 }
 0x8ac   : > { %v3464_v4 = vsel %vm23411_vm6, %v17594_v16, %v17598_v51  ;;  %v3465_v33 = vsel %vm23411_vm6, %v17598_v51, %v17599_v22  ;;  %v16262_v23 = vpack.c.bf16 %v17599_v22, %v17593_v9 }
 0x8ad   : > { %v16265_v44 = vpack.c.bf16 %v3465_v33, %v3462_v1  ;;  %17751 = vrot.lane.b32.xlu0 %v20460_v24, %s23403_s30  ;;  %5032 = vrot.lane.b32.xlu1 %v20844_v25, %s23412_s17  ;;  %v20963_v3 = vpop.permute.xlu0 %3218  ;;  %v20965_v30 = vpop.permute.xlu1 %17606  ;;  %v16256_v43 = vpack.c.bf16 %v3464_v4, %v3461_v36 }
 0x8ae   : > { %15371 = vmatmul.mubr.msk.f32.vlgmr.msra.gmra.mrb[0].mxu0 %vm23405_vm14, %v20816_v53  ;;  %15388 = vmatmul.mubr.msk.f32.gmra.mrb[4].mxu1 %vm23405_vm14, %v20963_v3  ;;  %v17609_v20 = vunpack.i.h.bf16 %v20965_v30  ;;  %v17608_v10 = vunpack.i.l.bf16 %v20965_v30 }
 0x8af   : > { %16249 = vmatpush1.bf16.msk.msra.mxu0 %vm20561_vm9, %v16247_v13  ;;  %16264 = vmatprep.subr.msk.bf16.mxu1 %vm20561_vm9, %v16262_v23 }
 0x8b0   : > { %16258 = vmatprep.subr.msk.bf16.mxu0 %vm20561_vm9, %v16256_v43  ;;  %16267 = vmatpush1.bf16.msk.msra.mxu1 %vm20561_vm9, %v16265_v44  ;;  %v3685_v35 = vsel %vm800_vm7, %v17608_v10, %v17609_v20 }
 0x8b1   : > { %17761 = vrot.lane.b32.xlu0 %v20418_v49, %s23403_s30  ;;  %5254 = vrot.lane.b32.xlu1 %v20761_v62, %s23374_s12  ;;  %v20983_v53 = vpop.permute.xlu0 %3440  ;;  %v17617_v7 = vpop.permute.xlu1 %17616  ;;  %s23779_s30 = smov 94  }
 0x8b2   : > { %3106 = vmatprep.mubr.f32.mxu0 %v23407_v47  ;;  %3631 = vmatprep.mubr.f32.mxu1 %v23407_v47  ;;  %v17619_v18 = vunpack.i.h.bf16 %v17617_v7  ;;  %v17618_v42 = vunpack.i.l.bf16 %v17617_v7 }
 0x8b3   : > { %15372 = vmatmul.mubr.msk.f32.gmra.mrb[2].mxu0 %vm23405_vm14, %v20858_v27  ;;  %15396 = vmatmul.mubr.msk.f32.vlgmr.msra.gmra.mrb[0].mxu1 %vm23405_vm14, %v20948_v31 }
 0x8b4   : > { %3112 = vmatprep.mubr.f32.mxu0 %v23407_v47  ;;  %3637 = vmatprep.mubr.f32.mxu1 %v23407_v47  ;;  %v3689_v15 = vsel %vm800_vm7, %v17618_v42, %v17619_v18 }
 0x8b5   : > { %5252 = vrot.lane.b32.xlu0 %v20737_v39, %s23374_s12  ;;  %17771 = vrot.lane.b32.xlu1 %v20460_v24, %s23677_s18  ;;  %v17612_v48 = vpop.permute.xlu0 %17611  ;;  %v21001_v29 = vpop.permute.xlu1 %3442 }
 0x8b6   : > { %v17614_v27 = vunpack.i.h.bf16 %v17612_v48  ;;  %v17613_v6 = vunpack.i.l.bf16 %v17612_v48 }
 0x8b7   : > { %15373 = vmatmul.mubr.msk.f32.gmra.mrb[4].mxu0 %vm23405_vm14, %v20873_v19  ;;  %15397 = vmatmul.mubr.msk.f32.gmra.mrb[2].mxu1 %vm23405_vm14, %v20983_v53 }
 0x8b8   : > { %v3686_v50 = vsel %vm800_vm7, %v17609_v20, %v17613_v6  ;;  %v3688_v34 = vsel %vm800_vm7, %v17614_v27, %v17618_v42  ;;  %v16274_v14 = vpack.c.bf16 %v17619_v18, %v17613_v6  ;;  %3324 = vmatprep.mubr.f32.mxu0 %v23407_v47  ;;  %3643 = vmatprep.mubr.f32.mxu1 %v23407_v47 }
 0x8b9   : > { %v16277_v8 = vpack.c.bf16 %v3689_v15, %v3686_v50  ;;  %17766 = vrot.lane.b32.xlu0 %v20393_v56, %s23677_s18  ;;  %17781 = vrot.lane.b32.xlu1 %v20418_v49, %s23677_s18  ;;  %v17622_v19 = vpop.permute.xlu0 %17621  ;;  %v21019_v12 = vpop.permute.xlu1 %3664  ;;  %v16268_v46 = vpack.c.bf16 %v3688_v34, %v3685_v35 }
 0x8ba   : > { %16276 = vmatprep.subr.msk.bf16.mxu1 %vm20561_vm9, %v16274_v14  ;;  %v17624_v54 = vunpack.i.h.bf16 %v17622_v19 }
 0x8bb   : > { %15381 = vmatmul.mubr.msk.f32.vlgmr.msra.gmra.mrb[0].mxu0 %vm23405_vm14, %v20912_v59  ;;  %15398 = vmatmul.mubr.msk.f32.gmra.mrb[4].mxu1 %vm23405_vm14, %v21001_v29  ;;  %v17623_v59 = vunpack.i.l.bf16 %v17622_v19 }
 0x8bc   : > { %16261 = vmatpush1.bf16.msk.msra.mxu0 %vm20561_vm9, %v16259_v63  ;;  %16279 = vmatpush1.bf16.msk.msra.mxu1 %vm20561_vm9, %v16277_v8  ;;  %v3687_v17 = vsel %vm800_vm7, %v17624_v54, %v17614_v27 }
 0x8bd   : > { %17776 = vrot.lane.b32.xlu0 %v20453_v52, %s23677_s18  ;;  %5476 = vrot.lane.b32.xlu1 %v20737_v39, %s23401_s20  ;;  %v21035_v2 = vpop.permute.xlu0 %3662  ;;  %v3684_v40 = vsel %vm800_vm7, %v17623_v59, %v17608_v10 }
 0x8be   : > { %16270 = vmatprep.subr.msk.bf16.mxu0 %vm20561_vm9, %v16268_v46  ;;  %v17632_v58 = vpop.permute.xlu1 %17631  ;;  %3330 = vmatprep.mubr.f32.mxu0 %v23407_v47  ;;  %v16271_v61 = vpack.c.bf16 %v3687_v17, %v3684_v40 }
 0x8bf   : > { %3855 = vmatprep.mubr.f32.mxu1 %v23407_v47  ;;  %15382 = vmatmul.mubr.msk.f32.gmra.mrb[2].mxu0 %vm23405_vm14, %v20892_v37  ;;  %v17633_v26 = vunpack.i.l.bf16 %v17632_v58  ;;  %v17634_v11 = vunpack.i.h.bf16 %v17632_v58 }
 0x8c0   : > { %15406 = vmatmul.mubr.msk.f32.vlgmr.msra.gmra.mrb[0].mxu1 %vm23405_vm14, %v21035_v2  ;;  %3336 = vmatprep.mubr.f32.mxu0 %v23407_v47 }
 0x8c1   : > { %5256 = vrot.lane.b32.xlu0 %v20844_v25, %s23374_s12  ;;  %17786 = vrot.lane.b32.xlu1 %v20393_v56, %s23418_s8  ;;  %v17627_v41 = vpop.permute.xlu0 %17626  ;;  %s23382_s12 = smov 86  }
 0x8c2   : > { %v17642_v28 = vpop.permute.xlu1 %17641  ;;  %3861 = vmatprep.mubr.f32.mxu1 %v23407_v47  ;;  %v17629_v37 = vunpack.i.h.bf16 %v17627_v41  ;;  %v17628_v5 = vunpack.i.l.bf16 %v17627_v41 }
 0x8c3   : > { %15383 = vmatmul.mubr.msk.f32.gmra.mrb[4].mxu0 %vm23405_vm14, %v20963_v3  ;;  %v17644_v23 = vunpack.i.h.bf16 %v17642_v28  ;;  %v17643_v13 = vunpack.i.l.bf16 %v17642_v28 }
 0x8c4   : > { %15407 = vmatmul.mubr.msk.f32.gmra.mrb[2].mxu1 %vm23405_vm14, %v21019_v12  ;;  %3548 = vmatprep.mubr.f32.mxu0 %v23407_v47  ;;  %v3909_v9 = vsel %vm863_vm8, %v17628_v5, %v17629_v37  ;;  %v3910_v22 = vsel %vm863_vm8, %v17629_v37, %v17633_v26 }
 0x8c5   : > { %5478 = vrot.lane.b32.xlu0 %v20761_v62, %s23401_s20  ;;  %17796 = vrot.lane.b32.xlu1 %v20453_v52, %s23418_s8  ;;  %v17637_v57 = vpop.permute.xlu0 %17636  ;;  %v3908_v30 = vsel %vm863_vm8, %v17643_v13, %v17628_v5  ;;  %v3911_v43 = vsel %vm863_vm8, %v17644_v23, %v17634_v11 }
 0x8c6   : > { %v17639_v55 = vunpack.i.h.bf16 %v17637_v57  ;;  %v17638_v32 = vunpack.i.l.bf16 %v17637_v57  ;;  %v21062_v16 = vpop.permute.xlu1 %3886  ;;  %3867 = vmatprep.mubr.f32.mxu1 %v23407_v47  ;;  %v16283_v20 = vpack.c.bf16 %v3911_v43, %v3908_v30 }
 0x8c7   : > { %15391 = vmatmul.mubr.msk.f32.vlgmr.msra.gmra.mrb[0].mxu0 %vm23405_vm14, %v20948_v31 }
 0x8c8   : > { %v3912_v51 = vsel %vm863_vm8, %v17634_v11, %v17638_v32  ;;  %v3913_v36 = vsel %vm863_vm8, %v17638_v32, %v17639_v55  ;;  %v16286_v1 = vpack.c.bf16 %v17639_v55, %v17633_v26  ;;  %16273 = vmatpush1.bf16.msk.msra.mxu0 %vm20561_vm9, %v16271_v61  ;;  %3554 = vmatprep.mubr.f32.mxu0 %v23407_v47 }
 0x8c9   : > { %v16289_v4 = vpack.c.bf16 %v3913_v36, %v3910_v22  ;;  %17791 = vrot.lane.b32.xlu0 %v20460_v24, %s23418_s8  ;;  %5480 = vrot.lane.b32.xlu1 %v20844_v25, %s23401_s20  ;;  %v21078_v33 = vpop.permute.xlu0 %3666  ;;  %v16280_v31 = vpack.c.bf16 %v3912_v51, %v3909_v9  ;;  %s23750_s20 = smov 96  }
 0x8ca   : > { %v17647_v44 = vpop.permute.xlu1 %17646  ;;  %15408 = vmatmul.mubr.msk.f32.gmra.mrb[4].mxu1 %vm23405_vm14, %v21078_v33  ;;  %16288 = vmatprep.subr.msk.bf16.mxu1 %vm20561_vm9, %v16286_v1 }
 0x8cb   : > { %15392 = vmatmul.mubr.msk.f32.gmra.mrb[2].mxu0 %vm23405_vm14, %v20983_v53  ;;  %16282 = vmatprep.subr.msk.bf16.mxu0 %vm20561_vm9, %v16280_v31  ;;  %v17649_v7 = vunpack.i.h.bf16 %v17647_v44  ;;  %v17648_v45 = vunpack.i.l.bf16 %v17647_v44 }
 0x8cc   : > { %16291 = vmatpush1.bf16.msk.msra.mxu1 %vm20561_vm9, %v16289_v4  ;;  %3560 = vmatprep.mubr.f32.mxu0 %v23407_v47 }
 0x8cd   : > { %17801 = vrot.lane.b32.xlu0 %v20418_v49, %s23418_s8  ;;  %5702 = vrot.lane.b32.xlu1 %v20761_v62, %s23382_s12  ;;  %v21095_v3 = vpop.permute.xlu0 %3888 }
 0x8ce   : > { %v17657_v53 = vpop.permute.xlu1 %17656  ;;  %4079 = vmatprep.mubr.f32.mxu1 %v23407_v47 }
 0x8cf   : > { %v17659_v21 = vunpack.i.h.bf16 %v17657_v53  ;;  %v17658_v18 = vunpack.i.l.bf16 %v17657_v53  ;;  %15393 = vmatmul.mubr.msk.f32.gmra.mrb[4].mxu0 %vm23405_vm14, %v21001_v29  ;;  %15416 = vmatmul.mubr.msk.f32.vlgmr.msra.gmra.mrb[0].mxu1 %vm23405_vm14, %v21062_v16  ;;  %v4133_v29 = vsel %vm23679_vm15, %v17648_v45, %v17649_v7 }
 0x8d0   : > { %3772 = vmatprep.mubr.f32.mxu0 %v23407_v47  ;;  %4085 = vmatprep.mubr.f32.mxu1 %v23407_v47 }
 0x8d1   : > { %5700 = vrot.lane.b32.xlu0 %v20737_v39, %s23382_s12  ;;  %17811 = vrot.lane.b32.xlu1 %v20460_v24, %s23678_s14  ;;  %v17652_v42 = vpop.permute.xlu0 %17651  ;;  %v4137_v6 = vsel %vm23680_vm0, %v17658_v18, %v17659_v21 }
 0x8d2   : > { %v17654_v10 = vunpack.i.h.bf16 %v17652_v42  ;;  %v17653_v48 = vunpack.i.l.bf16 %v17652_v42  ;;  %v21110_v27 = vpop.permute.xlu1 %3890 }
 0x8d3   : > { %15401 = vmatmul.mubr.msk.f32.vlgmr.msra.gmra.mrb[0].mxu0 %vm23405_vm14, %v21035_v2  ;;  %15417 = vmatmul.mubr.msk.f32.gmra.mrb[2].mxu1 %vm23405_vm14, %v21095_v3 }
 0x8d4   : > { %v4134_v38 = vsel %vm23681_vm1, %v17649_v7, %v17653_v48  ;;  %v4136_v0 = vsel %vm23682_vm2, %v17654_v10, %v17658_v18  ;;  %v16298_v15 = vpack.c.bf16 %v17659_v21, %v17653_v48  ;;  %16285 = vmatpush1.bf16.msk.msra.mxu0 %vm20561_vm9, %v16283_v20  ;;  %3778 = vmatprep.mubr.f32.mxu0 %v23407_v47  ;;  %vm23684_vm1 = vmmov %vm23680_vm0  ;;  %vm23685_vm2 = vcmask 777216  }
 0x8d5   : > { %v16301_v50 = vpack.c.bf16 %v4137_v6, %v4134_v38  ;;  %17806 = vrot.lane.b32.xlu0 %v20393_v56, %s23678_s14  ;;  %17821 = vrot.lane.b32.xlu1 %v20418_v49, %s23678_s14  ;;  %v17662_v34 = vpop.permute.xlu0 %17661  ;;  %v16292_v14 = vpack.c.bf16 %v4136_v0, %v4133_v29  ;;  %vm23686_vm15 = vmmov %vm23685_vm2 }
 0x8d6   : > { %v21127_v35 = vpop.permute.xlu1 %4112  ;;  %4091 = vmatprep.mubr.f32.mxu1 %v23407_v47  ;;  %16300 = vmatprep.subr.msk.bf16.mxu1 %vm20561_vm9, %v16298_v15  ;;  %v17664_v8 = vunpack.i.h.bf16 %v17662_v34  ;;  %v17663_v19 = vunpack.i.l.bf16 %v17662_v34 }
 0x8d7   : > { %15402 = vmatmul.mubr.msk.f32.gmra.mrb[2].mxu0 %vm23405_vm14, %v21019_v12  ;;  %15418 = vmatmul.mubr.msk.f32.gmra.mrb[4].mxu1 %vm23405_vm14, %v21110_v27 }
 0x8d8   : > { %16294 = vmatprep.subr.msk.bf16.mxu0 %vm20561_vm9, %v16292_v14  ;;  %16303 = vmatpush1.bf16.msk.msra.mxu1 %vm20561_vm9, %v16301_v50  ;;  %v4132_v12 = vsel %vm23680_vm0, %v17663_v19, %v17648_v45  ;;  %v4135_v2 = vsel %vm23684_vm1, %v17664_v8, %v17654_v10  ;;  %vm23687_vm0 = vmmov %vm23685_vm2 }
 0x8d9   : > { %17816 = vrot.lane.b32.xlu0 %v20453_v52, %s23678_s14  ;;  %5924 = vrot.lane.b32.xlu1 %v20737_v39, %s23683_s22  ;;  %v21144_v63 = vpop.permute.xlu0 %4110  ;;  %v16295_v54 = vpack.c.bf16 %v4135_v2, %v4132_v12  ;;  %vm23688_vm1 = vmmov %vm23687_vm0 }
 0x8da   : > { %v17672_v46 = vpop.permute.xlu1 %17671  ;;  %3784 = vmatprep.mubr.f32.mxu0 %v23407_v47  ;;  %4303 = vmatprep.mubr.f32.mxu1 %v23407_v47 }
 0x8db   : > { %15403 = vmatmul.mubr.msk.f32.gmra.mrb[4].mxu0 %vm23405_vm14, %v21078_v33  ;;  %15426 = vmatmul.mubr.msk.f32.vlgmr.msra.gmra.mrb[0].mxu1 %vm23405_vm14, %v21144_v63  ;;  %v17674_v17 = vunpack.i.h.bf16 %v17672_v46  ;;  %v17673_v37 = vunpack.i.l.bf16 %v17672_v46 }
 0x8dc   : > { %3996 = vmatprep.mubr.f32.mxu0 %v23407_v47  ;;  %4309 = vmatprep.mubr.f32.mxu1 %v23407_v47 }
 0x8dd   : > { %5704 = vrot.lane.b32.xlu0 %v20844_v25, %s23382_s12  ;;  %17826 = vrot.lane.b32.xlu1 %v20393_v56, %s23683_s22  ;;  %v17667_v58 = vpop.permute.xlu0 %17666  ;;  %s23385_s12 = smov 66  }
 0x8de   : > { %v17682_v59 = vpop.permute.xlu1 %17681  ;;  %v17669_v41 = vunpack.i.h.bf16 %v17667_v58  ;;  %v17668_v28 = vunpack.i.l.bf16 %v17667_v58 }
 0x8df   : > { %15411 = vmatmul.mubr.msk.f32.vlgmr.msra.gmra.mrb[0].mxu0 %vm23405_vm14, %v21062_v16  ;;  %15427 = vmatmul.mubr.msk.f32.gmra.mrb[2].mxu1 %vm23405_vm14, %v21127_v35  ;;  %v17684_v11 = vunpack.i.h.bf16 %v17682_v59  ;;  %v17683_v55 = vunpack.i.l.bf16 %v17682_v59 }
 0x8e0   : > { %16297 = vmatpush1.bf16.msk.msra.mxu0 %vm20561_vm9, %v16295_v54  ;;  %4002 = vmatprep.mubr.f32.mxu0 %v23407_v47  ;;  %v4357_v61 = vsel %vm23685_vm2, %v17668_v28, %v17669_v41  ;;  %v4358_v32 = vsel %vm23686_vm15, %v17669_v41, %v17673_v37  ;;  %vm23689_vm2 = vmmov %vm23687_vm0 }
 0x8e1   : > { %5926 = vrot.lane.b32.xlu0 %v20761_v62, %s23683_s22  ;;  %17836 = vrot.lane.b32.xlu1 %v20453_v52, %s23683_s22  ;;  %v17677_v40 = vpop.permute.xlu0 %17676  ;;  %v4356_v33 = vsel %vm23689_vm2, %v17683_v55, %v17668_v28  ;;  %vm23690_vm15 = vmmov %vm23687_vm0 }
 0x8e2   : > { %v17679_v5 = vunpack.i.h.bf16 %v17677_v40  ;;  %v17678_v26 = vunpack.i.l.bf16 %v17677_v40  ;;  %v21171_v57 = vpop.permute.xlu1 %4334  ;;  %4315 = vmatprep.mubr.f32.mxu1 %v23407_v47  ;;  %v4359_v31 = vsel %vm23690_vm15, %v17684_v11, %v17674_v17 }
 0x8e3   : > { %15412 = vmatmul.mubr.msk.f32.gmra.mrb[2].mxu0 %vm23405_vm14, %v21095_v3  ;;  %v16307_v13 = vpack.c.bf16 %v4359_v31, %v4356_v33 }
 0x8e4   : > { %v4360_v16 = vsel %vm23687_vm0, %v17674_v17, %v17678_v26  ;;  %v4361_v9 = vsel %vm23688_vm1, %v17678_v26, %v17679_v5  ;;  %v16310_v22 = vpack.c.bf16 %v17679_v5, %v17673_v37  ;;  %4008 = vmatprep.mubr.f32.mxu0 %v23407_v47  ;;  %vm23691_vm0 = vcmask 769024  }
 0x8e5   : > { %v16313_v51 = vpack.c.bf16 %v4361_v9, %v4358_v32  ;;  %17831 = vrot.lane.b32.xlu0 %v20460_v24, %s23683_s22  ;;  %5928 = vrot.lane.b32.xlu1 %v20844_v25, %s23683_s22  ;;  %v4115_v36 = vpop.permute.xlu0 %4114  ;;  %v16304_v1 = vpack.c.bf16 %v4360_v16, %v4357_v61  ;;  %vm23692_vm1 = vmmov %vm23691_vm0 }
 0x8e6   : > { %v17687_v4 = vpop.permute.xlu1 %17686  ;;  %15428 = vmatmul.mubr.msk.f32.gmra.mrb[4].mxu1 %vm23405_vm14, %v4115_v36  ;;  %16312 = vmatprep.subr.msk.bf16.mxu1 %vm20561_vm9, %v16310_v22  ;;  %vm23693_vm2 = vmmov %vm23691_vm0 }
 0x8e7   : > { %15413 = vmatmul.mubr.msk.f32.gmra.mrb[4].mxu0 %vm23405_vm14, %v21110_v27  ;;  %16306 = vmatprep.subr.msk.bf16.mxu0 %vm20561_vm9, %v16304_v1  ;;  %v17689_v3 = vunpack.i.h.bf16 %v17687_v4  ;;  %v17688_v30 = vunpack.i.l.bf16 %v17687_v4  ;;  %vm23694_vm15 = vmmov %vm23691_vm0 }
 0x8e8   : > { %16315 = vmatpush1.bf16.msk.msra.mxu1 %vm20561_vm9, %v16313_v51  ;;  %4220 = vmatprep.mubr.f32.mxu0 %v23407_v47 }
 0x8e9   : > { %17841 = vrot.lane.b32.xlu0 %v20418_v49, %s23683_s22  ;;  %6150 = vrot.lane.b32.xlu1 %v20761_v62, %s23385_s12  ;;  %v21201_v23 = vpop.permute.xlu0 %4336  ;;  %v4603_v42 = vsel %vm23691_vm0, %v17688_v30, %v17689_v3  ;;  %vm4582_vm0 = vcmask 64512  }
 0x8ea   : > { %v17697_v44 = vpop.permute.xlu1 %17696  ;;  %4527 = vmatprep.mubr.f32.mxu1 %v23407_v47 }
 0x8eb   : > { %v17699_v43 = vunpack.i.h.bf16 %v17697_v44  ;;  %v17698_v53 = vunpack.i.l.bf16 %v17697_v44  ;;  %15421 = vmatmul.mubr.msk.f32.vlgmr.msra.gmra.mrb[0].mxu0 %vm23405_vm14, %v21144_v63  ;;  %15436 = vmatmul.mubr.msk.f32.vlgmr.msra.gmra.mrb[0].mxu1 %vm23405_vm14, %v21171_v57 }
 0x8ec   : > { %16309 = vmatpush1.bf16.msk.msra.mxu0 %vm20561_vm9, %v16307_v13  ;;  %4226 = vmatprep.mubr.f32.mxu0 %v23407_v47 }
 0x8ed   : > { %6148 = vrot.lane.b32.xlu0 %v20737_v39, %s23385_s12  ;;  %17851 = vrot.lane.b32.xlu1 %v20460_v24, %s23421_s27  ;;  %v17692_v7 = vpop.permute.xlu0 %17691  ;;  %v4607_v20 = vsel %vm23692_vm1, %v17698_v53, %v17699_v43 }
 0x8ee   : > { %v17694_v45 = vunpack.i.h.bf16 %v17692_v7  ;;  %v17693_v21 = vunpack.i.l.bf16 %v17692_v7  ;;  %v4339_v18 = vpop.permute.xlu1 %4338  ;;  %4533 = vmatprep.mubr.f32.mxu1 %v23407_v47 }
 0x8ef   : > { %15422 = vmatmul.mubr.msk.f32.gmra.mrb[2].mxu0 %vm23405_vm14, %v21127_v35  ;;  %15437 = vmatmul.mubr.msk.f32.gmra.mrb[2].mxu1 %vm23405_vm14, %v21201_v23 }
 0x8f0   : > { %v4604_v10 = vsel %vm23693_vm2, %v17689_v3, %v17693_v21  ;;  %v4606_v48 = vsel %vm23694_vm15, %v17694_v45, %v17698_v53  ;;  %v16322_v27 = vpack.c.bf16 %v17699_v43, %v17693_v21  ;;  %4232 = vmatprep.mubr.f32.mxu0 %v23407_v47  ;;  %4539 = vmatprep.mubr.f32.mxu1 %v23407_v47  ;;  %vm23695_vm2 = vmmov %vm23692_vm1  ;;  %vm23696_vm15 = vcmask 760832   ;;  %v21314_v53 = vld [vmem:[#allocation4 + $0x8] sm:$0xff] }
 0x8f1   : > { %v16325_v29 = vpack.c.bf16 %v4607_v20, %v4604_v10  ;;  %17846 = vrot.lane.b32.xlu0 %v20393_v56, %s23421_s27  ;;  %17861 = vrot.lane.b32.xlu1 %v20418_v49, %s23421_s27  ;;  %v16316_v6 = vpack.c.bf16 %v4606_v48, %v4603_v42 }
 0x8f2   : > { %v17702_v38 = vpop.permute.xlu0 %17701  ;;  %v4573_v0 = vpop.permute.xlu1 %4572  ;;  %16324 = vmatprep.subr.msk.bf16.mxu1 %vm20561_vm9, %v16322_v27 }
 0x8f3   : > { %v17704_v15 = vunpack.i.h.bf16 %v17702_v38  ;;  %v17703_v50 = vunpack.i.l.bf16 %v17702_v38  ;;  %15423 = vmatmul.mubr.msk.f32.gmra.mrb[4].mxu0 %vm23405_vm14, %v4115_v36  ;;  %15438 = vmatmul.mubr.msk.f32.gmra.mrb[4].mxu1 %vm23405_vm14, %v4339_v18 }
 0x8f4   : > { %16318 = vmatprep.subr.msk.bf16.mxu0 %vm20561_vm9, %v16316_v6  ;;  %16327 = vmatpush1.bf16.msk.msra.mxu1 %vm20561_vm9, %v16325_v29 }
 0x8f5   : > { %v4602_v34 = vsel %vm23692_vm1, %v17703_v50, %v17688_v30  ;;  %v4605_v14 = vsel %vm23695_vm2, %v17704_v15, %v17694_v45  ;;  %17856 = vrot.lane.b32.xlu0 %v20453_v52, %s23421_s27  ;;  %6372 = vrot.lane.b32.xlu1 %v20737_v39, %s23389_s26  ;;  %vm23697_vm1 = vmmov %vm23696_vm15 }
 0x8f6   : > { %v16319_v35 = vpack.c.bf16 %v4605_v14, %v4602_v34  ;;  %v4571_v8 = vpop.permute.xlu0 %4570  ;;  %v4577_v19 = vpop.permute.xlu1 %4576  ;;  %4444 = vmatprep.mubr.f32.mxu0 %v23407_v47  ;;  %4773 = vmatprep.mubr.f32.mxu1 %v23407_v47  ;;  %vm23698_vm2 = vmmov %vm23697_vm1 }
 0x8f7   : > { %v4583_v63 = vsel %vm4582_vm0, %v4571_v8, %v4573_v0  ;;  %15431 = vmatmul.mubr.msk.f32.vlgmr.msra.gmra.mrb[0].mxu0 %vm23405_vm14, %v21171_v57  ;;  %vm23699_vm3 = vmmov %vm23697_vm1 }
 0x8f8   : > { %16321 = vmatpush1.bf16.msk.msra.mxu0 %vm20561_vm9, %v16319_v35  ;;  %15446 = vmatmul.mubr.msk.f32.vlgmr.msra.gmra.mrb[0].mxu1 %vm23405_vm14, %v4583_v63  ;;  %vm23700_vm4 = vmmov %vm23697_vm1 }
 0x8f9   : > { %6152 = vrot.lane.b32.xlu0 %v20844_v25, %s23385_s12  ;;  %17866 = vrot.lane.b32.xlu1 %v20393_v56, %s23423_s28  ;;  %s23391_s12 = smov 46   ;;  %vm23701_vm5 = vmmov %vm23697_vm1 }
 0x8fa   : > { %v4575_v46 = vpop.permute.xlu0 %4574  ;;  %4450 = vmatprep.mubr.f32.mxu0 %v23407_v47  ;;  %4779 = vmatprep.mubr.f32.mxu1 %v23407_v47 }
 0x8fb   : > { %v4584_v12 = vsel %vm4582_vm0, %v4575_v46, %v4577_v19  ;;  %v17712_v2 = vpop.permute.xlu1 %17711  ;;  %15432 = vmatmul.mubr.msk.f32.gmra.mrb[2].mxu0 %vm23405_vm14, %v21201_v23  ;;  %v21337_v19 = vld [vmem:[#allocation4 + $0x18] sm:$0xff] }
 0x8fc   : > { %15447 = vmatmul.mubr.msk.f32.gmra.mrb[2].mxu1 %vm23405_vm14, %v4584_v12  ;;  %4456 = vmatprep.mubr.f32.mxu0 %v23407_v47  ;;  %v17714_v28 = vunpack.i.h.bf16 %v17712_v2  ;;  %v17713_v40 = vunpack.i.l.bf16 %v17712_v2 }
 0x8fd   : > { %6374 = vrot.lane.b32.xlu0 %v20761_v62, %s23389_s26  ;;  %17876 = vrot.lane.b32.xlu1 %v20453_v52, %s23423_s28 }
 0x8fe   : > { %4785 = vmatprep.mubr.f32.mxu1 %v23407_v47  ;;  %v17707_v58 = vpop.permute.xlu0 %17706 }
 0x8ff   : > { %v4579_v54 = vpop.permute.xlu1 %4578  ;;  %15433 = vmatmul.mubr.msk.f32.gmra.mrb[4].mxu0 %vm23405_vm14, %v4339_v18  ;;  %v17709_v59 = vunpack.i.h.bf16 %v17707_v58  ;;  %v17708_v41 = vunpack.i.l.bf16 %v17707_v58 }
 0x900   : > { %4690 = vmatprep.mubr.f32.mxu0 %v23407_v47 }
 0x901   : > { %17871 = vrot.lane.b32.xlu0 %v20460_v24, %s23423_s28  ;;  %6376 = vrot.lane.b32.xlu1 %v20844_v25, %s23389_s26  ;;  %v4827_v11 = vsel %vm23696_vm15, %v17708_v41, %v17709_v59  ;;  %v4828_v55 = vsel %vm23697_vm1, %v17709_v59, %v17713_v40  ;;  %s23392_s26 = smov 36  }
 0x902   : > { %v17717_v17 = vpop.permute.xlu0 %17716 }
 0x903   : > { %v17722_v37 = vpop.permute.xlu1 %17721  ;;  %15441 = vmatmul.mubr.msk.f32.vlgmr.msra.gmra.mrb[0].mxu0 %vm23405_vm14, %v4583_v63  ;;  %v17719_v5 = vunpack.i.h.bf16 %v17717_v17  ;;  %v17718_v26 = vunpack.i.l.bf16 %v17717_v17 }
 0x904   : > { %v17724_v57 = vunpack.i.h.bf16 %v17722_v37  ;;  %v17723_v61 = vunpack.i.l.bf16 %v17722_v37  ;;  %4696 = vmatprep.mubr.f32.mxu0 %v23407_v47 }
 0x905   : > { %17881 = vrot.lane.b32.xlu0 %v20418_v49, %s23423_s28  ;;  %6598 = vrot.lane.b32.xlu1 %v20761_v62, %s23391_s12  ;;  %v4830_v32 = vsel %vm23698_vm2, %v17714_v28, %v17718_v26  ;;  %v4831_v16 = vsel %vm23699_vm3, %v17718_v26, %v17719_v5  ;;  %v16334_v9 = vpack.c.bf16 %v17719_v5, %v17713_v40  ;;  %vm23702_vm3 = vcmask 752640  }
 0x906   : > { %v4826_v22 = vsel %vm23700_vm4, %v17723_v61, %v17708_v41  ;;  %v16337_v51 = vpack.c.bf16 %v4831_v16, %v4828_v55  ;;  %v4829_v36 = vsel %vm23701_vm5, %v17724_v57, %v17714_v28  ;;  %v16328_v33 = vpack.c.bf16 %v4830_v32, %v4827_v11  ;;  %vm23703_vm4 = vmmov %vm23702_vm3 }
 0x907   : > { %v4581_v1 = vpop.permute.xlu0 %4580  ;;  %v4807_v4 = vpop.permute.xlu1 %4806  ;;  %15442 = vmatmul.mubr.msk.f32.gmra.mrb[2].mxu0 %vm23405_vm14, %v4584_v12  ;;  %v16331_v31 = vpack.c.bf16 %v4829_v36, %v4826_v22  ;;  %16336 = vmatprep.subr.msk.bf16.mxu1 %vm20561_vm9, %v16334_v9  ;;  %vm23704_vm5 = vmmov %vm23702_vm3 }
 0x908   : > { %v4585_v23 = vsel %vm4582_vm0, %v4579_v54, %v4581_v1  ;;  %4702 = vmatprep.mubr.f32.mxu0 %v23407_v47  ;;  %16330 = vmatprep.subr.msk.bf16.mxu0 %vm20561_vm9, %v16328_v33  ;;  %vm23705_vm15 = vmmov %vm23702_vm3 }
 0x909   : > { %6596 = vrot.lane.b32.xlu0 %v20737_v39, %s23391_s12  ;;  %17891 = vrot.lane.b32.xlu1 %v20460_v24, %s23427_s25  ;;  %vm23706_vm1 = vmmov %vm23702_vm3 }
 0x90a   : > { %15448 = vmatmul.mubr.msk.f32.gmra.mrb[4].mxu1 %vm23405_vm14, %v4585_v23  ;;  %16333 = vmatpush1.bf16.msk.msra.mxu0 %vm20561_vm9, %v16331_v31  ;;  %vm23707_vm2 = vmmov %vm23706_vm1 }
 0x90b   : > { %16339 = vmatpush1.bf16.msk.msra.mxu1 %vm20561_vm9, %v16337_v51  ;;  %v4805_v62 = vpop.permute.xlu0 %4804  ;;  %v17732_v13 = vpop.permute.xlu1 %17731  ;;  %15443 = vmatmul.mubr.msk.f32.gmra.mrb[4].mxu0 %vm23405_vm14, %v4585_v23 }
 0x90c   : > { %4997 = vmatprep.mubr.f32.mxu1 %v23407_v47  ;;  %4914 = vmatprep.mubr.f32.mxu0 %v23407_v47  ;;  %v17733_v45 = vunpack.i.l.bf16 %v17732_v13  ;;  %v17734_v42 = vunpack.i.h.bf16 %v17732_v13 }
 0x90d   : > { %17886 = vrot.lane.b32.xlu0 %v20393_v56, %s23427_s25  ;;  %17901 = vrot.lane.b32.xlu1 %v20418_v49, %s23427_s25 }
 0x90e   : > { %15456 = vmatmul.mubr.msk.f32.vlgmr.msra.gmra.mrb[0].mxu1 %vm23405_vm14, %v4805_v62 }
 0x90f   : > { %v17727_v39 = vpop.permute.xlu0 %17726  ;;  %v17742_v44 = vpop.permute.xlu1 %17741  ;;  %5003 = vmatprep.mubr.f32.mxu1 %v23407_v47  ;;  %15451 = vmatmul.mubr.msk.f32.vlgmr.msra.gmra.mrb[0].mxu0 %vm23405_vm14, %v4805_v62 }
 0x910   : > { %v17729_v3 = vunpack.i.h.bf16 %v17727_v39  ;;  %v17728_v30 = vunpack.i.l.bf16 %v17727_v39  ;;  %v17743_v43 = vunpack.i.l.bf16 %v17742_v44  ;;  %v17744_v7 = vunpack.i.h.bf16 %v17742_v44  ;;  %4920 = vmatprep.mubr.f32.mxu0 %v23407_v47 }
 0x911   : > { %17896 = vrot.lane.b32.xlu0 %v20453_v52, %s23427_s25  ;;  %6820 = vrot.lane.b32.xlu1 %v21314_v53, %s23392_s26 }
 0x912   : > { %15457 = vmatmul.mubr.msk.f32.gmra.mrb[2].mxu1 %vm23405_vm14, %v4807_v4  ;;  %v5051_v48 = vsel %vm23702_vm3, %v17728_v30, %v17729_v3  ;;  %v5052_v27 = vsel %vm23703_vm4, %v17729_v3, %v17733_v45  ;;  %v5050_v29 = vsel %vm23704_vm5, %v17743_v43, %v17728_v30  ;;  %v5053_v6 = vsel %vm23705_vm15, %v17744_v7, %v17734_v42 }
 0x913   : > { %v17737_v21 = vpop.permute.xlu0 %17736  ;;  %v5029_v18 = vpop.permute.xlu1 %5028  ;;  %5009 = vmatprep.mubr.f32.mxu1 %v23407_v47  ;;  %15452 = vmatmul.mubr.msk.f32.gmra.mrb[2].mxu0 %vm23405_vm14, %v4807_v4  ;;  %v16343_v8 = vpack.c.bf16 %v5053_v6, %v5050_v29  ;;  %vm23708_vm3 = vcmask 654336  }
 0x914   : > { %v17739_v20 = vunpack.i.h.bf16 %v17737_v21  ;;  %v17738_v10 = vunpack.i.l.bf16 %v17737_v21  ;;  %4926 = vmatprep.mubr.f32.mxu0 %v23407_v47  ;;  %vm23709_vm4 = vmmov %vm23708_vm3 }
 0x915   : > { %6600 = vrot.lane.b32.xlu0 %v20844_v25, %s23391_s12  ;;  %17906 = vrot.lane.b32.xlu1 %v20393_v56, %s23431_s9  ;;  %vm23710_vm5 = vmmov %vm23708_vm3  ;;  %s23394_s12 = smov 26  }
 0x916   : > { %v5054_v38 = vsel %vm23706_vm1, %v17734_v42, %v17738_v10  ;;  %v5055_v0 = vsel %vm23707_vm2, %v17738_v10, %v17739_v20  ;;  %v16346_v15 = vpack.c.bf16 %v17739_v20, %v17733_v45  ;;  %vm23711_vm15 = vmmov %vm23708_vm3  ;;  %v18700_v45 = vld [vmem:[#allocation4 + $0x28] sm:$0xf]  ;;  %v23406_v20 = vmov 122  }
 0x917   : > { %v16349_v50 = vpack.c.bf16 %v5055_v0, %v5052_v27  ;;  %v4809_v34 = vpop.permute.xlu0 %4808  ;;  %v17747_v14 = vpop.permute.xlu1 %17746  ;;  %v16340_v35 = vpack.c.bf16 %v5054_v38, %v5051_v48  ;;  %vm23712_vm1 = vmmov %vm23708_vm3  ;;  %17945 = vset.pattern.permute.xlu0 %v23406_v20  ;;  %17946 = vset.pattern.permute.xlu1 %v23406_v20 }
 0x918   : > { %15453 = vmatmul.mubr.msk.f32.gmra.mrb[4].mxu0 %vm23405_vm14, %v4809_v34  ;;  %15458 = vmatmul.mubr.msk.f32.gmra.mrb[4].mxu1 %vm23405_vm14, %v4809_v34  ;;  %v17749_v12 = vunpack.i.h.bf16 %v17747_v14  ;;  %v17748_v2 = vunpack.i.l.bf16 %v17747_v14  ;;  %vm23713_vm2 = vmmov %vm23712_vm1 }
 0x919   : > { %16348 = vmatprep.subr.msk.bf16.mxu1 %vm20561_vm9, %v16346_v15  ;;  %6822 = vrot.lane.b32.xlu0 %v21337_v19, %s23392_s26 }
 0x91a   : > { %17916 = vrot.lane.b32.xlu1 %v20453_v52, %s23431_s9  ;;  %16342 = vmatprep.subr.msk.bf16.mxu0 %vm20561_vm9, %v16340_v35  ;;  %v5275_v17 = vsel %vm23708_vm3, %v17748_v2, %v17749_v12  ;;  %vm23714_vm3 = vcmask 646144  }
 0x91b   : > { %16351 = vmatpush1.bf16.msk.msra.mxu1 %vm20561_vm9, %v16349_v50  ;;  %16345 = vmatpush1.bf16.msk.msra.mxu0 %vm20561_vm9, %v16343_v8  ;;  %v5031_v63 = vpop.permute.xlu0 %5030  ;;  %v17757_v46 = vpop.permute.xlu1 %17756 }
 0x91c   : > { %5221 = vmatprep.mubr.f32.mxu1 %v23407_v47  ;;  %5138 = vmatprep.mubr.f32.mxu0 %v23407_v47  ;;  %v17759_v58 = vunpack.i.h.bf16 %v17757_v46  ;;  %v17758_v54 = vunpack.i.l.bf16 %v17757_v46 }
 0x91d   : > { %17911 = vrot.lane.b32.xlu0 %v20460_v24, %s23431_s9 }
 0x91e   : > { %15466 = vmatmul.mubr.msk.f32.vlgmr.msra.gmra.mrb[0].mxu1 %vm23405_vm14, %v5029_v18  ;;  %6824 = vrot.lane.b32.xlu1 %v20844_v25, %s23392_s26  ;;  %v5279_v37 = vsel %vm23709_vm4, %v17758_v54, %v17759_v58  ;;  %s23395_s26 = smov 16   ;;  %vm23715_vm4 = vmmov %vm23714_vm3 }
 0x91f   : > { %15461 = vmatmul.mubr.msk.f32.vlgmr.msra.gmra.mrb[0].mxu0 %vm23405_vm14, %v5029_v18  ;;  %v17752_v59 = vpop.permute.xlu0 %17751  ;;  %v5033_v41 = vpop.permute.xlu1 %5032  ;;  %5227 = vmatprep.mubr.f32.mxu1 %v23407_v47 }
 0x920   : > { %v17754_v28 = vunpack.i.h.bf16 %v17752_v59  ;;  %v17753_v40 = vunpack.i.l.bf16 %v17752_v59  ;;  %5144 = vmatprep.mubr.f32.mxu0 %v23407_v47 }
 0x921   : > { %17921 = vrot.lane.b32.xlu0 %v20418_v49, %s23431_s9 }
 0x922   : > { %v5276_v5 = vsel %vm23710_vm5, %v17749_v12, %v17753_v40  ;;  %v5278_v25 = vsel %vm23711_vm15, %v17754_v28, %v17758_v54  ;;  %v16358_v26 = vpack.c.bf16 %v17759_v58, %v17753_v40  ;;  %15467 = vmatmul.mubr.msk.f32.gmra.mrb[2].mxu1 %vm23405_vm14, %v5031_v63  ;;  %7046 = vrot.lane.b32.xlu1 %v21337_v19, %s23394_s12  ;;  %vm23716_vm5 = vmmov %vm23714_vm3 }
 0x923   : > { %v16361_v57 = vpack.c.bf16 %v5279_v37, %v5276_v5  ;;  %15462 = vmatmul.mubr.msk.f32.gmra.mrb[2].mxu0 %vm23405_vm14, %v5031_v63  ;;  %v17762_v61 = vpop.permute.xlu0 %17761  ;;  %v5255_v11 = vpop.permute.xlu1 %5254  ;;  %5233 = vmatprep.mubr.f32.mxu1 %v23407_v47  ;;  %v16352_v55 = vpack.c.bf16 %v5278_v25, %v5275_v17  ;;  %vm23717_vm15 = vmmov %vm23714_vm3 }
 0x924   : > { %v17764_v32 = vunpack.i.h.bf16 %v17762_v61  ;;  %v17763_v16 = vunpack.i.l.bf16 %v17762_v61  ;;  %16360 = vmatprep.subr.msk.bf16.mxu1 %vm20561_vm9, %v16358_v26  ;;  %5150 = vmatprep.mubr.f32.mxu0 %v23407_v47 }
 0x925   : > { %7044 = vrot.lane.b32.xlu0 %v21314_v53, %s23394_s12  ;;  %16354 = vmatprep.subr.msk.bf16.mxu0 %vm20561_vm9, %v16352_v55 }
 0x926   : > { %v5274_v9 = vsel %vm23712_vm1, %v17763_v16, %v17748_v2  ;;  %v5277_v22 = vsel %vm23713_vm2, %v17764_v32, %v17754_v28  ;;  %15468 = vmatmul.mubr.msk.f32.gmra.mrb[4].mxu1 %vm23405_vm14, %v5033_v41  ;;  %17931 = vrot.lane.b32.xlu1 %v20460_v24, %s23429_s7  ;;  %vm23718_vm1 = vmmov %vm23714_vm3 }
 0x927   : > { %v16355_v51 = vpack.c.bf16 %v5277_v22, %v5274_v9  ;;  %16363 = vmatpush1.bf16.msk.msra.mxu1 %vm20561_vm9, %v16361_v57  ;;  %v5253_v36 = vpop.permute.xlu0 %5252  ;;  %v17772_v1 = vpop.permute.xlu1 %17771  ;;  %5445 = vmatprep.mubr.f32.mxu1 %v23407_v47  ;;  %vm23719_vm2 = vmmov %vm23718_vm1 }
 0x928   : > { %15463 = vmatmul.mubr.msk.f32.gmra.mrb[4].mxu0 %vm23405_vm14, %v5033_v41  ;;  %v17773_v62 = vunpack.i.l.bf16 %v17772_v1 }
 0x929   : > { %17926 = vrot.lane.b32.xlu0 %v20393_v56, %s23429_s7  ;;  %16357 = vmatpush1.bf16.msk.msra.mxu0 %vm20561_vm9, %v16355_v51 }
 0x92a   : > { %15476 = vmatmul.mubr.msk.f32.vlgmr.msra.gmra.mrb[0].mxu1 %vm23405_vm14, %v5253_v36  ;;  %17941 = vrot.lane.b32.xlu1 %v20418_v49, %s23429_s7  ;;  %v17774_v49 = vunpack.i.h.bf16 %v17772_v1 }
 0x92b   : > { %v17767_v24 = vpop.permute.xlu0 %17766  ;;  %v17782_v4 = vpop.permute.xlu1 %17781  ;;  %5362 = vmatprep.mubr.f32.mxu0 %v23407_v47  ;;  %5451 = vmatprep.mubr.f32.mxu1 %v23407_v47 }
 0x92c   : > { %v17769_v33 = vunpack.i.h.bf16 %v17767_v24  ;;  %v17768_v31 = vunpack.i.l.bf16 %v17767_v24  ;;  %15471 = vmatmul.mubr.msk.f32.vlgmr.msra.gmra.mrb[0].mxu0 %vm23405_vm14, %v5253_v36  ;;  %v17784_v23 = vunpack.i.h.bf16 %v17782_v4  ;;  %v17783_v56 = vunpack.i.l.bf16 %v17782_v4 }
 0x92d   : > { %17936 = vrot.lane.b32.xlu0 %v20453_v52, %s23429_s7  ;;  %5368 = vmatprep.mubr.f32.mxu0 %v23407_v47 }
 0x92e   : > { %15477 = vmatmul.mubr.msk.f32.gmra.mrb[2].mxu1 %vm23405_vm14, %v5255_v11  ;;  %7268 = vrot.lane.b32.xlu1 %v21314_v53, %s23395_s26  ;;  %v5499_v44 = vsel %vm23714_vm3, %v17768_v31, %v17769_v33  ;;  %v5500_v52 = vsel %vm23715_vm4, %v17769_v33, %v17773_v62  ;;  %v5498_v43 = vsel %vm23716_vm5, %v17783_v56, %v17768_v31  ;;  %vm23720_vm3 = vcmask 637952  }
 0x92f   : > { %v17777_v13 = vpop.permute.xlu0 %17776  ;;  %v5477_v39 = vpop.permute.xlu1 %5476  ;;  %5457 = vmatprep.mubr.f32.mxu1 %v23407_v47  ;;  %v5501_v7 = vsel %vm23717_vm15, %v17784_v23, %v17774_v49  ;;  %vm23721_vm4 = vmmov %vm23720_vm3 }
 0x930   : > { %v17779_v3 = vunpack.i.h.bf16 %v17777_v13  ;;  %v17778_v30 = vunpack.i.l.bf16 %v17777_v13  ;;  %15472 = vmatmul.mubr.msk.f32.gmra.mrb[2].mxu0 %vm23405_vm14, %v5255_v11  ;;  %v16367_v6 = vpack.c.bf16 %v5501_v7, %v5498_v43  ;;  %vm23722_vm5 = vmmov %vm23720_vm3 }
 0x931   : > { %7048 = vrot.lane.b32.xlu0 %v18700_v45, %s23394_s12  ;;  %5374 = vmatprep.mubr.f32.mxu0 %v23407_v47  ;;  %vm23723_vm15 = vmmov %vm23720_vm3  ;;  %s23749_s12 = smov 80  }
 0x932   : > { %v5502_v21 = vsel %vm23718_vm1, %v17774_v49, %v17778_v30  ;;  %v5503_v18 = vsel %vm23719_vm2, %v17778_v30, %v17779_v3  ;;  %v16370_v42 = vpack.c.bf16 %v17779_v3, %v17773_v62  ;;  %7272 = vrot.lane.b32.xlu1 %v18700_v45, %s23395_s26  ;;  %vm23724_vm1 = vmmov %vm23720_vm3 }
 0x933   : > { %v16373_v10 = vpack.c.bf16 %v5503_v18, %v5500_v52  ;;  %v5257_v48 = vpop.permute.xlu0 %5256  ;;  %v17787_v27 = vpop.permute.xlu1 %17786  ;;  %v16364_v29 = vpack.c.bf16 %v5502_v21, %v5499_v44  ;;  %vm23725_vm2 = vmmov %vm23724_vm1 }
 0x934   : > { %15473 = vmatmul.mubr.msk.f32.gmra.mrb[4].mxu0 %vm23405_vm14, %v5257_v48  ;;  %15478 = vmatmul.mubr.msk.f32.gmra.mrb[4].mxu1 %vm23405_vm14, %v5257_v48  ;;  %v17789_v15 = vunpack.i.h.bf16 %v17787_v27  ;;  %v17788_v50 = vunpack.i.l.bf16 %v17787_v27 }
 0x935   : > { %16372 = vmatprep.subr.msk.bf16.mxu1 %vm20561_vm9, %v16370_v42  ;;  %16366 = vmatprep.subr.msk.bf16.mxu0 %vm20561_vm9, %v16364_v29 }
 0x936   : > { %16375 = vmatpush1.bf16.msk.msra.mxu1 %vm20561_vm9, %v16373_v10  ;;  %16369 = vmatpush1.bf16.msk.msra.mxu0 %vm20561_vm9, %v16367_v6 }
 0x937   : > { %v5479_v38 = vpop.permute.xlu0 %5478  ;;  %v17797_v0 = vpop.permute.xlu1 %17796  ;;  %5669 = vmatprep.mubr.f32.mxu1 %v23407_v47  ;;  %5586 = vmatprep.mubr.f32.mxu0 %v23407_v47 }
 0x938   : > { %7270 = vrot.lane.b32.xlu0 %v21337_v19, %s23395_s26  ;;  %7497 = vperm.xlu1 %17946, %v21337_v19   ;;  %v17799_v34 = vunpack.i.h.bf16 %v17797_v0  ;;  %v17798_v14 = vunpack.i.l.bf16 %v17797_v0  ;;  %v5723_v19 = vsel %vm23720_vm3, %v17788_v50, %v17789_v15  ;;  %vm23726_vm3 = vcmask 506880   ;;  %s23751_s26 = smov 92  }
 0x939   : > { %15486 = vmatmul.mubr.msk.f32.vlgmr.msra.gmra.mrb[0].mxu1 %vm23405_vm14, %v5477_v39  ;;  %15481 = vmatmul.mubr.msk.f32.vlgmr.msra.gmra.mrb[0].mxu0 %vm23405_vm14, %v5477_v39 }
 0x93a   : > { %5675 = vmatprep.mubr.f32.mxu1 %v23407_v47  ;;  %5592 = vmatprep.mubr.f32.mxu0 %v23407_v47  ;;  %v5727_v12 = vsel %vm23721_vm4, %v17798_v14, %v17799_v34  ;;  %vm23727_vm4 = vmmov %vm23726_vm3 }
 0x93b   : > { %v17792_v35 = vpop.permute.xlu0 %17791  ;;  %v5481_v8 = vpop.permute.xlu1 %5480 }
 0x93c   : > { %v17794_v63 = vunpack.i.h.bf16 %v17792_v35  ;;  %v17793_v46 = vunpack.i.l.bf16 %v17792_v35  ;;  %7493 = vperm.xlu0 %17945, %v21314_v53   ;;  %7501 = vperm.xlu1 %17946, %v18700_v45  }
 0x93d   : > { %15487 = vmatmul.mubr.msk.f32.gmra.mrb[2].mxu1 %vm23405_vm14, %v5479_v38  ;;  %15482 = vmatmul.mubr.msk.f32.gmra.mrb[2].mxu0 %vm23405_vm14, %v5479_v38 }
 0x93e   : > { %v5724_v2 = vsel %vm23722_vm5, %v17789_v15, %v17793_v46  ;;  %v5726_v58 = vsel %vm23723_vm15, %v17794_v63, %v17798_v14  ;;  %v16382_v54 = vpack.c.bf16 %v17799_v34, %v17793_v46  ;;  %5681 = vmatprep.mubr.f32.mxu1 %v23407_v47  ;;  %5598 = vmatprep.mubr.f32.mxu0 %v23407_v47  ;;  %vm23728_vm5 = vmmov %vm23726_vm3 }
 0x93f   : > { %v16385_v59 = vpack.c.bf16 %v5727_v12, %v5724_v2  ;;  %v17802_v53 = vpop.permute.xlu0 %17801  ;;  %v5703_v41 = vpop.permute.xlu1 %5702  ;;  %v16376_v28 = vpack.c.bf16 %v5726_v58, %v5723_v19  ;;  %vm23729_vm15 = vmmov %vm23726_vm3 }
 0x940   : > { %v17804_v40 = vunpack.i.h.bf16 %v17802_v53  ;;  %v17803_v17 = vunpack.i.l.bf16 %v17802_v53  ;;  %16384 = vmatprep.subr.msk.bf16.mxu1 %vm20561_vm9, %v16382_v54 }
 0x941   : > { %15488 = vmatmul.mubr.msk.f32.gmra.mrb[4].mxu1 %vm23405_vm14, %v5481_v8  ;;  %16378 = vmatprep.subr.msk.bf16.mxu0 %vm20561_vm9, %v16376_v28 }
 0x942   : > { %v5722_v37 = vsel %vm23724_vm1, %v17803_v17, %v17788_v50  ;;  %v5725_v5 = vsel %vm23725_vm2, %v17804_v40, %v17794_v63  ;;  %16387 = vmatpush1.bf16.msk.msra.mxu1 %vm20561_vm9, %v16385_v59  ;;  %5893 = vmatprep.mubr.f32.mxu1 %v23407_v47  ;;  %vm23730_vm1 = vmmov %vm23726_vm3 }
 0x943   : > { %v16379_v25 = vpack.c.bf16 %v5725_v5, %v5722_v37  ;;  %v5701_v26 = vpop.permute.xlu0 %5700  ;;  %v17812_v57 = vpop.permute.xlu1 %17811  ;;  %15483 = vmatmul.mubr.msk.f32.gmra.mrb[4].mxu0 %vm23405_vm14, %v5481_v8  ;;  %vm23731_vm2 = vmmov %vm23730_vm1 }
 0x944   : > { %5810 = vmatprep.mubr.f32.mxu0 %v23407_v47  ;;  %v17814_v22 = vunpack.i.h.bf16 %v17812_v57  ;;  %v17813_v1 = vunpack.i.l.bf16 %v17812_v57 }
 0x945   : > { %15496 = vmatmul.mubr.msk.f32.vlgmr.msra.gmra.mrb[0].mxu1 %vm23405_vm14, %v5701_v26  ;;  %16381 = vmatpush1.bf16.msk.msra.mxu0 %vm20561_vm9, %v16379_v25 }
 0x946   : > { %5899 = vmatprep.mubr.f32.mxu1 %v23407_v47 }
 0x947   : > { %v17807_v61 = vpop.permute.xlu0 %17806  ;;  %v17822_v11 = vpop.permute.xlu1 %17821 }
 0x948   : > { %15491 = vmatmul.mubr.msk.f32.vlgmr.msra.gmra.mrb[0].mxu0 %vm23405_vm14, %v5701_v26  ;;  %v17809_v55 = vunpack.i.h.bf16 %v17807_v61  ;;  %v17808_v32 = vunpack.i.l.bf16 %v17807_v61  ;;  %v17824_v16 = vunpack.i.h.bf16 %v17822_v11  ;;  %v17823_v9 = vunpack.i.l.bf16 %v17822_v11 }
 0x949   : > { %15497 = vmatmul.mubr.msk.f32.gmra.mrb[2].mxu1 %vm23405_vm14, %v5703_v41  ;;  %5816 = vmatprep.mubr.f32.mxu0 %v23407_v47 }
 0x94a   : > { %5905 = vmatprep.mubr.f32.mxu1 %v23407_v47  ;;  %v5947_v33 = vsel %vm1430_vm13, %v17808_v32, %v17809_v55  ;;  %v5946_v31 = vsel %vm1430_vm13, %v17823_v9, %v17808_v32  ;;  %v5949_v23 = vsel %vm1430_vm13, %v17824_v16, %v17814_v22  ;;  %v5948_v56 = vsel %vm1430_vm13, %v17809_v55, %v17813_v1 }
 0x94b   : > { %v17817_v51 = vpop.permute.xlu0 %17816  ;;  %v5925_v36 = vpop.permute.xlu1 %5924  ;;  %v16391_v52 = vpack.c.bf16 %v5949_v23, %v5946_v31 }
 0x94c   : > { %v17819_v24 = vunpack.i.h.bf16 %v17817_v51  ;;  %v17818_v4 = vunpack.i.l.bf16 %v17817_v51  ;;  %15492 = vmatmul.mubr.msk.f32.gmra.mrb[2].mxu0 %vm23405_vm14, %v5703_v41 }
 0x94d   : > { %5822 = vmatprep.mubr.f32.mxu0 %v23407_v47 }
 0x94e   : > { %v5950_v49 = vsel %vm1430_vm13, %v17814_v22, %v17818_v4  ;;  %v5951_v62 = vsel %vm1430_vm13, %v17818_v4, %v17819_v24  ;;  %v16394_v13 = vpack.c.bf16 %v17819_v24, %v17813_v1 }
 0x94f   : > { %v16397_v39 = vpack.c.bf16 %v5951_v62, %v5948_v56  ;;  %v5705_v44 = vpop.permute.xlu0 %5704  ;;  %v17827_v3 = vpop.permute.xlu1 %17826  ;;  %v16388_v30 = vpack.c.bf16 %v5950_v49, %v5947_v33 }
 0x950   : > { %15493 = vmatmul.mubr.msk.f32.gmra.mrb[4].mxu0 %vm23405_vm14, %v5705_v44  ;;  %15498 = vmatmul.mubr.msk.f32.gmra.mrb[4].mxu1 %vm23405_vm14, %v5705_v44  ;;  %v17829_v18 = vunpack.i.h.bf16 %v17827_v3  ;;  %v17828_v42 = vunpack.i.l.bf16 %v17827_v3 }
 0x951   : > { %16396 = vmatprep.subr.msk.bf16.mxu1 %vm20561_vm9, %v16394_v13  ;;  %16390 = vmatprep.subr.msk.bf16.mxu0 %vm20561_vm9, %v16388_v30  ;;  %v21477_v43 = vpop.f32.mrb[6].mxu0 }
 0x952   : > { %16399 = vmatpush1.bf16.msk.msra.mxu1 %vm20561_vm9, %v16397_v39  ;;  %16393 = vmatpush1.bf16.msk.msra.mxu0 %vm20561_vm9, %v16391_v52  ;;  %v21483_v7 = vpop.f32.mrb[7].mxu0  ;;  %v6171_v50 = vsel %vm1493_vm12, %v17828_v42, %v17829_v18 }
 0x953   : > { %v5927_v45 = vpop.permute.xlu0 %5926  ;;  %v17837_v21 = vpop.permute.xlu1 %17836  ;;  %6117 = vmatprep.mubr.f32.mxu1 %v23407_v47  ;;  %6034 = vmatprep.mubr.f32.mxu0 %v23407_v47 }
 0x954   : > { %v17839_v10 = vunpack.i.h.bf16 %v17837_v21  ;;  %v17838_v48 = vunpack.i.l.bf16 %v17837_v21 }
 0x955   : > { %15506 = vmatmul.mubr.msk.f32.vlgmr.msra.gmra.mrb[0].mxu1 %vm23405_vm14, %v5925_v36  ;;  %15501 = vmatmul.mubr.msk.f32.vlgmr.msra.gmra.mrb[0].mxu0 %vm23405_vm14, %v5925_v36  ;;  %v21489_v27 = vpop.f32.mrb[8].mxu0 }
 0x956   : > { %6123 = vmatprep.mubr.f32.mxu1 %v23407_v47  ;;  %v21492_v29 = vpop.f32.mrb[9].mxu0  ;;  %6040 = vmatprep.mubr.f32.mxu0 %v23407_v47  ;;  %v6175_v34 = vsel %vm1493_vm12, %v17838_v48, %v17839_v10 }
 0x957   : > { %v17832_v6 = vpop.permute.xlu0 %17831  ;;  %v5929_v38 = vpop.permute.xlu1 %5928 }
 0x958   : > { %v17834_v0 = vunpack.i.h.bf16 %v17832_v6  ;;  %v17833_v15 = vunpack.i.l.bf16 %v17832_v6 }
 0x959   : > { %15507 = vmatmul.mubr.msk.f32.gmra.mrb[2].mxu1 %vm23405_vm14, %v5927_v45  ;;  %15502 = vmatmul.mubr.msk.f32.gmra.mrb[2].mxu0 %vm23405_vm14, %v5927_v45  ;;  %v21499_v14 = vpop.f32.mrb[10].mxu0 }
 0x95a   : > { %v6172_v35 = vsel %vm1493_vm12, %v17829_v18, %v17833_v15  ;;  %v6174_v8 = vsel %vm1493_vm12, %v17834_v0, %v17838_v48  ;;  %v16406_v63 = vpack.c.bf16 %v17839_v10, %v17833_v15  ;;  %6129 = vmatprep.mubr.f32.mxu1 %v23407_v47  ;;  %v21504_v46 = vpop.f32.mrb[11].mxu0  ;;  %6046 = vmatprep.mubr.f32.mxu0 %v23407_v47 }
 0x95b   : > { %v16409_v19 = vpack.c.bf16 %v6175_v34, %v6172_v35  ;;  %v17842_v12 = vpop.permute.xlu0 %17841  ;;  %v6151_v2 = vpop.permute.xlu1 %6150  ;;  %v16400_v58 = vpack.c.bf16 %v6174_v8, %v6171_v50 }
 0x95c   : > { %v17844_v54 = vunpack.i.h.bf16 %v17842_v12  ;;  %v17843_v59 = vunpack.i.l.bf16 %v17842_v12  ;;  %16408 = vmatprep.subr.msk.bf16.mxu1 %vm20561_vm9, %v16406_v63 }
 0x95d   : > { %15508 = vmatmul.mubr.msk.f32.gmra.mrb[4].mxu1 %vm23405_vm14, %v5929_v38  ;;  %16402 = vmatprep.subr.msk.bf16.mxu0 %vm20561_vm9, %v16400_v58 }
 0x95e   : > { %v6170_v53 = vsel %vm1493_vm12, %v17843_v59, %v17828_v42  ;;  %v6173_v41 = vsel %vm1493_vm12, %v17844_v54, %v17834_v0  ;;  %16411 = vmatpush1.bf16.msk.msra.mxu1 %vm20561_vm9, %v16409_v19  ;;  %6341 = vmatprep.mubr.f32.mxu1 %v23407_v47 }
 0x95f   : > { %v16403_v28 = vpack.c.bf16 %v6173_v41, %v6170_v53  ;;  %v6149_v40 = vpop.permute.xlu0 %6148  ;;  %v17852_v17 = vpop.permute.xlu1 %17851  ;;  %15503 = vmatmul.mubr.msk.f32.gmra.mrb[4].mxu0 %vm23405_vm14, %v5929_v38 }
 0x960   : > { %6258 = vmatprep.mubr.f32.mxu0 %v23407_v47  ;;  %v17854_v11 = vunpack.i.h.bf16 %v17852_v17  ;;  %v17853_v16 = vunpack.i.l.bf16 %v17852_v17 }
 0x961   : > { %15516 = vmatmul.mubr.msk.f32.vlgmr.msra.gmra.mrb[0].mxu1 %vm23405_vm14, %v6149_v40  ;;  %16405 = vmatpush1.bf16.msk.msra.mxu0 %vm20561_vm9, %v16403_v28 }
 0x962   : > { %6347 = vmatprep.mubr.f32.mxu1 %v23407_v47 }
 0x963   : > { %v17847_v37 = vpop.permute.xlu0 %17846  ;;  %v17862_v5 = vpop.permute.xlu1 %17861 }
 0x964   : > { %15511 = vmatmul.mubr.msk.f32.vlgmr.msra.gmra.mrb[0].mxu0 %vm23405_vm14, %v6149_v40  ;;  %v17849_v25 = vunpack.i.h.bf16 %v17847_v37  ;;  %v17848_v26 = vunpack.i.l.bf16 %v17847_v37  ;;  %v17864_v57 = vunpack.i.h.bf16 %v17862_v5  ;;  %v17863_v61 = vunpack.i.l.bf16 %v17862_v5 }
 0x965   : > { %15517 = vmatmul.mubr.msk.f32.gmra.mrb[2].mxu1 %vm23405_vm14, %v6151_v2  ;;  %6264 = vmatprep.mubr.f32.mxu0 %v23407_v47 }
 0x966   : > { %6353 = vmatprep.mubr.f32.mxu1 %v23407_v47  ;;  %v6395_v51 = vsel %vm1569_vm11, %v17848_v26, %v17849_v25  ;;  %v6394_v36 = vsel %vm1569_vm11, %v17863_v61, %v17848_v26  ;;  %v6397_v1 = vsel %vm1569_vm11, %v17864_v57, %v17854_v11  ;;  %v6396_v24 = vsel %vm1569_vm11, %v17849_v25, %v17853_v16 }
 0x967   : > { %v17857_v55 = vpop.permute.xlu0 %17856  ;;  %v6373_v32 = vpop.permute.xlu1 %6372  ;;  %v16415_v13 = vpack.c.bf16 %v6397_v1, %v6394_v36 }
 0x968   : > { %v17859_v9 = vunpack.i.h.bf16 %v17857_v55  ;;  %v17858_v22 = vunpack.i.l.bf16 %v17857_v55  ;;  %15512 = vmatmul.mubr.msk.f32.gmra.mrb[2].mxu0 %vm23405_vm14, %v6151_v2 }
 0x969   : > { %6270 = vmatprep.mubr.f32.mxu0 %v23407_v47 }
 0x96a   : > { %v6398_v4 = vsel %vm1569_vm11, %v17854_v11, %v17858_v22  ;;  %v6399_v33 = vsel %vm1569_vm11, %v17858_v22, %v17859_v9  ;;  %v16418_v31 = vpack.c.bf16 %v17859_v9, %v17853_v16 }
 0x96b   : > { %v16421_v23 = vpack.c.bf16 %v6399_v33, %v6396_v24  ;;  %v6153_v56 = vpop.permute.xlu0 %6152  ;;  %v17867_v49 = vpop.permute.xlu1 %17866  ;;  %v16412_v62 = vpack.c.bf16 %v6398_v4, %v6395_v51 }
 0x96c   : > { %15513 = vmatmul.mubr.msk.f32.gmra.mrb[4].mxu0 %vm23405_vm14, %v6153_v56  ;;  %15518 = vmatmul.mubr.msk.f32.gmra.mrb[4].mxu1 %vm23405_vm14, %v6153_v56  ;;  %v17869_v3 = vunpack.i.h.bf16 %v17867_v49  ;;  %v17868_v30 = vunpack.i.l.bf16 %v17867_v49 }
 0x96d   : > { %16420 = vmatprep.subr.msk.bf16.mxu1 %vm20561_vm9, %v16418_v31  ;;  %16414 = vmatprep.subr.msk.bf16.mxu0 %vm20561_vm9, %v16412_v62 }
 0x96e   : > { %16423 = vmatpush1.bf16.msk.msra.mxu1 %vm20561_vm9, %v16421_v23  ;;  %16417 = vmatpush1.bf16.msk.msra.mxu0 %vm20561_vm9, %v16415_v13  ;;  %v6619_v48 = vsel %vm1642_vm10, %v17868_v30, %v17869_v3 }
 0x96f   : > { %v6375_v39 = vpop.permute.xlu0 %6374  ;;  %v17877_v44 = vpop.permute.xlu1 %17876  ;;  %6565 = vmatprep.mubr.f32.mxu1 %v23407_v47  ;;  %6482 = vmatprep.mubr.f32.mxu0 %v23407_v47 }
 0x970   : > { %v17879_v52 = vunpack.i.h.bf16 %v17877_v44  ;;  %v17878_v45 = vunpack.i.l.bf16 %v17877_v44 }
 0x971   : > { %15526 = vmatmul.mubr.msk.f32.vlgmr.msra.gmra.mrb[0].mxu1 %vm23405_vm14, %v6373_v32  ;;  %15521 = vmatmul.mubr.msk.f32.vlgmr.msra.gmra.mrb[0].mxu0 %vm23405_vm14, %v6373_v32 }
 0x972   : > { %6571 = vmatprep.mubr.f32.mxu1 %v23407_v47  ;;  %6488 = vmatprep.mubr.f32.mxu0 %v23407_v47  ;;  %v6623_v6 = vsel %vm1642_vm10, %v17878_v45, %v17879_v52 }
 0x973   : > { %v17872_v21 = vpop.permute.xlu0 %17871  ;;  %v6377_v18 = vpop.permute.xlu1 %6376 }
 0x974   : > { %v17874_v42 = vunpack.i.h.bf16 %v17872_v21  ;;  %v17873_v10 = vunpack.i.l.bf16 %v17872_v21 }
 0x975   : > { %15527 = vmatmul.mubr.msk.f32.gmra.mrb[2].mxu1 %vm23405_vm14, %v6375_v39  ;;  %15522 = vmatmul.mubr.msk.f32.gmra.mrb[2].mxu0 %vm23405_vm14, %v6375_v39 }
 0x976   : > { %v6620_v38 = vsel %vm1642_vm10, %v17869_v3, %v17873_v10  ;;  %v6622_v0 = vsel %vm1642_vm10, %v17874_v42, %v17878_v45  ;;  %v16430_v15 = vpack.c.bf16 %v17879_v52, %v17873_v10  ;;  %6577 = vmatprep.mubr.f32.mxu1 %v23407_v47  ;;  %6494 = vmatprep.mubr.f32.mxu0 %v23407_v47 }
 0x977   : > { %v16433_v50 = vpack.c.bf16 %v6623_v6, %v6620_v38  ;;  %v17882_v34 = vpop.permute.xlu0 %17881  ;;  %v6599_v35 = vpop.permute.xlu1 %6598  ;;  %v16424_v8 = vpack.c.bf16 %v6622_v0, %v6619_v48 }
 0x978   : > { %v17884_v63 = vunpack.i.h.bf16 %v17882_v34  ;;  %v17883_v19 = vunpack.i.l.bf16 %v17882_v34  ;;  %16432 = vmatprep.subr.msk.bf16.mxu1 %vm20561_vm9, %v16430_v15 }
 0x979   : > { %15528 = vmatmul.mubr.msk.f32.gmra.mrb[4].mxu1 %vm23405_vm14, %v6377_v18  ;;  %16426 = vmatprep.subr.msk.bf16.mxu0 %vm20561_vm9, %v16424_v8 }
 0x97a   : > { %v6618_v12 = vsel %vm1642_vm10, %v17883_v19, %v17868_v30  ;;  %v6621_v2 = vsel %vm1642_vm10, %v17884_v63, %v17874_v42  ;;  %16435 = vmatpush1.bf16.msk.msra.mxu1 %vm20561_vm9, %v16433_v50  ;;  %6789 = vmatprep.mubr.f32.mxu1 %v23407_v47 }
 0x97b   : > { %v16427_v58 = vpack.c.bf16 %v6621_v2, %v6618_v12  ;;  %v6597_v54 = vpop.permute.xlu0 %6596  ;;  %v17892_v59 = vpop.permute.xlu1 %17891  ;;  %15523 = vmatmul.mubr.msk.f32.gmra.mrb[4].mxu0 %vm23405_vm14, %v6377_v18 }
 0x97c   : > { %6706 = vmatprep.mubr.f32.mxu0 %v23407_v47  ;;  %v17894_v5 = vunpack.i.h.bf16 %v17892_v59  ;;  %v17893_v57 = vunpack.i.l.bf16 %v17892_v59 }
 0x97d   : > { %15536 = vmatmul.mubr.msk.f32.vlgmr.msra.gmra.mrb[0].mxu1 %vm23405_vm14, %v6597_v54  ;;  %16429 = vmatpush1.bf16.msk.msra.mxu0 %vm20561_vm9, %v16427_v58 }
 0x97e   : > { %6795 = vmatprep.mubr.f32.mxu1 %v23407_v47 }
 0x97f   : > { %v17887_v53 = vpop.permute.xlu0 %17886  ;;  %v17902_v41 = vpop.permute.xlu1 %17901 }
 0x980   : > { %15531 = vmatmul.mubr.msk.f32.vlgmr.msra.gmra.mrb[0].mxu0 %vm23405_vm14, %v6597_v54  ;;  %v17889_v28 = vunpack.i.h.bf16 %v17887_v53  ;;  %v17888_v40 = vunpack.i.l.bf16 %v17887_v53  ;;  %v17904_v17 = vunpack.i.h.bf16 %v17902_v41  ;;  %v17903_v37 = vunpack.i.l.bf16 %v17902_v41 }
 0x981   : > { %15537 = vmatmul.mubr.msk.f32.gmra.mrb[2].mxu1 %vm23405_vm14, %v6599_v35  ;;  %6712 = vmatprep.mubr.f32.mxu0 %v23407_v47 }
 0x982   : > { %6801 = vmatprep.mubr.f32.mxu1 %v23407_v47  ;;  %v6843_v55 = vsel %vm23726_vm3, %v17888_v40, %v17889_v28  ;;  %v6842_v32 = vsel %vm23727_vm4, %v17903_v37, %v17888_v40  ;;  %v6845_v16 = vsel %vm23728_vm5, %v17904_v17, %v17894_v5  ;;  %v6844_v9 = vsel %vm23729_vm15, %v17889_v28, %v17893_v57 }
 0x983   : > { %v17897_v25 = vpop.permute.xlu0 %17896  ;;  %v6821_v26 = vpop.permute.xlu1 %6820  ;;  %v16439_v31 = vpack.c.bf16 %v6845_v16, %v6842_v32  ;;  %vm23732_vm3 = vcmask 498688  }
 0x984   : > { %v17899_v61 = vunpack.i.h.bf16 %v17897_v25  ;;  %v17898_v11 = vunpack.i.l.bf16 %v17897_v25  ;;  %15532 = vmatmul.mubr.msk.f32.gmra.mrb[2].mxu0 %vm23405_vm14, %v6599_v35  ;;  %vm23733_vm4 = vmmov %vm23732_vm3 }
 0x985   : > { %6718 = vmatprep.mubr.f32.mxu0 %v23407_v47  ;;  %vm23734_vm5 = vmmov %vm23732_vm3 }
 0x986   : > { %v6846_v22 = vsel %vm23730_vm1, %v17894_v5, %v17898_v11  ;;  %v6847_v51 = vsel %vm23731_vm2, %v17898_v11, %v17899_v61  ;;  %v16442_v36 = vpack.c.bf16 %v17899_v61, %v17893_v57  ;;  %vm23735_vm15 = vmmov %vm23732_vm3 }
 0x987   : > { %v16445_v1 = vpack.c.bf16 %v6847_v51, %v6844_v9  ;;  %v6601_v24 = vpop.permute.xlu0 %6600  ;;  %v17907_v4 = vpop.permute.xlu1 %17906  ;;  %v16436_v33 = vpack.c.bf16 %v6846_v22, %v6843_v55  ;;  %vm23736_vm1 = vmmov %vm23732_vm3 }
 0x988   : > { %15533 = vmatmul.mubr.msk.f32.gmra.mrb[4].mxu0 %vm23405_vm14, %v6601_v24  ;;  %15538 = vmatmul.mubr.msk.f32.gmra.mrb[4].mxu1 %vm23405_vm14, %v6601_v24  ;;  %v17909_v49 = vunpack.i.h.bf16 %v17907_v4  ;;  %v17908_v62 = vunpack.i.l.bf16 %v17907_v4  ;;  %vm23737_vm2 = vmmov %vm23736_vm1  ;;  %v21665_v24 = vld [vmem:[%s23238_s3] sm:$0xff] }
 0x989   : > { %16444 = vmatprep.subr.msk.bf16.mxu1 %vm20561_vm9, %v16442_v36  ;;  %16438 = vmatprep.subr.msk.bf16.mxu0 %vm20561_vm9, %v16436_v33  ;;  %v21672_v4 = vld [vmem:[%s23238_s3 + $0x20] sm:$0x3] }
 0x98a   : > { %16447 = vmatpush1.bf16.msk.msra.mxu1 %vm20561_vm9, %v16445_v1  ;;  %16441 = vmatpush1.bf16.msk.msra.mxu0 %vm20561_vm9, %v16439_v31  ;;  %v7067_v45 = vsel %vm23732_vm3, %v17908_v62, %v17909_v49  ;;  %vm23738_vm3 = vcmask 490496   ;;  %v7528_v31 = vld [vmem:[%s23240_s5] ss:$2 sm:$0xf] }
 0x98b   : > { %v6823_v23 = vpop.permute.xlu0 %6822  ;;  %7013 = vmatprep.mubr.f32.mxu1 %v23407_v47  ;;  %6930 = vmatprep.mubr.f32.mxu0 %v23407_v47 }
 0x98c   : > { %v17917_v56 = vpop.permute.xlu1 %17916  ;;  %7566 = vrot.lane.b32.xlu1 %v21665_v24, %s23425_s19 }
 0x98d   : > { %v17919_v13 = vunpack.i.h.bf16 %v17917_v56  ;;  %v17918_v39 = vunpack.i.l.bf16 %v17917_v56  ;;  %15546 = vmatmul.mubr.msk.f32.vlgmr.msra.gmra.mrb[0].mxu1 %vm23405_vm14, %v6821_v26  ;;  %15541 = vmatmul.mubr.msk.f32.vlgmr.msra.gmra.mrb[0].mxu0 %vm23405_vm14, %v6821_v26 }
 0x98e   : > { %7019 = vmatprep.mubr.f32.mxu1 %v23407_v47  ;;  %6936 = vmatprep.mubr.f32.mxu0 %v23407_v47 }
 0x98f   : > { %v17912_v44 = vpop.permute.xlu0 %17911  ;;  %v7071_v21 = vsel %vm23733_vm4, %v17918_v39, %v17919_v13  ;;  %vm23739_vm4 = vmmov %vm23738_vm3 }
 0x990   : > { %v17914_v3 = vunpack.i.h.bf16 %v17912_v44  ;;  %v17913_v30 = vunpack.i.l.bf16 %v17912_v44  ;;  %v6825_v52 = vpop.permute.xlu1 %6824  ;;  %7568 = vrot.lane.b32.xlu1 %v21672_v4, %s23425_s19 }
 0x991   : > { %15547 = vmatmul.mubr.msk.f32.gmra.mrb[2].mxu1 %vm23405_vm14, %v6823_v23  ;;  %15542 = vmatmul.mubr.msk.f32.gmra.mrb[2].mxu0 %vm23405_vm14, %v6823_v23 }
 0x992   : > { %v7068_v18 = vsel %vm23734_vm5, %v17909_v49, %v17913_v30  ;;  %v7070_v42 = vsel %vm23735_vm15, %v17914_v3, %v17918_v39  ;;  %v16454_v10 = vpack.c.bf16 %v17919_v13, %v17913_v30  ;;  %7025 = vmatprep.mubr.f32.mxu1 %v23407_v47  ;;  %6942 = vmatprep.mubr.f32.mxu0 %v23407_v47  ;;  %vm23740_vm5 = vmmov %vm23738_vm3 }
 0x993   : > { %v16457_v48 = vpack.c.bf16 %v7071_v21, %v7068_v18  ;;  %v17922_v6 = vpop.permute.xlu0 %17921  ;;  %v16448_v38 = vpack.c.bf16 %v7070_v42, %v7067_v45  ;;  %vm23741_vm15 = vmmov %vm23738_vm3  ;;  %v23745_v21 = vld [vmem:[#allocation11_spill] sm:$0xff] }
 0x994   : > { %v17924_v0 = vunpack.i.h.bf16 %v17922_v6  ;;  %v17923_v15 = vunpack.i.l.bf16 %v17922_v6  ;;  %v7047_v50 = vpop.permute.xlu1 %7046  ;;  %16456 = vmatprep.subr.msk.bf16.mxu1 %vm20561_vm9, %v16454_v10  ;;  %v7541_v18 = vrot.slane %v7528_v31, %v23745_v21 }
 0x995   : > { %15548 = vmatmul.mubr.msk.f32.gmra.mrb[4].mxu1 %vm23405_vm14, %v6825_v52  ;;  %16450 = vmatprep.subr.msk.bf16.mxu0 %vm20561_vm9, %v16448_v38 }
 0x996   : > { %v7066_v34 = vsel %vm23736_vm1, %v17923_v15, %v17908_v62  ;;  %v7069_v35 = vsel %vm23737_vm2, %v17924_v0, %v17914_v3  ;;  %16459 = vmatpush1.bf16.msk.msra.mxu1 %vm20561_vm9, %v16457_v48  ;;  %7237 = vmatprep.mubr.f32.mxu1 %v23407_v47  ;;  %vm23742_vm1 = vmmov %vm23738_vm3 }
 0x997   : > { %v16451_v8 = vpack.c.bf16 %v7069_v35, %v7066_v34  ;;  %v7045_v63 = vpop.permute.xlu0 %7044  ;;  %15543 = vmatmul.mubr.msk.f32.gmra.mrb[4].mxu0 %vm23405_vm14, %v6825_v52  ;;  %vm23743_vm2 = vmmov %vm23742_vm1  ;;  %v23744_v52 = vld [vmem:[#allocation9_spill] sm:$0xff] }
 0x998   : > { %v17932_v19 = vpop.permute.xlu1 %17931  ;;  %7154 = vmatprep.mubr.f32.mxu0 %v23407_v47  ;;  %v21682_v45 = vrot.slane %v7528_v31, %v23744_v52 }
 0x999   : > { %15556 = vmatmul.mubr.msk.f32.vlgmr.msra.gmra.mrb[0].mxu1 %vm23405_vm14, %v7045_v63  ;;  %16453 = vmatpush1.bf16.msk.msra.mxu0 %vm20561_vm9, %v16451_v8  ;;  %v17934_v41 = vunpack.i.h.bf16 %v17932_v19  ;;  %v17933_v40 = vunpack.i.l.bf16 %v17932_v19 }
 0x99a   : > { %7243 = vmatprep.mubr.f32.mxu1 %v23407_v47 }
 0x99b   : > { %v17927_v12 = vpop.permute.xlu0 %17926 }
 0x99c   : > { %v17942_v2 = vpop.permute.xlu1 %17941  ;;  %15551 = vmatmul.mubr.msk.f32.vlgmr.msra.gmra.mrb[0].mxu0 %vm23405_vm14, %v7045_v63  ;;  %v17929_v58 = vunpack.i.h.bf16 %v17927_v12  ;;  %v17928_v54 = vunpack.i.l.bf16 %v17927_v12 }
 0x99d   : > { %v17944_v59 = vunpack.i.h.bf16 %v17942_v2  ;;  %v17943_v53 = vunpack.i.l.bf16 %v17942_v2  ;;  %15557 = vmatmul.mubr.msk.f32.gmra.mrb[2].mxu1 %vm23405_vm14, %v7047_v50  ;;  %7160 = vmatprep.mubr.f32.mxu0 %v23407_v47 }
 0x99e   : > { %7249 = vmatprep.mubr.f32.mxu1 %v23407_v47  ;;  %v7291_v5 = vsel %vm23738_vm3, %v17928_v54, %v17929_v58  ;;  %v7292_v57 = vsel %vm23741_vm15, %v17929_v58, %v17933_v40  ;;  %vm7621_vm3 = vcmask 162816  }
 0x99f   : > { %v17937_v28 = vpop.permute.xlu0 %17936  ;;  %v7290_v25 = vsel %vm23739_vm4, %v17943_v53, %v17928_v54  ;;  %v7293_v26 = vsel %vm23740_vm5, %v17944_v59, %v17934_v41  ;;  %vm23752_vm4 = vcmask 498688  }
 0x9a0   : > { %v17939_v17 = vunpack.i.h.bf16 %v17937_v28  ;;  %v17938_v37 = vunpack.i.l.bf16 %v17937_v28  ;;  %15552 = vmatmul.mubr.msk.f32.gmra.mrb[2].mxu0 %vm23405_vm14, %v7047_v50  ;;  %v16463_v22 = vpack.c.bf16 %v7293_v26, %v7290_v25  ;;  %v7269_v51 = vpop.permute.xlu1 %7268  ;;  %v23747_v28 = vld [vmem:[#allocation8_spill] sm:$0xff]  ;;  %vm23753_vm5 = vmmov %vm23752_vm4 }
 0x9a1   : > { %7166 = vmatprep.mubr.f32.mxu0 %v23407_v47  ;;  %vm23754_vm15 = vmmov %vm23752_vm4 }
 0x9a2   : > { %v7294_v61 = vsel %vm23742_vm1, %v17934_v41, %v17938_v37  ;;  %v7295_v11 = vsel %vm23743_vm2, %v17938_v37, %v17939_v17  ;;  %v16466_v55 = vpack.c.bf16 %v17939_v17, %v17933_v40  ;;  %v23748_v40 = vsub.s32 3, %v23747_v28  ;;  %vm23755_vm1 = vmmov %vm23752_vm4 }
 0x9a3   : > { %v16469_v32 = vpack.c.bf16 %v7295_v11, %v7292_v57  ;;  %v7049_v16 = vpop.permute.xlu0 %7048  ;;  %v16460_v9 = vpack.c.bf16 %v7294_v61, %v7291_v5  ;;  %vm23756_vm2 = vmmov %vm23755_vm1 }
 0x9a4   : > { %15558 = vmatmul.mubr.msk.f32.gmra.mrb[4].mxu1 %vm23405_vm14, %v7049_v16  ;;  %16468 = vmatprep.subr.msk.bf16.mxu1 %vm20561_vm9, %v16466_v55  ;;  %v7273_v1 = vpop.permute.xlu1 %7272 }
 0x9a5   : > { %15553 = vmatmul.mubr.msk.f32.gmra.mrb[4].mxu0 %vm23405_vm14, %v7049_v16  ;;  %16462 = vmatprep.subr.msk.bf16.mxu0 %vm20561_vm9, %v16460_v9 }
 0x9a6   : > { %16471 = vmatpush1.bf16.msk.msra.mxu1 %vm20561_vm9, %v16469_v32  ;;  %16465 = vmatpush1.bf16.msk.msra.mxu0 %vm20561_vm9, %v16463_v22 }
 0x9a7   : > { %7461 = vmatprep.mubr.f32.mxu1 %v23407_v47  ;;  %7378 = vmatprep.mubr.f32.mxu0 %v23407_v47 }
 0x9a9   : > { %15566 = vmatmul.mubr.msk.f32.vlgmr.msra.gmra.mrb[0].mxu1 %vm23405_vm14, %v7269_v51  ;;  %15561 = vmatmul.mubr.msk.f32.vlgmr.msra.gmra.mrb[0].mxu0 %vm23405_vm14, %v7269_v51 }
 0x9aa   : > { %v7271_v36 = vpop.permute.xlu0 %7270  ;;  %7467 = vmatprep.mubr.f32.mxu1 %v23407_v47  ;;  %7384 = vmatprep.mubr.f32.mxu0 %v23407_v47 }
 0x9ad   : > { %15567 = vmatmul.mubr.msk.f32.gmra.mrb[2].mxu1 %vm23405_vm14, %v7271_v36  ;;  %15562 = vmatmul.mubr.msk.f32.gmra.mrb[2].mxu0 %vm23405_vm14, %v7271_v36 }
 0x9ae   : > { %7473 = vmatprep.mubr.f32.mxu1 %v23407_v47  ;;  %7390 = vmatprep.mubr.f32.mxu0 %v23407_v47 }
 0x9b1   : > { %15568 = vmatmul.mubr.msk.f32.gmra.mrb[4].mxu1 %vm23405_vm14, %v7273_v1  ;;  %15563 = vmatmul.mubr.msk.f32.gmra.mrb[4].mxu0 %vm23405_vm14, %v7273_v1  ;;  %vm23757_vm14 = vmmov %vm23755_vm1 }
 0x9b2   : > { %7697 = vmatprep.mubr.f32.mxu0 %v23407_v47 }
 0x9b7   : > { %v7498_v33 = vpop.permute.xlu1 %7497 }
 0x9bb   : > { %v7494_v23 = vpop.permute.xlu0 %7493  ;;  %v21685_v10 = vpop.permute.xlu1 %7501 }
 0x9fe   : > { %v21695_v53 = vpop.permute.xlu1 %7566 }
 0x9ff   : > { %15953 = vmatprep.mubr.msk.f32.mxu1 %vm7621_vm3, %v21695_v53 }
 0xa7c   : > { %v7463_v56 = vpop.f32.mrb[0].mxu1  ;;  %v7380_v49 = vpop.f32.mrb[0].mxu0 }
 0xa7d   : > { %v16822_v62 = vadd.f32 %v7463_v56, %v21477_v43  ;;  %v7465_v13 = vpop.f32.mrb[1].mxu1  ;;  %v7382_v39 = vpop.f32.mrb[1].mxu0  ;;  %v7504_v44 = vadd.f32 %v7494_v23, %v7380_v49  ;;  %v23746_v43 = vld [vmem:[#allocation10_spill] sm:$0xff] }
 0xa7e   : > { %v16823_v3 = vadd.f32 %v7465_v13, %v21483_v7  ;;  %v7505_v30 = vadd.f32 %v7494_v23, %v7382_v39  ;;  %v21688_v50 = vrot.slane %v7528_v31, %v23746_v43 }
 0xa7f   : > { %v7506_v42 = vadd.f32 %v16822_v62, %v7494_v23  ;;  %v7516_v63 = vmax.f32 %v7504_v44, 0.0 }
 0xa80   : > { %v7507_v48 = vadd.f32 %v16823_v3, %v7494_v23  ;;  %v7517_v6 = vmax.f32 %v7505_v30, 0.0  ;;  %v7469_v38 = vpop.f32.mrb[2].mxu1  ;;  %v7386_v0 = vpop.f32.mrb[2].mxu0 }
 0xa81   : > { %v7518_v15 = vmax.f32 %v7506_v42, 0.0  ;;  %v16824_v34 = vadd.f32 %v7469_v38, %v21489_v27  ;;  %v7508_v7 = vadd.f32 %v7498_v33, %v7386_v0  ;;  %v7471_v35 = vpop.f32.mrb[3].mxu1  ;;  %v7388_v8 = vpop.f32.mrb[3].mxu0  ;;  %v7545_v27 = vrot.slane %v7528_v31, %v23748_v40 }
 0xa82   : > { %v21692_v19 = vmul.f32 %v21682_v45, %v7517_v6  ;;  %v16825_v12 = vadd.f32 %v7471_v35, %v21492_v29  ;;  %v7509_v2 = vadd.f32 %v7498_v33, %v7388_v8  ;;  %v7519_v41 = vmax.f32 %v7507_v48, 0.0 }
 0xa83   : > { %v7552_v58 = vmul.f32 %v7541_v18, %v7518_v15  ;;  %v7510_v54 = vadd.f32 %v16824_v34, %v7498_v33  ;;  %v7520_v59 = vmax.f32 %v7508_v7, 0.0  ;;  %v21706_v55 = vmul.f32 %v21688_v50, %v7516_v63  ;;  %v8823_v7 = vld [vmem:[%s23238_s3 + $0x20] sm:$0x3] }
 0xa84   : > { %v7511_v17 = vadd.f32 %v16825_v12, %v7498_v33  ;;  %v7521_v37 = vmax.f32 %v7509_v2, 0.0  ;;  %v7475_v5 = vpop.f32.mrb[4].mxu1  ;;  %v7392_v25 = vpop.f32.mrb[4].mxu0  ;;  %v7553_v1 = vmul.f32 %v7545_v27, %v7519_v41 }
 0xa85   : > { %v7522_v26 = vmax.f32 %v7510_v54, 0.0  ;;  %v21702_v29 = vmul.f32 %v21688_v50, %v7520_v59  ;;  %v16826_v57 = vadd.f32 %v7475_v5, %v21499_v14  ;;  %v7477_v61 = vpop.f32.mrb[5].mxu1  ;;  %v7394_v11 = vpop.f32.mrb[5].mxu0  ;;  %v21714_v36 = vpack.i.bf16 %v7552_v58, %v21692_v19  ;;  %v21894_v54 = vld [vmem:[%s23238_s3 + $0x28] sm:$0x3] }
 0xa86   : > { %v7523_v32 = vmax.f32 %v7511_v17, 0.0  ;;  %v16827_v16 = vadd.f32 %v7477_v61, %v21504_v46  ;;  %v21710_v22 = vmul.f32 %v21682_v45, %v7521_v37  ;;  %v7512_v30 = vadd.f32 %v21685_v10, %v7392_v25 }
 0xa87   : > { %v7556_v9 = vmul.f32 %v7541_v18, %v7522_v26  ;;  %v7514_v51 = vadd.f32 %v16826_v57, %v21685_v10  ;;  %v21719_v31 = vpack.i.bf16 %v21702_v29, %v21706_v55  ;;  %v7513_v48 = vadd.f32 %v21685_v10, %v7394_v11 }
 0xa88   : > { %v7557_v33 = vmul.f32 %v7545_v27, %v7523_v32  ;;  %v7515_v14 = vadd.f32 %v16827_v16, %v21685_v10  ;;  %v21851_v10 = vld [vmem:[%s23238_s3 + $0x8] sm:$0xff] }
 0xa89   : > { %v7526_v23 = vmax.f32 %v7514_v51, 0.0  ;;  %v21724_v62 = vpack.i.bf16 %v7556_v9, %v21710_v22  ;;  %v21740_v39 = vpack.c.bf16 %v7556_v9, %v7552_v58  ;;  %v7525_v6 = vmax.f32 %v7513_v48, 0.0 }
 0xa8a   : > { %v7527_v56 = vmax.f32 %v7515_v14, 0.0  ;;  %v17952_v46 = vpack.i.bf16 %v7557_v33, %v7553_v1 }
 0xa8b   : > { %v21721_v49 = vmul.f32 %v7541_v18, %v7526_v23  ;;  %v7524_v18 = vmax.f32 %v7512_v30, 0.0  ;;  %v21783_v38 = vmul.f32 %v21682_v45, %v7525_v6  ;;  %v21842_v45 = vpop.permute.xlu1 %7568 }
 0xa8c   : > { %v7561_v13 = vmul.f32 %v7545_v27, %v7527_v56  ;;  %17953 = vrot.lane.b32.xlu0 %v17952_v46, %s23429_s7  ;;  %17948 = vrot.lane.b32.xlu1 %v17952_v46, %s23431_s9 }
 0xa8d   : > { %v21767_v42 = vmul.f32 %v21688_v50, %v7524_v18 }
 0xa90   : > { %7602 = vrot.lane.b32.xlu1 %v21721_v49, %s23431_s9  ;;  %7807 = vrot.lane.b32.xlu0 %v7561_v13, %s23429_s7 }
 0xa94   : > { %7805 = vrot.lane.b32.xlu1 %v21721_v49, %s23429_s7  ;;  %17963 = vrot.lane.b32.xlu0 %v17952_v46, %s23423_s28 }
 0xa98   : > { %7604 = vrot.lane.b32.xlu1 %v7561_v13, %s23431_s9  ;;  %17968 = vrot.lane.b32.xlu0 %v21714_v36, %s23431_s9 }
 0xa9c   : > { %17958 = vrot.lane.b32.xlu1 %v17952_v46, %s23427_s25  ;;  %17988 = vrot.lane.b32.xlu0 %v21719_v31, %s23431_s9 }
 0xaa0   : > { %8010 = vrot.lane.b32.xlu1 %v21721_v49, %s23427_s25  ;;  %17993 = vrot.lane.b32.xlu0 %v21719_v31, %s23429_s7 }
 0xaa4   : > { %7986 = vrot.lane.b32.xlu1 %v21665_v24, %s23420_s11  ;;  %18003 = vrot.lane.b32.xlu0 %v21719_v31, %s23423_s28 }
 0xaa8   : > { %8012 = vrot.lane.b32.xlu1 %v7561_v13, %s23427_s25  ;;  %18013 = vrot.lane.b32.xlu0 %v21724_v62, %s23429_s7 }
 0xaac   : > { %7988 = vrot.lane.b32.xlu1 %v21672_v4, %s23420_s11  ;;  %18018 = vrot.lane.b32.xlu0 %v21724_v62, %s23427_s25  ;;  %s23802_s11 = smov 110  }
 0xab0   : > { %17973 = vrot.lane.b32.xlu1 %v21714_v36, %s23429_s7  ;;  %18023 = vrot.lane.b32.xlu0 %v21724_v62, %s23423_s28 }
 0xab4   : > { %17978 = vrot.lane.b32.xlu1 %v21714_v36, %s23427_s25  ;;  %7598 = vrot.lane.b32.xlu0 %v21767_v42, %s23431_s9 }
 0xab8   : > { %17983 = vrot.lane.b32.xlu1 %v21714_v36, %s23423_s28  ;;  %7801 = vrot.lane.b32.xlu0 %v21767_v42, %s23429_s7 }
 0xabc   : > { %17998 = vrot.lane.b32.xlu1 %v21719_v31, %s23427_s25  ;;  %8006 = vrot.lane.b32.xlu0 %v21767_v42, %s23427_s25 }
 0xac0   : > { %18008 = vrot.lane.b32.xlu1 %v21724_v62, %s23431_s9  ;;  %7600 = vrot.lane.b32.xlu0 %v21783_v38, %s23431_s9  ;;  %s18857_s9 = smov 52  }
 0xac4   : > { %8221 = vrot.lane.b32.xlu1 %v21721_v49, %s23423_s28  ;;  %7803 = vrot.lane.b32.xlu0 %v21783_v38, %s23429_s7  ;;  %s18855_s7 = smov 4  }
 0xac8   : > { %18028 = vrot.lane.b32.xlu1 %v21714_v36, %s23421_s27  ;;  %8008 = vrot.lane.b32.xlu0 %v21783_v38, %s23427_s25  ;;  %s23828_s25 = smov 125  }
 0xacc   : > { %8197 = vrot.lane.b32.xlu1 %v21665_v24, %s23417_s10  ;;  %8219 = vrot.lane.b32.xlu0 %v21783_v38, %s23423_s28 }
 0xad0   : > { %8223 = vrot.lane.b32.xlu1 %v7561_v13, %s23423_s28  ;;  %8217 = vrot.lane.b32.xlu0 %v21767_v42, %s23423_s28  ;;  %s23815_s28 = smov 112  }
 0xad4   : > { %8199 = vrot.lane.b32.xlu1 %v21672_v4, %s23417_s10  ;;  %18033 = vrot.lane.b32.xlu0 %v21724_v62, %s23421_s27  ;;  %s18851_s10 = smov 104  }
 0xad8   : > { %8432 = vrot.lane.b32.xlu1 %v21721_v49, %s23421_s27  ;;  %18038 = vrot.lane.b32.xlu0 %v21719_v31, %s23421_s27 }
 0xadc   : > { %18048 = vrot.lane.b32.xlu1 %v21714_v36, %s23683_s22  ;;  %18043 = vrot.lane.b32.xlu0 %v17952_v46, %s23421_s27 }
 0xae0   : > { %8408 = vrot.lane.b32.xlu1 %v21665_v24, %s23416_s15  ;;  %8430 = vrot.lane.b32.xlu0 %v21783_v38, %s23421_s27 }
 0xae4   : > { %8434 = vrot.lane.b32.xlu1 %v7561_v13, %s23421_s27  ;;  %8428 = vrot.lane.b32.xlu0 %v21767_v42, %s23421_s27 }
 0xae8   : > { %8637 = vrot.lane.b32.xlu1 %v21783_v38, %s23683_s22  ;;  %18053 = vrot.lane.b32.xlu0 %v21724_v62, %s23683_s22 }
 0xaec   : > { %8635 = vrot.lane.b32.xlu1 %v21767_v42, %s23683_s22  ;;  %18058 = vrot.lane.b32.xlu0 %v21719_v31, %s23683_s22 }
 0xaf0   : > { %18068 = vrot.lane.b32.xlu1 %v21724_v62, %s23678_s14  ;;  %8410 = vrot.lane.b32.xlu0 %v21672_v4, %s23416_s15  ;;  %s23787_s15 = smov 124  }
 0xaf4   : > { %18073 = vrot.lane.b32.xlu1 %v21719_v31, %s23678_s14  ;;  %8639 = vrot.lane.b32.xlu0 %v21721_v49, %s23683_s22 }
 0xaf8   : > { %8853 = vrot.lane.b32.xlu1 %v21783_v38, %s23678_s14  ;;  %18063 = vrot.lane.b32.xlu0 %v21714_v36, %s23678_s14 }
 0xafc   : > { %8851 = vrot.lane.b32.xlu1 %v21767_v42, %s23678_s14  ;;  %8619 = vrot.lane.b32.xlu0 %v21665_v24, %s23415_s16 }
 0xafe   : > { %v21853_v0 = vpop.permute.xlu0 %17953  ;;  %v21855_v15 = vpop.permute.xlu1 %17948 }
 0xaff   : > { %v17950_v23 = vunpack.i.l.bf16 %v21855_v15  ;;  %v17951_v13 = vunpack.i.h.bf16 %v21855_v15 }
 0xb00   : > { %8831 = vrot.lane.b32.xlu1 %v21851_v10, %s23413_s13  ;;  %8621 = vrot.lane.b32.xlu0 %v21672_v4, %s23415_s16  ;;  %s23782_s16 = smov 95  }
 0xb02   : > { %v21861_v50 = vpop.permute.xlu1 %7602  ;;  %v21863_v34 = vpop.permute.xlu0 %7807 }
 0xb04   : > { %18083 = vrot.lane.b32.xlu1 %v21724_v62, %s23418_s8  ;;  %8855 = vrot.lane.b32.xlu0 %v21721_v49, %s23678_s14 }
 0xb06   : > { %v21872_v35 = vpop.permute.xlu1 %7805  ;;  %v21874_v8 = vpop.permute.xlu0 %17963 }
 0xb08   : > { %8833 = vrot.lane.b32.xlu1 %v8823_v7, %s23413_s13  ;;  %8829 = vrot.lane.b32.xlu0 %v21665_v24, %s23413_s13 }
 0xb0a   : > { %v21879_v63 = vpop.permute.xlu1 %7604  ;;  %v17969_v12 = vpop.permute.xlu0 %17968 }
 0xb0b   : > { %v17971_v1 = vunpack.i.h.bf16 %v17969_v12  ;;  %v17970_v33 = vunpack.i.l.bf16 %v17969_v12 }
 0xb0c   : > { %9055 = vrot.lane.b32.xlu1 %v21783_v38, %s23418_s8  ;;  %18078 = vrot.lane.b32.xlu0 %v21714_v36, %s23418_s8 }
 0xb0d   : > { %v7607_v6 = vsel %vm23752_vm4, %v17970_v33, %v17971_v1  ;;  %v7608_v7 = vsel %vm23753_vm5, %v17971_v1, %v17950_v23  ;;  %vm7626_vm4 = vcmask 1043456   ;;  %v17955_v1 = vunpack.i.l.bf16 %v21853_v0  ;;  %vm23759_vm5 = vmmov %vm23755_vm1 }
 0xb0e   : > { %v21885_v2 = vpop.permute.xlu1 %17958  ;;  %v17989_v58 = vpop.permute.xlu0 %17988  ;;  %v17956_v23 = vunpack.i.h.bf16 %v21853_v0 }
 0xb0f   : > { %v17990_v14 = vunpack.i.l.bf16 %v17989_v58  ;;  %v17991_v30 = vunpack.i.h.bf16 %v17989_v58 }
 0xb10   : > { %9053 = vrot.lane.b32.xlu1 %v21767_v42, %s23418_s8  ;;  %18088 = vrot.lane.b32.xlu0 %v21719_v31, %s23418_s8 }
 0xb11   : > { %v7606_v12 = vsel %vm23754_vm15, %v17990_v14, %v17970_v33  ;;  %vm23760_vm15 = vcmask 490496  }
 0xb12   : > { %v21896_v59 = vpop.permute.xlu1 %8010  ;;  %v21898_v41 = vpop.permute.xlu0 %17993 }
 0xb14   : > { %18098 = vrot.lane.b32.xlu1 %v21724_v62, %s23677_s18  ;;  %8835 = vrot.lane.b32.xlu0 %v21894_v54, %s23413_s13  ;;  %s23781_s13 = smov 16  }
 0xb16   : > { %v21904_v40 = vpop.permute.xlu1 %7986  ;;  %v21906_v27 = vpop.permute.xlu0 %18003 }
 0xb18   : > { %18103 = vrot.lane.b32.xlu1 %v21719_v31, %s23677_s18  ;;  %9057 = vrot.lane.b32.xlu0 %v21721_v49, %s23418_s8  ;;  %s23796_s8 = smov 109  }
 0xb1a   : > { %v21912_v17 = vpop.permute.xlu1 %8012  ;;  %v21914_v37 = vpop.permute.xlu0 %18013 }
 0xb1b   : > { %v18016_v33 = vunpack.i.h.bf16 %v21914_v37  ;;  %v18015_v14 = vunpack.i.l.bf16 %v21914_v37 }
 0xb1c   : > { %9257 = vrot.lane.b32.xlu1 %v21783_v38, %s23677_s18  ;;  %18093 = vrot.lane.b32.xlu0 %v21714_v36, %s23677_s18 }
 0xb1e   : > { %v21920_v5 = vpop.permute.xlu1 %7988  ;;  %v21922_v25 = vpop.permute.xlu0 %18018 }
 0xb20   : > { %9255 = vrot.lane.b32.xlu1 %v21767_v42, %s23677_s18  ;;  %9037 = vrot.lane.b32.xlu0 %v21851_v10, %s23412_s17 }
 0xb22   : > { %v21928_v26 = vpop.permute.xlu1 %17973  ;;  %v21930_v57 = vpop.permute.xlu0 %18023 }
 0xb23   : > { %v17976_v60 = vunpack.i.h.bf16 %v21928_v26  ;;  %v17975_v43 = vunpack.i.l.bf16 %v21928_v26 }
 0xb24   : > { %18113 = vrot.lane.b32.xlu1 %v21724_v62, %s23749_s12  ;;  %9039 = vrot.lane.b32.xlu0 %v21894_v54, %s23412_s17  ;;  %s23780_s17 = smov 36  }
 0xb26   : > { %v21936_v61 = vpop.permute.xlu1 %17978  ;;  %v7599_v11 = vpop.permute.xlu0 %7598 }
 0xb28   : > { %18118 = vrot.lane.b32.xlu1 %v21719_v31, %s23749_s12  ;;  %9259 = vrot.lane.b32.xlu0 %v21721_v49, %s23677_s18 }
 0xb2a   : > { %v21942_v32 = vpop.permute.xlu1 %17983  ;;  %v21944_v16 = vpop.permute.xlu0 %7801 }
 0xb2c   : > { %9459 = vrot.lane.b32.xlu1 %v21783_v38, %s23749_s12  ;;  %18108 = vrot.lane.b32.xlu0 %v21714_v36, %s23749_s12 }
 0xb2e   : > { %v21950_v9 = vpop.permute.xlu1 %17998  ;;  %v21952_v51 = vpop.permute.xlu0 %8006 }
 0xb30   : > { %9457 = vrot.lane.b32.xlu1 %v21767_v42, %s23749_s12  ;;  %9239 = vrot.lane.b32.xlu0 %v21851_v10, %s23750_s20 }
 0xb32   : > { %v18009_v56 = vpop.permute.xlu1 %18008  ;;  %v7601_v46 = vpop.permute.xlu0 %7600 }
 0xb33   : > { %v18011_v18 = vunpack.i.h.bf16 %v18009_v56  ;;  %v18010_v48 = vunpack.i.l.bf16 %v18009_v56  ;;  %v7613_v26 = vsel %vm23759_vm5, %v7601_v46, %v21861_v50 }
 0xb34   : > { %18128 = vrot.lane.b32.xlu1 %v21724_v62, %s23751_s26  ;;  %9241 = vrot.lane.b32.xlu0 %v21894_v54, %s23750_s20 }
 0xb35   : > { %v7609_v3 = vsel %vm23755_vm1, %v17991_v30, %v18010_v48  ;;  %v7610_v44 = vsel %vm23756_vm2, %v18010_v48, %v18011_v18  ;;  %v7611_v15 = vsel %vm23757_vm14, %v18011_v18, %v17951_v13  ;;  %vm23758_vm14 = vmmov %vm23755_vm1  ;;  %v7810_v13 = vsel %vm23760_vm15, %v17975_v43, %v17976_v60 }
 0xb36   : > { %v21970_v58 = vpop.permute.xlu1 %8221  ;;  %v21972_v56 = vpop.permute.xlu0 %7803  ;;  %v16472_v20 = vpack.c.bf16 %v7610_v44, %v7607_v6  ;;  %v16476_v47 = vpack.c.bf16 %v7611_v15, %v7608_v7  ;;  %v16474_v28 = vpack.c.bf16 %v7609_v3, %v7606_v12  ;;  %v7614_v44 = vsel %vm23758_vm14, %v21861_v50, %v21879_v63  ;;  %vm23761_vm1 = vmmov %vm23760_vm15 }
 0xb37   : > { %v7811_v63 = vsel %vm23761_vm1, %v17976_v60, %v17955_v1  ;;  %vm23762_vm2 = vmmov %vm23761_vm1  ;;  %v17981_v30 = vunpack.i.h.bf16 %v21936_v61  ;;  %v17960_v48 = vunpack.i.l.bf16 %v21885_v2  ;;  %v18021_v6 = vunpack.i.h.bf16 %v21922_v25 }
 0xb38   : > { %16473 = vmatprep.subr.bf16.mxu0 %v16472_v20  ;;  %16477 = vmatprep.subr.bf16.mxu1 %v16476_v47  ;;  %v17995_v20 = vunpack.i.l.bf16 %v21898_v41  ;;  %vm23763_vm14 = vmmov %vm23759_vm5  ;;  %v17980_v7 = vunpack.i.l.bf16 %v21936_v61  ;;  %v18020_v15 = vunpack.i.l.bf16 %v21922_v25  ;;  %v18000_v61 = vunpack.i.l.bf16 %v21950_v9 }
 0xb39   : > { %18133 = vrot.lane.b32.xlu1 %v21719_v31, %s23751_s26  ;;  %9461 = vrot.lane.b32.xlu0 %v21721_v49, %s23749_s12  ;;  %v7612_v50 = vsel %vm23763_vm14, %v7599_v11, %v7601_v46  ;;  %vm23764_vm5 = vmmov %vm23761_vm1  ;;  %v7816_v25 = vsel %vm23762_vm2, %v21972_v56, %v21872_v35 }
 0xb3a   : > { %16475 = vmatpush1.bf16.msra.mxu0 %v16474_v28  ;;  %16479 = vmatpush3.bf16.msra.mxu1 %v16476_v47  ;;  %v21987_v3 = vpop.permute.xlu1 %18028  ;;  %v21991_v37 = vpop.permute.xlu0 %8008  ;;  %v17996_v28 = vunpack.i.h.bf16 %v21898_v41  ;;  %v7809_v47 = vsel %vm23762_vm2, %v17995_v20, %v17975_v43  ;;  %v7813_v0 = vsel %vm23764_vm5, %v18015_v14, %v18016_v33  ;;  %vm23765_vm6 = vmmov %vm23761_vm1  ;;  %v23771_v20 = vmov 0.0  }
 0xb3b   : > { %15569 = vmatprep.subr.msk.mxu0 %vm7626_vm4, %v7613_v26  ;;  %15951 = vmatprep.subr.msk.mxu1 %vm7626_vm4, %v7614_v44  ;;  %v7814_v18 = vsel %vm23765_vm6, %v18016_v33, %v17956_v23  ;;  %vm23766_vm15 = vmmov %vm23761_vm1  ;;  %v16480_v41 = vpack.c.bf16 %v7813_v0, %v7810_v13  ;;  %v17961_v33 = vunpack.i.h.bf16 %v21885_v2  ;;  %v17985_v0 = vunpack.i.l.bf16 %v21942_v32 }
 0xb3c   : > { %v7812_v60 = vsel %vm23766_vm15, %v17996_v28, %v18015_v14  ;;  %v16484_v11 = vpack.c.bf16 %v7814_v18, %v7811_v63  ;;  %vm23767_vm6 = vmmov %vm23761_vm1  ;;  %v18001_v14 = vunpack.i.h.bf16 %v21950_v9  ;;  %vm23768_vm1 = vcmask 506880  }
 0xb3d   : > { %9661 = vrot.lane.b32.xlu1 %v21783_v38, %s23751_s26  ;;  %18123 = vrot.lane.b32.xlu0 %v21714_v36, %s23751_s26  ;;  %v16482_v12 = vpack.c.bf16 %v7812_v60, %v7809_v47  ;;  %v7817_v1 = vsel %vm23767_vm6, %v21872_v35, %v21863_v34  ;;  %vm23769_vm14 = vmmov %vm23768_vm1  ;;  %v7815_v63 = vsel %vm23762_vm2, %v21944_v16, %v21972_v56  ;;  %v17986_v28 = vunpack.i.h.bf16 %v21942_v32 }
 0xb3e   : > { %15570 = vmatpush1.msk.msra.mxu0 %vm7626_vm4, %v7612_v50  ;;  %15952 = vmatpush3.msk.msra.mxu1 %vm7626_vm4, %v7614_v44  ;;  %v22011_v43 = vpop.permute.xlu1 %8197  ;;  %v22013_v46 = vpop.permute.xlu0 %8219  ;;  %v8019_v9 = vsel %vm23769_vm14, %v18021_v6, %v17961_v33  ;;  %vm23770_vm5 = vmmov %vm23768_vm1  ;;  %v8017_v13 = vsel %vm23768_vm1, %v18001_v14, %v18020_v15  ;;  %v18026_v16 = vunpack.i.h.bf16 %v21930_v57  ;;  %v18025_v18 = vunpack.i.l.bf16 %v21930_v57 }
 0xb3f   : > { %15571 = vmatmul.mubr.msk.f32.vlgmr.msra.gmra.mrb[12].mxu0 %vm7621_vm3, %v21695_v53  ;;  %15954 = vmatmul.mubr.msk.f32.vlgmr.msra.gmra.mrb[6].mxu1 %vm7621_vm3, %v21842_v45  ;;  %v8016_v53 = vsel %vm23768_vm1, %v17981_v30, %v17960_v48  ;;  %v8015_v44 = vsel %vm23770_vm5, %v17980_v7, %v17981_v30  ;;  %vm23772_vm15 = vmmov %vm23768_vm1  ;;  %v17966_v32 = vunpack.i.h.bf16 %v21874_v8  ;;  %v18005_v48 = vunpack.i.l.bf16 %v21906_v27 }
 0xb40   : > { %16481 = vmatprep.subr.bf16.mxu0 %v16480_v41  ;;  %16485 = vmatprep.subr.bf16.mxu1 %v16484_v11  ;;  %v16492_v26 = vpack.c.bf16 %v8019_v9, %v8016_v53  ;;  %v8018_v23 = vsel %vm23772_vm15, %v18020_v15, %v18021_v6  ;;  %vm23773_vm6 = vmmov %vm23768_vm1 }
 0xb41   : > { %16483 = vmatpush1.bf16.msra.mxu0 %v16482_v12  ;;  %16487 = vmatpush3.bf16.msra.mxu1 %v16484_v11  ;;  %v8014_v35 = vsel %vm23773_vm6, %v18000_v61, %v17980_v7  ;;  %v16488_v47 = vpack.c.bf16 %v8018_v23, %v8015_v44  ;;  %vm23775_vm14 = vmmov %vm23768_vm1  ;;  %v18006_v7 = vunpack.i.h.bf16 %v21906_v27  ;;  %v8225_v12 = vsel %vm1642_vm10, %v18005_v48, %v17985_v0 }
 0xb42   : > { %15960 = vmatprep.subr.msk.mxu1 %vm7626_vm4, %v7817_v1  ;;  %9659 = vrot.lane.b32.xlu1 %v21767_v42, %s23751_s26  ;;  %v22036_v34 = vpop.permute.xlu1 %8223  ;;  %v22038_v2 = vpop.permute.xlu0 %8217  ;;  %v16490_v56 = vpack.c.bf16 %v8017_v13, %v8014_v35  ;;  %v8022_v60 = vsel %vm23775_vm14, %v21896_v59, %v21912_v17  ;;  %vm23776_vm5 = vmmov %vm23768_vm1  ;;  %v8229_v17 = vsel %vm1642_vm10, %v18025_v18, %v18026_v16  ;;  %v18031_v61 = vunpack.i.h.bf16 %v21987_v3 }
 0xb43   : > { %9441 = vrot.lane.b32.xlu0 %v21851_v10, %s23683_s22  ;;  %15576 = vmatprep.subr.msk.mxu0 %vm7626_vm4, %v7816_v25  ;;  %v8021_v41 = vsel %vm23776_vm5, %v21991_v37, %v21896_v59  ;;  %v8230_v59 = vsel %vm1642_vm10, %v18026_v16, %v17966_v32  ;;  %vm23777_vm15 = vmmov %vm23768_vm1  ;;  %v8233_v13 = vsel %vm1642_vm10, %v21970_v58, %v22036_v34  ;;  %vm23783_vm6 = vcmask 637952  }
 0xb44   : > { %7703 = vmatprep.mubr.f32.mxu0 %v23771_v20  ;;  %15962 = vmatprep.mubr.msk.f32.mxu1 %vm7621_vm3, %v21665_v24  ;;  %v8020_v15 = vsel %vm23777_vm15, %v21952_v51, %v21991_v37  ;;  %v8228_v51 = vsel %vm1642_vm10, %v18006_v7, %v18025_v18  ;;  %v8231_v34 = vsel %vm1642_vm10, %v22038_v2, %v22013_v46  ;;  %vm23784_vm1 = vmmov %vm23783_vm6 }
 0xb45   : > { %15572 = vmatmul.mubr.msk.f32.gmra.mrb[14].mxu0 %vm7621_vm3, %v21842_v45  ;;  %15961 = vmatpush3.msk.msra.mxu1 %vm7626_vm4, %v7817_v1  ;;  %v17965_v45 = vunpack.i.l.bf16 %v21874_v8  ;;  %v8226_v8 = vsel %vm1642_vm10, %v17985_v0, %v17986_v28  ;;  %vm23785_vm2 = vmmov %vm23784_vm1 }
 0xb46   : > { %15577 = vmatpush1.msk.msra.mxu0 %vm7626_vm4, %v7815_v63  ;;  %16493 = vmatprep.subr.bf16.mxu1 %v16492_v26  ;;  %v22059_v30 = vpop.permute.xlu1 %8199  ;;  %v22061_v50 = vpop.permute.xlu0 %18033  ;;  %v16496_v1 = vpack.c.bf16 %v8229_v17, %v8226_v8  ;;  %vm23786_vm14 = vmmov %vm23784_vm1 }
 0xb47   : > { %18143 = vrot.lane.b32.xlu1 %v21724_v62, %s23774_s29  ;;  %9443 = vrot.lane.b32.xlu0 %v21894_v54, %s23683_s22  ;;  %v18036_v53 = vunpack.i.h.bf16 %v22061_v50  ;;  %v18035_v37 = vunpack.i.l.bf16 %v22061_v50  ;;  %vm23788_vm5 = vmmov %vm23784_vm1 }
 0xb48   : > { %16489 = vmatprep.subr.bf16.mxu0 %v16488_v47  ;;  %7898 = vmatprep.mubr.f32.mxu0 %v23771_v20  ;;  %vm23789_vm15 = vmmov %vm23784_vm1 }
 0xb49   : > { %15578 = vmatmul.mubr.msk.f32.vlgmr.msra.gmra.mrb[12].mxu0 %vm7621_vm3, %v21665_v24  ;;  %15963 = vmatmul.mubr.msk.f32.vlgmr.msra.gmra.mrb[6].mxu1 %vm7621_vm3, %v21672_v4  ;;  %v8227_v24 = vsel %vm1642_vm10, %v17986_v28, %v17965_v45 }
 0xb4a   : > { %16491 = vmatpush1.bf16.msra.mxu0 %v16490_v56  ;;  %16495 = vmatpush3.bf16.msra.mxu1 %v16492_v26  ;;  %v22083_v11 = vpop.permute.xlu1 %8432  ;;  %v18039_v57 = vpop.permute.xlu0 %18038  ;;  %v16500_v6 = vpack.c.bf16 %v8230_v59, %v8227_v24  ;;  %v18030_v26 = vunpack.i.l.bf16 %v21987_v3  ;;  %v8232_v3 = vsel %vm1642_vm10, %v22013_v46, %v21970_v58 }
 0xb4b   : > { %15583 = vmatprep.subr.msk.mxu0 %vm7626_vm4, %v8021_v41  ;;  %15969 = vmatprep.subr.msk.mxu1 %vm7626_vm4, %v8022_v60  ;;  %v18041_v63 = vunpack.i.h.bf16 %v18039_v57  ;;  %v18040_v28 = vunpack.i.l.bf16 %v18039_v57 }
 0xb4c   : > { %15971 = vmatprep.mubr.msk.f32.mxu1 %vm7621_vm3, %v21904_v40  ;;  %18148 = vrot.lane.b32.xlu1 %v21719_v31, %s23774_s29  ;;  %v8437_v58 = vsel %vm1569_vm11, %v18030_v26, %v18031_v61 }
 0xb4d   : > { %9663 = vrot.lane.b32.xlu0 %v21721_v49, %s23751_s26  ;;  %7904 = vmatprep.mubr.f32.mxu0 %v23771_v20  ;;  %v8436_v45 = vsel %vm1569_vm11, %v18040_v28, %v18030_v26  ;;  %v8439_v16 = vsel %vm1569_vm11, %v18041_v63, %v18035_v37 }
 0xb4e   : > { %15579 = vmatmul.mubr.msk.f32.gmra.mrb[14].mxu0 %vm7621_vm3, %v21672_v4  ;;  %15970 = vmatpush3.msk.msra.mxu1 %vm7626_vm4, %v8022_v60  ;;  %v22107_v33 = vpop.permute.xlu1 %18048  ;;  %v18044_v14 = vpop.permute.xlu0 %18043  ;;  %v16498_v4 = vpack.c.bf16 %v8228_v51, %v8225_v12 }
 0xb4f   : > { %15584 = vmatpush1.msk.msra.mxu0 %vm7626_vm4, %v8020_v15  ;;  %16501 = vmatprep.subr.bf16.mxu1 %v16500_v6  ;;  %v18046_v27 = vunpack.i.h.bf16 %v18044_v14  ;;  %v18045_v25 = vunpack.i.l.bf16 %v18044_v14  ;;  %v18051_v46 = vunpack.i.h.bf16 %v22107_v33  ;;  %v18050_v2 = vunpack.i.l.bf16 %v22107_v33 }
 0xb50   : > { %16497 = vmatprep.subr.bf16.mxu0 %v16496_v1  ;;  %9863 = vrot.lane.b32.xlu1 %v21783_v38, %s23774_s29 }
 0xb51   : > { %18138 = vrot.lane.b32.xlu0 %v21714_v36, %s23774_s29  ;;  %8103 = vmatprep.mubr.f32.mxu0 %v23771_v20  ;;  %v8438_v9 = vsel %vm1569_vm11, %v18031_v61, %v18045_v25  ;;  %v8441_v44 = vsel %vm1569_vm11, %v18036_v53, %v18046_v27  ;;  %v8642_v59 = vsel %vm1493_vm12, %v18050_v2, %v18051_v46 }
 0xb52   : > { %15585 = vmatmul.mubr.msk.f32.vlgmr.msra.gmra.mrb[12].mxu0 %vm7621_vm3, %v21904_v40  ;;  %15972 = vmatmul.mubr.msk.f32.vlgmr.msra.gmra.mrb[6].mxu1 %vm7621_vm3, %v21920_v5  ;;  %v22126_v23 = vpop.permute.xlu1 %8408  ;;  %v8431_v35 = vpop.permute.xlu0 %8430  ;;  %v8440_v40 = vsel %vm1569_vm11, %v18035_v37, %v18036_v53  ;;  %v16508_v47 = vpack.c.bf16 %v8441_v44, %v8438_v9 }
 0xb53   : > { %16499 = vmatpush1.bf16.msra.mxu0 %v16498_v4  ;;  %16503 = vmatpush3.bf16.msra.mxu1 %v16500_v6  ;;  %v16504_v56 = vpack.c.bf16 %v8440_v40, %v8437_v58  ;;  %v8443_v24 = vsel %vm1569_vm11, %v8431_v35, %v22083_v11 }
 0xb54   : > { %15590 = vmatprep.subr.msk.mxu0 %vm7626_vm4, %v8232_v3  ;;  %15978 = vmatprep.subr.msk.mxu1 %vm7626_vm4, %v8233_v13 }
 0xb55   : > { %15980 = vmatprep.mubr.msk.f32.mxu1 %vm7621_vm3, %v22011_v43  ;;  %9861 = vrot.lane.b32.xlu1 %v21767_v42, %s23774_s29 }
 0xb56   : > { %9643 = vrot.lane.b32.xlu0 %v21851_v10, %s23778_s23  ;;  %8109 = vmatprep.mubr.f32.mxu0 %v23771_v20  ;;  %v8435_v50 = vpop.permute.xlu1 %8434  ;;  %v8429_v0 = vpop.permute.xlu0 %8428 }
 0xb57   : > { %15586 = vmatmul.mubr.msk.f32.gmra.mrb[14].mxu0 %vm7621_vm3, %v21920_v5  ;;  %15979 = vmatpush3.msk.msra.mxu1 %vm7626_vm4, %v8233_v13  ;;  %v16506_v5 = vpack.c.bf16 %v8439_v16, %v8436_v45  ;;  %v8444_v60 = vsel %vm1569_vm11, %v22083_v11, %v8435_v50  ;;  %v8442_v12 = vsel %vm1569_vm11, %v8429_v0, %v8431_v35 }
 0xb58   : > { %15591 = vmatpush1.msk.msra.mxu0 %vm7626_vm4, %v8231_v34  ;;  %16509 = vmatprep.subr.bf16.mxu1 %v16508_v47 }
 0xb59   : > { %16505 = vmatprep.subr.bf16.mxu0 %v16504_v56  ;;  %18158 = vrot.lane.b32.xlu1 %v21724_v62, %s23779_s30 }
 0xb5a   : > { %9645 = vrot.lane.b32.xlu0 %v21894_v54, %s23778_s23  ;;  %8314 = vmatprep.mubr.f32.mxu0 %v23771_v20  ;;  %v8638_v18 = vpop.permute.xlu1 %8637  ;;  %v18054_v32 = vpop.permute.xlu0 %18053 }
 0xb5b   : > { %15592 = vmatmul.mubr.msk.f32.vlgmr.msra.gmra.mrb[12].mxu0 %vm7621_vm3, %v22011_v43  ;;  %15981 = vmatmul.mubr.msk.f32.vlgmr.msra.gmra.mrb[6].mxu1 %vm7621_vm3, %v22059_v30  ;;  %v18056_v41 = vunpack.i.h.bf16 %v18054_v32  ;;  %v18055_v57 = vunpack.i.l.bf16 %v18054_v32  ;;  %v22254_v32 = vld [vmem:[%s23238_s3 + $0x30] sm:$0x3] }
 0xb5c   : > { %16507 = vmatpush1.bf16.msra.mxu0 %v16506_v5  ;;  %16511 = vmatpush3.bf16.msra.mxu1 %v16508_v47  ;;  %v10049_v47 = vld [vmem:[%s23238_s3 + $0x28] sm:$0x3] }
 0xb5d   : > { %15597 = vmatprep.subr.msk.mxu0 %vm7626_vm4, %v8443_v24  ;;  %18163 = vrot.lane.b32.xlu1 %v21719_v31, %s23779_s30  ;;  %v8644_v8 = vsel %vm1493_vm12, %v18055_v57, %v18056_v41  ;;  %v16516_v6 = vpack.c.bf16 %v18056_v41, %v18051_v46 }
 0xb5e   : > { %9865 = vrot.lane.b32.xlu0 %v21721_v49, %s23774_s29  ;;  %15987 = vmatprep.subr.msk.mxu1 %vm7626_vm4, %v8444_v60  ;;  %v8636_v43 = vpop.permute.xlu1 %8635  ;;  %v18059_v48 = vpop.permute.xlu0 %18058  ;;  %v16512_v7 = vpack.c.bf16 %v8644_v8, %v8642_v59 }
 0xb5f   : > { %8320 = vmatprep.mubr.f32.mxu0 %v23771_v20  ;;  %v18061_v17 = vunpack.i.h.bf16 %v18059_v48  ;;  %v18060_v11 = vunpack.i.l.bf16 %v18059_v48  ;;  %15989 = vmatprep.mubr.msk.f32.mxu1 %vm7621_vm3, %v22126_v23  ;;  %v8645_v4 = vsel %vm1493_vm12, %v8636_v43, %v8638_v18 }
 0xb60   : > { %15593 = vmatmul.mubr.msk.f32.gmra.mrb[14].mxu0 %vm7621_vm3, %v22059_v30  ;;  %15988 = vmatpush3.msk.msra.mxu1 %vm7626_vm4, %v8444_v60  ;;  %v22202_v30 = vld [vmem:[%s23238_s3 + $0x10] sm:$0xff] }
 0xb61   : > { %15598 = vmatpush1.msk.msra.mxu0 %vm7626_vm4, %v8442_v12  ;;  %10080 = vrot.lane.b32.xlu1 %v21783_v38, %s23779_s30  ;;  %v8641_v15 = vsel %vm1493_vm12, %v18060_v11, %v18050_v2  ;;  %v8643_v1 = vsel %vm1493_vm12, %v18061_v17, %v18055_v57 }
 0xb62   : > { %18153 = vrot.lane.b32.xlu0 %v21714_v36, %s23779_s30  ;;  %8525 = vmatprep.mubr.f32.mxu0 %v23771_v20  ;;  %v18069_v33 = vpop.permute.xlu1 %18068  ;;  %v8411_v14 = vpop.permute.xlu0 %8410  ;;  %v16514_v61 = vpack.c.bf16 %v8643_v1, %v8641_v15 }
 0xb63   : > { %16517 = vmatprep.subr.bf16.mxu1 %v16516_v6  ;;  %16513 = vmatprep.subr.bf16.mxu0 %v16512_v7  ;;  %v18071_v51 = vunpack.i.h.bf16 %v18069_v33  ;;  %v18070_v37 = vunpack.i.l.bf16 %v18069_v33 }
 0xb64   : > { %15599 = vmatmul.mubr.msk.f32.vlgmr.msra.gmra.mrb[12].mxu0 %vm7621_vm3, %v22126_v23  ;;  %15990 = vmatmul.mubr.msk.f32.vlgmr.msra.gmra.mrb[6].mxu1 %vm7621_vm3, %v8411_v14 }
 0xb65   : > { %10078 = vrot.lane.b32.xlu1 %v21767_v42, %s23779_s30  ;;  %16519 = vmatpush3.bf16.msra.mxu1 %v16516_v6  ;;  %v8860_v63 = vsel %vm1430_vm13, %v18070_v37, %v18071_v51 }
 0xb66   : > { %9845 = vrot.lane.b32.xlu0 %v21851_v10, %s23780_s17  ;;  %16515 = vmatpush1.bf16.msra.mxu0 %v16514_v61  ;;  %v18074_v53 = vpop.permute.xlu1 %18073  ;;  %v8640_v27 = vpop.permute.xlu0 %8639 }
 0xb67   : > { %8531 = vmatprep.mubr.f32.mxu0 %v23771_v20  ;;  %15996 = vmatprep.subr.msk.mxu1 %vm7626_vm4, %v8640_v27  ;;  %v8646_v25 = vsel %vm1493_vm12, %v8638_v18, %v8640_v27  ;;  %v18076_v9 = vunpack.i.h.bf16 %v18074_v53  ;;  %v18075_v23 = vunpack.i.l.bf16 %v18074_v53 }
 0xb68   : > { %15600 = vmatmul.mubr.msk.f32.gmra.mrb[14].mxu0 %vm7621_vm3, %v8411_v14  ;;  %15604 = vmatprep.subr.msk.mxu0 %vm7626_vm4, %v8646_v25 }
 0xb69   : > { %10057 = vrot.lane.b32.xlu1 %v22202_v30, %s23781_s13  ;;  %15997 = vmatpush3.msk.msra.mxu1 %vm7626_vm4, %v8640_v27  ;;  %v8859_v28 = vsel %vm1430_vm13, %v18076_v9, %v18070_v37 }
 0xb6a   : > { %9847 = vrot.lane.b32.xlu0 %v21894_v54, %s23780_s17  ;;  %15605 = vmatpush1.msk.msra.mxu0 %vm7626_vm4, %v8645_v4  ;;  %v8854_v44 = vpop.permute.xlu1 %8853  ;;  %v18064_v26 = vpop.permute.xlu0 %18063 }
 0xb6b   : > { %v18066_v35 = vunpack.i.h.bf16 %v18064_v26  ;;  %v18065_v13 = vunpack.i.l.bf16 %v18064_v26  ;;  %8727 = vmatprep.mubr.f32.mxu0 %v23771_v20 }
 0xb6d   : > { %18173 = vrot.lane.b32.xlu1 %v21724_v62, %s23782_s16  ;;  %v8857_v3 = vsel %vm1430_vm13, %v18075_v23, %v18065_v13  ;;  %v16524_v40 = vpack.c.bf16 %v18071_v51, %v18066_v35  ;;  %v8858_v54 = vsel %vm1430_vm13, %v18065_v13, %v18066_v35 }
 0xb6e   : > { %10082 = vrot.lane.b32.xlu0 %v21721_v49, %s23779_s30  ;;  %v8852_v34 = vpop.permute.xlu1 %8851  ;;  %v8620_v58 = vpop.permute.xlu0 %8619  ;;  %v16520_v50 = vpack.c.bf16 %v8860_v63, %v8858_v54  ;;  %v16522_v0 = vpack.c.bf16 %v8859_v28, %v8857_v3 }
 0xb6f   : > { %16525 = vmatprep.subr.bf16.mxu1 %v16524_v40  ;;  %15606 = vmatmul.mubr.msk.f32.vlgmr.msra.gmra.mrb[12].mxu0 %vm7621_vm3, %v8620_v58  ;;  %v8861_v2 = vsel %vm1430_vm13, %v8852_v34, %v8854_v44 }
 0xb70   : > { %16521 = vmatprep.subr.bf16.mxu0 %v16520_v50  ;;  %15998 = vmatprep.mubr.msk.f32.mxu1 %vm7621_vm3, %v8620_v58 }
 0xb71   : > { %10059 = vrot.lane.b32.xlu1 %v10049_v47, %s23781_s13  ;;  %16523 = vmatpush1.bf16.msra.mxu0 %v16522_v0 }
 0xb72   : > { %10055 = vrot.lane.b32.xlu0 %v21851_v10, %s23781_s13  ;;  %v8832_v45 = vpop.permute.xlu1 %8831  ;;  %v8622_v16 = vpop.permute.xlu0 %8621  ;;  %8733 = vmatprep.mubr.f32.mxu0 %v23771_v20 }
 0xb73   : > { %15999 = vmatmul.mubr.msk.f32.vlgmr.msra.gmra.mrb[6].mxu1 %vm7621_vm3, %v8622_v16  ;;  %15607 = vmatmul.mubr.msk.f32.gmra.mrb[14].mxu0 %vm7621_vm3, %v8622_v16 }
 0xb74   : > { %16527 = vmatpush3.bf16.msra.mxu1 %v16524_v40  ;;  %8943 = vmatprep.mubr.f32.mxu0 %v23771_v20 }
 0xb75   : > { %10282 = vrot.lane.b32.xlu1 %v21783_v38, %s23782_s16 }
 0xb76   : > { %18168 = vrot.lane.b32.xlu0 %v21714_v36, %s23782_s16  ;;  %v18084_v56 = vpop.permute.xlu1 %18083  ;;  %v8856_v46 = vpop.permute.xlu0 %8855 }
 0xb77   : > { %16005 = vmatprep.subr.msk.mxu1 %vm7626_vm4, %v8856_v46  ;;  %v8862_v10 = vsel %vm1430_vm13, %v8854_v44, %v8856_v46  ;;  %v18086_v41 = vunpack.i.h.bf16 %v18084_v56  ;;  %v18085_v57 = vunpack.i.l.bf16 %v18084_v56 }
 0xb78   : > { %15611 = vmatprep.subr.msk.mxu0 %vm7626_vm4, %v8862_v10  ;;  %16006 = vmatpush3.msk.msra.mxu1 %vm7626_vm4, %v8856_v46 }
 0xb79   : > { %10280 = vrot.lane.b32.xlu1 %v21767_v42, %s23782_s16  ;;  %15612 = vmatpush1.msk.msra.mxu0 %vm7626_vm4, %v8861_v2  ;;  %v9062_v11 = vsel %vm23784_vm1, %v18085_v57, %v18086_v41 }
 0xb7a   : > { %18178 = vrot.lane.b32.xlu0 %v21719_v31, %s23782_s16  ;;  %v8834_v5 = vpop.permute.xlu1 %8833  ;;  %v8830_v18 = vpop.permute.xlu0 %8829 }
 0xb7b   : > { %v8837_v60 = vsel %vm4582_vm0, %v8830_v18, %v8832_v45 }
 0xb7c   : > { %15613 = vmatmul.mubr.msk.f32.vlgmr.msra.gmra.mrb[12].mxu0 %vm7621_vm3, %v8837_v60  ;;  %16007 = vmatprep.mubr.msk.f32.mxu1 %vm7621_vm3, %v8837_v60 }
 0xb7d   : > { %18188 = vrot.lane.b32.xlu1 %v21724_v62, %s23750_s20  ;;  %8949 = vmatprep.mubr.f32.mxu0 %v23771_v20 }
 0xb7e   : > { %10061 = vrot.lane.b32.xlu0 %v22254_v32, %s23781_s13  ;;  %v9056_v24 = vpop.permute.xlu1 %9055  ;;  %v18079_v8 = vpop.permute.xlu0 %18078 }
 0xb7f   : > { %v18081_v43 = vunpack.i.h.bf16 %v18079_v8  ;;  %v18080_v48 = vunpack.i.l.bf16 %v18079_v8 }
 0xb81   : > { %18193 = vrot.lane.b32.xlu1 %v21719_v31, %s23750_s20  ;;  %v16532_v59 = vpack.c.bf16 %v18086_v41, %v18081_v43  ;;  %v9060_v17 = vsel %vm23783_vm6, %v18080_v48, %v18081_v43  ;;  %vm23790_vm6 = vcmask 646144  }
 0xb82   : > { %10284 = vrot.lane.b32.xlu0 %v21721_v49, %s23782_s16  ;;  %v9054_v6 = vpop.permute.xlu1 %9053  ;;  %v18089_v7 = vpop.permute.xlu0 %18088  ;;  %v16528_v12 = vpack.c.bf16 %v9062_v11, %v9060_v17  ;;  %vm23791_vm1 = vmmov %vm23790_vm6 }
 0xb83   : > { %v18091_v15 = vunpack.i.h.bf16 %v18089_v7  ;;  %v18090_v1 = vunpack.i.l.bf16 %v18089_v7  ;;  %16533 = vmatprep.subr.bf16.mxu1 %v16532_v59  ;;  %v9063_v26 = vsel %vm23789_vm15, %v9054_v6, %v9056_v24  ;;  %vm23795_vm15 = vmmov %vm23791_vm1 }
 0xb84   : > { %16529 = vmatprep.subr.bf16.mxu0 %v16528_v12 }
 0xb85   : > { %10484 = vrot.lane.b32.xlu1 %v21783_v38, %s23750_s20  ;;  %v9061_v33 = vsel %vm23785_vm2, %v18091_v15, %v18085_v57  ;;  %v9059_v14 = vsel %vm23786_vm14, %v18090_v1, %v18080_v48  ;;  %vm23792_vm2 = vmmov %vm23791_vm1 }
 0xb86   : > { %18183 = vrot.lane.b32.xlu0 %v21714_v36, %s23750_s20  ;;  %v18099_v61 = vpop.permute.xlu1 %18098  ;;  %v8836_v53 = vpop.permute.xlu0 %8835  ;;  %v16530_v27 = vpack.c.bf16 %v9061_v33, %v9059_v14  ;;  %vm23793_vm14 = vmmov %vm23791_vm1 }
 0xb87   : > { %v8838_v25 = vsel %vm4582_vm0, %v8834_v5, %v8836_v53  ;;  %v18101_v9 = vunpack.i.h.bf16 %v18099_v61  ;;  %v18100_v44 = vunpack.i.l.bf16 %v18099_v61 }
 0xb88   : > { %16008 = vmatmul.mubr.msk.f32.vlgmr.msra.gmra.mrb[6].mxu1 %vm7621_vm3, %v8838_v25  ;;  %16531 = vmatpush1.bf16.msra.mxu0 %v16530_v27 }
 0xb89   : > { %10482 = vrot.lane.b32.xlu1 %v21767_v42, %s23750_s20  ;;  %16535 = vmatpush3.bf16.msra.mxu1 %v16532_v59  ;;  %v9264_v40 = vsel %vm23790_vm6, %v18100_v44, %v18101_v9  ;;  %vm23797_vm6 = vcmask 654336  }
 0xb8a   : > { %10264 = vrot.lane.b32.xlu0 %v22202_v30, %s23787_s15  ;;  %15614 = vmatmul.mubr.msk.f32.gmra.mrb[14].mxu0 %vm7621_vm3, %v8838_v25  ;;  %v18104_v51 = vpop.permute.xlu1 %18103  ;;  %v9058_v37 = vpop.permute.xlu0 %9057 }
 0xb8b   : > { %16014 = vmatprep.subr.msk.mxu1 %vm7626_vm4, %v9058_v37  ;;  %v9064_v4 = vsel %vm23788_vm5, %v9056_v24, %v9058_v37  ;;  %9145 = vmatprep.mubr.f32.mxu0 %v23771_v20  ;;  %v18106_v23 = vunpack.i.h.bf16 %v18104_v51  ;;  %v18105_v63 = vunpack.i.l.bf16 %v18104_v51  ;;  %vm23794_vm5 = vmmov %vm23791_vm1 }
 0xb8c   : > { %15618 = vmatprep.subr.msk.mxu0 %vm7626_vm4, %v9064_v4 }
 0xb8d   : > { %18203 = vrot.lane.b32.xlu1 %v21724_v62, %s23425_s19  ;;  %16015 = vmatpush3.msk.msra.mxu1 %vm7626_vm4, %v9058_v37  ;;  %v9263_v54 = vsel %vm23791_vm1, %v18106_v23, %v18100_v44  ;;  %vm23798_vm1 = vmmov %vm23797_vm6 }
 0xb8e   : > { %10266 = vrot.lane.b32.xlu0 %v22254_v32, %s23787_s15  ;;  %15619 = vmatpush1.msk.msra.mxu0 %vm7626_vm4, %v9063_v26  ;;  %v9258_v35 = vpop.permute.xlu1 %9257  ;;  %v18094_v13 = vpop.permute.xlu0 %18093 }
 0xb8f   : > { %v18096_v28 = vunpack.i.h.bf16 %v18094_v13  ;;  %v18095_v3 = vunpack.i.l.bf16 %v18094_v13 }
 0xb91   : > { %18208 = vrot.lane.b32.xlu1 %v21719_v31, %s23425_s19  ;;  %v9261_v47 = vsel %vm23792_vm2, %v18105_v63, %v18095_v3  ;;  %v16540_v34 = vpack.c.bf16 %v18101_v9, %v18096_v28  ;;  %v9262_v58 = vsel %vm23793_vm14, %v18095_v3, %v18096_v28  ;;  %vm23799_vm2 = vmmov %vm23798_vm1 }
 0xb92   : > { %10486 = vrot.lane.b32.xlu0 %v21721_v49, %s23750_s20  ;;  %v9256_v50 = vpop.permute.xlu1 %9255  ;;  %v9038_v0 = vpop.permute.xlu0 %9037  ;;  %v16536_v45 = vpack.c.bf16 %v9264_v40, %v9262_v58  ;;  %v16538_v16 = vpack.c.bf16 %v9263_v54, %v9261_v47  ;;  %vm23800_vm14 = vmmov %vm23798_vm1 }
 0xb93   : > { %16541 = vmatprep.subr.bf16.mxu1 %v16540_v34  ;;  %15620 = vmatmul.mubr.msk.f32.vlgmr.msra.gmra.mrb[12].mxu0 %vm7621_vm3, %v9038_v0  ;;  %v9265_v18 = vsel %vm23795_vm15, %v9256_v50, %v9258_v35  ;;  %vm23803_vm15 = vmmov %vm23798_vm1 }
 0xb94   : > { %16537 = vmatprep.subr.bf16.mxu0 %v16536_v45  ;;  %16016 = vmatprep.mubr.msk.f32.mxu1 %vm7621_vm3, %v9038_v0 }
 0xb95   : > { %10686 = vrot.lane.b32.xlu1 %v21783_v38, %s23425_s19  ;;  %16539 = vmatpush1.bf16.msra.mxu0 %v16538_v16 }
 0xb96   : > { %18198 = vrot.lane.b32.xlu0 %v21714_v36, %s23425_s19  ;;  %v18114_v56 = vpop.permute.xlu1 %18113  ;;  %v9040_v46 = vpop.permute.xlu0 %9039  ;;  %9151 = vmatprep.mubr.f32.mxu0 %v23771_v20 }
 0xb97   : > { %16017 = vmatmul.mubr.msk.f32.vlgmr.msra.gmra.mrb[6].mxu1 %vm7621_vm3, %v9040_v46  ;;  %15621 = vmatmul.mubr.msk.f32.gmra.mrb[14].mxu0 %vm7621_vm3, %v9040_v46  ;;  %v18116_v60 = vunpack.i.h.bf16 %v18114_v56  ;;  %v18115_v41 = vunpack.i.l.bf16 %v18114_v56 }
 0xb98   : > { %16543 = vmatpush3.bf16.msra.mxu1 %v16540_v34  ;;  %9347 = vmatprep.mubr.f32.mxu0 %v23771_v20 }
 0xb99   : > { %10684 = vrot.lane.b32.xlu1 %v21767_v42, %s23425_s19  ;;  %v9466_v17 = vsel %vm23797_vm6, %v18115_v41, %v18116_v60  ;;  %vm23804_vm6 = vcmask 752640  }
 0xb9a   : > { %10466 = vrot.lane.b32.xlu0 %v22202_v30, %s18851_s10  ;;  %v18119_v10 = vpop.permute.xlu1 %18118  ;;  %v9260_v2 = vpop.permute.xlu0 %9259 }
 0xb9b   : > { %16023 = vmatprep.subr.msk.mxu1 %vm7626_vm4, %v9260_v2  ;;  %v9266_v5 = vsel %vm23794_vm5, %v9258_v35, %v9260_v2  ;;  %v18121_v57 = vunpack.i.h.bf16 %v18119_v10  ;;  %v18120_v43 = vunpack.i.l.bf16 %v18119_v10  ;;  %vm23801_vm5 = vmmov %vm23798_vm1 }
 0xb9c   : > { %15625 = vmatprep.subr.msk.mxu0 %vm7626_vm4, %v9266_v5  ;;  %16024 = vmatpush3.msk.msra.mxu1 %vm7626_vm4, %v9260_v2 }
 0xb9d   : > { %18218 = vrot.lane.b32.xlu1 %v21724_v62, %s23796_s8  ;;  %15626 = vmatpush1.msk.msra.mxu0 %vm7626_vm4, %v9265_v18  ;;  %v9465_v11 = vsel %vm23798_vm1, %v18121_v57, %v18115_v41  ;;  %vm23805_vm1 = vmmov %vm23804_vm6 }
 0xb9e   : > { %10468 = vrot.lane.b32.xlu0 %v22254_v32, %s18851_s10  ;;  %v9460_v24 = vpop.permute.xlu1 %9459  ;;  %v18109_v8 = vpop.permute.xlu0 %18108  ;;  %s18852_s10 = smov 84  }
 0xb9f   : > { %v18111_v48 = vunpack.i.h.bf16 %v18109_v8  ;;  %v18110_v59 = vunpack.i.l.bf16 %v18109_v8 }
 0xba1   : > { %18223 = vrot.lane.b32.xlu1 %v21719_v31, %s23796_s8  ;;  %v9463_v6 = vsel %vm23799_vm2, %v18120_v43, %v18110_v59  ;;  %v16548_v7 = vpack.c.bf16 %v18116_v60, %v18111_v48  ;;  %v9464_v12 = vsel %vm23800_vm14, %v18110_v59, %v18111_v48  ;;  %vm23806_vm2 = vmmov %vm23805_vm1 }
 0xba2   : > { %10688 = vrot.lane.b32.xlu0 %v21721_v49, %s23425_s19  ;;  %v9458_v15 = vpop.permute.xlu1 %9457  ;;  %v9240_v1 = vpop.permute.xlu0 %9239  ;;  %v16544_v33 = vpack.c.bf16 %v9466_v17, %v9464_v12  ;;  %v16546_v14 = vpack.c.bf16 %v9465_v11, %v9463_v6  ;;  %vm23807_vm14 = vmmov %vm23805_vm1  ;;  %s18856_s19 = smov 72  }
 0xba3   : > { %16549 = vmatprep.subr.bf16.mxu1 %v16548_v7  ;;  %15627 = vmatmul.mubr.msk.f32.vlgmr.msra.gmra.mrb[12].mxu0 %vm7621_vm3, %v9240_v1  ;;  %v9467_v9 = vsel %vm23803_vm15, %v9458_v15, %v9460_v24  ;;  %vm23810_vm15 = vmmov %vm23805_vm1 }
 0xba4   : > { %16545 = vmatprep.subr.bf16.mxu0 %v16544_v33  ;;  %16025 = vmatprep.mubr.msk.f32.mxu1 %vm7621_vm3, %v9240_v1 }
 0xba5   : > { %10888 = vrot.lane.b32.xlu1 %v21783_v38, %s23796_s8  ;;  %16547 = vmatpush1.bf16.msra.mxu0 %v16546_v14 }
 0xba6   : > { %18213 = vrot.lane.b32.xlu0 %v21714_v36, %s23796_s8  ;;  %v18129_v61 = vpop.permute.xlu1 %18128  ;;  %v9242_v53 = vpop.permute.xlu0 %9241  ;;  %9353 = vmatprep.mubr.f32.mxu0 %v23771_v20 }
 0xba7   : > { %16026 = vmatmul.mubr.msk.f32.vlgmr.msra.gmra.mrb[6].mxu1 %vm7621_vm3, %v9242_v53  ;;  %15628 = vmatmul.mubr.msk.f32.gmra.mrb[14].mxu0 %vm7621_vm3, %v9242_v53  ;;  %v18131_v37 = vunpack.i.h.bf16 %v18129_v61  ;;  %v18130_v4 = vunpack.i.l.bf16 %v18129_v61 }
 0xba8   : > { %16551 = vmatpush3.bf16.msra.mxu1 %v16548_v7  ;;  %9549 = vmatprep.mubr.f32.mxu0 %v23771_v20 }
 0xba9   : > { %10886 = vrot.lane.b32.xlu1 %v21767_v42, %s23796_s8  ;;  %v9668_v28 = vsel %vm23804_vm6, %v18130_v4, %v18131_v37  ;;  %vm23811_vm6 = vcmask 760832  }
 0xbaa   : > { %10668 = vrot.lane.b32.xlu0 %v22202_v30, %s18852_s10 }
 0xbab   : > { %v18134_v27 = vpop.permute.xlu1 %18133  ;;  %v9462_v25 = vpop.permute.xlu0 %9461 }
 0xbac   : > { %16032 = vmatprep.subr.msk.mxu1 %vm7626_vm4, %v9462_v25  ;;  %v9468_v51 = vsel %vm23801_vm5, %v9460_v24, %v9462_v25  ;;  %v18136_v44 = vunpack.i.h.bf16 %v18134_v27  ;;  %v18135_v35 = vunpack.i.l.bf16 %v18134_v27  ;;  %vm23809_vm5 = vmmov %vm23805_vm1 }
 0xbad   : > { %18233 = vrot.lane.b32.xlu1 %v21724_v62, %s23802_s11  ;;  %15632 = vmatprep.subr.msk.mxu0 %vm7626_vm4, %v9468_v51 }
 0xbae   : > { %10670 = vrot.lane.b32.xlu0 %v22254_v32, %s18852_s10  ;;  %16033 = vmatpush3.msk.msra.mxu1 %vm7626_vm4, %v9462_v25  ;;  %v9667_v3 = vsel %vm23805_vm1, %v18136_v44, %v18130_v4  ;;  %s23808_s10 = smov 111   ;;  %vm23812_vm1 = vmmov %vm23811_vm6 }
 0xbaf   : > { %15633 = vmatpush1.msk.msra.mxu0 %vm7626_vm4, %v9467_v9  ;;  %v9662_v26 = vpop.permute.xlu1 %9661  ;;  %v18124_v23 = vpop.permute.xlu0 %18123 }
 0xbb0   : > { %v18126_v13 = vunpack.i.h.bf16 %v18124_v23  ;;  %v18125_v63 = vunpack.i.l.bf16 %v18124_v23 }
 0xbb1   : > { %18238 = vrot.lane.b32.xlu1 %v21719_v31, %s23802_s11 }
 0xbb2   : > { %10890 = vrot.lane.b32.xlu0 %v21721_v49, %s23796_s8  ;;  %v9665_v40 = vsel %vm23806_vm2, %v18135_v35, %v18125_v63  ;;  %v16556_v54 = vpack.c.bf16 %v18131_v37, %v18126_v13  ;;  %v9666_v47 = vsel %vm23807_vm14, %v18125_v63, %v18126_v13  ;;  %vm23813_vm2 = vmmov %vm23812_vm1 }
 0xbb3   : > { %v16552_v34 = vpack.c.bf16 %v9668_v28, %v9666_v47  ;;  %v16554_v58 = vpack.c.bf16 %v9667_v3, %v9665_v40  ;;  %vm23814_vm14 = vmmov %vm23812_vm1 }
 0xbb4   : > { %v9660_v50 = vpop.permute.xlu1 %9659  ;;  %16557 = vmatprep.subr.bf16.mxu1 %v16556_v54 }
 0xbb5   : > { %11090 = vrot.lane.b32.xlu1 %v21783_v38, %s23802_s11  ;;  %v9442_v0 = vpop.permute.xlu0 %9441  ;;  %16553 = vmatprep.subr.bf16.mxu0 %v16552_v34  ;;  %v9669_v18 = vsel %vm23810_vm15, %v9660_v50, %v9662_v26  ;;  %vm23817_vm15 = vmmov %vm23812_vm1  ;;  %v22434_v50 = vld [vmem:[%s23238_s3 + $0x18] sm:$0xff] }
 0xbb6   : > { %18228 = vrot.lane.b32.xlu0 %v21714_v36, %s23802_s11  ;;  %15634 = vmatmul.mubr.msk.f32.vlgmr.msra.gmra.mrb[12].mxu0 %vm7621_vm3, %v9442_v0 }
 0xbb7   : > { %16555 = vmatpush1.bf16.msra.mxu0 %v16554_v58  ;;  %16034 = vmatprep.mubr.msk.f32.mxu1 %vm7621_vm3, %v9442_v0 }
 0xbb8   : > { %9555 = vmatprep.mubr.f32.mxu0 %v23771_v20 }
 0xbb9   : > { %11088 = vrot.lane.b32.xlu1 %v21767_v42, %s23802_s11  ;;  %v18144_v45 = vpop.permute.xlu1 %18143  ;;  %v9444_v16 = vpop.permute.xlu0 %9443 }
 0xbba   : > { %10870 = vrot.lane.b32.xlu0 %v22202_v30, %s23421_s27  ;;  %16035 = vmatmul.mubr.msk.f32.vlgmr.msra.gmra.mrb[6].mxu1 %vm7621_vm3, %v9444_v16  ;;  %v18146_v2 = vunpack.i.h.bf16 %v18144_v45  ;;  %v18145_v5 = vunpack.i.l.bf16 %v18144_v45 }
 0xbbb   : > { %16559 = vmatpush3.bf16.msra.mxu1 %v16556_v54  ;;  %15635 = vmatmul.mubr.msk.f32.gmra.mrb[14].mxu0 %vm7621_vm3, %v9444_v16 }
 0xbbc   : > { %9751 = vmatprep.mubr.f32.mxu0 %v23771_v20  ;;  %v9870_v48 = vsel %vm23811_vm6, %v18145_v5, %v18146_v2  ;;  %vm23818_vm6 = vcmask 769024  }
 0xbbd   : > { %18248 = vrot.lane.b32.xlu1 %v21724_v62, %s23808_s10 }
 0xbbe   : > { %10872 = vrot.lane.b32.xlu0 %v22254_v32, %s23421_s27  ;;  %v18149_v56 = vpop.permute.xlu1 %18148  ;;  %s18853_s27 = smov 44  }
 0xbbf   : > { %v9664_v46 = vpop.permute.xlu0 %9663  ;;  %v18151_v60 = vunpack.i.h.bf16 %v18149_v56  ;;  %v18150_v24 = vunpack.i.l.bf16 %v18149_v56 }
 0xbc0   : > { %16041 = vmatprep.subr.msk.mxu1 %vm7626_vm4, %v9664_v46  ;;  %v9670_v10 = vsel %vm23809_vm5, %v9662_v26, %v9664_v46  ;;  %vm23816_vm5 = vmmov %vm23812_vm1 }
 0xbc1   : > { %18253 = vrot.lane.b32.xlu1 %v21719_v31, %s23808_s10  ;;  %15639 = vmatprep.subr.msk.mxu0 %vm7626_vm4, %v9670_v10  ;;  %v9869_v59 = vsel %vm23812_vm1, %v18151_v60, %v18145_v5  ;;  %vm23819_vm1 = vmmov %vm23818_vm6 }
 0xbc2   : > { %11092 = vrot.lane.b32.xlu0 %v21721_v49, %s23802_s11  ;;  %16042 = vmatpush3.msk.msra.mxu1 %vm7626_vm4, %v9664_v46  ;;  %v9864_v41 = vpop.permute.xlu1 %9863 }
 0xbc3   : > { %15640 = vmatpush1.msk.msra.mxu0 %vm7626_vm4, %v9669_v18  ;;  %v18139_v57 = vpop.permute.xlu0 %18138 }
 0xbc4   : > { %v18141_v8 = vunpack.i.h.bf16 %v18139_v57  ;;  %v18140_v43 = vunpack.i.l.bf16 %v18139_v57 }
 0xbc5   : > { %11292 = vrot.lane.b32.xlu1 %v21783_v38, %s23808_s10 }
 0xbc6   : > { %v9867_v17 = vsel %vm23813_vm2, %v18150_v24, %v18140_v43  ;;  %18243 = vrot.lane.b32.xlu0 %v21714_v36, %s23808_s10  ;;  %v16564_v11 = vpack.c.bf16 %v18146_v2, %v18141_v8  ;;  %v9868_v6 = vsel %vm23814_vm14, %v18140_v43, %v18141_v8  ;;  %vm23820_vm2 = vmmov %vm23819_vm1 }
 0xbc7   : > { %v9862_v7 = vpop.permute.xlu1 %9861  ;;  %v16560_v12 = vpack.c.bf16 %v9870_v48, %v9868_v6  ;;  %v16562_v15 = vpack.c.bf16 %v9869_v59, %v9867_v17  ;;  %vm23821_vm14 = vmmov %vm23819_vm1 }
 0xbc8   : > { %v9644_v1 = vpop.permute.xlu0 %9643  ;;  %16565 = vmatprep.subr.bf16.mxu1 %v16564_v11  ;;  %v9871_v25 = vsel %vm23817_vm15, %v9862_v7, %v9864_v41  ;;  %vm23823_vm15 = vmmov %vm23819_vm1 }
 0xbc9   : > { %11290 = vrot.lane.b32.xlu1 %v21767_v42, %s23808_s10  ;;  %16561 = vmatprep.subr.bf16.mxu0 %v16560_v12 }
 0xbca   : > { %11072 = vrot.lane.b32.xlu0 %v22202_v30, %s18853_s27  ;;  %15641 = vmatmul.mubr.msk.f32.vlgmr.msra.gmra.mrb[12].mxu0 %vm7621_vm3, %v9644_v1 }
 0xbcb   : > { %16563 = vmatpush1.bf16.msra.mxu0 %v16562_v15  ;;  %v18159_v33 = vpop.permute.xlu1 %18158  ;;  %16043 = vmatprep.mubr.msk.f32.mxu1 %vm7621_vm3, %v9644_v1 }
 0xbcc   : > { %v9646_v14 = vpop.permute.xlu0 %9645  ;;  %9757 = vmatprep.mubr.f32.mxu0 %v23771_v20  ;;  %v18161_v51 = vunpack.i.h.bf16 %v18159_v33  ;;  %v18160_v37 = vunpack.i.l.bf16 %v18159_v33 }
 0xbcd   : > { %16044 = vmatmul.mubr.msk.f32.vlgmr.msra.gmra.mrb[6].mxu1 %vm7621_vm3, %v9646_v14  ;;  %18263 = vrot.lane.b32.xlu1 %v21724_v62, %s23815_s28 }
 0xbce   : > { %16567 = vmatpush3.bf16.msra.mxu1 %v16564_v11  ;;  %11074 = vrot.lane.b32.xlu0 %v22254_v32, %s18853_s27  ;;  %v10087_v13 = vsel %vm23818_vm6, %v18160_v37, %v18161_v51  ;;  %s18854_s27 = smov 24   ;;  %vm10063_vm6 = vcmask 130048  }
 0xbcf   : > { %v18164_v61 = vpop.permute.xlu1 %18163  ;;  %15642 = vmatmul.mubr.msk.f32.gmra.mrb[14].mxu0 %vm7621_vm3, %v9646_v14  ;;  %v22480_v14 = vld [vmem:[%s23238_s3 + $0x38] sm:$0x3] }
 0xbd0   : > { %v9866_v53 = vpop.permute.xlu0 %9865  ;;  %9953 = vmatprep.mubr.f32.mxu0 %v23771_v20  ;;  %v18166_v4 = vunpack.i.h.bf16 %v18164_v61  ;;  %v18165_v26 = vunpack.i.l.bf16 %v18164_v61 }
 0xbd1   : > { %16050 = vmatprep.subr.msk.mxu1 %vm7626_vm4, %v9866_v53  ;;  %18268 = vrot.lane.b32.xlu1 %v21719_v31, %s23815_s28  ;;  %v9872_v27 = vsel %vm23816_vm5, %v9864_v41, %v9866_v53  ;;  %vm23822_vm5 = vmmov %vm23819_vm1 }
 0xbd2   : > { %11294 = vrot.lane.b32.xlu0 %v21721_v49, %s23808_s10  ;;  %15646 = vmatprep.subr.msk.mxu0 %vm7626_vm4, %v9872_v27  ;;  %v10086_v63 = vsel %vm23819_vm1, %v18166_v4, %v18160_v37  ;;  %vm23824_vm1 = vcmask 777216  }
 0xbd3   : > { %16051 = vmatpush3.msk.msra.mxu1 %vm7626_vm4, %v9866_v53  ;;  %15647 = vmatpush1.msk.msra.mxu0 %vm7626_vm4, %v9871_v25  ;;  %v10081_v9 = vpop.permute.xlu1 %10080 }
 0xbd4   : > { %v18154_v44 = vpop.permute.xlu0 %18153 }
 0xbd5   : > { %v18156_v23 = vunpack.i.h.bf16 %v18154_v44  ;;  %v18155_v35 = vunpack.i.l.bf16 %v18154_v44  ;;  %11509 = vrot.lane.b32.xlu1 %v21783_v38, %s23815_s28 }
 0xbd6   : > { %18258 = vrot.lane.b32.xlu0 %v21714_v36, %s23815_s28 }
 0xbd7   : > { %v10084_v28 = vsel %vm23820_vm2, %v18165_v26, %v18155_v35  ;;  %v10079_v3 = vpop.permute.xlu1 %10078  ;;  %v16572_v40 = vpack.c.bf16 %v18161_v51, %v18156_v23  ;;  %v10085_v54 = vsel %vm23821_vm14, %v18155_v35, %v18156_v23  ;;  %vm23825_vm2 = vmmov %vm23824_vm1 }
 0xbd8   : > { %v9846_v47 = vpop.permute.xlu0 %9845  ;;  %v16568_v34 = vpack.c.bf16 %v10087_v13, %v10085_v54  ;;  %v16570_v58 = vpack.c.bf16 %v10086_v63, %v10084_v28  ;;  %v10088_v10 = vsel %vm23823_vm15, %v10079_v3, %v10081_v9  ;;  %vm23826_vm14 = vmmov %vm23824_vm1 }
 0xbd9   : > { %16573 = vmatprep.subr.bf16.mxu1 %v16572_v40  ;;  %11507 = vrot.lane.b32.xlu1 %v21767_v42, %s23815_s28  ;;  %vm23829_vm15 = vmmov %vm23824_vm1 }
 0xbda   : > { %11274 = vrot.lane.b32.xlu0 %v22202_v30, %s18854_s27  ;;  %16569 = vmatprep.subr.bf16.mxu0 %v16568_v34 }
 0xbdb   : > { %15648 = vmatmul.mubr.msk.f32.vlgmr.msra.gmra.mrb[12].mxu0 %vm7621_vm3, %v9846_v47  ;;  %v10058_v0 = vpop.permute.xlu1 %10057  ;;  %16052 = vmatprep.mubr.msk.f32.mxu1 %vm7621_vm3, %v9846_v47 }
 0xbdc   : > { %16571 = vmatpush1.bf16.msra.mxu0 %v16570_v58  ;;  %v9848_v45 = vpop.permute.xlu0 %9847  ;;  %9959 = vmatprep.mubr.f32.mxu0 %v23771_v20 }
 0xbdd   : > { %16053 = vmatmul.mubr.msk.f32.vlgmr.msra.gmra.mrb[6].mxu1 %vm7621_vm3, %v9848_v45  ;;  %11486 = vrot.lane.b32.xlu1 %v22434_v50, %s18855_s7 }
 0xbde   : > { %16575 = vmatpush3.bf16.msra.mxu1 %v16572_v40  ;;  %11276 = vrot.lane.b32.xlu0 %v22254_v32, %s18854_s27  ;;  %v11478_v32 = vld [vmem:[%s23238_s3 + $0x30] sm:$0x3]  ;;  %s23838_s27 = smov 127  }
 0xbdf   : > { %v18174_v16 = vpop.permute.xlu1 %18173  ;;  %15649 = vmatmul.mubr.msk.f32.gmra.mrb[14].mxu0 %vm7621_vm3, %v9848_v45 }
 0xbe0   : > { %v10083_v56 = vpop.permute.xlu0 %10082  ;;  %10170 = vmatprep.mubr.f32.mxu0 %v23771_v20  ;;  %v18176_v60 = vunpack.i.h.bf16 %v18174_v16  ;;  %v18175_v41 = vunpack.i.l.bf16 %v18174_v16 }
 0xbe1   : > { %16059 = vmatprep.subr.msk.mxu1 %vm7626_vm4, %v10083_v56  ;;  %18278 = vrot.lane.b32.xlu1 %v21724_v62, %s23787_s15  ;;  %v10089_v46 = vsel %vm23822_vm5, %v10081_v9, %v10083_v56  ;;  %vm23827_vm5 = vmmov %vm23824_vm1 }
 0xbe2   : > { %11511 = vrot.lane.b32.xlu0 %v21721_v49, %s23815_s28  ;;  %15653 = vmatprep.subr.msk.mxu0 %vm7626_vm4, %v10089_v46  ;;  %v10289_v17 = vsel %vm23825_vm2, %v18175_v41, %v18176_v60 }
 0xbe3   : > { %16060 = vmatpush3.msk.msra.mxu1 %vm7626_vm4, %v10083_v56  ;;  %15654 = vmatpush1.msk.msra.mxu0 %vm7626_vm4, %v10088_v10  ;;  %v10060_v2 = vpop.permute.xlu1 %10059 }
 0xbe4   : > { %v10056_v5 = vpop.permute.xlu0 %10055 }
 0xbe5   : > { %v10064_v18 = vsel %vm10063_vm6, %v10056_v5, %v10058_v0  ;;  %11488 = vrot.lane.b32.xlu1 %v11478_v32, %s18855_s7 }
 0xbe6   : > { %11484 = vrot.lane.b32.xlu0 %v22202_v30, %s18855_s7  ;;  %15655 = vmatmul.mubr.msk.f32.vlgmr.msra.gmra.mrb[12].mxu0 %vm7621_vm3, %v10064_v18 }
 0xbe7   : > { %v10283_v57 = vpop.permute.xlu1 %10282  ;;  %16061 = vmatprep.mubr.msk.f32.mxu1 %vm7621_vm3, %v10064_v18  ;;  %10176 = vmatprep.mubr.f32.mxu0 %v23771_v20 }
 0xbe8   : > { %v18169_v24 = vpop.permute.xlu0 %18168 }
 0xbe9   : > { %v18171_v8 = vunpack.i.h.bf16 %v18169_v24  ;;  %v18170_v43 = vunpack.i.l.bf16 %v18169_v24  ;;  %11711 = vrot.lane.b32.xlu1 %v21783_v38, %s23787_s15 }
 0xbea   : > { %18273 = vrot.lane.b32.xlu0 %v21714_v36, %s23787_s15 }
 0xbeb   : > { %v10281_v48 = vpop.permute.xlu1 %10280  ;;  %v16580_v30 = vpack.c.bf16 %v18176_v60, %v18171_v8  ;;  %v10287_v59 = vsel %vm23824_vm1, %v18170_v43, %v18171_v8 }
 0xbec   : > { %v18179_v11 = vpop.permute.xlu0 %18178  ;;  %v16576_v6 = vpack.c.bf16 %v10289_v17, %v10287_v59 }
 0xbed   : > { %v18181_v7 = vunpack.i.h.bf16 %v18179_v11  ;;  %v18180_v12 = vunpack.i.l.bf16 %v18179_v11  ;;  %16581 = vmatprep.subr.bf16.mxu1 %v16580_v30  ;;  %11709 = vrot.lane.b32.xlu1 %v21767_v42, %s23787_s15 }
 0xbee   : > { %18283 = vrot.lane.b32.xlu0 %v21719_v31, %s23787_s15  ;;  %16577 = vmatprep.subr.bf16.mxu0 %v16576_v6 }
 0xbef   : > { %v10288_v15 = vsel %vm23826_vm14, %v18181_v7, %v18175_v41  ;;  %v10286_v1 = vsel %vm23827_vm5, %v18180_v12, %v18170_v43  ;;  %v18189_v33 = vpop.permute.xlu1 %18188 }
 0xbf0   : > { %v10062_v61 = vpop.permute.xlu0 %10061  ;;  %v16578_v53 = vpack.c.bf16 %v10288_v15, %v10286_v1  ;;  %v18191_v9 = vunpack.i.h.bf16 %v18189_v33  ;;  %v18190_v44 = vunpack.i.l.bf16 %v18189_v33 }
 0xbf1   : > { %v10065_v27 = vsel %vm10063_vm6, %v10060_v2, %v10062_v61  ;;  %18293 = vrot.lane.b32.xlu1 %v21724_v62, %s23828_s25  ;;  %vm23830_vm6 = vmmov %vm23824_vm1  ;;  %vm23831_vm1 = vcmask 785408  }
 0xbf2   : > { %11490 = vrot.lane.b32.xlu0 %v22480_v14, %s18855_s7  ;;  %16062 = vmatmul.mubr.msk.f32.vlgmr.msra.gmra.mrb[6].mxu1 %vm7621_vm3, %v10065_v27  ;;  %v10290_v4 = vsel %vm23830_vm6, %v10281_v48, %v10283_v57  ;;  %v10491_v3 = vsel %vm23831_vm1, %v18190_v44, %v18191_v9  ;;  %vm23832_vm2 = vmmov %vm23831_vm1  ;;  %s23835_s7 = smov 126  }
 0xbf3   : > { %16579 = vmatpush1.bf16.msra.mxu0 %v16578_v53  ;;  %16583 = vmatpush3.bf16.msra.mxu1 %v16580_v30  ;;  %v18194_v25 = vpop.permute.xlu1 %18193  ;;  %vm23833_vm14 = vmmov %vm23831_vm1 }
 0xbf4   : > { %15656 = vmatmul.mubr.msk.f32.gmra.mrb[14].mxu0 %vm7621_vm3, %v10065_v27  ;;  %v10285_v51 = vpop.permute.xlu0 %10284  ;;  %v18196_v26 = vunpack.i.h.bf16 %v18194_v25  ;;  %v18195_v13 = vunpack.i.l.bf16 %v18194_v25  ;;  %vm23834_vm5 = vmmov %vm23831_vm1 }
 0xbf5   : > { %16068 = vmatprep.subr.msk.mxu1 %vm7626_vm4, %v10285_v51  ;;  %18298 = vrot.lane.b32.xlu1 %v21719_v31, %s23828_s25  ;;  %v10291_v37 = vsel %vm23829_vm15, %v10283_v57, %v10285_v51  ;;  %vm23836_vm15 = vmmov %vm23831_vm1 }
 0xbf6   : > { %11713 = vrot.lane.b32.xlu0 %v21721_v49, %s23787_s15  ;;  %15660 = vmatprep.subr.msk.mxu0 %vm7626_vm4, %v10291_v37  ;;  %v10490_v40 = vsel %vm23832_vm2, %v18196_v26, %v18190_v44  ;;  %vm23837_vm6 = vmmov %vm23831_vm1  ;;  %vm23839_vm1 = vcmask 900096  }
 0xbf7   : > { %16069 = vmatpush3.msk.msra.mxu1 %vm7626_vm4, %v10285_v51  ;;  %15661 = vmatpush1.msk.msra.mxu0 %vm7626_vm4, %v10290_v4  ;;  %v10485_v23 = vpop.permute.xlu1 %10484  ;;  %vm23840_vm2 = vmmov %vm23839_vm1 }
 0xbf8   : > { %v18184_v35 = vpop.permute.xlu0 %18183  ;;  %10372 = vmatprep.mubr.f32.mxu0 %v23771_v20 }
 0xbf9   : > { %v18186_v63 = vunpack.i.h.bf16 %v18184_v35  ;;  %v18185_v28 = vunpack.i.l.bf16 %v18184_v35  ;;  %11913 = vrot.lane.b32.xlu1 %v21783_v38, %s23828_s25 }
 0xbfa   : > { %18288 = vrot.lane.b32.xlu0 %v21714_v36, %s23828_s25 }
 0xbfb   : > { %v10488_v54 = vsel %vm23833_vm14, %v18195_v13, %v18185_v28  ;;  %v10483_v47 = vpop.permute.xlu1 %10482  ;;  %v16588_v34 = vpack.c.bf16 %v18191_v9, %v18186_v63  ;;  %v10489_v58 = vsel %vm23834_vm5, %v18185_v28, %v18186_v63  ;;  %vm23841_vm14 = vmmov %vm23839_vm1 }
 0xbfc   : > { %v10265_v0 = vpop.permute.xlu0 %10264  ;;  %v16584_v45 = vpack.c.bf16 %v10491_v3, %v10489_v58  ;;  %v16586_v16 = vpack.c.bf16 %v10490_v40, %v10488_v54  ;;  %v10492_v5 = vsel %vm23837_vm6, %v10483_v47, %v10485_v23  ;;  %vm23842_vm5 = vmmov %vm23839_vm1 }
 0xbfd   : > { %16589 = vmatprep.subr.bf16.mxu1 %v16588_v34  ;;  %11911 = vrot.lane.b32.xlu1 %v21767_v42, %s23828_s25  ;;  %vm23844_vm6 = vmmov %vm23839_vm1 }
 0xbfe   : > { %11693 = vrot.lane.b32.xlu0 %v22434_v50, %s23815_s28  ;;  %16585 = vmatprep.subr.bf16.mxu0 %v16584_v45 }
 0xbff   : > { %15662 = vmatmul.mubr.msk.f32.vlgmr.msra.gmra.mrb[12].mxu0 %vm7621_vm3, %v10265_v0  ;;  %v18204_v56 = vpop.permute.xlu1 %18203  ;;  %16070 = vmatprep.mubr.msk.f32.mxu1 %vm7621_vm3, %v10265_v0 }
 0xc00   : > { %16587 = vmatpush1.bf16.msra.mxu0 %v16586_v16  ;;  %v10267_v46 = vpop.permute.xlu0 %10266  ;;  %10378 = vmatprep.mubr.f32.mxu0 %v23771_v20  ;;  %v18206_v18 = vunpack.i.h.bf16 %v18204_v56  ;;  %v18205_v60 = vunpack.i.l.bf16 %v18204_v56 }
 0xc01   : > { %16071 = vmatmul.mubr.msk.f32.vlgmr.msra.gmra.mrb[6].mxu1 %vm7621_vm3, %v10267_v46  ;;  %18308 = vrot.lane.b32.xlu1 %v21724_v62, %s23835_s7 }
 0xc02   : > { %16591 = vmatpush3.bf16.msra.mxu1 %v16588_v34  ;;  %11695 = vrot.lane.b32.xlu0 %v22480_v14, %s23815_s28  ;;  %v10693_v30 = vsel %vm863_vm8, %v18205_v60, %v18206_v18 }
 0xc03   : > { %v18209_v10 = vpop.permute.xlu1 %18208  ;;  %15663 = vmatmul.mubr.msk.f32.gmra.mrb[14].mxu0 %vm7621_vm3, %v10267_v46 }
 0xc04   : > { %v10487_v32 = vpop.permute.xlu0 %10486  ;;  %10574 = vmatprep.mubr.f32.mxu0 %v23771_v20  ;;  %v18211_v41 = vunpack.i.h.bf16 %v18209_v10  ;;  %v18210_v8 = vunpack.i.l.bf16 %v18209_v10 }
 0xc05   : > { %16077 = vmatprep.subr.msk.mxu1 %vm7626_vm4, %v10487_v32  ;;  %18313 = vrot.lane.b32.xlu1 %v21719_v31, %s23835_s7  ;;  %v10493_v2 = vsel %vm23836_vm15, %v10485_v23, %v10487_v32  ;;  %vm23843_vm15 = vmmov %vm23839_vm1 }
 0xc06   : > { %11915 = vrot.lane.b32.xlu0 %v21721_v49, %s23828_s25  ;;  %15667 = vmatprep.subr.msk.mxu0 %vm7626_vm4, %v10493_v2  ;;  %v10692_v59 = vsel %vm863_vm8, %v18211_v41, %v18205_v60 }
 0xc07   : > { %16078 = vmatpush3.msk.msra.mxu1 %vm7626_vm4, %v10487_v32  ;;  %15668 = vmatpush1.msk.msra.mxu0 %vm7626_vm4, %v10492_v5  ;;  %v10687_v57 = vpop.permute.xlu1 %10686 }
 0xc08   : > { %v18199_v24 = vpop.permute.xlu0 %18198 }
 0xc09   : > { %v18201_v43 = vunpack.i.h.bf16 %v18199_v24  ;;  %v18200_v48 = vunpack.i.l.bf16 %v18199_v24  ;;  %12115 = vrot.lane.b32.xlu1 %v21783_v38, %s23835_s7 }
 0xc0a   : > { %18303 = vrot.lane.b32.xlu0 %v21714_v36, %s23835_s7 }
 0xc0b   : > { %v10690_v17 = vsel %vm863_vm8, %v18210_v8, %v18200_v48  ;;  %v10685_v11 = vpop.permute.xlu1 %10684  ;;  %v16596_v6 = vpack.c.bf16 %v18206_v18, %v18201_v43  ;;  %v10691_v7 = vsel %vm863_vm8, %v18200_v48, %v18201_v43  ;;  %v18859_v8 = vmov 116  }
 0xc0c   : > { %v10467_v12 = vpop.permute.xlu0 %10466  ;;  %v16592_v15 = vpack.c.bf16 %v10693_v30, %v10691_v7  ;;  %v16594_v1 = vpack.c.bf16 %v10692_v59, %v10690_v17  ;;  %v10694_v51 = vsel %vm863_vm8, %v10685_v11, %v10687_v57  ;;  %18333 = vset.pattern.permute.xlu1 %v18859_v8  ;;  %18332 = vset.pattern.permute.xlu0 %v18859_v8 }
 0xc0d   : > { %16597 = vmatprep.subr.bf16.mxu1 %v16596_v6  ;;  %12113 = vrot.lane.b32.xlu1 %v21767_v42, %s23835_s7 }
 0xc0e   : > { %11895 = vrot.lane.b32.xlu0 %v22434_v50, %s23751_s26  ;;  %16593 = vmatprep.subr.bf16.mxu0 %v16592_v15 }
 0xc0f   : > { %15669 = vmatmul.mubr.msk.f32.vlgmr.msra.gmra.mrb[12].mxu0 %vm7621_vm3, %v10467_v12  ;;  %v18219_v33 = vpop.permute.xlu1 %18218  ;;  %16079 = vmatprep.mubr.msk.f32.mxu1 %vm7621_vm3, %v10467_v12 }
 0xc10   : > { %16595 = vmatpush1.bf16.msra.mxu0 %v16594_v1  ;;  %v10469_v61 = vpop.permute.xlu0 %10468  ;;  %10580 = vmatprep.mubr.f32.mxu0 %v23771_v20  ;;  %v18220_v37 = vunpack.i.l.bf16 %v18219_v33 }
 0xc11   : > { %16080 = vmatmul.mubr.msk.f32.vlgmr.msra.gmra.mrb[6].mxu1 %vm7621_vm3, %v10469_v61  ;;  %18323 = vrot.lane.b32.xlu1 %v21724_v62, %s23838_s27  ;;  %v18221_v62 = vunpack.i.h.bf16 %v18219_v33 }
 0xc12   : > { %16599 = vmatpush3.bf16.msra.mxu1 %v16596_v6  ;;  %11897 = vrot.lane.b32.xlu0 %v22480_v14, %s23751_s26 }
 0xc13   : > { %v18224_v53 = vpop.permute.xlu1 %18223  ;;  %15670 = vmatmul.mubr.msk.f32.gmra.mrb[14].mxu0 %vm7621_vm3, %v10469_v61  ;;  %v10895_v35 = vsel %vm800_vm7, %v18220_v37, %v18221_v62 }
 0xc14   : > { %v10689_v27 = vpop.permute.xlu0 %10688  ;;  %10776 = vmatprep.mubr.f32.mxu0 %v23771_v20  ;;  %v18226_v4 = vunpack.i.h.bf16 %v18224_v53  ;;  %v18225_v26 = vunpack.i.l.bf16 %v18224_v53 }
 0xc15   : > { %16086 = vmatprep.subr.msk.mxu1 %vm7626_vm4, %v10689_v27  ;;  %18328 = vrot.lane.b32.xlu1 %v21719_v31, %s23838_s27  ;;  %v10695_v25 = vsel %vm863_vm8, %v10687_v57, %v10689_v27 }
 0xc16   : > { %12117 = vrot.lane.b32.xlu0 %v21721_v49, %s23835_s7  ;;  %15674 = vmatprep.subr.msk.mxu0 %vm7626_vm4, %v10695_v25  ;;  %v10894_v13 = vsel %vm800_vm7, %v18226_v4, %v18220_v37 }
 0xc17   : > { %16087 = vmatpush3.msk.msra.mxu1 %vm7626_vm4, %v10689_v27  ;;  %15675 = vmatpush1.msk.msra.mxu0 %vm7626_vm4, %v10694_v51  ;;  %v10889_v9 = vpop.permute.xlu1 %10888  ;;  %v23845_v51 = vmov 122  }
 0xc18   : > { %v18214_v44 = vpop.permute.xlu0 %18213 }
 0xc19   : > { %v18216_v31 = vunpack.i.h.bf16 %v18214_v44  ;;  %v18215_v23 = vunpack.i.l.bf16 %v18214_v44  ;;  %12317 = vrot.lane.b32.xlu1 %v21783_v38, %s23838_s27 }
 0xc1a   : > { %18318 = vrot.lane.b32.xlu0 %v21714_v36, %s23838_s27 }
 0xc1b   : > { %v10892_v63 = vsel %vm800_vm7, %v18225_v26, %v18215_v23  ;;  %v10887_v28 = vpop.permute.xlu1 %10886  ;;  %v16604_v3 = vpack.c.bf16 %v18221_v62, %v18216_v31  ;;  %v10893_v40 = vsel %vm800_vm7, %v18215_v23, %v18216_v31 }
 0xc1c   : > { %v10669_v54 = vpop.permute.xlu0 %10668  ;;  %v16600_v47 = vpack.c.bf16 %v10895_v35, %v10893_v40  ;;  %v16602_v34 = vpack.c.bf16 %v10894_v13, %v10892_v63  ;;  %v10896_v56 = vsel %vm800_vm7, %v10887_v28, %v10889_v9 }
 0xc1d   : > { %16605 = vmatprep.subr.bf16.mxu1 %v16604_v3  ;;  %12315 = vrot.lane.b32.xlu1 %v21767_v42, %s23838_s27 }
 0xc1e   : > { %12097 = vrot.lane.b32.xlu0 %v22434_v50, %s18856_s19  ;;  %16601 = vmatprep.subr.bf16.mxu0 %v16600_v47 }
 0xc1f   : > { %15676 = vmatmul.mubr.msk.f32.vlgmr.msra.gmra.mrb[12].mxu0 %vm7621_vm3, %v10669_v54  ;;  %v18234_v36 = vpop.permute.xlu1 %18233  ;;  %16088 = vmatprep.mubr.msk.f32.mxu1 %vm7621_vm3, %v10669_v54 }
 0xc20   : > { %16603 = vmatpush1.bf16.msra.mxu0 %v16602_v34  ;;  %v10671_v58 = vpop.permute.xlu0 %10670  ;;  %10782 = vmatprep.mubr.f32.mxu0 %v23771_v20  ;;  %v18236_v46 = vunpack.i.h.bf16 %v18234_v36  ;;  %v18235_v10 = vunpack.i.l.bf16 %v18234_v36 }
 0xc21   : > { %16089 = vmatmul.mubr.msk.f32.vlgmr.msra.gmra.mrb[6].mxu1 %vm7621_vm3, %v10671_v58  ;;  %12301 = vrot.lane.b32.xlu1 %v22480_v14, %s18857_s9 }
 0xc22   : > { %16607 = vmatpush3.bf16.msra.mxu1 %v16604_v3  ;;  %12099 = vrot.lane.b32.xlu0 %v22480_v14, %s18856_s19  ;;  %v11097_v24 = vsel %vm23840_vm2, %v18235_v10, %v18236_v46  ;;  %s23885_s19 = smov 118  }
 0xc23   : > { %v18239_v0 = vpop.permute.xlu1 %18238  ;;  %15677 = vmatmul.mubr.msk.f32.gmra.mrb[14].mxu0 %vm7621_vm3, %v10671_v58 }
 0xc24   : > { %v10891_v45 = vpop.permute.xlu0 %10890  ;;  %10978 = vmatprep.mubr.f32.mxu0 %v23771_v20  ;;  %v18241_v32 = vunpack.i.h.bf16 %v18239_v0  ;;  %v18240_v18 = vunpack.i.l.bf16 %v18239_v0 }
 0xc25   : > { %16095 = vmatprep.subr.msk.mxu1 %vm7626_vm4, %v10891_v45  ;;  %v10897_v16 = vsel %vm800_vm7, %v10889_v9, %v10891_v45  ;;  %12503 = vrot.lane.b32.xlu1 %v22480_v14, %s18858_s0 }
 0xc26   : > { %12319 = vrot.lane.b32.xlu0 %v21721_v49, %s23838_s27  ;;  %15681 = vmatprep.subr.msk.mxu0 %vm7626_vm4, %v10897_v16  ;;  %v11096_v57 = vsel %vm23839_vm1, %v18241_v32, %v18235_v10  ;;  %vm23846_vm1 = vcmask 908288  }
 0xc27   : > { %16096 = vmatpush3.msk.msra.mxu1 %vm7626_vm4, %v10891_v45  ;;  %15682 = vmatpush1.msk.msra.mxu0 %vm7626_vm4, %v10896_v56  ;;  %v11091_v2 = vpop.permute.xlu1 %11090  ;;  %vm23847_vm2 = vmmov %vm23846_vm1 }
 0xc28   : > { %v18229_v5 = vpop.permute.xlu0 %18228 }
 0xc29   : > { %v18231_v60 = vunpack.i.h.bf16 %v18229_v5  ;;  %v18230_v41 = vunpack.i.l.bf16 %v18229_v5  ;;  %12678 = vperm.xlu1 %18333, %v22480_v14  }
 0xc2a   : > { %12299 = vrot.lane.b32.xlu0 %v22434_v50, %s18857_s9  ;;  %s23884_s9 = smov 61  }
 0xc2b   : > { %v11094_v43 = vsel %vm23841_vm14, %v18240_v18, %v18230_v41  ;;  %v11089_v48 = vpop.permute.xlu1 %11088  ;;  %v16612_v30 = vpack.c.bf16 %v18236_v46, %v18231_v60  ;;  %v11095_v59 = vsel %vm23842_vm5, %v18230_v41, %v18231_v60  ;;  %vm23848_vm14 = vmmov %vm23846_vm1 }
 0xc2c   : > { %v10871_v17 = vpop.permute.xlu0 %10870  ;;  %v16608_v11 = vpack.c.bf16 %v11097_v24, %v11095_v59  ;;  %v16610_v6 = vpack.c.bf16 %v11096_v57, %v11094_v43  ;;  %v11098_v33 = vsel %vm23844_vm6, %v11089_v48, %v11091_v2  ;;  %vm23849_vm5 = vmmov %vm23846_vm1 }
 0xc2d   : > { %16613 = vmatprep.subr.bf16.mxu1 %v16612_v30  ;;  %15683 = vmatmul.mubr.msk.f32.vlgmr.msra.gmra.mrb[12].mxu0 %vm7621_vm3, %v10871_v17  ;;  %vm23851_vm6 = vmmov %vm23846_vm1 }
 0xc2e   : > { %16609 = vmatprep.subr.bf16.mxu0 %v16608_v11  ;;  %16097 = vmatprep.mubr.msk.f32.mxu1 %vm7621_vm3, %v10871_v17 }
 0xc2f   : > { %16611 = vmatpush1.bf16.msra.mxu0 %v16610_v6  ;;  %v18249_v7 = vpop.permute.xlu1 %18248  ;;  %12501 = vrot.lane.b32.xlu0 %v22434_v50, %s18858_s0  ;;  %s23886_s0 = smov 60  }
 0xc30   : > { %v10873_v12 = vpop.permute.xlu0 %10872  ;;  %10984 = vmatprep.mubr.f32.mxu0 %v23771_v20  ;;  %v18251_v61 = vunpack.i.h.bf16 %v18249_v7  ;;  %v18250_v53 = vunpack.i.l.bf16 %v18249_v7 }
 0xc31   : > { %16098 = vmatmul.mubr.msk.f32.vlgmr.msra.gmra.mrb[6].mxu1 %vm7621_vm3, %v10873_v12  ;;  %15684 = vmatmul.mubr.msk.f32.gmra.mrb[14].mxu0 %vm7621_vm3, %v10873_v12 }
 0xc32   : > { %16615 = vmatpush3.bf16.msra.mxu1 %v16612_v30  ;;  %11180 = vmatprep.mubr.f32.mxu0 %v23771_v20  ;;  %v11299_v9 = vsel %vm23846_vm1, %v18250_v53, %v18251_v61 }
 0xc33   : > { %v18254_v14 = vpop.permute.xlu1 %18253  ;;  %12674 = vperm.xlu0 %18332, %v22434_v50  }
 0xc34   : > { %v11093_v15 = vpop.permute.xlu0 %11092  ;;  %v18256_v27 = vunpack.i.h.bf16 %v18254_v14  ;;  %v18255_v62 = vunpack.i.l.bf16 %v18254_v14 }
 0xc35   : > { %16104 = vmatprep.subr.msk.mxu1 %vm7626_vm4, %v11093_v15  ;;  %v11099_v1 = vsel %vm23843_vm15, %v11091_v2, %v11093_v15  ;;  %vm23850_vm15 = vmmov %vm23846_vm1  ;;  %vm23852_vm1 = vcmask 916480  }
 0xc36   : > { %15688 = vmatprep.subr.msk.mxu0 %vm7626_vm4, %v11099_v1  ;;  %16105 = vmatpush3.msk.msra.mxu1 %vm7626_vm4, %v11093_v15  ;;  %v11298_v44 = vsel %vm23847_vm2, %v18256_v27, %v18250_v53  ;;  %vm23853_vm2 = vmmov %vm23852_vm1 }
 0xc37   : > { %15689 = vmatpush1.msk.msra.mxu0 %vm7626_vm4, %v11098_v33  ;;  %v11293_v25 = vpop.permute.xlu1 %11292  ;;  %18694 = vset.pattern.permute.xlu0 %v23845_v51 }
 0xc38   : > { %v18244_v50 = vpop.permute.xlu0 %18243 }
 0xc39   : > { %v18246_v37 = vunpack.i.h.bf16 %v18244_v50  ;;  %v18245_v4 = vunpack.i.l.bf16 %v18244_v50 }
 0xc3b   : > { %v11296_v26 = vsel %vm23848_vm14, %v18255_v62, %v18245_v4  ;;  %v11291_v31 = vpop.permute.xlu1 %11290  ;;  %v16620_v23 = vpack.c.bf16 %v18251_v61, %v18246_v37  ;;  %v11297_v35 = vsel %vm23849_vm5, %v18245_v4, %v18246_v37  ;;  %vm23854_vm14 = vmmov %vm23852_vm1 }
 0xc3c   : > { %v11073_v13 = vpop.permute.xlu0 %11072  ;;  %v16616_v63 = vpack.c.bf16 %v11299_v9, %v11297_v35  ;;  %v16618_v28 = vpack.c.bf16 %v11298_v44, %v11296_v26  ;;  %v11300_v36 = vsel %vm23851_vm6, %v11291_v31, %v11293_v25  ;;  %vm23855_vm5 = vmmov %vm23852_vm1 }
 0xc3d   : > { %16621 = vmatprep.subr.bf16.mxu1 %v16620_v23  ;;  %15690 = vmatmul.mubr.msk.f32.vlgmr.msra.gmra.mrb[12].mxu0 %vm7621_vm3, %v11073_v13  ;;  %vm23857_vm6 = vmmov %vm23852_vm1 }
 0xc3e   : > { %16617 = vmatprep.subr.bf16.mxu0 %v16616_v63  ;;  %16106 = vmatprep.mubr.msk.f32.mxu1 %vm7621_vm3, %v11073_v13 }
 0xc3f   : > { %16619 = vmatpush1.bf16.msra.mxu0 %v16618_v28  ;;  %v18264_v3 = vpop.permute.xlu1 %18263  ;;  %11186 = vmatprep.mubr.f32.mxu0 %v23771_v20 }
 0xc40   : > { %v11075_v40 = vpop.permute.xlu0 %11074  ;;  %v18266_v58 = vunpack.i.h.bf16 %v18264_v3  ;;  %v18265_v0 = vunpack.i.l.bf16 %v18264_v3 }
 0xc41   : > { %16107 = vmatmul.mubr.msk.f32.vlgmr.msra.gmra.mrb[6].mxu1 %vm7621_vm3, %v11075_v40  ;;  %15691 = vmatmul.mubr.msk.f32.gmra.mrb[14].mxu0 %vm7621_vm3, %v11075_v40 }
 0xc42   : > { %16623 = vmatpush3.bf16.msra.mxu1 %v16620_v23  ;;  %11382 = vmatprep.mubr.f32.mxu0 %v23771_v20  ;;  %v11516_v2 = vsel %vm23852_vm1, %v18265_v0, %v18266_v58 }
 0xc43   : > { %v18269_v54 = vpop.permute.xlu1 %18268 }
 0xc44   : > { %v11295_v47 = vpop.permute.xlu0 %11294  ;;  %v18271_v45 = vunpack.i.h.bf16 %v18269_v54  ;;  %v18270_v46 = vunpack.i.l.bf16 %v18269_v54 }
 0xc45   : > { %16113 = vmatprep.subr.msk.mxu1 %vm7626_vm4, %v11295_v47  ;;  %v11301_v34 = vsel %vm23850_vm15, %v11293_v25, %v11295_v47  ;;  %vm23856_vm15 = vmmov %vm23852_vm1  ;;  %vm11492_vm1 = vcmask 31744  }
 0xc46   : > { %15695 = vmatprep.subr.msk.mxu0 %vm7626_vm4, %v11301_v34  ;;  %16114 = vmatpush3.msk.msra.mxu1 %vm7626_vm4, %v11295_v47  ;;  %v11515_v5 = vsel %vm23853_vm2, %v18271_v45, %v18265_v0  ;;  %vm23858_vm2 = vcmask 1014784  }
 0xc47   : > { %15696 = vmatpush1.msk.msra.mxu0 %vm7626_vm4, %v11300_v36  ;;  %v11510_v16 = vpop.permute.xlu1 %11509 }
 0xc48   : > { %v18259_v56 = vpop.permute.xlu0 %18258 }
 0xc49   : > { %v18261_v10 = vunpack.i.h.bf16 %v18259_v56  ;;  %v18260_v32 = vunpack.i.l.bf16 %v18259_v56 }
 0xc4b   : > { %v11513_v18 = vsel %vm23854_vm14, %v18270_v46, %v18260_v32  ;;  %v11508_v60 = vpop.permute.xlu1 %11507  ;;  %v16628_v41 = vpack.c.bf16 %v18266_v58, %v18261_v10  ;;  %v11514_v57 = vsel %vm23855_vm5, %v18260_v32, %v18261_v10  ;;  %vm23859_vm14 = vmmov %vm23858_vm2 }
 0xc4c   : > { %v11275_v24 = vpop.permute.xlu0 %11274  ;;  %v16624_v8 = vpack.c.bf16 %v11516_v2, %v11514_v57  ;;  %v16626_v43 = vpack.c.bf16 %v11515_v5, %v11513_v18  ;;  %v11517_v6 = vsel %vm23857_vm6, %v11508_v60, %v11510_v16  ;;  %vm23860_vm5 = vmmov %vm23858_vm2 }
 0xc4d   : > { %16629 = vmatprep.subr.bf16.mxu1 %v16628_v41  ;;  %15697 = vmatmul.mubr.msk.f32.vlgmr.msra.gmra.mrb[12].mxu0 %vm7621_vm3, %v11275_v24  ;;  %vm23862_vm6 = vmmov %vm23858_vm2 }
 0xc4e   : > { %16625 = vmatprep.subr.bf16.mxu0 %v16624_v8  ;;  %16115 = vmatprep.mubr.msk.f32.mxu1 %vm7621_vm3, %v11275_v24 }
 0xc4f   : > { %16627 = vmatpush1.bf16.msra.mxu0 %v16626_v43  ;;  %v11487_v48 = vpop.permute.xlu1 %11486  ;;  %11388 = vmatprep.mubr.f32.mxu0 %v23771_v20 }
 0xc50   : > { %v11277_v30 = vpop.permute.xlu0 %11276 }
 0xc51   : > { %16116 = vmatmul.mubr.msk.f32.vlgmr.msra.gmra.mrb[6].mxu1 %vm7621_vm3, %v11277_v30  ;;  %15698 = vmatmul.mubr.msk.f32.gmra.mrb[14].mxu0 %vm7621_vm3, %v11277_v30 }
 0xc52   : > { %16631 = vmatpush3.bf16.msra.mxu1 %v16628_v41  ;;  %11599 = vmatprep.mubr.f32.mxu0 %v23771_v20 }
 0xc53   : > { %v18279_v59 = vpop.permute.xlu1 %18278 }
 0xc54   : > { %v11512_v17 = vpop.permute.xlu0 %11511  ;;  %v18281_v15 = vunpack.i.h.bf16 %v18279_v59  ;;  %v18280_v1 = vunpack.i.l.bf16 %v18279_v59 }
 0xc55   : > { %16122 = vmatprep.subr.msk.mxu1 %vm7626_vm4, %v11512_v17  ;;  %v11518_v11 = vsel %vm23856_vm15, %v11510_v16, %v11512_v17  ;;  %vm23861_vm15 = vmmov %vm23858_vm2 }
 0xc56   : > { %15702 = vmatprep.subr.msk.mxu0 %vm7626_vm4, %v11518_v11  ;;  %16123 = vmatpush3.msk.msra.mxu1 %vm7626_vm4, %v11512_v17  ;;  %v11718_v62 = vsel %vm23859_vm14, %v18280_v1, %v18281_v15 }
 0xc57   : > { %15703 = vmatpush1.msk.msra.mxu0 %vm7626_vm4, %v11517_v6  ;;  %v11489_v7 = vpop.permute.xlu1 %11488 }
 0xc58   : > { %v11485_v12 = vpop.permute.xlu0 %11484 }
 0xc59   : > { %v11493_v14 = vsel %vm11492_vm1, %v11485_v12, %v11487_v48 }
 0xc5a   : > { %15704 = vmatmul.mubr.msk.f32.vlgmr.msra.gmra.mrb[12].mxu0 %vm7621_vm3, %v11493_v14  ;;  %16124 = vmatprep.mubr.msk.f32.mxu1 %vm7621_vm3, %v11493_v14 }
 0xc5b   : > { %v11712_v33 = vpop.permute.xlu1 %11711  ;;  %11605 = vmatprep.mubr.f32.mxu0 %v23771_v20 }
 0xc5c   : > { %v18274_v61 = vpop.permute.xlu0 %18273 }
 0xc5d   : > { %v18276_v53 = vunpack.i.h.bf16 %v18274_v61  ;;  %v18275_v27 = vunpack.i.l.bf16 %v18274_v61 }
 0xc5f   : > { %v11710_v25 = vpop.permute.xlu1 %11709  ;;  %v16636_v51 = vpack.c.bf16 %v18281_v15, %v18276_v53  ;;  %v11716_v50 = vsel %vm23858_vm2, %v18275_v27, %v18276_v53 }
 0xc60   : > { %v18284_v37 = vpop.permute.xlu0 %18283  ;;  %v16632_v4 = vpack.c.bf16 %v11718_v62, %v11716_v50  ;;  %v11719_v54 = vsel %vm23858_vm2, %v11710_v25, %v11712_v33 }
 0xc61   : > { %v18286_v9 = vunpack.i.h.bf16 %v18284_v37  ;;  %v18285_v44 = vunpack.i.l.bf16 %v18284_v37  ;;  %16637 = vmatprep.subr.bf16.mxu1 %v16636_v51 }
 0xc62   : > { %16633 = vmatprep.subr.bf16.mxu0 %v16632_v4 }
 0xc63   : > { %v11717_v26 = vsel %vm23860_vm5, %v18286_v9, %v18280_v1  ;;  %v11715_v31 = vsel %vm23861_vm15, %v18285_v44, %v18275_v27  ;;  %v18294_v23 = vpop.permute.xlu1 %18293 }
 0xc64   : > { %v11491_v35 = vpop.permute.xlu0 %11490  ;;  %v16634_v13 = vpack.c.bf16 %v11717_v26, %v11715_v31  ;;  %v18296_v47 = vunpack.i.h.bf16 %v18294_v23  ;;  %v18295_v34 = vunpack.i.l.bf16 %v18294_v23 }
 0xc65   : > { %v11494_v63 = vsel %vm11492_vm1, %v11489_v7, %v11491_v35  ;;  %vm23863_vm1 = vcmask 1022976  }
 0xc66   : > { %16125 = vmatmul.mubr.msk.f32.vlgmr.msra.gmra.mrb[6].mxu1 %vm7621_vm3, %v11494_v63  ;;  %16635 = vmatpush1.bf16.msra.mxu0 %v16634_v13  ;;  %v11920_v46 = vsel %vm23863_vm1, %v18295_v34, %v18296_v47  ;;  %vm23864_vm14 = vmmov %vm23863_vm1 }
 0xc67   : > { %16639 = vmatpush3.bf16.msra.mxu1 %v16636_v51  ;;  %15705 = vmatmul.mubr.msk.f32.gmra.mrb[14].mxu0 %vm7621_vm3, %v11494_v63  ;;  %v18299_v28 = vpop.permute.xlu1 %18298  ;;  %vm23865_vm5 = vmmov %vm23863_vm1 }
 0xc68   : > { %v11714_v3 = vpop.permute.xlu0 %11713  ;;  %11801 = vmatprep.mubr.f32.mxu0 %v23771_v20  ;;  %v18301_v36 = vunpack.i.h.bf16 %v18299_v28  ;;  %v18300_v45 = vunpack.i.l.bf16 %v18299_v28  ;;  %vm23866_vm15 = vmmov %vm23863_vm1 }
 0xc69   : > { %16131 = vmatprep.subr.msk.mxu1 %vm7626_vm4, %v11714_v3  ;;  %v11720_v40 = vsel %vm23862_vm6, %v11712_v33, %v11714_v3  ;;  %vm23867_vm6 = vmmov %vm23863_vm1 }
 0xc6a   : > { %15709 = vmatprep.subr.msk.mxu0 %vm7626_vm4, %v11720_v40  ;;  %v11919_v10 = vsel %vm23864_vm14, %v18301_v36, %v18295_v34  ;;  %vm23868_vm2 = vmmov %vm23863_vm1  ;;  %vm23869_vm1 = vcmask 1031168  }
 0xc6b   : > { %16132 = vmatpush3.msk.msra.mxu1 %vm7626_vm4, %v11714_v3  ;;  %15710 = vmatpush1.msk.msra.mxu0 %vm7626_vm4, %v11719_v54  ;;  %v11914_v58 = vpop.permute.xlu1 %11913  ;;  %vm23870_vm14 = vmmov %vm23869_vm1 }
 0xc6c   : > { %v18289_v0 = vpop.permute.xlu0 %18288 }
 0xc6d   : > { %v18291_v16 = vunpack.i.h.bf16 %v18289_v0  ;;  %v18290_v56 = vunpack.i.l.bf16 %v18289_v0 }
 0xc6f   : > { %v11917_v32 = vsel %vm23865_vm5, %v18300_v45, %v18290_v56  ;;  %v11912_v2 = vpop.permute.xlu1 %11911  ;;  %v16644_v5 = vpack.c.bf16 %v18296_v47, %v18291_v16  ;;  %v11918_v18 = vsel %vm23866_vm15, %v18290_v56, %v18291_v16  ;;  %vm23871_vm5 = vmmov %vm23869_vm1 }
 0xc70   : > { %v11694_v60 = vpop.permute.xlu0 %11693  ;;  %v16640_v41 = vpack.c.bf16 %v11920_v46, %v11918_v18  ;;  %v16642_v57 = vpack.c.bf16 %v11919_v10, %v11917_v32  ;;  %v11921_v59 = vsel %vm23868_vm2, %v11912_v2, %v11914_v58  ;;  %vm23872_vm15 = vmmov %vm23869_vm1 }
 0xc71   : > { %16645 = vmatprep.subr.bf16.mxu1 %v16644_v5  ;;  %15711 = vmatmul.mubr.msk.f32.vlgmr.msra.gmra.mrb[12].mxu0 %vm7621_vm3, %v11694_v60  ;;  %vm23874_vm2 = vmmov %vm23869_vm1 }
 0xc72   : > { %16641 = vmatprep.subr.bf16.mxu0 %v16640_v41  ;;  %16133 = vmatprep.mubr.msk.f32.mxu1 %vm7621_vm3, %v11694_v60 }
 0xc73   : > { %16643 = vmatpush1.bf16.msra.mxu0 %v16642_v57  ;;  %v18309_v24 = vpop.permute.xlu1 %18308  ;;  %11807 = vmatprep.mubr.f32.mxu0 %v23771_v20  ;;  %v23881_v57 = vpack.c.bf16 %v21710_v22, %v21692_v19  ;;  %v15744_v22 = vld [vmem:[%s23240_s5 + $0x1] ss:$2 sm:$0x7] }
 0xc74   : > { %v11696_v8 = vpop.permute.xlu0 %11695  ;;  %v18311_v17 = vunpack.i.h.bf16 %v18309_v24  ;;  %v18310_v11 = vunpack.i.l.bf16 %v18309_v24  ;;  %v23882_v24 = vpack.c.bf16 %v21702_v29, %v21706_v55 }
 0xc75   : > { %16134 = vmatmul.mubr.msk.f32.vlgmr.msra.gmra.mrb[6].mxu1 %vm7621_vm3, %v11696_v8  ;;  %15712 = vmatmul.mubr.msk.f32.gmra.mrb[14].mxu0 %vm7621_vm3, %v11696_v8 }
 0xc76   : > { %16647 = vmatpush3.bf16.msra.mxu1 %v16644_v5  ;;  %12003 = vmatprep.mubr.f32.mxu0 %v23771_v20  ;;  %v12122_v33 = vsel %vm23869_vm1, %v18310_v11, %v18311_v17 }
 0xc77   : > { %v18314_v43 = vpop.permute.xlu1 %18313 }
 0xc78   : > { %v11916_v48 = vpop.permute.xlu0 %11915  ;;  %v18316_v6 = vunpack.i.h.bf16 %v18314_v43  ;;  %v18315_v14 = vunpack.i.l.bf16 %v18314_v43 }
 0xc79   : > { %16140 = vmatprep.subr.msk.mxu1 %vm7626_vm4, %v11916_v48  ;;  %v11922_v30 = vsel %vm23867_vm6, %v11914_v58, %v11916_v48  ;;  %vm23873_vm6 = vmmov %vm23869_vm1  ;;  %vm23875_vm1 = vcmask 1039360  }
 0xc7a   : > { %15716 = vmatprep.subr.msk.mxu0 %vm7626_vm4, %v11922_v30  ;;  %16141 = vmatpush3.msk.msra.mxu1 %vm7626_vm4, %v11916_v48  ;;  %v12121_v61 = vsel %vm23870_vm14, %v18316_v6, %v18310_v11  ;;  %vm23876_vm14 = vmmov %vm23875_vm1  ;;  %v12703_v48 = vrot.slane %v15744_v22, %v23744_v52 }
 0xc7b   : > { %15717 = vmatpush1.msk.msra.mxu0 %vm7626_vm4, %v11921_v59  ;;  %v12116_v7 = vpop.permute.xlu1 %12115 }
 0xc7c   : > { %v18304_v12 = vpop.permute.xlu0 %18303 }
 0xc7d   : > { %v18306_v15 = vunpack.i.h.bf16 %v18304_v12  ;;  %v18305_v1 = vunpack.i.l.bf16 %v18304_v12 }
 0xc7f   : > { %v12119_v53 = vsel %vm23871_vm5, %v18315_v14, %v18305_v1  ;;  %v12114_v27 = vpop.permute.xlu1 %12113  ;;  %v16652_v25 = vpack.c.bf16 %v18311_v17, %v18306_v15  ;;  %v12120_v51 = vsel %vm23872_vm15, %v18305_v1, %v18306_v15  ;;  %vm23877_vm5 = vmmov %vm23875_vm1  ;;  %v12707_v17 = vrot.slane %v15744_v22, %v23745_v21 }
 0xc80   : > { %v11896_v50 = vpop.permute.xlu0 %11895  ;;  %v16648_v62 = vpack.c.bf16 %v12122_v33, %v12120_v51  ;;  %v16650_v37 = vpack.c.bf16 %v12121_v61, %v12119_v53  ;;  %v12123_v23 = vsel %vm23874_vm2, %v12114_v27, %v12116_v7  ;;  %vm23878_vm15 = vmmov %vm23875_vm1  ;;  %v22750_v27 = vld [vmem:[%s23239_s4] sm:$0x1] }
 0xc81   : > { %16653 = vmatprep.subr.bf16.mxu1 %v16652_v25  ;;  %15718 = vmatmul.mubr.msk.f32.vlgmr.msra.gmra.mrb[12].mxu0 %vm7621_vm3, %v11896_v50  ;;  %vm23880_vm2 = vmmov %vm23875_vm1 }
 0xc82   : > { %16649 = vmatprep.subr.bf16.mxu0 %v16648_v62  ;;  %16142 = vmatprep.mubr.msk.f32.mxu1 %vm7621_vm3, %v11896_v50 }
 0xc83   : > { %16651 = vmatpush1.bf16.msra.mxu0 %v16650_v37  ;;  %v18324_v4 = vpop.permute.xlu1 %18323  ;;  %12009 = vmatprep.mubr.f32.mxu0 %v23771_v20 }
 0xc84   : > { %v11898_v9 = vpop.permute.xlu0 %11897  ;;  %v18326_v35 = vunpack.i.h.bf16 %v18324_v4  ;;  %v18325_v13 = vunpack.i.l.bf16 %v18324_v4 }
 0xc85   : > { %16143 = vmatmul.mubr.msk.f32.vlgmr.msra.gmra.mrb[6].mxu1 %vm7621_vm3, %v11898_v9  ;;  %15719 = vmatmul.mubr.msk.f32.gmra.mrb[14].mxu0 %vm7621_vm3, %v11898_v9 }
 0xc86   : > { %16655 = vmatpush3.bf16.msra.mxu1 %v16652_v25  ;;  %12205 = vmatprep.mubr.f32.mxu0 %v23771_v20  ;;  %v12324_v47 = vsel %vm23875_vm1, %v18325_v13, %v18326_v35 }
 0xc87   : > { %v18329_v44 = vpop.permute.xlu1 %18328 }
 0xc88   : > { %v12118_v26 = vpop.permute.xlu0 %12117  ;;  %v18331_v63 = vunpack.i.h.bf16 %v18329_v44  ;;  %v18330_v3 = vunpack.i.l.bf16 %v18329_v44 }
 0xc89   : > { %16149 = vmatprep.subr.msk.mxu1 %vm7626_vm4, %v12118_v26  ;;  %v12124_v31 = vsel %vm23873_vm6, %v12116_v7, %v12118_v26  ;;  %vm23879_vm6 = vmmov %vm23875_vm1  ;;  %v23883_v7 = vld [vmem:[#allocation10_spill] sm:$0xff] }
 0xc8a   : > { %15723 = vmatprep.subr.msk.mxu0 %vm7626_vm4, %v12124_v31  ;;  %16150 = vmatpush3.msk.msra.mxu1 %vm7626_vm4, %v12118_v26  ;;  %v12323_v34 = vsel %vm23876_vm14, %v18331_v63, %v18325_v13  ;;  %v12699_v12 = vrot.slane %v15744_v22, %v23883_v7  ;;  %v12722_v9 = vrot.slane %v22750_v27, %v23883_v7 }
 0xc8b   : > { %15724 = vmatpush1.msk.msra.mxu0 %vm7626_vm4, %v12123_v23  ;;  %v12318_v46 = vpop.permute.xlu1 %12317 }
 0xc8c   : > { %v18319_v28 = vpop.permute.xlu0 %18318 }
 0xc8d   : > { %v18321_v40 = vunpack.i.h.bf16 %v18319_v28  ;;  %v18320_v54 = vunpack.i.l.bf16 %v18319_v28  ;;  %v13911_v28 = vld [vmem:[%s23239_s4] sm:$0x3] }
 0xc8f   : > { %v12321_v36 = vsel %vm23877_vm5, %v18330_v3, %v18320_v54  ;;  %v16660_v58 = vpack.c.bf16 %v18326_v35, %v18321_v40  ;;  %v12322_v0 = vsel %vm23878_vm15, %v18320_v54, %v18321_v40  ;;  %v12316_v32 = vpop.permute.xlu1 %12315  ;;  %v13916_v3 = vrot.slane %v13911_v28, %v23883_v7  ;;  %v22877_v54 = vld [vmem:[%s23239_s4 + $0x1] sm:$0x1] }
 0xc90   : > { %v12098_v45 = vpop.permute.xlu0 %12097  ;;  %v16656_v16 = vpack.c.bf16 %v12324_v47, %v12322_v0  ;;  %v16658_v56 = vpack.c.bf16 %v12323_v34, %v12321_v36  ;;  %v12325_v18 = vsel %vm23880_vm2, %v12316_v32, %v12318_v46  ;;  %v13920_v40 = vrot.slane %v13911_v28, %v23744_v52 }
 0xc91   : > { %16661 = vmatprep.subr.bf16.mxu1 %v16660_v58  ;;  %15725 = vmatmul.mubr.msk.f32.vlgmr.msra.gmra.mrb[12].mxu0 %vm7621_vm3, %v12098_v45  ;;  %v22883_v47 = vrot.slane %v22877_v54, %v23883_v7  ;;  %vm23908_vm5 = vcmask 80896   ;;  %vm23909_vm15 = vcmask 490496  }
 0xc92   : > { %16657 = vmatprep.subr.bf16.mxu0 %v16656_v16  ;;  %16151 = vmatprep.mubr.msk.f32.mxu1 %vm7621_vm3, %v12098_v45 }
 0xc93   : > { %16659 = vmatpush1.bf16.msra.mxu0 %v16658_v56  ;;  %12211 = vmatprep.mubr.f32.mxu0 %v23771_v20  ;;  %v12302_v60 = vpop.permute.xlu1 %12301 }
 0xc94   : > { %v12100_v10 = vpop.permute.xlu0 %12099 }
 0xc95   : > { %16152 = vmatmul.mubr.msk.f32.vlgmr.msra.gmra.mrb[6].mxu1 %vm7621_vm3, %v12100_v10  ;;  %15726 = vmatmul.mubr.msk.f32.gmra.mrb[14].mxu0 %vm7621_vm3, %v12100_v10 }
 0xc96   : > { %16663 = vmatpush3.bf16.msra.mxu1 %v16660_v58  ;;  %12407 = vmatprep.mubr.f32.mxu0 %v23771_v20 }
 0xc97   : > { %v12504_v29 = vpop.permute.xlu1 %12503 }
 0xc98   : > { %v12320_v2 = vpop.permute.xlu0 %12319 }
 0xc99   : > { %16158 = vmatprep.subr.msk.mxu1 %vm7626_vm4, %v12320_v2  ;;  %v12326_v5 = vsel %vm23879_vm6, %v12318_v46, %v12320_v2  ;;  %vm23910_vm6 = vmmov %vm23909_vm15 }
 0xc9a   : > { %15730 = vmatprep.subr.msk.mxu0 %vm7626_vm4, %v12326_v5  ;;  %16159 = vmatpush3.msk.msra.mxu1 %vm7626_vm4, %v12320_v2  ;;  %vm23911_vm2 = vmmov %vm23910_vm6 }
 0xc9b   : > { %15731 = vmatpush1.msk.msra.mxu0 %vm7626_vm4, %v12325_v18  ;;  %16669 = vmatprep.subr.bf16.mxu1 %v21740_v39 }
 0xc9c   : > { %v12300_v41 = vpop.permute.xlu0 %12299  ;;  %16665 = vmatprep.subr.bf16.mxu0 %v23881_v57 }
 0xc9d   : > { %15732 = vmatmul.mubr.msk.f32.vlgmr.msra.gmra.mrb[12].mxu0 %vm7621_vm3, %v12300_v41  ;;  %16160 = vmatprep.mubr.msk.f32.mxu1 %vm7621_vm3, %v12300_v41 }
 0xc9e   : > { %16667 = vmatpush1.bf16.msra.mxu0 %v23882_v24  ;;  %16161 = vmatmul.mubr.msk.f32.vlgmr.msra.gmra.mrb[6].mxu1 %vm7621_vm3, %v12302_v60  ;;  %v24003_v24 = vld [vmem:[#allocation8_spill] sm:$0xff] }
 0xc9f   : > { %15737 = vmatprep.subr.msk.mxu0 %vm7626_vm4, %v21783_v38  ;;  %16671 = vmatpush3.bf16.msra.mxu1 %v21740_v39 }
 0xca0   : > { %16167 = vmatprep.subr.msk.mxu1 %vm7626_vm4, %v21721_v49  ;;  %12413 = vmatprep.mubr.f32.mxu0 %v23771_v20 }
 0xca1   : > { %15733 = vmatmul.mubr.msk.f32.gmra.mrb[14].mxu0 %vm7621_vm3, %v12302_v60  ;;  %v12502_v19 = vpop.permute.xlu0 %12501 }
 0xca2   : > { %15738 = vmatpush1.msk.msra.mxu0 %vm7626_vm4, %v21767_v42  ;;  %12579 = vmatprep.mubr.f32.mxu0 %v23771_v20 }
 0xca3   : > { %16168 = vmatpush3.msk.msra.mxu1 %vm7626_vm4, %v21721_v49  ;;  %16169 = vmatprep.mubr.msk.f32.mxu1 %vm7621_vm3, %v12502_v19 }
 0xca5   : > { %15739 = vmatmul.mubr.msk.f32.vlgmr.msra.gmra.mrb[12].mxu0 %vm7621_vm3, %v12502_v19 }
 0xca6   : > { %16170 = vmatmul.mubr.msk.f32.vlgmr.msra.gmra.mrb[6].mxu1 %vm7621_vm3, %v12504_v29  ;;  %12585 = vmatprep.mubr.f32.mxu0 %v23771_v20 }
 0xca7   : > { %12819 = vmatprep.mubr.f32.mxu1 %v23771_v20 }
 0xca8   : > { %v12679_v39 = vpop.permute.xlu1 %12678 }
 0xca9   : > { %15740 = vmatmul.mubr.msk.f32.gmra.mrb[14].mxu0 %vm7621_vm3, %v12504_v29  ;;  %vm23902_vm3 = vcmask 498688  }
 0xcaa   : > { %vm23903_vm4 = vmmov %vm23902_vm3 }
 0xcab   : > { %vm23904_vm1 = vmmov %vm23902_vm3 }
 0xcac   : > { %vm23905_vm14 = vmmov %vm23904_vm1 }
 0xcb2   : > { %v12675_v55 = vpop.permute.xlu0 %12674 }
 0xd78   : > { %v12581_v49 = vpop.f32.mrb[12].mxu0 }
 0xd79   : > { %v12681_v42 = vadd.f32 %v12675_v55, %v12581_v49  ;;  %v12583_v38 = vpop.f32.mrb[13].mxu0  ;;  %v16171_v8 = vpop.f32.mrb[6].mxu1 }
 0xd7a   : > { %v12682_v43 = vadd.f32 %v12675_v55, %v12583_v38  ;;  %v12686_v30 = vadd.f32 %v16171_v8, %v12679_v39  ;;  %v12658_v59 = vpop.f32.mrb[7].mxu1 }
 0xd7b   : > { %v12683_v11 = vadd.f32 %v12675_v55, %v12658_v59  ;;  %v12687_v6 = vmax.f32 %v12681_v42, 0.0 }
 0xd7c   : > { %v12688_v14 = vmax.f32 %v12682_v43, 0.0  ;;  %v12692_v15 = vmax.f32 %v12686_v30, 0.0  ;;  %v12587_v1 = vpop.f32.mrb[14].mxu0 }
 0xd7d   : > { %v12689_v33 = vmax.f32 %v12683_v11, 0.0  ;;  %v12684_v61 = vadd.f32 %v12679_v39, %v12587_v1  ;;  %v12589_v53 = vpop.f32.mrb[15].mxu0  ;;  %v22754_v62 = vmul.f32 %v12699_v12, %v12687_v6 }
 0xd7e   : > { %v22752_v25 = vmul.f32 %v12703_v48, %v12688_v14  ;;  %v12685_v51 = vadd.f32 %v12679_v39, %v12589_v53  ;;  %v12716_v37 = vmul.f32 %v12707_v17, %v12692_v15 }
 0xd7f   : > { %v12713_v50 = vmul.f32 %v12707_v17, %v12689_v33  ;;  %v12690_v21 = vmax.f32 %v12684_v61, 0.0 }
 0xd80   : > { %v12691_v4 = vmax.f32 %v12685_v51, 0.0 }
 0xd81   : > { %v22758_v44 = vmul.f32 %v12699_v12, %v12690_v21  ;;  %v22761_v26 = vpack.i.bf16 %v12713_v50, %v22752_v25 }
 0xd82   : > { %v22763_v31 = vmul.f32 %v12703_v48, %v12691_v4 }
 0xd83   : > { %18335 = vrot.lane.b32.xlu1 %v22761_v26, %s23884_s9  ;;  %v22769_v23 = vpack.i.bf16 %v22758_v44, %v22754_v62  ;;  %v16819_v63 = vpack.c.bf16 %v22758_v44, %v22754_v62 }
 0xd84   : > { %v22772_v35 = vpack.i.bf16 %v12716_v37, %v22763_v31  ;;  %v16816_v13 = vpack.c.bf16 %v22763_v31, %v22752_v25 }
 0xd86   : > { %18345 = vrot.lane.b32.xlu0 %v22772_v35, %s23884_s9 }
 0xd87   : > { %18340 = vrot.lane.b32.xlu1 %v22769_v23, %s23884_s9  ;;  %s23888_s9 = smov 108  }
 0xd8a   : > { %12723 = vrot.lane.b32.xlu0 %v12722_v9, %s23885_s19  ;;  %s23889_s19 = smov 63  }
 0xd8b   : > { %18350 = vrot.lane.b32.xlu1 %v22761_v26, %s23886_s0 }
 0xd8e   : > { %18360 = vrot.lane.b32.xlu0 %v22772_v35, %s23886_s0 }
 0xd8f   : > { %18355 = vrot.lane.b32.xlu1 %v22769_v23, %s23886_s0  ;;  %s23890_s0 = smov 98  }
 0xd92   : > { %18365 = vrot.lane.b32.xlu0 %v22761_v26, %s23887_s1 }
 0xd93   : > { %18375 = vrot.lane.b32.xlu1 %v22772_v35, %s23887_s1 }
 0xd96   : > { %18370 = vrot.lane.b32.xlu0 %v22769_v23, %s23887_s1  ;;  %s23892_s1 = smov 88  }
 0xd97   : > { %12921 = vrot.lane.b32.xlu1 %v12722_v9, %s23888_s9 }
 0xd9a   : > { %18380 = vrot.lane.b32.xlu0 %v22761_v26, %s23889_s19 }
 0xd9b   : > { %18390 = vrot.lane.b32.xlu1 %v22772_v35, %s23889_s19 }
 0xd9e   : > { %18385 = vrot.lane.b32.xlu0 %v22769_v23, %s23889_s19  ;;  %s23893_s19 = smov 78  }
 0xd9f   : > { %13020 = vrot.lane.b32.xlu1 %v12722_v9, %s23890_s0  ;;  %s23895_s0 = smov 58  }
 0xda2   : > { %18395 = vrot.lane.b32.xlu0 %v22761_v26, %s23891_s2 }
 0xda3   : > { %18405 = vrot.lane.b32.xlu1 %v22772_v35, %s23891_s2 }
 0xda6   : > { %18400 = vrot.lane.b32.xlu0 %v22769_v23, %s23891_s2  ;;  %s23894_s2 = smov 68  }
 0xda7   : > { %13119 = vrot.lane.b32.xlu1 %v12722_v9, %s23892_s1  ;;  %s23897_s1 = smov 38  }
 0xdaa   : > { %18410 = vrot.lane.b32.xlu0 %v22761_v26, %s23683_s22 }
 0xdab   : > { %18420 = vrot.lane.b32.xlu1 %v22772_v35, %s23683_s22 }
 0xdae   : > { %18415 = vrot.lane.b32.xlu0 %v22769_v23, %s23683_s22 }
 0xdaf   : > { %13218 = vrot.lane.b32.xlu1 %v12722_v9, %s23893_s19 }
 0xdb2   : > { %18425 = vrot.lane.b32.xlu0 %v22761_v26, %s23678_s14 }
 0xdb3   : > { %18435 = vrot.lane.b32.xlu1 %v22772_v35, %s23678_s14 }
 0xdb6   : > { %18430 = vrot.lane.b32.xlu0 %v22769_v23, %s23678_s14  ;;  %s23896_s14 = smov 48  }
 0xdb7   : > { %13317 = vrot.lane.b32.xlu1 %v12722_v9, %s23894_s2 }
 0xdba   : > { %18440 = vrot.lane.b32.xlu0 %v22761_v26, %s23893_s19 }
 0xdbb   : > { %18450 = vrot.lane.b32.xlu1 %v22772_v35, %s23893_s19 }
 0xdbe   : > { %18445 = vrot.lane.b32.xlu0 %v22769_v23, %s23893_s19 }
 0xdbf   : > { %13416 = vrot.lane.b32.xlu1 %v12722_v9, %s23895_s0 }
 0xdc2   : > { %18455 = vrot.lane.b32.xlu0 %v22761_v26, %s23677_s18 }
 0xdc3   : > { %18465 = vrot.lane.b32.xlu1 %v22772_v35, %s23677_s18 }
 0xdc6   : > { %18460 = vrot.lane.b32.xlu0 %v22769_v23, %s23677_s18  ;;  %s23898_s18 = smov 28  }
 0xdc7   : > { %13515 = vrot.lane.b32.xlu1 %v12722_v9, %s23896_s14 }
 0xdca   : > { %18470 = vrot.lane.b32.xlu0 %v22761_v26, %s23749_s12 }
 0xdcb   : > { %18480 = vrot.lane.b32.xlu1 %v22772_v35, %s23749_s12 }
 0xdce   : > { %18475 = vrot.lane.b32.xlu0 %v22769_v23, %s23749_s12  ;;  %s23899_s12 = smov 18  }
 0xdcf   : > { %13614 = vrot.lane.b32.xlu1 %v12722_v9, %s23897_s1 }
 0xdd2   : > { %18485 = vrot.lane.b32.xlu0 %v22761_v26, %s23751_s26 }
 0xdd3   : > { %18495 = vrot.lane.b32.xlu1 %v22772_v35, %s23751_s26 }
 0xdd6   : > { %18490 = vrot.lane.b32.xlu0 %v22769_v23, %s23751_s26  ;;  %s23900_s26 = smov 8  }
 0xdd7   : > { %13713 = vrot.lane.b32.xlu1 %v12722_v9, %s23898_s18 }
 0xdda   : > { %18500 = vrot.lane.b32.xlu0 %v22761_v26, %s23774_s29 }
 0xddb   : > { %18510 = vrot.lane.b32.xlu1 %v22772_v35, %s23774_s29 }
 0xdde   : > { %18505 = vrot.lane.b32.xlu0 %v22769_v23, %s23774_s29 }
 0xddf   : > { %13812 = vrot.lane.b32.xlu1 %v12722_v9, %s23899_s12 }
 0xde2   : > { %18515 = vrot.lane.b32.xlu0 %v22761_v26, %s23779_s30 }
 0xde3   : > { %18525 = vrot.lane.b32.xlu1 %v22772_v35, %s23779_s30 }
 0xde6   : > { %18520 = vrot.lane.b32.xlu0 %v22769_v23, %s23779_s30  ;;  %s23901_s30 = smov 116  }
 0xde7   : > { %13921 = vrot.lane.b32.xlu1 %v13916_v3, %s23900_s26 }
 0xdea   : > { %13923 = vrot.lane.b32.xlu0 %v13920_v40, %s23900_s26 }
 0xdeb   : > { %18530 = vrot.lane.b32.xlu1 %v22761_v26, %s23782_s16 }
 0xdee   : > { %18540 = vrot.lane.b32.xlu0 %v22772_v35, %s23782_s16 }
 0xdef   : > { %18535 = vrot.lane.b32.xlu1 %v22769_v23, %s23782_s16  ;;  %s23907_s16 = smov 106  }
 0xdf2   : > { %14029 = vrot.lane.b32.xlu0 %v22883_v47, %s23835_s7 }
 0xdf3   : > { %18545 = vrot.lane.b32.xlu1 %v22761_v26, %s23750_s20 }
 0xdf5   : > { %v18336_v52 = vpop.permute.xlu1 %18335 }
 0xdf6   : > { %18555 = vrot.lane.b32.xlu0 %v22772_v35, %s23750_s20  ;;  %v18338_v34 = vunpack.i.h.bf16 %v18336_v52  ;;  %v18337_v36 = vunpack.i.l.bf16 %v18336_v52 }
 0xdf7   : > { %18550 = vrot.lane.b32.xlu1 %v22769_v23, %s23750_s20 }
 0xdf8   : > { %v18346_v58 = vpop.permute.xlu0 %18345  ;;  %v12744_v10 = vsel %vm23902_vm3, %v18337_v36, %v18338_v34  ;;  %vm23912_vm3 = vmmov %vm23911_vm2 }
 0xdf9   : > { %v18348_v0 = vunpack.i.h.bf16 %v18346_v58  ;;  %v18347_v45 = vunpack.i.l.bf16 %v18346_v58  ;;  %v18341_v16 = vpop.permute.xlu1 %18340 }
 0xdfa   : > { %v18343_v56 = vunpack.i.h.bf16 %v18341_v16  ;;  %v18342_v46 = vunpack.i.l.bf16 %v18341_v16  ;;  %14128 = vrot.lane.b32.xlu0 %v22883_v47, %s23901_s30 }
 0xdfb   : > { %v12746_v32 = vsel %vm23903_vm4, %v18347_v45, %v18348_v0  ;;  %18560 = vrot.lane.b32.xlu1 %v22761_v26, %s23888_s9  ;;  %vm23913_vm4 = vcmask 506880  }
 0xdfc   : > { %v16672_v2 = vpack.c.bf16 %v12746_v32, %v12744_v10  ;;  %v12743_v5 = vsel %vm23904_vm1, %v18342_v46, %v18337_v36  ;;  %v12745_v18 = vsel %vm23905_vm14, %v18343_v56, %v18347_v45  ;;  %v12724_v60 = vpop.permute.xlu0 %12723  ;;  %vm23914_vm1 = vmmov %vm23913_vm4 }
 0xdfd   : > { %v16675_v41 = vpack.c.bf16 %v12745_v18, %v12743_v5  ;;  %v18351_v57 = vpop.permute.xlu1 %18350  ;;  %vm23915_vm14 = vmmov %vm23908_vm5 }
 0xdfe   : > { %18570 = vrot.lane.b32.xlu0 %v22772_v35, %s23888_s9  ;;  %16674 = vmatprep.subr.msk.bf16.mxu1 %vm20561_vm9, %v16672_v2  ;;  %v18353_v19 = vunpack.i.h.bf16 %v18351_v57  ;;  %v18352_v29 = vunpack.i.l.bf16 %v18351_v57 }
 0xdff   : > { %18565 = vrot.lane.b32.xlu1 %v22769_v23, %s23888_s9  ;;  %16677 = vmatpush1.bf16.msk.msra.mxu1 %vm20561_vm9, %v16675_v41 }
 0xe00   : > { %v18361_v55 = vpop.permute.xlu0 %18360  ;;  %v12839_v8 = vsel %vm23909_vm15, %v18352_v29, %v18353_v19  ;;  %vm23917_vm15 = vmmov %vm23914_vm1 }
 0xe01   : > { %v18363_v22 = vunpack.i.h.bf16 %v18361_v55  ;;  %v18362_v39 = vunpack.i.l.bf16 %v18361_v55  ;;  %v18356_v49 = vpop.permute.xlu1 %18355 }
 0xe02   : > { %v18358_v42 = vunpack.i.h.bf16 %v18356_v49  ;;  %v18357_v38 = vunpack.i.l.bf16 %v18356_v49  ;;  %14227 = vrot.lane.b32.xlu0 %v22883_v47, %s23907_s16  ;;  %15747 = vmatmul.mubr.msk.f32.vlgmr.msra.gmra.mrb[8].mxu1 %vm23908_vm5, %v12724_v60  ;;  %vm23916_vm5 = vmmov %vm23914_vm1 }
 0xe03   : > { %v12841_v43 = vsel %vm23910_vm6, %v18362_v39, %v18363_v22  ;;  %18575 = vrot.lane.b32.xlu1 %v22761_v26, %s23796_s8  ;;  %12914 = vmatprep.mubr.f32.mxu1 %v23771_v20  ;;  %vm23919_vm6 = vmmov %vm23915_vm14 }
 0xe04   : > { %v16678_v48 = vpack.c.bf16 %v12841_v43, %v12839_v8  ;;  %v12838_v30 = vsel %vm23911_vm2, %v18357_v38, %v18352_v29  ;;  %v12840_v59 = vsel %vm23912_vm3, %v18358_v42, %v18362_v39  ;;  %v18366_v17 = vpop.permute.xlu0 %18365  ;;  %vm23927_vm3 = vmmov %vm23919_vm6 }
 0xe05   : > { %v16681_v11 = vpack.c.bf16 %v12840_v59, %v12838_v30  ;;  %v18368_v6 = vunpack.i.h.bf16 %v18366_v17  ;;  %v18367_v12 = vunpack.i.l.bf16 %v18366_v17  ;;  %v18376_v14 = vpop.permute.xlu1 %18375 }
 0xe06   : > { %v18378_v15 = vunpack.i.h.bf16 %v18376_v14  ;;  %v18377_v1 = vunpack.i.l.bf16 %v18376_v14  ;;  %18585 = vrot.lane.b32.xlu0 %v22772_v35, %s23796_s8  ;;  %16680 = vmatprep.subr.msk.bf16.mxu1 %vm20561_vm9, %v16678_v48 }
 0xe07   : > { %v12936_v33 = vsel %vm23913_vm4, %v18367_v12, %v18368_v6  ;;  %18580 = vrot.lane.b32.xlu1 %v22769_v23, %s23796_s8  ;;  %16683 = vmatpush1.bf16.msk.msra.mxu1 %vm20561_vm9, %v16681_v11  ;;  %s23918_s8 = smov 86  }
 0xe08   : > { %v12938_v61 = vsel %vm23914_vm1, %v18377_v1, %v18378_v15  ;;  %v18371_v53 = vpop.permute.xlu0 %18370 }
 0xe09   : > { %v16684_v51 = vpack.c.bf16 %v12938_v61, %v12936_v33  ;;  %v18373_v50 = vunpack.i.h.bf16 %v18371_v53  ;;  %v18372_v21 = vunpack.i.l.bf16 %v18371_v53  ;;  %v12922_v37 = vpop.permute.xlu1 %12921 }
 0xe0a   : > { %14326 = vrot.lane.b32.xlu0 %v22883_v47, %s23750_s20  ;;  %15750 = vmatmul.mubr.msk.f32.vlgmr.msra.gmra.mrb[8].mxu1 %vm23915_vm14, %v22750_v27  ;;  %vm23930_vm14 = vcmask 646144  }
 0xe0b   : > { %v12937_v4 = vsel %vm23916_vm5, %v18373_v50, %v18377_v1  ;;  %v12935_v9 = vsel %vm23917_vm15, %v18372_v21, %v18367_v12  ;;  %18590 = vrot.lane.b32.xlu1 %v22761_v26, %s23802_s11  ;;  %16686 = vmatprep.subr.msk.bf16.mxu1 %vm20561_vm9, %v16684_v51  ;;  %vm23931_vm5 = vmmov %vm23930_vm14 }
 0xe0c   : > { %v16687_v28 = vpack.c.bf16 %v12937_v4, %v12935_v9  ;;  %v18381_v3 = vpop.permute.xlu0 %18380  ;;  %13011 = vmatprep.mubr.f32.mxu1 %v23771_v20  ;;  %vm23932_vm15 = vmmov %vm23927_vm3 }
 0xe0d   : > { %v18383_v40 = vunpack.i.h.bf16 %v18381_v3  ;;  %v18382_v52 = vunpack.i.l.bf16 %v18381_v3  ;;  %v18391_v34 = vpop.permute.xlu1 %18390 }
 0xe0e   : > { %v18393_v36 = vunpack.i.h.bf16 %v18391_v34  ;;  %v18392_v58 = vunpack.i.l.bf16 %v18391_v34  ;;  %18600 = vrot.lane.b32.xlu0 %v22772_v35, %s23802_s11  ;;  %16689 = vmatpush1.bf16.msk.msra.mxu1 %vm20561_vm9, %v16687_v28 }
 0xe0f   : > { %v13035_v27 = vsel %vm1642_vm10, %v18382_v52, %v18383_v40  ;;  %18595 = vrot.lane.b32.xlu1 %v22769_v23, %s23802_s11  ;;  %s23921_s11 = smov 66  }
 0xe10   : > { %v13037_v0 = vsel %vm1642_vm10, %v18392_v58, %v18393_v36  ;;  %v18386_v45 = vpop.permute.xlu0 %18385 }
 0xe11   : > { %v16690_v16 = vpack.c.bf16 %v13037_v0, %v13035_v27  ;;  %v18388_v56 = vunpack.i.h.bf16 %v18386_v45  ;;  %v18387_v46 = vunpack.i.l.bf16 %v18386_v45  ;;  %v13021_v10 = vpop.permute.xlu1 %13020 }
 0xe12   : > { %14425 = vrot.lane.b32.xlu0 %v22883_v47, %s23918_s8  ;;  %15753 = vmatmul.mubr.msk.f32.vlgmr.msra.gmra.mrb[8].mxu1 %vm23919_vm6, %v12922_v37 }
 0xe13   : > { %v13036_v32 = vsel %vm1642_vm10, %v18388_v56, %v18392_v58  ;;  %v13034_v2 = vsel %vm1642_vm10, %v18387_v46, %v18382_v52  ;;  %18605 = vrot.lane.b32.xlu1 %v22761_v26, %s23808_s10  ;;  %16692 = vmatprep.subr.msk.bf16.mxu1 %vm20561_vm9, %v16690_v16  ;;  %vm23920_vm10 = vmmov %vm23919_vm6 }
 0xe14   : > { %v16693_v5 = vpack.c.bf16 %v13036_v32, %v13034_v2  ;;  %v18396_v18 = vpop.permute.xlu0 %18395  ;;  %13110 = vmatprep.mubr.f32.mxu1 %v23771_v20 }
 0xe15   : > { %v18398_v60 = vunpack.i.h.bf16 %v18396_v18  ;;  %v18397_v41 = vunpack.i.l.bf16 %v18396_v18  ;;  %v18406_v57 = vpop.permute.xlu1 %18405 }
 0xe16   : > { %v18408_v19 = vunpack.i.h.bf16 %v18406_v57  ;;  %v18407_v29 = vunpack.i.l.bf16 %v18406_v57  ;;  %18615 = vrot.lane.b32.xlu0 %v22772_v35, %s23808_s10  ;;  %16695 = vmatpush1.bf16.msk.msra.mxu1 %vm20561_vm9, %v16693_v5 }
 0xe17   : > { %v13134_v55 = vsel %vm1569_vm11, %v18397_v41, %v18398_v60  ;;  %18610 = vrot.lane.b32.xlu1 %v22769_v23, %s23808_s10 }
 0xe18   : > { %v13136_v22 = vsel %vm1569_vm11, %v18407_v29, %v18408_v19  ;;  %v18401_v39 = vpop.permute.xlu0 %18400 }
 0xe19   : > { %v16696_v49 = vpack.c.bf16 %v13136_v22, %v13134_v55  ;;  %v18403_v42 = vunpack.i.h.bf16 %v18401_v39  ;;  %v18402_v38 = vunpack.i.l.bf16 %v18401_v39  ;;  %v13120_v8 = vpop.permute.xlu1 %13119 }
 0xe1a   : > { %14524 = vrot.lane.b32.xlu0 %v22883_v47, %s23683_s22  ;;  %15756 = vmatmul.mubr.msk.f32.vlgmr.msra.gmra.mrb[8].mxu1 %vm23920_vm10, %v13021_v10  ;;  %s23926_s22 = smov 46   ;;  %vm23934_vm10 = vmmov %vm23931_vm5 }
 0xe1b   : > { %v13135_v43 = vsel %vm1569_vm11, %v18403_v42, %v18407_v29  ;;  %v13133_v48 = vsel %vm1569_vm11, %v18402_v38, %v18397_v41  ;;  %18620 = vrot.lane.b32.xlu1 %v22761_v26, %s23815_s28  ;;  %16698 = vmatprep.subr.msk.bf16.mxu1 %vm20561_vm9, %v16696_v49  ;;  %vm23922_vm11 = vmmov %vm23919_vm6 }
 0xe1c   : > { %v16699_v30 = vpack.c.bf16 %v13135_v43, %v13133_v48  ;;  %v18411_v59 = vpop.permute.xlu0 %18410  ;;  %13209 = vmatprep.mubr.f32.mxu1 %v23771_v20 }
 0xe1d   : > { %v18413_v17 = vunpack.i.h.bf16 %v18411_v59  ;;  %v18412_v11 = vunpack.i.l.bf16 %v18411_v59  ;;  %v18421_v6 = vpop.permute.xlu1 %18420 }
 0xe1e   : > { %v18423_v12 = vunpack.i.h.bf16 %v18421_v6  ;;  %v18422_v14 = vunpack.i.l.bf16 %v18421_v6  ;;  %18630 = vrot.lane.b32.xlu0 %v22772_v35, %s23815_s28  ;;  %16701 = vmatpush1.bf16.msk.msra.mxu1 %vm20561_vm9, %v16699_v30 }
 0xe1f   : > { %v13233_v15 = vsel %vm1493_vm12, %v18412_v11, %v18413_v17  ;;  %18625 = vrot.lane.b32.xlu1 %v22769_v23, %s23815_s28  ;;  %s15318_s28 = sshll.u32 %s24006_s24, 1 }
 0xe20   : > { %v13235_v1 = vsel %vm1493_vm12, %v18422_v14, %v18423_v12  ;;  %v18416_v33 = vpop.permute.xlu0 %18415 }
 0xe21   : > { %v16702_v61 = vpack.c.bf16 %v13235_v1, %v13233_v15  ;;  %v18418_v53 = vunpack.i.h.bf16 %v18416_v33  ;;  %v18417_v51 = vunpack.i.l.bf16 %v18416_v33  ;;  %v13219_v50 = vpop.permute.xlu1 %13218 }
 0xe22   : > { %14623 = vrot.lane.b32.xlu0 %v22883_v47, %s23921_s11  ;;  %15759 = vmatmul.mubr.msk.f32.vlgmr.msra.gmra.mrb[8].mxu1 %vm23922_vm11, %v13120_v8  ;;  %vm23935_vm11 = vcmask 654336  }
 0xe23   : > { %v13234_v21 = vsel %vm1493_vm12, %v18418_v53, %v18422_v14  ;;  %v13232_v37 = vsel %vm1493_vm12, %v18417_v51, %v18412_v11  ;;  %18635 = vrot.lane.b32.xlu1 %v22761_v26, %s23787_s15  ;;  %16704 = vmatprep.subr.msk.bf16.mxu1 %vm20561_vm9, %v16702_v61  ;;  %vm23923_vm12 = vmmov %vm23919_vm6 }
 0xe24   : > { %v16705_v4 = vpack.c.bf16 %v13234_v21, %v13232_v37  ;;  %v18426_v9 = vpop.permute.xlu0 %18425  ;;  %13308 = vmatprep.mubr.f32.mxu1 %v23771_v20  ;;  %vm23933_vm6 = vmmov %vm23931_vm5 }
 0xe25   : > { %v18428_v28 = vunpack.i.h.bf16 %v18426_v9  ;;  %v18427_v3 = vunpack.i.l.bf16 %v18426_v9  ;;  %v18436_v40 = vpop.permute.xlu1 %18435 }
 0xe26   : > { %v18438_v52 = vunpack.i.h.bf16 %v18436_v40  ;;  %v18437_v34 = vunpack.i.l.bf16 %v18436_v40  ;;  %18645 = vrot.lane.b32.xlu0 %v22772_v35, %s23787_s15  ;;  %16707 = vmatpush1.bf16.msk.msra.mxu1 %vm20561_vm9, %v16705_v4 }
 0xe27   : > { %v13332_v36 = vsel %vm1430_vm13, %v18427_v3, %v18428_v28  ;;  %18640 = vrot.lane.b32.xlu1 %v22769_v23, %s23787_s15 }
 0xe28   : > { %v13334_v58 = vsel %vm1430_vm13, %v18437_v34, %v18438_v52  ;;  %v18431_v27 = vpop.permute.xlu0 %18430 }
 0xe29   : > { %v16708_v0 = vpack.c.bf16 %v13334_v58, %v13332_v36  ;;  %v18433_v45 = vunpack.i.h.bf16 %v18431_v27  ;;  %v18432_v16 = vunpack.i.l.bf16 %v18431_v27  ;;  %v13318_v56 = vpop.permute.xlu1 %13317 }
 0xe2a   : > { %14722 = vrot.lane.b32.xlu0 %v22883_v47, %s23778_s23  ;;  %15762 = vmatmul.mubr.msk.f32.vlgmr.msra.gmra.mrb[8].mxu1 %vm23923_vm12, %v13219_v50  ;;  %vm23936_vm12 = vmmov %vm23935_vm11 }
 0xe2b   : > { %v13333_v46 = vsel %vm1430_vm13, %v18433_v45, %v18437_v34  ;;  %v13331_v10 = vsel %vm1430_vm13, %v18432_v16, %v18427_v3  ;;  %18650 = vrot.lane.b32.xlu1 %v22761_v26, %s23828_s25  ;;  %16710 = vmatprep.subr.msk.bf16.mxu1 %vm20561_vm9, %v16708_v0  ;;  %vm23924_vm13 = vcmask 637952  }
 0xe2c   : > { %v16711_v32 = vpack.c.bf16 %v13333_v46, %v13331_v10  ;;  %v18441_v2 = vpop.permute.xlu0 %18440  ;;  %13407 = vmatprep.mubr.f32.mxu1 %v23771_v20  ;;  %vm23925_vm2 = vmmov %vm23924_vm13 }
 0xe2d   : > { %v18443_v5 = vunpack.i.h.bf16 %v18441_v2  ;;  %v18442_v18 = vunpack.i.l.bf16 %v18441_v2  ;;  %v18451_v60 = vpop.permute.xlu1 %18450  ;;  %vm23928_vm4 = vmmov %vm23925_vm2 }
 0xe2e   : > { %v18453_v41 = vunpack.i.h.bf16 %v18451_v60  ;;  %v18452_v57 = vunpack.i.l.bf16 %v18451_v60  ;;  %18660 = vrot.lane.b32.xlu0 %v22772_v35, %s23828_s25  ;;  %16713 = vmatpush1.bf16.msk.msra.mxu1 %vm20561_vm9, %v16711_v32  ;;  %vm23929_vm1 = vmmov %vm23925_vm2 }
 0xe2f   : > { %v13431_v19 = vsel %vm23924_vm13, %v18442_v18, %v18443_v5  ;;  %18655 = vrot.lane.b32.xlu1 %v22769_v23, %s23828_s25  ;;  %vm23937_vm13 = vmmov %vm23927_vm3 }
 0xe30   : > { %v13433_v29 = vsel %vm23925_vm2, %v18452_v57, %v18453_v41  ;;  %v18446_v55 = vpop.permute.xlu0 %18445  ;;  %vm23939_vm2 = vmmov %vm23935_vm11 }
 0xe31   : > { %v16714_v22 = vpack.c.bf16 %v13433_v29, %v13431_v19  ;;  %v18448_v39 = vunpack.i.h.bf16 %v18446_v55  ;;  %v18447_v49 = vunpack.i.l.bf16 %v18446_v55  ;;  %v13417_v42 = vpop.permute.xlu1 %13416 }
 0xe32   : > { %14821 = vrot.lane.b32.xlu0 %v22883_v47, %s23926_s22  ;;  %15765 = vmatmul.mubr.msk.f32.vlgmr.msra.gmra.mrb[8].mxu1 %vm23927_vm3, %v13318_v56  ;;  %vm23940_vm3 = vmmov %vm23939_vm2 }
 0xe33   : > { %v13432_v38 = vsel %vm23928_vm4, %v18448_v39, %v18452_v57  ;;  %v13430_v8 = vsel %vm23929_vm1, %v18447_v49, %v18442_v18  ;;  %18665 = vrot.lane.b32.xlu1 %v22761_v26, %s23835_s7  ;;  %16716 = vmatprep.subr.msk.bf16.mxu1 %vm20561_vm9, %v16714_v22  ;;  %vm23941_vm4 = vcmask 752640  }
 0xe34   : > { %v16717_v43 = vpack.c.bf16 %v13432_v38, %v13430_v8  ;;  %v18456_v48 = vpop.permute.xlu0 %18455  ;;  %13506 = vmatprep.mubr.f32.mxu1 %v23771_v20  ;;  %vm23942_vm1 = vmmov %vm23941_vm4 }
 0xe35   : > { %v18458_v30 = vunpack.i.h.bf16 %v18456_v48  ;;  %v18457_v59 = vunpack.i.l.bf16 %v18456_v48  ;;  %v18466_v17 = vpop.permute.xlu1 %18465 }
 0xe36   : > { %v18468_v11 = vunpack.i.h.bf16 %v18466_v17  ;;  %v18467_v6 = vunpack.i.l.bf16 %v18466_v17  ;;  %18675 = vrot.lane.b32.xlu0 %v22772_v35, %s23835_s7  ;;  %16719 = vmatpush1.bf16.msk.msra.mxu1 %vm20561_vm9, %v16717_v43 }
 0xe37   : > { %v13530_v12 = vsel %vm23930_vm14, %v18457_v59, %v18458_v30  ;;  %18670 = vrot.lane.b32.xlu1 %v22769_v23, %s23835_s7  ;;  %vm23943_vm14 = vmmov %vm23937_vm13 }
 0xe38   : > { %v13532_v14 = vsel %vm23931_vm5, %v18467_v6, %v18468_v11  ;;  %v18461_v15 = vpop.permute.xlu0 %18460  ;;  %vm23944_vm5 = vmmov %vm23942_vm1 }
 0xe39   : > { %v16720_v1 = vpack.c.bf16 %v13532_v14, %v13530_v12  ;;  %v18463_v33 = vunpack.i.h.bf16 %v18461_v15  ;;  %v18462_v61 = vunpack.i.l.bf16 %v18461_v15  ;;  %v13516_v53 = vpop.permute.xlu1 %13515 }
 0xe3a   : > { %14920 = vrot.lane.b32.xlu0 %v22883_v47, %s23780_s17  ;;  %15768 = vmatmul.mubr.msk.f32.vlgmr.msra.gmra.mrb[8].mxu1 %vm23932_vm15, %v13417_v42  ;;  %s23938_s17 = smov 26   ;;  %vm23945_vm15 = vmmov %vm23942_vm1 }
 0xe3b   : > { %v13531_v51 = vsel %vm23933_vm6, %v18463_v33, %v18467_v6  ;;  %v13529_v50 = vsel %vm23934_vm10, %v18462_v61, %v18457_v59  ;;  %18680 = vrot.lane.b32.xlu1 %v22761_v26, %s23838_s27  ;;  %16722 = vmatprep.subr.msk.bf16.mxu1 %vm20561_vm9, %v16720_v1  ;;  %vm23946_vm6 = vcmask 760832  }
 0xe3c   : > { %v16723_v21 = vpack.c.bf16 %v13531_v51, %v13529_v50  ;;  %v18471_v37 = vpop.permute.xlu0 %18470  ;;  %13605 = vmatprep.mubr.f32.mxu1 %v23771_v20  ;;  %vm23947_vm10 = vmmov %vm23946_vm6 }
 0xe3d   : > { %v18473_v4 = vunpack.i.h.bf16 %v18471_v37  ;;  %v18472_v9 = vunpack.i.l.bf16 %v18471_v37  ;;  %v18481_v28 = vpop.permute.xlu1 %18480 }
 0xe3e   : > { %v18483_v3 = vunpack.i.h.bf16 %v18481_v28  ;;  %v18482_v40 = vunpack.i.l.bf16 %v18481_v28  ;;  %18685 = vrot.lane.b32.xlu0 %v22772_v35, %s23838_s27  ;;  %16725 = vmatpush1.bf16.msk.msra.mxu1 %vm20561_vm9, %v16723_v21 }
 0xe3f   : > { %v13629_v26 = vsel %vm23935_vm11, %v18472_v9, %v18473_v4  ;;  %18690 = vrot.lane.b32.xlu1 %v22769_v23, %s23838_s27  ;;  %vm23948_vm11 = vmmov %vm23937_vm13 }
 0xe40   : > { %v13631_v52 = vsel %vm23936_vm12, %v18482_v40, %v18483_v3  ;;  %v18476_v34 = vpop.permute.xlu0 %18475  ;;  %vm23949_vm12 = vmmov %vm23946_vm6 }
 0xe41   : > { %v16726_v36 = vpack.c.bf16 %v13631_v52, %v13629_v26  ;;  %v18478_v58 = vunpack.i.h.bf16 %v18476_v34  ;;  %v18477_v27 = vunpack.i.l.bf16 %v18476_v34  ;;  %v13615_v0 = vpop.permute.xlu1 %13614 }
 0xe42   : > { %15771 = vmatmul.mubr.msk.f32.vlgmr.msra.gmra.mrb[8].mxu1 %vm23937_vm13, %v13516_v53  ;;  %15019 = vrot.lane.b32.xlu0 %v22883_v47, %s23938_s17  ;;  %vm23950_vm13 = vmmov %vm23946_vm6 }
 0xe43   : > { %v13630_v35 = vsel %vm23939_vm2, %v18478_v58, %v18482_v40  ;;  %v13628_v45 = vsel %vm23940_vm3, %v18477_v27, %v18472_v9  ;;  %16728 = vmatprep.subr.msk.bf16.mxu1 %vm20561_vm9, %v16726_v36  ;;  %13704 = vmatprep.mubr.f32.mxu1 %v23771_v20  ;;  %vm23951_vm2 = vcmask 769024  }
 0xe44   : > { %v16729_v23 = vpack.c.bf16 %v13630_v35, %v13628_v45  ;;  %v18486_v16 = vpop.permute.xlu0 %18485  ;;  %15118 = vrot.lane.b32.xlu1 %v22883_v47, %s23781_s13  ;;  %vm23952_vm3 = vmmov %vm23951_vm2  ;;  %s276_s13 = scalar_lea.vmem %s23241_s6, %s15318_s28 }
 0xe45   : > { %v18488_v56 = vunpack.i.h.bf16 %v18486_v16  ;;  %v18487_v46 = vunpack.i.l.bf16 %v18486_v16  ;;  %v18496_v10 = vpop.permute.xlu1 %18495 }
 0xe46   : > { %v18498_v32 = vunpack.i.h.bf16 %v18496_v10  ;;  %v18497_v2 = vunpack.i.l.bf16 %v18496_v10  ;;  %16731 = vmatpush1.bf16.msk.msra.mxu1 %vm20561_vm9, %v16729_v23  ;;  %15200 = vperm.xlu0 %18694, %v22877_v54  }
 0xe47   : > { %v13728_v5 = vsel %vm23941_vm4, %v18487_v46, %v18488_v56  ;;  %vm23953_vm4 = vmmov %vm23948_vm11 }
 0xe48   : > { %v13730_v18 = vsel %vm23942_vm1, %v18497_v2, %v18498_v32  ;;  %v18491_v60 = vpop.permute.xlu0 %18490  ;;  %vm23954_vm1 = vmmov %vm23951_vm2 }
 0xe49   : > { %v16732_v41 = vpack.c.bf16 %v13730_v18, %v13728_v5  ;;  %v18493_v57 = vunpack.i.h.bf16 %v18491_v60  ;;  %v18492_v19 = vunpack.i.l.bf16 %v18491_v60  ;;  %v13714_v29 = vpop.permute.xlu1 %13713 }
 0xe4a   : > { %15774 = vmatmul.mubr.msk.f32.vlgmr.msra.gmra.mrb[8].mxu1 %vm23943_vm14, %v13615_v0  ;;  %vm23955_vm14 = vmmov %vm23954_vm1 }
 0xe4b   : > { %v13729_v47 = vsel %vm23944_vm5, %v18493_v57, %v18497_v2  ;;  %v13727_v55 = vsel %vm23945_vm15, %v18492_v19, %v18487_v46  ;;  %16734 = vmatprep.subr.msk.bf16.mxu1 %vm20561_vm9, %v16732_v41  ;;  %13803 = vmatprep.mubr.f32.mxu1 %v23771_v20  ;;  %vm23956_vm5 = vmmov %vm23953_vm4  ;;  %vm23957_vm15 = vcmask 777216  }
 0xe4c   : > { %v16735_v54 = vpack.c.bf16 %v13729_v47, %v13727_v55  ;;  %v18501_v22 = vpop.permute.xlu0 %18500 }
 0xe4d   : > { %v18503_v39 = vunpack.i.h.bf16 %v18501_v22  ;;  %v18502_v49 = vunpack.i.l.bf16 %v18501_v22  ;;  %v18511_v42 = vpop.permute.xlu1 %18510 }
 0xe4e   : > { %v18513_v38 = vunpack.i.h.bf16 %v18511_v42  ;;  %v18512_v8 = vunpack.i.l.bf16 %v18511_v42  ;;  %16737 = vmatpush1.bf16.msk.msra.mxu1 %vm20561_vm9, %v16735_v54 }
 0xe4f   : > { %v13827_v43 = vsel %vm23946_vm6, %v18502_v49, %v18503_v39  ;;  %vm23958_vm6 = vmmov %vm23957_vm15 }
 0xe50   : > { %v13829_v48 = vsel %vm23947_vm10, %v18512_v8, %v18513_v38  ;;  %v18506_v30 = vpop.permute.xlu0 %18505  ;;  %vm23959_vm10 = vmmov %vm23958_vm6 }
 0xe51   : > { %v16738_v59 = vpack.c.bf16 %v13829_v48, %v13827_v43  ;;  %v18508_v17 = vunpack.i.h.bf16 %v18506_v30  ;;  %v18507_v11 = vunpack.i.l.bf16 %v18506_v30  ;;  %v13813_v6 = vpop.permute.xlu1 %13812 }
 0xe52   : > { %15777 = vmatmul.mubr.msk.f32.vlgmr.msra.gmra.mrb[8].mxu1 %vm23948_vm11, %v13714_v29  ;;  %vm23960_vm11 = vmmov %vm23958_vm6 }
 0xe53   : > { %v13828_v12 = vsel %vm23949_vm12, %v18508_v17, %v18512_v8  ;;  %v13826_v14 = vsel %vm23950_vm13, %v18507_v11, %v18502_v49  ;;  %16740 = vmatprep.subr.msk.bf16.mxu1 %vm20561_vm9, %v16738_v59  ;;  %13902 = vmatprep.mubr.f32.mxu1 %v23771_v20  ;;  %vm23962_vm12 = vcmask 785408  }
 0xe54   : > { %v16741_v15 = vpack.c.bf16 %v13828_v12, %v13826_v14  ;;  %v18516_v1 = vpop.permute.xlu0 %18515  ;;  %vm23963_vm13 = vmmov %vm23962_vm12 }
 0xe55   : > { %v18518_v33 = vunpack.i.h.bf16 %v18516_v1  ;;  %v18517_v61 = vunpack.i.l.bf16 %v18516_v1  ;;  %v18526_v53 = vpop.permute.xlu1 %18525 }
 0xe56   : > { %v18528_v51 = vunpack.i.h.bf16 %v18526_v53  ;;  %v18527_v50 = vunpack.i.l.bf16 %v18526_v53  ;;  %16743 = vmatpush1.bf16.msk.msra.mxu1 %vm20561_vm9, %v16741_v15 }
 0xe57   : > { %v13939_v21 = vsel %vm23951_vm2, %v18517_v61, %v18518_v33  ;;  %vm23964_vm2 = vmmov %vm23962_vm12 }
 0xe58   : > { %v13941_v37 = vsel %vm23952_vm3, %v18527_v50, %v18528_v51  ;;  %v18521_v4 = vpop.permute.xlu0 %18520  ;;  %vm23965_vm3 = vmmov %vm23964_vm2 }
 0xe59   : > { %v16744_v9 = vpack.c.bf16 %v13941_v37, %v13939_v21  ;;  %v18523_v28 = vunpack.i.h.bf16 %v18521_v4  ;;  %v18522_v3 = vunpack.i.l.bf16 %v18521_v4  ;;  %v13922_v40 = vpop.permute.xlu1 %13921 }
 0xe5a   : > { %15780 = vmatmul.mubr.msk.f32.vlgmr.msra.gmra.mrb[8].mxu1 %vm23953_vm4, %v13813_v6 }
 0xe5b   : > { %v13940_v26 = vsel %vm23954_vm1, %v18523_v28, %v18527_v50  ;;  %v13938_v52 = vsel %vm23955_vm14, %v18522_v3, %v18517_v61  ;;  %16746 = vmatprep.subr.msk.bf16.mxu1 %vm20561_vm9, %v16744_v9  ;;  %14014 = vmatprep.mubr.f32.mxu1 %v23771_v20 }
 0xe5c   : > { %v16747_v34 = vpack.c.bf16 %v13940_v26, %v13938_v52  ;;  %v13924_v36 = vpop.permute.xlu0 %13923 }
 0xe5d   : > { %v18531_v58 = vpop.permute.xlu1 %18530  ;;  %v13925_v45 = vsel %vm4582_vm0, %v13922_v40, %v13924_v36  ;;  %vm23961_vm0 = vmmov %vm23953_vm4 }
 0xe5e   : > { %16749 = vmatpush1.bf16.msk.msra.mxu1 %vm20561_vm9, %v16747_v34  ;;  %v18533_v27 = vunpack.i.h.bf16 %v18531_v58  ;;  %v18532_v0 = vunpack.i.l.bf16 %v18531_v58  ;;  %vm23966_vm4 = vmmov %vm23961_vm0 }
 0xe5f   : > { %vm23967_vm1 = vmmov %vm23961_vm0 }
 0xe60   : > { %v18541_v35 = vpop.permute.xlu0 %18540  ;;  %v14044_v32 = vsel %vm23957_vm15, %v18532_v0, %v18533_v27 }
 0xe61   : > { %v18543_v23 = vunpack.i.h.bf16 %v18541_v35  ;;  %v18542_v16 = vunpack.i.l.bf16 %v18541_v35  ;;  %v18536_v56 = vpop.permute.xlu1 %18535 }
 0xe62   : > { %v18538_v46 = vunpack.i.h.bf16 %v18536_v56  ;;  %v18537_v10 = vunpack.i.l.bf16 %v18536_v56  ;;  %15783 = vmatmul.mubr.msk.f32.vlgmr.msra.gmra.mrb[8].mxu1 %vm23956_vm5, %v13925_v45 }
 0xe63   : > { %v14046_v2 = vsel %vm23958_vm6, %v18542_v16, %v18543_v23  ;;  %14119 = vmatprep.mubr.f32.mxu1 %v23771_v20  ;;  %vm23973_vm6 = vmmov %vm23961_vm0 }
 0xe64   : > { %v16750_v5 = vpack.c.bf16 %v14046_v2, %v14044_v32  ;;  %v14043_v18 = vsel %vm23959_vm10, %v18537_v10, %v18532_v0  ;;  %v14045_v60 = vsel %vm23960_vm11, %v18538_v46, %v18542_v16  ;;  %v14030_v41 = vpop.permute.xlu0 %14029  ;;  %vm23974_vm10 = vcmask 908288  }
 0xe65   : > { %v16753_v57 = vpack.c.bf16 %v14045_v60, %v14043_v18  ;;  %v18546_v19 = vpop.permute.xlu1 %18545  ;;  %vm23975_vm11 = vmmov %vm23974_vm10 }
 0xe66   : > { %16752 = vmatprep.subr.msk.bf16.mxu1 %vm20561_vm9, %v16750_v5  ;;  %v18548_v29 = vunpack.i.h.bf16 %v18546_v19  ;;  %v18547_v47 = vunpack.i.l.bf16 %v18546_v19 }
 0xe67   : > { %16755 = vmatpush1.bf16.msk.msra.mxu1 %vm20561_vm9, %v16753_v57 }
 0xe68   : > { %v18556_v55 = vpop.permute.xlu0 %18555  ;;  %v14143_v38 = vsel %vm23962_vm12, %v18547_v47, %v18548_v29 }
 0xe69   : > { %v18558_v54 = vunpack.i.h.bf16 %v18556_v55  ;;  %v18557_v22 = vunpack.i.l.bf16 %v18556_v55  ;;  %v18551_v39 = vpop.permute.xlu1 %18550 }
 0xe6a   : > { %v18553_v49 = vunpack.i.h.bf16 %v18551_v39  ;;  %v18552_v42 = vunpack.i.l.bf16 %v18551_v39  ;;  %15786 = vmatmul.mubr.msk.f32.vlgmr.msra.gmra.mrb[8].mxu1 %vm23961_vm0, %v14030_v41 }
 0xe6b   : > { %v14145_v8 = vsel %vm23963_vm13, %v18557_v22, %v18558_v54  ;;  %14218 = vmatprep.mubr.f32.mxu1 %v23771_v20  ;;  %vm23978_vm13 = vmmov %vm23967_vm1 }
 0xe6c   : > { %v16756_v43 = vpack.c.bf16 %v14145_v8, %v14143_v38  ;;  %v14142_v48 = vsel %vm23964_vm2, %v18552_v42, %v18547_v47  ;;  %v14144_v30 = vsel %vm23965_vm3, %v18553_v49, %v18557_v22  ;;  %v14129_v59 = vpop.permute.xlu0 %14128  ;;  %vm23979_vm2 = vcmask 916480  }
 0xe6d   : > { %v16759_v17 = vpack.c.bf16 %v14144_v30, %v14142_v48  ;;  %v18561_v11 = vpop.permute.xlu1 %18560  ;;  %vm23980_vm3 = vmmov %vm23979_vm2 }
 0xe6e   : > { %16758 = vmatprep.subr.msk.bf16.mxu1 %vm20561_vm9, %v16756_v43  ;;  %v18563_v6 = vunpack.i.h.bf16 %v18561_v11  ;;  %v18562_v12 = vunpack.i.l.bf16 %v18561_v11 }
 0xe6f   : > { %16761 = vmatpush1.bf16.msk.msra.mxu1 %vm20561_vm9, %v16759_v17 }
 0xe70   : > { %v18571_v14 = vpop.permute.xlu0 %18570  ;;  %v14242_v51 = vsel %vm863_vm8, %v18562_v12, %v18563_v6 }
 0xe71   : > { %v18573_v15 = vunpack.i.h.bf16 %v18571_v14  ;;  %v18572_v1 = vunpack.i.l.bf16 %v18571_v14  ;;  %v18566_v33 = vpop.permute.xlu1 %18565 }
 0xe72   : > { %v18568_v61 = vunpack.i.h.bf16 %v18566_v33  ;;  %v18567_v53 = vunpack.i.l.bf16 %v18566_v33  ;;  %15789 = vmatmul.mubr.msk.f32.vlgmr.msra.gmra.mrb[8].mxu1 %vm23966_vm4, %v14129_v59  ;;  %vm23981_vm4 = vmmov %vm23979_vm2 }
 0xe73   : > { %v14244_v50 = vsel %vm863_vm8, %v18572_v1, %v18573_v15  ;;  %14317 = vmatprep.mubr.f32.mxu1 %v23771_v20 }
 0xe74   : > { %v16762_v21 = vpack.c.bf16 %v14244_v50, %v14242_v51  ;;  %v14241_v37 = vsel %vm863_vm8, %v18567_v53, %v18562_v12  ;;  %v14243_v4 = vsel %vm863_vm8, %v18568_v61, %v18572_v1  ;;  %v14228_v9 = vpop.permute.xlu0 %14227  ;;  %vm23968_vm8 = vmmov %vm23961_vm0 }
 0xe75   : > { %v16765_v28 = vpack.c.bf16 %v14243_v4, %v14241_v37  ;;  %v18576_v3 = vpop.permute.xlu1 %18575  ;;  %vm23976_vm0 = vmmov %vm23974_vm10 }
 0xe76   : > { %16764 = vmatprep.subr.msk.bf16.mxu1 %vm20561_vm9, %v16762_v21  ;;  %v18578_v40 = vunpack.i.h.bf16 %v18576_v3  ;;  %v18577_v26 = vunpack.i.l.bf16 %v18576_v3  ;;  %vm23977_vm12 = vmmov %vm23976_vm0 }
 0xe77   : > { %16767 = vmatpush1.bf16.msk.msra.mxu1 %vm20561_vm9, %v16765_v28 }
 0xe78   : > { %v18586_v52 = vpop.permute.xlu0 %18585  ;;  %v14341_v35 = vsel %vm800_vm7, %v18577_v26, %v18578_v40 }
 0xe79   : > { %v18588_v34 = vunpack.i.h.bf16 %v18586_v52  ;;  %v18587_v36 = vunpack.i.l.bf16 %v18586_v52  ;;  %v18581_v58 = vpop.permute.xlu1 %18580 }
 0xe7a   : > { %v18583_v27 = vunpack.i.h.bf16 %v18581_v58  ;;  %v18582_v0 = vunpack.i.l.bf16 %v18581_v58  ;;  %15792 = vmatmul.mubr.msk.f32.vlgmr.msra.gmra.mrb[8].mxu1 %vm23967_vm1, %v14228_v9  ;;  %vm23982_vm1 = vmmov %vm23979_vm2 }
 0xe7b   : > { %v14343_v45 = vsel %vm800_vm7, %v18587_v36, %v18588_v34  ;;  %14416 = vmatprep.mubr.f32.mxu1 %v23771_v20 }
 0xe7c   : > { %v16768_v23 = vpack.c.bf16 %v14343_v45, %v14341_v35  ;;  %v14340_v16 = vsel %vm800_vm7, %v18582_v0, %v18577_v26  ;;  %v14342_v56 = vsel %vm800_vm7, %v18583_v27, %v18587_v36  ;;  %v14327_v46 = vpop.permute.xlu0 %14326  ;;  %vm23969_vm7 = vcmask 900096  }
 0xe7d   : > { %v16771_v10 = vpack.c.bf16 %v14342_v56, %v14340_v16  ;;  %v18591_v32 = vpop.permute.xlu1 %18590  ;;  %vm23970_vm14 = vmmov %vm23969_vm7 }
 0xe7e   : > { %16770 = vmatprep.subr.msk.bf16.mxu1 %vm20561_vm9, %v16768_v23  ;;  %v18593_v2 = vunpack.i.h.bf16 %v18591_v32  ;;  %v18592_v5 = vunpack.i.l.bf16 %v18591_v32  ;;  %vm23971_vm5 = vmmov %vm23969_vm7 }
 0xe7f   : > { %16773 = vmatpush1.bf16.msk.msra.mxu1 %vm20561_vm9, %v16771_v10  ;;  %vm23972_vm15 = vmmov %vm23971_vm5 }
 0xe80   : > { %v18601_v18 = vpop.permute.xlu0 %18600  ;;  %v14440_v47 = vsel %vm23969_vm7, %v18592_v5, %v18593_v2  ;;  %vm23984_vm7 = vcmask 1014784  }
 0xe81   : > { %v18603_v60 = vunpack.i.h.bf16 %v18601_v18  ;;  %v18602_v41 = vunpack.i.l.bf16 %v18601_v18  ;;  %v18596_v57 = vpop.permute.xlu1 %18595 }
 0xe82   : > { %v18598_v19 = vunpack.i.h.bf16 %v18596_v57  ;;  %v18597_v29 = vunpack.i.l.bf16 %v18596_v57  ;;  %15795 = vmatmul.mubr.msk.f32.vlgmr.msra.gmra.mrb[8].mxu1 %vm23968_vm8, %v14327_v46  ;;  %vm23983_vm8 = vmmov %vm23973_vm6 }
 0xe83   : > { %v14442_v55 = vsel %vm23970_vm14, %v18602_v41, %v18603_v60  ;;  %14515 = vmatprep.mubr.f32.mxu1 %v23771_v20  ;;  %vm23985_vm14 = vmmov %vm23984_vm7 }
 0xe84   : > { %v16774_v54 = vpack.c.bf16 %v14442_v55, %v14440_v47  ;;  %v14439_v22 = vsel %vm23971_vm5, %v18597_v29, %v18592_v5  ;;  %v14441_v39 = vsel %vm23972_vm15, %v18598_v19, %v18602_v41  ;;  %v14426_v49 = vpop.permute.xlu0 %14425  ;;  %vm23986_vm5 = vmmov %vm23984_vm7 }
 0xe85   : > { %v16777_v42 = vpack.c.bf16 %v14441_v39, %v14439_v22  ;;  %v18606_v38 = vpop.permute.xlu1 %18605  ;;  %vm23987_vm15 = vmmov %vm23986_vm5 }
 0xe86   : > { %16776 = vmatprep.subr.msk.bf16.mxu1 %vm20561_vm9, %v16774_v54  ;;  %v18608_v8 = vunpack.i.h.bf16 %v18606_v38  ;;  %v18607_v43 = vunpack.i.l.bf16 %v18606_v38 }
 0xe87   : > { %16779 = vmatpush1.bf16.msk.msra.mxu1 %vm20561_vm9, %v16777_v42 }
 0xe88   : > { %v18616_v48 = vpop.permute.xlu0 %18615  ;;  %v14539_v12 = vsel %vm23974_vm10, %v18607_v43, %v18608_v8  ;;  %vm23988_vm10 = vcmask 1022976  }
 0xe89   : > { %v18618_v30 = vunpack.i.h.bf16 %v18616_v48  ;;  %v18617_v59 = vunpack.i.l.bf16 %v18616_v48  ;;  %v18611_v17 = vpop.permute.xlu1 %18610 }
 0xe8a   : > { %v18613_v11 = vunpack.i.h.bf16 %v18611_v17  ;;  %v18612_v6 = vunpack.i.l.bf16 %v18611_v17  ;;  %15798 = vmatmul.mubr.msk.f32.vlgmr.msra.gmra.mrb[8].mxu1 %vm23973_vm6, %v14426_v49 }
 0xe8b   : > { %v14541_v14 = vsel %vm23975_vm11, %v18617_v59, %v18618_v30  ;;  %14614 = vmatprep.mubr.f32.mxu1 %v23771_v20  ;;  %vm23989_vm11 = vmmov %vm23988_vm10 }
 0xe8c   : > { %v16780_v15 = vpack.c.bf16 %v14541_v14, %v14539_v12  ;;  %v14538_v1 = vsel %vm23976_vm0, %v18612_v6, %v18607_v43  ;;  %v14540_v33 = vsel %vm23977_vm12, %v18613_v11, %v18617_v59  ;;  %v14525_v61 = vpop.permute.xlu0 %14524  ;;  %vm23990_vm0 = vmmov %vm23988_vm10 }
 0xe8d   : > { %v16783_v53 = vpack.c.bf16 %v14540_v33, %v14538_v1  ;;  %v18621_v51 = vpop.permute.xlu1 %18620  ;;  %vm23991_vm12 = vmmov %vm23990_vm0 }
 0xe8e   : > { %16782 = vmatprep.subr.msk.bf16.mxu1 %vm20561_vm9, %v16780_v15  ;;  %v18623_v50 = vunpack.i.h.bf16 %v18621_v51  ;;  %v18622_v21 = vunpack.i.l.bf16 %v18621_v51 }
 0xe8f   : > { %16785 = vmatpush1.bf16.msk.msra.mxu1 %vm20561_vm9, %v16783_v53 }
 0xe90   : > { %v18631_v37 = vpop.permute.xlu0 %18630  ;;  %v14638_v26 = vsel %vm23979_vm2, %v18622_v21, %v18623_v50  ;;  %vm23993_vm2 = vcmask 1031168  }
 0xe91   : > { %v18633_v4 = vunpack.i.h.bf16 %v18631_v37  ;;  %v18632_v9 = vunpack.i.l.bf16 %v18631_v37  ;;  %v18626_v28 = vpop.permute.xlu1 %18625 }
 0xe92   : > { %v18628_v3 = vunpack.i.h.bf16 %v18626_v28  ;;  %v18627_v40 = vunpack.i.l.bf16 %v18626_v28  ;;  %15801 = vmatmul.mubr.msk.f32.vlgmr.msra.gmra.mrb[8].mxu1 %vm23978_vm13, %v14525_v61  ;;  %vm23992_vm13 = vmmov %vm23973_vm6 }
 0xe93   : > { %v14640_v52 = vsel %vm23980_vm3, %v18632_v9, %v18633_v4  ;;  %14713 = vmatprep.mubr.f32.mxu1 %v23771_v20  ;;  %vm23994_vm3 = vmmov %vm23993_vm2 }
 0xe94   : > { %v16786_v34 = vpack.c.bf16 %v14640_v52, %v14638_v26  ;;  %v14637_v36 = vsel %vm23981_vm4, %v18627_v40, %v18622_v21  ;;  %v14639_v58 = vsel %vm23982_vm1, %v18628_v3, %v18632_v9  ;;  %v14624_v27 = vpop.permute.xlu0 %14623  ;;  %vm23995_vm4 = vmmov %vm23993_vm2 }
 0xe95   : > { %v16789_v0 = vpack.c.bf16 %v14639_v58, %v14637_v36  ;;  %v18636_v35 = vpop.permute.xlu1 %18635  ;;  %vm23996_vm1 = vmmov %vm23993_vm2 }
 0xe96   : > { %16788 = vmatprep.subr.msk.bf16.mxu1 %vm20561_vm9, %v16786_v34  ;;  %v18638_v45 = vunpack.i.h.bf16 %v18636_v35  ;;  %v18637_v23 = vunpack.i.l.bf16 %v18636_v35 }
 0xe97   : > { %16791 = vmatpush1.bf16.msk.msra.mxu1 %vm20561_vm9, %v16789_v0 }
 0xe98   : > { %v18646_v16 = vpop.permute.xlu0 %18645  ;;  %v14737_v5 = vsel %vm23984_vm7, %v18637_v23, %v18638_v45  ;;  %vm23998_vm7 = vcmask 1039360  }
 0xe99   : > { %v18648_v56 = vunpack.i.h.bf16 %v18646_v16  ;;  %v18647_v46 = vunpack.i.l.bf16 %v18646_v16  ;;  %v18641_v10 = vpop.permute.xlu1 %18640 }
 0xe9a   : > { %v18643_v32 = vunpack.i.h.bf16 %v18641_v10  ;;  %v18642_v2 = vunpack.i.l.bf16 %v18641_v10  ;;  %15804 = vmatmul.mubr.msk.f32.vlgmr.msra.gmra.mrb[8].mxu1 %vm23983_vm8, %v14624_v27  ;;  %vm23997_vm8 = vmmov %vm23973_vm6 }
 0xe9b   : > { %v14739_v18 = vsel %vm23985_vm14, %v18647_v46, %v18648_v56  ;;  %14812 = vmatprep.mubr.f32.mxu1 %v23771_v20  ;;  %vm23999_vm14 = vmmov %vm23998_vm7 }
 0xe9c   : > { %v16792_v60 = vpack.c.bf16 %v14739_v18, %v14737_v5  ;;  %v14736_v41 = vsel %vm23986_vm5, %v18642_v2, %v18637_v23  ;;  %v14738_v57 = vsel %vm23987_vm15, %v18643_v32, %v18647_v46  ;;  %v14723_v19 = vpop.permute.xlu0 %14722  ;;  %vm24000_vm5 = vmmov %vm23998_vm7 }
 0xe9d   : > { %v16795_v29 = vpack.c.bf16 %v14738_v57, %v14736_v41  ;;  %v18651_v47 = vpop.permute.xlu1 %18650  ;;  %vm24001_vm15 = vmmov %vm24000_vm5 }
 0xe9e   : > { %16794 = vmatprep.subr.msk.bf16.mxu1 %vm20561_vm9, %v16792_v60  ;;  %v18653_v55 = vunpack.i.h.bf16 %v18651_v47  ;;  %v18652_v54 = vunpack.i.l.bf16 %v18651_v47  ;;  %v18860_v60 = vmov 1966171168  }
 0xe9f   : > { %16797 = vmatpush1.bf16.msk.msra.mxu1 %vm20561_vm9, %v16795_v29  ;;  %v15215_v25 = vunpack.c.l.s4 %v18860_v60 }
 0xea0   : > { %v18661_v22 = vpop.permute.xlu0 %18660  ;;  %v14836_v43 = vsel %vm23988_vm10, %v18652_v54, %v18653_v55  ;;  %vm24002_vm10 = vmmov %vm23973_vm6  ;;  %v24004_v55 = vlaneseq }
 0xea1   : > { %v18663_v39 = vunpack.i.h.bf16 %v18661_v22  ;;  %v18662_v49 = vunpack.i.l.bf16 %v18661_v22  ;;  %v18656_v42 = vpop.permute.xlu1 %18655  ;;  %v15216_v41 = vunpack.c.0.s8 %v15215_v25 }
 0xea2   : > { %v18658_v38 = vunpack.i.h.bf16 %v18656_v42  ;;  %v18657_v8 = vunpack.i.l.bf16 %v18656_v42  ;;  %15807 = vmatmul.mubr.msk.f32.vlgmr.msra.gmra.mrb[8].mxu1 %vm23973_vm6, %v14723_v19 }
 0xea3   : > { %v14838_v48 = vsel %vm23989_vm11, %v18662_v49, %v18663_v39  ;;  %14911 = vmatprep.mubr.f32.mxu1 %v23771_v20 }
 0xea4   : > { %v16798_v30 = vpack.c.bf16 %v14838_v48, %v14836_v43  ;;  %v14835_v59 = vsel %vm23990_vm0, %v18657_v8, %v18652_v54  ;;  %v14837_v17 = vsel %vm23991_vm12, %v18658_v38, %v18662_v49  ;;  %v14822_v11 = vpop.permute.xlu0 %14821 }
 0xea5   : > { %v16801_v6 = vpack.c.bf16 %v14837_v17, %v14835_v59  ;;  %v18666_v12 = vpop.permute.xlu1 %18665 }
 0xea6   : > { %16800 = vmatprep.subr.msk.bf16.mxu1 %vm20561_vm9, %v16798_v30  ;;  %v18668_v14 = vunpack.i.h.bf16 %v18666_v12  ;;  %v18667_v15 = vunpack.i.l.bf16 %v18666_v12 }
 0xea7   : > { %16803 = vmatpush1.bf16.msk.msra.mxu1 %vm20561_vm9, %v16801_v6 }
 0xea8   : > { %v18676_v1 = vpop.permute.xlu0 %18675  ;;  %v14935_v21 = vsel %vm23993_vm2, %v18667_v15, %v18668_v14 }
 0xea9   : > { %v18678_v33 = vunpack.i.h.bf16 %v18676_v1  ;;  %v18677_v61 = vunpack.i.l.bf16 %v18676_v1  ;;  %v18671_v53 = vpop.permute.xlu1 %18670 }
 0xeaa   : > { %v18673_v51 = vunpack.i.h.bf16 %v18671_v53  ;;  %v18672_v50 = vunpack.i.l.bf16 %v18671_v53  ;;  %15810 = vmatmul.mubr.msk.f32.vlgmr.msra.gmra.mrb[8].mxu1 %vm23992_vm13, %v14822_v11 }
 0xeab   : > { %v14937_v37 = vsel %vm23994_vm3, %v18677_v61, %v18678_v33  ;;  %15010 = vmatprep.mubr.f32.mxu1 %v23771_v20 }
 0xeac   : > { %v16804_v4 = vpack.c.bf16 %v14937_v37, %v14935_v21  ;;  %v14934_v9 = vsel %vm23995_vm4, %v18672_v50, %v18667_v15  ;;  %v14936_v28 = vsel %vm23996_vm1, %v18673_v51, %v18677_v61  ;;  %v14921_v3 = vpop.permute.xlu0 %14920 }
 0xead   : > { %v16807_v40 = vpack.c.bf16 %v14936_v28, %v14934_v9  ;;  %v18681_v26 = vpop.permute.xlu1 %18680 }
 0xeae   : > { %16806 = vmatprep.subr.msk.bf16.mxu1 %vm20561_vm9, %v16804_v4  ;;  %v18683_v52 = vunpack.i.h.bf16 %v18681_v26  ;;  %v18682_v34 = vunpack.i.l.bf16 %v18681_v26 }
 0xeaf   : > { %16809 = vmatpush1.bf16.msk.msra.mxu1 %vm20561_vm9, %v16807_v40 }
 0xeb0   : > { %v18686_v36 = vpop.permute.xlu0 %18685  ;;  %v15034_v23 = vsel %vm23998_vm7, %v18682_v34, %v18683_v52 }
 0xeb1   : > { %v18688_v58 = vunpack.i.h.bf16 %v18686_v36  ;;  %v18687_v27 = vunpack.i.l.bf16 %v18686_v36  ;;  %v18691_v0 = vpop.permute.xlu1 %18690 }
 0xeb2   : > { %v18693_v35 = vunpack.i.h.bf16 %v18691_v0  ;;  %v18692_v45 = vunpack.i.l.bf16 %v18691_v0  ;;  %15813 = vmatmul.mubr.msk.f32.vlgmr.msra.gmra.mrb[8].mxu1 %vm23997_vm8, %v14921_v3 }
 0xeb3   : > { %v15036_v16 = vsel %vm23999_vm14, %v18687_v27, %v18688_v58  ;;  %15109 = vmatprep.mubr.f32.mxu1 %v23771_v20 }
 0xeb4   : > { %v16810_v56 = vpack.c.bf16 %v15036_v16, %v15034_v23  ;;  %v15033_v46 = vsel %vm24000_vm5, %v18692_v45, %v18682_v34  ;;  %v15035_v10 = vsel %vm24001_vm15, %v18693_v35, %v18687_v27  ;;  %v15020_v2 = vpop.permute.xlu0 %15019 }
 0xeb5   : > { %v16813_v32 = vpack.c.bf16 %v15035_v10, %v15033_v46 }
 0xeb6   : > { %16812 = vmatprep.subr.msk.bf16.mxu1 %vm20561_vm9, %v16810_v56  ;;  %v15119_v5 = vpop.permute.xlu1 %15118 }
 0xeb7   : > { %16815 = vmatpush1.bf16.msk.msra.mxu1 %vm20561_vm9, %v16813_v32 }
 0xeb8   : > { %16818 = vmatprep.subr.msk.bf16.mxu1 %vm20561_vm9, %v16816_v13 }
 0xeba   : > { %15816 = vmatmul.mubr.msk.f32.vlgmr.msra.gmra.mrb[8].mxu1 %vm23973_vm6, %v15020_v2 }
 0xebb   : > { %16821 = vmatpush1.bf16.msk.msra.mxu1 %vm20561_vm9, %v16819_v63  ;;  %15190 = vmatprep.mubr.f32.mxu1 %v23771_v20  ;;  %v15219_v63 = vsub.s32 %v15216_v41, %v24003_v24  ;;  %vm15231_vm9 = vcmp.lt.s32.totalorder %v24004_v55, 256 }
 0xec2   : > { %15819 = vmatmul.mubr.msk.f32.vlgmr.msra.gmra.mrb[8].mxu1 %vm24002_vm10, %v15119_v5 }
 0xec5   : > { %v15201_v18 = vpop.permute.xlu0 %15200 }
 0xec6   : > { %v15206_v31 = vrot.slane %v15201_v18, %v23883_v7 }
 0xf95   : > { %v15192_v13 = vpop.f32.mrb[8].mxu1 }
 0xf96   : > { %v15207_v57 = vadd.f32 %v15206_v31, %v15192_v13  ;;  %v15194_v19 = vpop.f32.mrb[9].mxu1 }
 0xf97   : > { %v15208_v29 = vadd.f32 %v15206_v31, %v15194_v19 }
 0xf98   : > { %v15209_v62 = vmax.f32 %v15207_v57, 0.0 }
 0xf99   : > { %v15210_v44 = vmax.f32 %v15208_v29, 0.0 }
 0xf9b   : > { %v15213_v47 = vcombine.low %v15209_v62, %v15210_v44 }
 0xf9d   : > { %v15220_v20 = vrot.slane %v15213_v47, %v15219_v63 }
 0xf9f   : > { %v15227_v54 = vrot.slane %v15220_v20, %v15219_v63 }
 0xfa1   : > { %15233 = vst.msk [vmem:[%s276_s13] sm:$0x3] %vm15231_vm9, %v15227_v54 }
 0xfa2 PF: > { %s18_s21 = sadd.s32 1, %s18771_s21  }
 0xfa3   : > { %p15_p9 = scmp.ge.s32.totalorder %s18_s21, 4  }
 0xfa5   :  { %17 = sbr.rel (!%p15_p9) target bundleno = 6 (0x6), region = 84 }
 0xfac   :  { %15253 = vsyncpa [#allocation3], 1 }
 0xfad   :  { %15255 = vsyncpa [#allocation3 + $0x1], 1 }
 0xfae   :  { %15256 = vsyncpa [#allocation5], 1 }

</bundles_post_ra>
